<compile_context>
chip_gen: v5e
topology: v5e:2x2
jax: 0.10.0
libtpu: 0.0.40
codegen_flags: <defaults>
</compile_context>

<pallas_src>
import functools

import numpy as np
import jax
import jax.numpy as jnp
from jax import lax
from jax.experimental import pallas as pl
from jax.experimental.pallas import tpu as pltpu


def matching_kernel(dij_ref, meta_ref, cy_ref, out_ref,
                    *, block_rows, sub_rows, Lx, Ly, S, T, premask_ok):
    """One grid step: `block_rows` batch samples, processed in (sub_rows, 128) vreg slabs."""
    del_c = dij_ref[0]          # cost of skipping a sprite  (x)
    ins_c = dij_ref[1]          # cost of skipping a char    (y)

    # Hoisted per-step constants. Lane t represents DP column j = t + 1.
    jj = lax.broadcasted_iota(jnp.int32, (sub_rows, T), 1)
    jf = jj.astype(jnp.float32)
    jins = jf * ins_c                       # t * ins   (prefix-min offset)
    d0 = jins + ins_c                       # D[0, j] = j * ins
    BIG = jnp.float32(1e9)
    valid_lane = jj < Ly

    num_slabs = block_rows // sub_rows
    for k in range(num_slabs):              # sub-slab loop bounds vreg pressure per slab
        r0 = k * sub_rows
        meta = meta_ref[pl.ds(r0, sub_rows), :]            # (sub, 128) int32 packed
        xlen_col = meta[:, 0:1]
        ylen_col = meta[:, 1:2]

        # Hoisted stage-1 gather, streamed in via BlockSpec: cy[s][b, t] = cij[s, ys[b, t]].
        cy = [cy_ref[s, pl.ds(r0, sub_rows), :] for s in range(S)]     # S x (sub, T) f32

        d_prev = d0
        res_vec = jnp.where(xlen_col == 0, d0, 0.0)        # handles xlen == 0

        # DP over sprite rows; fully unrolled (Lx is small for this model).
        # TODO(synk): for Lx in the hundreds, switch to a partially unrolled fori_loop with a
        # dynamically sliced xs column to bound instruction footprint / live ranges.
        for i in range(1, Lx + 1):
            fi = jnp.float32(i)

            # Fused stage-2 gather: crow[b, t] = cij[xs[b, i-1], ys[b, t]]
            xcol = meta[:, i + 1:i + 2]                    # xs[:, i-1]
            crow = cy[0]
            for s in range(1, S):
                crow = jnp.where(xcol == s, cy[s], crow)

            # D[i-1, j-1]: lane shift-right; boundary D[i-1, 0] = (i-1) * del
            sp = pltpu.roll(d_prev, shift=1, axis=1)
            sp = jnp.where(jj == 0, (fi - 1.0) * del_c, sp)

            # candidates not involving D[i, j-1]
            base = jnp.minimum(sp + crow, d_prev + del_c)

            # Resolve the D[i, j-1] dependency with a log-step prefix-min.
            # NOTE: the (base - jins) factorization is only valid because ins_c is constant
            # across j (dij[1]); do NOT reuse for position-dependent insertion costs.
            e_vec = base - jins
            if premask_ok:
                # Single pre-mask of invalid lanes; circular wrap-in lanes stay BIG for every
                # shift used (guaranteed by the Ly + 2*max_shift - 1 <= T check in the wrapper).
                e_vec = jnp.where(valid_lane, e_vec, BIG)
                s_ = 1
                while s_ < Ly:
                    e_vec = jnp.minimum(e_vec, pltpu.roll(e_vec, shift=s_, axis=1))
                    s_ *= 2
            else:
                s_ = 1
                while s_ < Ly:
                    rolled = pltpu.roll(e_vec, shift=s_, axis=1)
                    e_vec = jnp.minimum(e_vec, jnp.where(jj >= s_, rolled, BIG))
                    s_ *= 2
            d_cur = jnp.minimum(e_vec + jins, fi * del_c + d0)

            # deferred extraction: pure VPU select in-loop, one XLU reduce after the loop
            res_vec = jnp.where(i == xlen_col, d_cur, res_vec)
            d_prev = d_cur

        # pick res_vec[b, ylen[b]-1] with a single cross-lane reduce
        yl_idx = jnp.maximum(ylen_col - 1, 0)
        r = jnp.sum(jnp.where(jj == yl_idx, res_vec, 0.0), axis=1, keepdims=True)
        r = jnp.where(ylen_col == 0, xlen_col.astype(jnp.float32) * del_c, r)
        out_ref[pl.ds(r0, sub_rows), :] = r.astype(out_ref.dtype)


def matching_model_robust_forward(P, xs, ys, x_lengths, y_lengths, *,
                                  block_rows=128, sub_rows=8):
    """Pallas-backed forward of MatchingModelRobust. Returns (per_batch_cost, mean_loss)."""
    B, Lx = xs.shape
    _, Ly = ys.shape
    S, A = P.shape
    T = 128                     # lane-padded DP row width
    assert Ly <= T, "DP row (y length) must fit the 128-lane vreg"
    assert Lx + 2 <= T, "xs must fit the packed (xlen, ylen, xs...) meta row"

    # ----- grid sizing: amortize per-step overhead, keep >= 2 tiles for v7x megacore -----
    rows_needed = pl.cdiv(B, sub_rows)                               # total 8-row sub-slabs
    slabs_per_tile = max(1, min(max(1, block_rows // sub_rows),
                                max(1, pl.cdiv(rows_needed, 2))))
    block_rows = slabs_per_tile * sub_rows
    num_tiles = pl.cdiv(rows_needed, slabs_per_tile)
    B_pad = num_tiles * block_rows

    # premask trick in the prefix-min is safe iff circular wrap-in lanes can never be
    # contaminated by valid lanes for any shift used
    max_shift, s_ = 0, 1
    while s_ < Ly:
        max_shift, s_ = s_, s_ * 2
    premask_ok = (Ly + 2 * max_shift - 1) <= T

    # ----- batch-invariant / host-side precompute (hoisted from the kernel) -----
    # cij = 1 - softmax(P, dim=1)
    cij = 1.0 - jax.nn.softmax(P.astype(jnp.float32), axis=1)        # (S, A)
    # dij = clamp(do_nothing_ij, 0, 1)
    dij = jnp.clip(jnp.array([1, 1], jnp.int32), 0, 1).astype(jnp.float32)

    # Stage-1 substitution gather hoisted to XLA: cy[s, b, t] = cij[s, ys[b, t]].
    ys_i = jnp.clip(ys.astype(jnp.int32), 0, A - 1)
    cy = cij[:, ys_i]                                                # (S, B, Ly)
    cy_pad = jnp.zeros((S, B_pad, T), jnp.float32).at[:, :B, :Ly].set(cy)

    # Lane-dense packed per-sample metadata row: [xlen, ylen, xs[0..Lx-1], 0, ...].
    # Lengths are clamped to the padded dims (out-of-range lengths are documented behavior).
    xlen = jnp.clip(x_lengths.astype(jnp.int32), 0, Lx).reshape(B)
    ylen = jnp.clip(y_lengths.astype(jnp.int32), 0, Ly).reshape(B)
    meta = jnp.zeros((B_pad, T), jnp.int32)
    meta = meta.at[:B, 0].set(xlen)
    meta = meta.at[:B, 1].set(ylen)
    meta = meta.at[:B, 2:2 + Lx].set(jnp.clip(xs.astype(jnp.int32), 0, S - 1))

    kernel = functools.partial(matching_kernel, block_rows=block_rows, sub_rows=sub_rows,
                               Lx=Lx, Ly=Ly, S=S, T=T, premask_ok=premask_ok)
    out = pl.pallas_call(
        kernel,
        out_shape=jax.ShapeDtypeStruct((B_pad, 1), jnp.float32),
        grid_spec=pltpu.PrefetchScalarGridSpec(
            num_scalar_prefetch=0,
            grid=(num_tiles,),
            in_specs=[
                pl.BlockSpec(memory_space=pltpu.MemorySpace.SMEM),        # dij (2,)
                pl.BlockSpec((block_rows, T), lambda t: (t, 0)),          # packed meta
                pl.BlockSpec((S, block_rows, T), lambda t: (0, t, 0)),    # cy planes
            ],
            out_specs=pl.BlockSpec((block_rows, 1), lambda t: (t, 0)),
        ),
        compiler_params=pltpu.CompilerParams(dimension_semantics=("parallel",)),
    )(dij, meta, cy_pad)

    per_batch = out[:B, 0]
    return per_batch, jnp.mean(per_batch)


def reference_forward(P, xs, ys, x_lengths, y_lengths):
    """Pure numpy reference (same semantics)."""
    P = np.asarray(P, np.float32)
    e = np.exp(P - P.max(axis=1, keepdims=True))
    cij = 1.0 - e / e.sum(axis=1, keepdims=True)
    del_c, ins_c = 1.0, 1.0
    B = xs.shape[0]
    out = np.zeros(B, np.float64)
    for b in range(B):
        lx, ly = int(x_lengths[b]), int(y_lengths[b])
        D = np.zeros((lx + 1, ly + 1), np.float64)
        for i in range(1, lx + 1):
            D[i, 0] = i * del_c
        for j in range(1, ly + 1):
            D[0, j] = j * ins_c
        for i in range(1, lx + 1):
            for j in range(1, ly + 1):
                D[i, j] = min(D[i - 1, j - 1] + cij[xs[b, i - 1], ys[b, j - 1]],
                              D[i - 1, j] + del_c,
                              D[i, j - 1] + ins_c)
        out[b] = D[lx, ly]
    return out, out.mean()


if __name__ == "__main__":
    # B=40 exercises: multiple sub-slabs per tile, 2 grid tiles, and batch padding.
    B, S, A, Lx, Ly = 40, 10, 26, 8, 7

    key = jax.random.PRNGKey(0)
    kp, kx, ky, klx, kly = jax.random.split(key, 5)

    # Parameter init mirrors the module: P = softmax(rand(S, A), dim=1)
    P = jax.nn.softmax(jax.random.uniform(kp, (S, A), jnp.float32), axis=1)

    xs = jax.random.randint(kx, (B, Lx), 0, S, jnp.int32)          # predicted sprite ids
    ys = jax.random.randint(ky, (B, Ly), 0, A, jnp.int32)          # ground-truth char ids
    x_lengths = jax.random.randint(klx, (B,), 1, Lx + 1, jnp.int32)
    y_lengths = jax.random.randint(kly, (B,), 1, Ly + 1, jnp.int32)

    per_batch, loss = matching_model_robust_forward(P, xs, ys, x_lengths, y_lengths)
    jax.block_until_ready((per_batch, loss))

    ref_pb, ref_loss = reference_forward(np.asarray(P), np.asarray(xs), np.asarray(ys),
                                         np.asarray(x_lengths), np.asarray(y_lengths))
    np.testing.assert_allclose(np.asarray(per_batch), ref_pb, rtol=1e-5, atol=1e-5)
    np.testing.assert_allclose(float(loss), ref_loss, rtol=1e-5, atol=1e-5)

    print("KERNEL_OK")
</pallas_src>

<mosaic_0001>
module attributes {stable_mosaic.version = 11 : i64} {
  func.func @matching_kernel(%arg0: i32, %arg1: memref<2xf32, #tpu.memory_space<smem>>, %arg2: memref<24x128xi32, #tpu.memory_space<vmem>>, %arg3: memref<10x24x128xf32, #tpu.memory_space<vmem>>, %arg4: memref<24x1xf32, #tpu.memory_space<vmem>>) attributes {dimension_semantics = [#tpu.dimension_semantics<parallel>], iteration_bounds = array<i64: 2>, scalar_prefetch = 0 : i64, scratch_operands = 0 : i64, tpu.core_type = #tpu.core_type<tc>, window_params = [{transform_indices = @transform_0, window_bounds = array<i64: 2>}, {transform_indices = @transform_1, window_bounds = array<i64: 24, 128>}, {transform_indices = @transform_2, window_bounds = array<i64: 10, 24, 128>}, {transform_indices = @transform_3, window_bounds = array<i64: 24, 1>}]} {
    %c0 = arith.constant 0 : index
    %0 = memref.load %arg1[%c0] : memref<2xf32, #tpu.memory_space<smem>>
    %c1 = arith.constant 1 : index
    %1 = memref.load %arg1[%c1] : memref<2xf32, #tpu.memory_space<smem>>
    %2 = tpu.iota {dimensions = array<i32: 1>} : vector<8x128xi32>
    %3 = arith.sitofp %2 : vector<8x128xi32> to vector<8x128xf32>
    %4 = vector.broadcast %1 : f32 to vector<8x128xf32>
    %5 = arith.mulf %3, %4 : vector<8x128xf32>
    %6 = vector.broadcast %1 : f32 to vector<8x128xf32>
    %7 = arith.addf %5, %6 : vector<8x128xf32>
    %c7_i32 = arith.constant 7 : i32
    %8 = vector.broadcast %c7_i32 : i32 to vector<8x128xi32>
    %9 = arith.cmpi slt, %2, %8 : vector<8x128xi32>
    %c0_0 = arith.constant 0 : index
    %c0_1 = arith.constant 0 : index
    %10 = vector.load %arg2[%c0_0, %c0_1] : memref<24x128xi32, #tpu.memory_space<vmem>>, vector<8x128xi32>
    %11 = vector.extract_strided_slice %10 {offsets = [0, 0], sizes = [8, 1], strides = [1, 1]} : vector<8x128xi32> to vector<8x1xi32>
    %12 = vector.extract_strided_slice %10 {offsets = [0, 1], sizes = [8, 1], strides = [1, 1]} : vector<8x128xi32> to vector<8x1xi32>
    %c0_2 = arith.constant 0 : index
    %c0_3 = arith.constant 0 : index
    %c0_4 = arith.constant 0 : index
    %13 = vector.load %arg3[%c0_2, %c0_3, %c0_4] : memref<10x24x128xf32, #tpu.memory_space<vmem>>, vector<1x8x128xf32>
    %14 = vector.shape_cast %13 : vector<1x8x128xf32> to vector<8x128xf32>
    %c1_5 = arith.constant 1 : index
    %c0_6 = arith.constant 0 : index
    %c0_7 = arith.constant 0 : index
    %15 = vector.load %arg3[%c1_5, %c0_6, %c0_7] : memref<10x24x128xf32, #tpu.memory_space<vmem>>, vector<1x8x128xf32>
    %16 = vector.shape_cast %15 : vector<1x8x128xf32> to vector<8x128xf32>
    %c2 = arith.constant 2 : index
    %c0_8 = arith.constant 0 : index
    %c0_9 = arith.constant 0 : index
    %17 = vector.load %arg3[%c2, %c0_8, %c0_9] : memref<10x24x128xf32, #tpu.memory_space<vmem>>, vector<1x8x128xf32>
    %18 = vector.shape_cast %17 : vector<1x8x128xf32> to vector<8x128xf32>
    %c3 = arith.constant 3 : index
    %c0_10 = arith.constant 0 : index
    %c0_11 = arith.constant 0 : index
    %19 = vector.load %arg3[%c3, %c0_10, %c0_11] : memref<10x24x128xf32, #tpu.memory_space<vmem>>, vector<1x8x128xf32>
    %20 = vector.shape_cast %19 : vector<1x8x128xf32> to vector<8x128xf32>
    %c4 = arith.constant 4 : index
    %c0_12 = arith.constant 0 : index
    %c0_13 = arith.constant 0 : index
    %21 = vector.load %arg3[%c4, %c0_12, %c0_13] : memref<10x24x128xf32, #tpu.memory_space<vmem>>, vector<1x8x128xf32>
    %22 = vector.shape_cast %21 : vector<1x8x128xf32> to vector<8x128xf32>
    %c5 = arith.constant 5 : index
    %c0_14 = arith.constant 0 : index
    %c0_15 = arith.constant 0 : index
    %23 = vector.load %arg3[%c5, %c0_14, %c0_15] : memref<10x24x128xf32, #tpu.memory_space<vmem>>, vector<1x8x128xf32>
    %24 = vector.shape_cast %23 : vector<1x8x128xf32> to vector<8x128xf32>
    %c6 = arith.constant 6 : index
    %c0_16 = arith.constant 0 : index
    %c0_17 = arith.constant 0 : index
    %25 = vector.load %arg3[%c6, %c0_16, %c0_17] : memref<10x24x128xf32, #tpu.memory_space<vmem>>, vector<1x8x128xf32>
    %26 = vector.shape_cast %25 : vector<1x8x128xf32> to vector<8x128xf32>
    %c7 = arith.constant 7 : index
    %c0_18 = arith.constant 0 : index
    %c0_19 = arith.constant 0 : index
    %27 = vector.load %arg3[%c7, %c0_18, %c0_19] : memref<10x24x128xf32, #tpu.memory_space<vmem>>, vector<1x8x128xf32>
    %28 = vector.shape_cast %27 : vector<1x8x128xf32> to vector<8x128xf32>
    %c8 = arith.constant 8 : index
    %c0_20 = arith.constant 0 : index
    %c0_21 = arith.constant 0 : index
    %29 = vector.load %arg3[%c8, %c0_20, %c0_21] : memref<10x24x128xf32, #tpu.memory_space<vmem>>, vector<1x8x128xf32>
    %30 = vector.shape_cast %29 : vector<1x8x128xf32> to vector<8x128xf32>
    %c9 = arith.constant 9 : index
    %c0_22 = arith.constant 0 : index
    %c0_23 = arith.constant 0 : index
    %31 = vector.load %arg3[%c9, %c0_22, %c0_23] : memref<10x24x128xf32, #tpu.memory_space<vmem>>, vector<1x8x128xf32>
    %32 = vector.shape_cast %31 : vector<1x8x128xf32> to vector<8x128xf32>
    %c0_i32 = arith.constant 0 : i32
    %33 = vector.broadcast %c0_i32 : i32 to vector<8x1xi32>
    %34 = arith.cmpi eq, %11, %33 : vector<8x1xi32>
    %cst = arith.constant 0.000000e+00 : f32
    %35 = vector.shape_cast %34 : vector<8x1xi1> to vector<8x1xi1>
    %36 = vector.broadcast %35 : vector<8x1xi1> to vector<8x128xi1>
    %37 = vector.broadcast %cst : f32 to vector<8x128xf32>
    %38 = arith.select %36, %7, %37 : vector<8x128xi1>, vector<8x128xf32>
    %39 = vector.extract_strided_slice %10 {offsets = [0, 2], sizes = [8, 1], strides = [1, 1]} : vector<8x128xi32> to vector<8x1xi32>
    %c1_i32 = arith.constant 1 : i32
    %40 = vector.broadcast %c1_i32 : i32 to vector<8x1xi32>
    %41 = arith.cmpi eq, %39, %40 : vector<8x1xi32>
    %42 = vector.shape_cast %41 : vector<8x1xi1> to vector<8x1xi1>
    %43 = vector.broadcast %42 : vector<8x1xi1> to vector<8x128xi1>
    %44 = arith.select %43, %16, %14 : vector<8x128xi1>, vector<8x128xf32>
    %c2_i32 = arith.constant 2 : i32
    %45 = vector.broadcast %c2_i32 : i32 to vector<8x1xi32>
    %46 = arith.cmpi eq, %39, %45 : vector<8x1xi32>
    %47 = vector.shape_cast %46 : vector<8x1xi1> to vector<8x1xi1>
    %48 = vector.broadcast %47 : vector<8x1xi1> to vector<8x128xi1>
    %49 = arith.select %48, %18, %44 : vector<8x128xi1>, vector<8x128xf32>
    %c3_i32 = arith.constant 3 : i32
    %50 = vector.broadcast %c3_i32 : i32 to vector<8x1xi32>
    %51 = arith.cmpi eq, %39, %50 : vector<8x1xi32>
    %52 = vector.shape_cast %51 : vector<8x1xi1> to vector<8x1xi1>
    %53 = vector.broadcast %52 : vector<8x1xi1> to vector<8x128xi1>
    %54 = arith.select %53, %20, %49 : vector<8x128xi1>, vector<8x128xf32>
    %c4_i32 = arith.constant 4 : i32
    %55 = vector.broadcast %c4_i32 : i32 to vector<8x1xi32>
    %56 = arith.cmpi eq, %39, %55 : vector<8x1xi32>
    %57 = vector.shape_cast %56 : vector<8x1xi1> to vector<8x1xi1>
    %58 = vector.broadcast %57 : vector<8x1xi1> to vector<8x128xi1>
    %59 = arith.select %58, %22, %54 : vector<8x128xi1>, vector<8x128xf32>
    %c5_i32 = arith.constant 5 : i32
    %60 = vector.broadcast %c5_i32 : i32 to vector<8x1xi32>
    %61 = arith.cmpi eq, %39, %60 : vector<8x1xi32>
    %62 = vector.shape_cast %61 : vector<8x1xi1> to vector<8x1xi1>
    %63 = vector.broadcast %62 : vector<8x1xi1> to vector<8x128xi1>
    %64 = arith.select %63, %24, %59 : vector<8x128xi1>, vector<8x128xf32>
    %c6_i32 = arith.constant 6 : i32
    %65 = vector.broadcast %c6_i32 : i32 to vector<8x1xi32>
    %66 = arith.cmpi eq, %39, %65 : vector<8x1xi32>
    %67 = vector.shape_cast %66 : vector<8x1xi1> to vector<8x1xi1>
    %68 = vector.broadcast %67 : vector<8x1xi1> to vector<8x128xi1>
    %69 = arith.select %68, %26, %64 : vector<8x128xi1>, vector<8x128xf32>
    %c7_i32_24 = arith.constant 7 : i32
    %70 = vector.broadcast %c7_i32_24 : i32 to vector<8x1xi32>
    %71 = arith.cmpi eq, %39, %70 : vector<8x1xi32>
    %72 = vector.shape_cast %71 : vector<8x1xi1> to vector<8x1xi1>
    %73 = vector.broadcast %72 : vector<8x1xi1> to vector<8x128xi1>
    %74 = arith.select %73, %28, %69 : vector<8x128xi1>, vector<8x128xf32>
    %c8_i32 = arith.constant 8 : i32
    %75 = vector.broadcast %c8_i32 : i32 to vector<8x1xi32>
    %76 = arith.cmpi eq, %39, %75 : vector<8x1xi32>
    %77 = vector.shape_cast %76 : vector<8x1xi1> to vector<8x1xi1>
    %78 = vector.broadcast %77 : vector<8x1xi1> to vector<8x128xi1>
    %79 = arith.select %78, %30, %74 : vector<8x128xi1>, vector<8x128xf32>
    %c9_i32 = arith.constant 9 : i32
    %80 = vector.broadcast %c9_i32 : i32 to vector<8x1xi32>
    %81 = arith.cmpi eq, %39, %80 : vector<8x1xi32>
    %82 = vector.shape_cast %81 : vector<8x1xi1> to vector<8x1xi1>
    %83 = vector.broadcast %82 : vector<8x1xi1> to vector<8x128xi1>
    %84 = arith.select %83, %32, %79 : vector<8x128xi1>, vector<8x128xf32>
    %c1_i32_25 = arith.constant 1 : i32
    %85 = tpu.dynamic_rotate %7 by %c1_i32_25 dim 1 : vector<8x128xf32>, i32 -> vector<8x128xf32>
    %c0_i32_26 = arith.constant 0 : i32
    %86 = vector.broadcast %c0_i32_26 : i32 to vector<8x128xi32>
    %87 = arith.cmpi eq, %2, %86 : vector<8x128xi32>
    %cst_27 = arith.constant 1.000000e+00 : f32
    %cst_28 = arith.constant 1.000000e+00 : f32
    %88 = arith.subf %cst_27, %cst_28 : f32
    %89 = arith.mulf %88, %0 : f32
    %90 = vector.broadcast %89 : f32 to vector<8x128xf32>
    %91 = arith.select %87, %90, %85 : vector<8x128xi1>, vector<8x128xf32>
    %92 = arith.addf %91, %84 : vector<8x128xf32>
    %93 = vector.broadcast %0 : f32 to vector<8x128xf32>
    %94 = arith.addf %7, %93 : vector<8x128xf32>
    %95 = arith.minimumf %92, %94 : vector<8x128xf32>
    %96 = arith.subf %95, %5 : vector<8x128xf32>
    %cst_29 = arith.constant 1.000000e+09 : f32
    %97 = vector.broadcast %cst_29 : f32 to vector<8x128xf32>
    %98 = arith.select %9, %96, %97 : vector<8x128xi1>, vector<8x128xf32>
    %c1_i32_30 = arith.constant 1 : i32
    %99 = tpu.dynamic_rotate %98 by %c1_i32_30 dim 1 : vector<8x128xf32>, i32 -> vector<8x128xf32>
    %100 = arith.minimumf %98, %99 : vector<8x128xf32>
    %c2_i32_31 = arith.constant 2 : i32
    %101 = tpu.dynamic_rotate %100 by %c2_i32_31 dim 1 : vector<8x128xf32>, i32 -> vector<8x128xf32>
    %102 = arith.minimumf %100, %101 : vector<8x128xf32>
    %c4_i32_32 = arith.constant 4 : i32
    %103 = tpu.dynamic_rotate %102 by %c4_i32_32 dim 1 : vector<8x128xf32>, i32 -> vector<8x128xf32>
    %104 = arith.minimumf %102, %103 : vector<8x128xf32>
    %105 = arith.addf %104, %5 : vector<8x128xf32>
    %cst_33 = arith.constant 1.000000e+00 : f32
    %106 = arith.mulf %cst_33, %0 : f32
    %107 = vector.broadcast %106 : f32 to vector<8x128xf32>
    %108 = arith.addf %107, %7 : vector<8x128xf32>
    %109 = arith.minimumf %105, %108 : vector<8x128xf32>
    %c1_i32_34 = arith.constant 1 : i32
    %110 = vector.broadcast %c1_i32_34 : i32 to vector<8x1xi32>
    %111 = arith.cmpi eq, %11, %110 : vector<8x1xi32>
    %112 = vector.shape_cast %111 : vector<8x1xi1> to vector<8x1xi1>
    %113 = vector.broadcast %112 : vector<8x1xi1> to vector<8x128xi1>
    %114 = arith.select %113, %109, %38 : vector<8x128xi1>, vector<8x128xf32>
    %115 = vector.extract_strided_slice %10 {offsets = [0, 3], sizes = [8, 1], strides = [1, 1]} : vector<8x128xi32> to vector<8x1xi32>
    %c1_i32_35 = arith.constant 1 : i32
    %116 = vector.broadcast %c1_i32_35 : i32 to vector<8x1xi32>
    %117 = arith.cmpi eq, %115, %116 : vector<8x1xi32>
    %118 = vector.shape_cast %117 : vector<8x1xi1> to vector<8x1xi1>
    %119 = vector.broadcast %118 : vector<8x1xi1> to vector<8x128xi1>
    %120 = arith.select %119, %16, %14 : vector<8x128xi1>, vector<8x128xf32>
    %c2_i32_36 = arith.constant 2 : i32
    %121 = vector.broadcast %c2_i32_36 : i32 to vector<8x1xi32>
    %122 = arith.cmpi eq, %115, %121 : vector<8x1xi32>
    %123 = vector.shape_cast %122 : vector<8x1xi1> to vector<8x1xi1>
    %124 = vector.broadcast %123 : vector<8x1xi1> to vector<8x128xi1>
    %125 = arith.select %124, %18, %120 : vector<8x128xi1>, vector<8x128xf32>
    %c3_i32_37 = arith.constant 3 : i32
    %126 = vector.broadcast %c3_i32_37 : i32 to vector<8x1xi32>
    %127 = arith.cmpi eq, %115, %126 : vector<8x1xi32>
    %128 = vector.shape_cast %127 : vector<8x1xi1> to vector<8x1xi1>
    %129 = vector.broadcast %128 : vector<8x1xi1> to vector<8x128xi1>
    %130 = arith.select %129, %20, %125 : vector<8x128xi1>, vector<8x128xf32>
    %c4_i32_38 = arith.constant 4 : i32
    %131 = vector.broadcast %c4_i32_38 : i32 to vector<8x1xi32>
    %132 = arith.cmpi eq, %115, %131 : vector<8x1xi32>
    %133 = vector.shape_cast %132 : vector<8x1xi1> to vector<8x1xi1>
    %134 = vector.broadcast %133 : vector<8x1xi1> to vector<8x128xi1>
    %135 = arith.select %134, %22, %130 : vector<8x128xi1>, vector<8x128xf32>
    %c5_i32_39 = arith.constant 5 : i32
    %136 = vector.broadcast %c5_i32_39 : i32 to vector<8x1xi32>
    %137 = arith.cmpi eq, %115, %136 : vector<8x1xi32>
    %138 = vector.shape_cast %137 : vector<8x1xi1> to vector<8x1xi1>
    %139 = vector.broadcast %138 : vector<8x1xi1> to vector<8x128xi1>
    %140 = arith.select %139, %24, %135 : vector<8x128xi1>, vector<8x128xf32>
    %c6_i32_40 = arith.constant 6 : i32
    %141 = vector.broadcast %c6_i32_40 : i32 to vector<8x1xi32>
    %142 = arith.cmpi eq, %115, %141 : vector<8x1xi32>
    %143 = vector.shape_cast %142 : vector<8x1xi1> to vector<8x1xi1>
    %144 = vector.broadcast %143 : vector<8x1xi1> to vector<8x128xi1>
    %145 = arith.select %144, %26, %140 : vector<8x128xi1>, vector<8x128xf32>
    %c7_i32_41 = arith.constant 7 : i32
    %146 = vector.broadcast %c7_i32_41 : i32 to vector<8x1xi32>
    %147 = arith.cmpi eq, %115, %146 : vector<8x1xi32>
    %148 = vector.shape_cast %147 : vector<8x1xi1> to vector<8x1xi1>
    %149 = vector.broadcast %148 : vector<8x1xi1> to vector<8x128xi1>
    %150 = arith.select %149, %28, %145 : vector<8x128xi1>, vector<8x128xf32>
    %c8_i32_42 = arith.constant 8 : i32
    %151 = vector.broadcast %c8_i32_42 : i32 to vector<8x1xi32>
    %152 = arith.cmpi eq, %115, %151 : vector<8x1xi32>
    %153 = vector.shape_cast %152 : vector<8x1xi1> to vector<8x1xi1>
    %154 = vector.broadcast %153 : vector<8x1xi1> to vector<8x128xi1>
    %155 = arith.select %154, %30, %150 : vector<8x128xi1>, vector<8x128xf32>
    %c9_i32_43 = arith.constant 9 : i32
    %156 = vector.broadcast %c9_i32_43 : i32 to vector<8x1xi32>
    %157 = arith.cmpi eq, %115, %156 : vector<8x1xi32>
    %158 = vector.shape_cast %157 : vector<8x1xi1> to vector<8x1xi1>
    %159 = vector.broadcast %158 : vector<8x1xi1> to vector<8x128xi1>
    %160 = arith.select %159, %32, %155 : vector<8x128xi1>, vector<8x128xf32>
    %c1_i32_44 = arith.constant 1 : i32
    %161 = tpu.dynamic_rotate %109 by %c1_i32_44 dim 1 : vector<8x128xf32>, i32 -> vector<8x128xf32>
    %c0_i32_45 = arith.constant 0 : i32
    %162 = vector.broadcast %c0_i32_45 : i32 to vector<8x128xi32>
    %163 = arith.cmpi eq, %2, %162 : vector<8x128xi32>
    %cst_46 = arith.constant 2.000000e+00 : f32
    %cst_47 = arith.constant 1.000000e+00 : f32
    %164 = arith.subf %cst_46, %cst_47 : f32
    %165 = arith.mulf %164, %0 : f32
    %166 = vector.broadcast %165 : f32 to vector<8x128xf32>
    %167 = arith.select %163, %166, %161 : vector<8x128xi1>, vector<8x128xf32>
    %168 = arith.addf %167, %160 : vector<8x128xf32>
    %169 = vector.broadcast %0 : f32 to vector<8x128xf32>
    %170 = arith.addf %109, %169 : vector<8x128xf32>
    %171 = arith.minimumf %168, %170 : vector<8x128xf32>
    %172 = arith.subf %171, %5 : vector<8x128xf32>
    %cst_48 = arith.constant 1.000000e+09 : f32
    %173 = vector.broadcast %cst_48 : f32 to vector<8x128xf32>
    %174 = arith.select %9, %172, %173 : vector<8x128xi1>, vector<8x128xf32>
    %c1_i32_49 = arith.constant 1 : i32
    %175 = tpu.dynamic_rotate %174 by %c1_i32_49 dim 1 : vector<8x128xf32>, i32 -> vector<8x128xf32>
    %176 = arith.minimumf %174, %175 : vector<8x128xf32>
    %c2_i32_50 = arith.constant 2 : i32
    %177 = tpu.dynamic_rotate %176 by %c2_i32_50 dim 1 : vector<8x128xf32>, i32 -> vector<8x128xf32>
    %178 = arith.minimumf %176, %177 : vector<8x128xf32>
    %c4_i32_51 = arith.constant 4 : i32
    %179 = tpu.dynamic_rotate %178 by %c4_i32_51 dim 1 : vector<8x128xf32>, i32 -> vector<8x128xf32>
    %180 = arith.minimumf %178, %179 : vector<8x128xf32>
    %181 = arith.addf %180, %5 : vector<8x128xf32>
    %cst_52 = arith.constant 2.000000e+00 : f32
    %182 = arith.mulf %cst_52, %0 : f32
    %183 = vector.broadcast %182 : f32 to vector<8x128xf32>
    %184 = arith.addf %183, %7 : vector<8x128xf32>
    %185 = arith.minimumf %181, %184 : vector<8x128xf32>
    %c2_i32_53 = arith.constant 2 : i32
    %186 = vector.broadcast %c2_i32_53 : i32 to vector<8x1xi32>
    %187 = arith.cmpi eq, %11, %186 : vector<8x1xi32>
    %188 = vector.shape_cast %187 : vector<8x1xi1> to vector<8x1xi1>
    %189 = vector.broadcast %188 : vector<8x1xi1> to vector<8x128xi1>
    %190 = arith.select %189, %185, %114 : vector<8x128xi1>, vector<8x128xf32>
    %191 = vector.extract_strided_slice %10 {offsets = [0, 4], sizes = [8, 1], strides = [1, 1]} : vector<8x128xi32> to vector<8x1xi32>
    %c1_i32_54 = arith.constant 1 : i32
    %192 = vector.broadcast %c1_i32_54 : i32 to vector<8x1xi32>
    %193 = arith.cmpi eq, %191, %192 : vector<8x1xi32>
    %194 = vector.shape_cast %193 : vector<8x1xi1> to vector<8x1xi1>
    %195 = vector.broadcast %194 : vector<8x1xi1> to vector<8x128xi1>
    %196 = arith.select %195, %16, %14 : vector<8x128xi1>, vector<8x128xf32>
    %c2_i32_55 = arith.constant 2 : i32
    %197 = vector.broadcast %c2_i32_55 : i32 to vector<8x1xi32>
    %198 = arith.cmpi eq, %191, %197 : vector<8x1xi32>
    %199 = vector.shape_cast %198 : vector<8x1xi1> to vector<8x1xi1>
    %200 = vector.broadcast %199 : vector<8x1xi1> to vector<8x128xi1>
    %201 = arith.select %200, %18, %196 : vector<8x128xi1>, vector<8x128xf32>
    %c3_i32_56 = arith.constant 3 : i32
    %202 = vector.broadcast %c3_i32_56 : i32 to vector<8x1xi32>
    %203 = arith.cmpi eq, %191, %202 : vector<8x1xi32>
    %204 = vector.shape_cast %203 : vector<8x1xi1> to vector<8x1xi1>
    %205 = vector.broadcast %204 : vector<8x1xi1> to vector<8x128xi1>
    %206 = arith.select %205, %20, %201 : vector<8x128xi1>, vector<8x128xf32>
    %c4_i32_57 = arith.constant 4 : i32
    %207 = vector.broadcast %c4_i32_57 : i32 to vector<8x1xi32>
    %208 = arith.cmpi eq, %191, %207 : vector<8x1xi32>
    %209 = vector.shape_cast %208 : vector<8x1xi1> to vector<8x1xi1>
    %210 = vector.broadcast %209 : vector<8x1xi1> to vector<8x128xi1>
    %211 = arith.select %210, %22, %206 : vector<8x128xi1>, vector<8x128xf32>
    %c5_i32_58 = arith.constant 5 : i32
    %212 = vector.broadcast %c5_i32_58 : i32 to vector<8x1xi32>
    %213 = arith.cmpi eq, %191, %212 : vector<8x1xi32>
    %214 = vector.shape_cast %213 : vector<8x1xi1> to vector<8x1xi1>
    %215 = vector.broadcast %214 : vector<8x1xi1> to vector<8x128xi1>
    %216 = arith.select %215, %24, %211 : vector<8x128xi1>, vector<8x128xf32>
    %c6_i32_59 = arith.constant 6 : i32
    %217 = vector.broadcast %c6_i32_59 : i32 to vector<8x1xi32>
    %218 = arith.cmpi eq, %191, %217 : vector<8x1xi32>
    %219 = vector.shape_cast %218 : vector<8x1xi1> to vector<8x1xi1>
    %220 = vector.broadcast %219 : vector<8x1xi1> to vector<8x128xi1>
    %221 = arith.select %220, %26, %216 : vector<8x128xi1>, vector<8x128xf32>
    %c7_i32_60 = arith.constant 7 : i32
    %222 = vector.broadcast %c7_i32_60 : i32 to vector<8x1xi32>
    %223 = arith.cmpi eq, %191, %222 : vector<8x1xi32>
    %224 = vector.shape_cast %223 : vector<8x1xi1> to vector<8x1xi1>
    %225 = vector.broadcast %224 : vector<8x1xi1> to vector<8x128xi1>
    %226 = arith.select %225, %28, %221 : vector<8x128xi1>, vector<8x128xf32>
    %c8_i32_61 = arith.constant 8 : i32
    %227 = vector.broadcast %c8_i32_61 : i32 to vector<8x1xi32>
    %228 = arith.cmpi eq, %191, %227 : vector<8x1xi32>
    %229 = vector.shape_cast %228 : vector<8x1xi1> to vector<8x1xi1>
    %230 = vector.broadcast %229 : vector<8x1xi1> to vector<8x128xi1>
    %231 = arith.select %230, %30, %226 : vector<8x128xi1>, vector<8x128xf32>
    %c9_i32_62 = arith.constant 9 : i32
    %232 = vector.broadcast %c9_i32_62 : i32 to vector<8x1xi32>
    %233 = arith.cmpi eq, %191, %232 : vector<8x1xi32>
    %234 = vector.shape_cast %233 : vector<8x1xi1> to vector<8x1xi1>
    %235 = vector.broadcast %234 : vector<8x1xi1> to vector<8x128xi1>
    %236 = arith.select %235, %32, %231 : vector<8x128xi1>, vector<8x128xf32>
    %c1_i32_63 = arith.constant 1 : i32
    %237 = tpu.dynamic_rotate %185 by %c1_i32_63 dim 1 : vector<8x128xf32>, i32 -> vector<8x128xf32>
    %c0_i32_64 = arith.constant 0 : i32
    %238 = vector.broadcast %c0_i32_64 : i32 to vector<8x128xi32>
    %239 = arith.cmpi eq, %2, %238 : vector<8x128xi32>
    %cst_65 = arith.constant 3.000000e+00 : f32
    %cst_66 = arith.constant 1.000000e+00 : f32
    %240 = arith.subf %cst_65, %cst_66 : f32
    %241 = arith.mulf %240, %0 : f32
    %242 = vector.broadcast %241 : f32 to vector<8x128xf32>
    %243 = arith.select %239, %242, %237 : vector<8x128xi1>, vector<8x128xf32>
    %244 = arith.addf %243, %236 : vector<8x128xf32>
    %245 = vector.broadcast %0 : f32 to vector<8x128xf32>
    %246 = arith.addf %185, %245 : vector<8x128xf32>
    %247 = arith.minimumf %244, %246 : vector<8x128xf32>
    %248 = arith.subf %247, %5 : vector<8x128xf32>
    %cst_67 = arith.constant 1.000000e+09 : f32
    %249 = vector.broadcast %cst_67 : f32 to vector<8x128xf32>
    %250 = arith.select %9, %248, %249 : vector<8x128xi1>, vector<8x128xf32>
    %c1_i32_68 = arith.constant 1 : i32
    %251 = tpu.dynamic_rotate %250 by %c1_i32_68 dim 1 : vector<8x128xf32>, i32 -> vector<8x128xf32>
    %252 = arith.minimumf %250, %251 : vector<8x128xf32>
    %c2_i32_69 = arith.constant 2 : i32
    %253 = tpu.dynamic_rotate %252 by %c2_i32_69 dim 1 : vector<8x128xf32>, i32 -> vector<8x128xf32>
    %254 = arith.minimumf %252, %253 : vector<8x128xf32>
    %c4_i32_70 = arith.constant 4 : i32
    %255 = tpu.dynamic_rotate %254 by %c4_i32_70 dim 1 : vector<8x128xf32>, i32 -> vector<8x128xf32>
    %256 = arith.minimumf %254, %255 : vector<8x128xf32>
    %257 = arith.addf %256, %5 : vector<8x128xf32>
    %cst_71 = arith.constant 3.000000e+00 : f32
    %258 = arith.mulf %cst_71, %0 : f32
    %259 = vector.broadcast %258 : f32 to vector<8x128xf32>
    %260 = arith.addf %259, %7 : vector<8x128xf32>
    %261 = arith.minimumf %257, %260 : vector<8x128xf32>
    %c3_i32_72 = arith.constant 3 : i32
    %262 = vector.broadcast %c3_i32_72 : i32 to vector<8x1xi32>
    %263 = arith.cmpi eq, %11, %262 : vector<8x1xi32>
    %264 = vector.shape_cast %263 : vector<8x1xi1> to vector<8x1xi1>
    %265 = vector.broadcast %264 : vector<8x1xi1> to vector<8x128xi1>
    %266 = arith.select %265, %261, %190 : vector<8x128xi1>, vector<8x128xf32>
    %267 = vector.extract_strided_slice %10 {offsets = [0, 5], sizes = [8, 1], strides = [1, 1]} : vector<8x128xi32> to vector<8x1xi32>
    %c1_i32_73 = arith.constant 1 : i32
    %268 = vector.broadcast %c1_i32_73 : i32 to vector<8x1xi32>
    %269 = arith.cmpi eq, %267, %268 : vector<8x1xi32>
    %270 = vector.shape_cast %269 : vector<8x1xi1> to vector<8x1xi1>
    %271 = vector.broadcast %270 : vector<8x1xi1> to vector<8x128xi1>
    %272 = arith.select %271, %16, %14 : vector<8x128xi1>, vector<8x128xf32>
    %c2_i32_74 = arith.constant 2 : i32
    %273 = vector.broadcast %c2_i32_74 : i32 to vector<8x1xi32>
    %274 = arith.cmpi eq, %267, %273 : vector<8x1xi32>
    %275 = vector.shape_cast %274 : vector<8x1xi1> to vector<8x1xi1>
    %276 = vector.broadcast %275 : vector<8x1xi1> to vector<8x128xi1>
    %277 = arith.select %276, %18, %272 : vector<8x128xi1>, vector<8x128xf32>
    %c3_i32_75 = arith.constant 3 : i32
    %278 = vector.broadcast %c3_i32_75 : i32 to vector<8x1xi32>
    %279 = arith.cmpi eq, %267, %278 : vector<8x1xi32>
    %280 = vector.shape_cast %279 : vector<8x1xi1> to vector<8x1xi1>
    %281 = vector.broadcast %280 : vector<8x1xi1> to vector<8x128xi1>
    %282 = arith.select %281, %20, %277 : vector<8x128xi1>, vector<8x128xf32>
    %c4_i32_76 = arith.constant 4 : i32
    %283 = vector.broadcast %c4_i32_76 : i32 to vector<8x1xi32>
    %284 = arith.cmpi eq, %267, %283 : vector<8x1xi32>
    %285 = vector.shape_cast %284 : vector<8x1xi1> to vector<8x1xi1>
    %286 = vector.broadcast %285 : vector<8x1xi1> to vector<8x128xi1>
    %287 = arith.select %286, %22, %282 : vector<8x128xi1>, vector<8x128xf32>
    %c5_i32_77 = arith.constant 5 : i32
    %288 = vector.broadcast %c5_i32_77 : i32 to vector<8x1xi32>
    %289 = arith.cmpi eq, %267, %288 : vector<8x1xi32>
    %290 = vector.shape_cast %289 : vector<8x1xi1> to vector<8x1xi1>
    %291 = vector.broadcast %290 : vector<8x1xi1> to vector<8x128xi1>
    %292 = arith.select %291, %24, %287 : vector<8x128xi1>, vector<8x128xf32>
    %c6_i32_78 = arith.constant 6 : i32
    %293 = vector.broadcast %c6_i32_78 : i32 to vector<8x1xi32>
    %294 = arith.cmpi eq, %267, %293 : vector<8x1xi32>
    %295 = vector.shape_cast %294 : vector<8x1xi1> to vector<8x1xi1>
    %296 = vector.broadcast %295 : vector<8x1xi1> to vector<8x128xi1>
    %297 = arith.select %296, %26, %292 : vector<8x128xi1>, vector<8x128xf32>
    %c7_i32_79 = arith.constant 7 : i32
    %298 = vector.broadcast %c7_i32_79 : i32 to vector<8x1xi32>
    %299 = arith.cmpi eq, %267, %298 : vector<8x1xi32>
    %300 = vector.shape_cast %299 : vector<8x1xi1> to vector<8x1xi1>
    %301 = vector.broadcast %300 : vector<8x1xi1> to vector<8x128xi1>
    %302 = arith.select %301, %28, %297 : vector<8x128xi1>, vector<8x128xf32>
    %c8_i32_80 = arith.constant 8 : i32
    %303 = vector.broadcast %c8_i32_80 : i32 to vector<8x1xi32>
    %304 = arith.cmpi eq, %267, %303 : vector<8x1xi32>
    %305 = vector.shape_cast %304 : vector<8x1xi1> to vector<8x1xi1>
    %306 = vector.broadcast %305 : vector<8x1xi1> to vector<8x128xi1>
    %307 = arith.select %306, %30, %302 : vector<8x128xi1>, vector<8x128xf32>
    %c9_i32_81 = arith.constant 9 : i32
    %308 = vector.broadcast %c9_i32_81 : i32 to vector<8x1xi32>
    %309 = arith.cmpi eq, %267, %308 : vector<8x1xi32>
    %310 = vector.shape_cast %309 : vector<8x1xi1> to vector<8x1xi1>
    %311 = vector.broadcast %310 : vector<8x1xi1> to vector<8x128xi1>
    %312 = arith.select %311, %32, %307 : vector<8x128xi1>, vector<8x128xf32>
    %c1_i32_82 = arith.constant 1 : i32
    %313 = tpu.dynamic_rotate %261 by %c1_i32_82 dim 1 : vector<8x128xf32>, i32 -> vector<8x128xf32>
    %c0_i32_83 = arith.constant 0 : i32
    %314 = vector.broadcast %c0_i32_83 : i32 to vector<8x128xi32>
    %315 = arith.cmpi eq, %2, %314 : vector<8x128xi32>
    %cst_84 = arith.constant 4.000000e+00 : f32
    %cst_85 = arith.constant 1.000000e+00 : f32
    %316 = arith.subf %cst_84, %cst_85 : f32
    %317 = arith.mulf %316, %0 : f32
    %318 = vector.broadcast %317 : f32 to vector<8x128xf32>
    %319 = arith.select %315, %318, %313 : vector<8x128xi1>, vector<8x128xf32>
    %320 = arith.addf %319, %312 : vector<8x128xf32>
    %321 = vector.broadcast %0 : f32 to vector<8x128xf32>
    %322 = arith.addf %261, %321 : vector<8x128xf32>
    %323 = arith.minimumf %320, %322 : vector<8x128xf32>
    %324 = arith.subf %323, %5 : vector<8x128xf32>
    %cst_86 = arith.constant 1.000000e+09 : f32
    %325 = vector.broadcast %cst_86 : f32 to vector<8x128xf32>
    %326 = arith.select %9, %324, %325 : vector<8x128xi1>, vector<8x128xf32>
    %c1_i32_87 = arith.constant 1 : i32
    %327 = tpu.dynamic_rotate %326 by %c1_i32_87 dim 1 : vector<8x128xf32>, i32 -> vector<8x128xf32>
    %328 = arith.minimumf %326, %327 : vector<8x128xf32>
    %c2_i32_88 = arith.constant 2 : i32
    %329 = tpu.dynamic_rotate %328 by %c2_i32_88 dim 1 : vector<8x128xf32>, i32 -> vector<8x128xf32>
    %330 = arith.minimumf %328, %329 : vector<8x128xf32>
    %c4_i32_89 = arith.constant 4 : i32
    %331 = tpu.dynamic_rotate %330 by %c4_i32_89 dim 1 : vector<8x128xf32>, i32 -> vector<8x128xf32>
    %332 = arith.minimumf %330, %331 : vector<8x128xf32>
    %333 = arith.addf %332, %5 : vector<8x128xf32>
    %cst_90 = arith.constant 4.000000e+00 : f32
    %334 = arith.mulf %cst_90, %0 : f32
    %335 = vector.broadcast %334 : f32 to vector<8x128xf32>
    %336 = arith.addf %335, %7 : vector<8x128xf32>
    %337 = arith.minimumf %333, %336 : vector<8x128xf32>
    %c4_i32_91 = arith.constant 4 : i32
    %338 = vector.broadcast %c4_i32_91 : i32 to vector<8x1xi32>
    %339 = arith.cmpi eq, %11, %338 : vector<8x1xi32>
    %340 = vector.shape_cast %339 : vector<8x1xi1> to vector<8x1xi1>
    %341 = vector.broadcast %340 : vector<8x1xi1> to vector<8x128xi1>
    %342 = arith.select %341, %337, %266 : vector<8x128xi1>, vector<8x128xf32>
    %343 = vector.extract_strided_slice %10 {offsets = [0, 6], sizes = [8, 1], strides = [1, 1]} : vector<8x128xi32> to vector<8x1xi32>
    %c1_i32_92 = arith.constant 1 : i32
    %344 = vector.broadcast %c1_i32_92 : i32 to vector<8x1xi32>
    %345 = arith.cmpi eq, %343, %344 : vector<8x1xi32>
    %346 = vector.shape_cast %345 : vector<8x1xi1> to vector<8x1xi1>
    %347 = vector.broadcast %346 : vector<8x1xi1> to vector<8x128xi1>
    %348 = arith.select %347, %16, %14 : vector<8x128xi1>, vector<8x128xf32>
    %c2_i32_93 = arith.constant 2 : i32
    %349 = vector.broadcast %c2_i32_93 : i32 to vector<8x1xi32>
    %350 = arith.cmpi eq, %343, %349 : vector<8x1xi32>
    %351 = vector.shape_cast %350 : vector<8x1xi1> to vector<8x1xi1>
    %352 = vector.broadcast %351 : vector<8x1xi1> to vector<8x128xi1>
    %353 = arith.select %352, %18, %348 : vector<8x128xi1>, vector<8x128xf32>
    %c3_i32_94 = arith.constant 3 : i32
    %354 = vector.broadcast %c3_i32_94 : i32 to vector<8x1xi32>
    %355 = arith.cmpi eq, %343, %354 : vector<8x1xi32>
    %356 = vector.shape_cast %355 : vector<8x1xi1> to vector<8x1xi1>
    %357 = vector.broadcast %356 : vector<8x1xi1> to vector<8x128xi1>
    %358 = arith.select %357, %20, %353 : vector<8x128xi1>, vector<8x128xf32>
    %c4_i32_95 = arith.constant 4 : i32
    %359 = vector.broadcast %c4_i32_95 : i32 to vector<8x1xi32>
    %360 = arith.cmpi eq, %343, %359 : vector<8x1xi32>
    %361 = vector.shape_cast %360 : vector<8x1xi1> to vector<8x1xi1>
    %362 = vector.broadcast %361 : vector<8x1xi1> to vector<8x128xi1>
    %363 = arith.select %362, %22, %358 : vector<8x128xi1>, vector<8x128xf32>
    %c5_i32_96 = arith.constant 5 : i32
    %364 = vector.broadcast %c5_i32_96 : i32 to vector<8x1xi32>
    %365 = arith.cmpi eq, %343, %364 : vector<8x1xi32>
    %366 = vector.shape_cast %365 : vector<8x1xi1> to vector<8x1xi1>
    %367 = vector.broadcast %366 : vector<8x1xi1> to vector<8x128xi1>
    %368 = arith.select %367, %24, %363 : vector<8x128xi1>, vector<8x128xf32>
    %c6_i32_97 = arith.constant 6 : i32
    %369 = vector.broadcast %c6_i32_97 : i32 to vector<8x1xi32>
    %370 = arith.cmpi eq, %343, %369 : vector<8x1xi32>
    %371 = vector.shape_cast %370 : vector<8x1xi1> to vector<8x1xi1>
    %372 = vector.broadcast %371 : vector<8x1xi1> to vector<8x128xi1>
    %373 = arith.select %372, %26, %368 : vector<8x128xi1>, vector<8x128xf32>
    %c7_i32_98 = arith.constant 7 : i32
    %374 = vector.broadcast %c7_i32_98 : i32 to vector<8x1xi32>
    %375 = arith.cmpi eq, %343, %374 : vector<8x1xi32>
    %376 = vector.shape_cast %375 : vector<8x1xi1> to vector<8x1xi1>
    %377 = vector.broadcast %376 : vector<8x1xi1> to vector<8x128xi1>
    %378 = arith.select %377, %28, %373 : vector<8x128xi1>, vector<8x128xf32>
    %c8_i32_99 = arith.constant 8 : i32
    %379 = vector.broadcast %c8_i32_99 : i32 to vector<8x1xi32>
    %380 = arith.cmpi eq, %343, %379 : vector<8x1xi32>
    %381 = vector.shape_cast %380 : vector<8x1xi1> to vector<8x1xi1>
    %382 = vector.broadcast %381 : vector<8x1xi1> to vector<8x128xi1>
    %383 = arith.select %382, %30, %378 : vector<8x128xi1>, vector<8x128xf32>
    %c9_i32_100 = arith.constant 9 : i32
    %384 = vector.broadcast %c9_i32_100 : i32 to vector<8x1xi32>
    %385 = arith.cmpi eq, %343, %384 : vector<8x1xi32>
    %386 = vector.shape_cast %385 : vector<8x1xi1> to vector<8x1xi1>
    %387 = vector.broadcast %386 : vector<8x1xi1> to vector<8x128xi1>
    %388 = arith.select %387, %32, %383 : vector<8x128xi1>, vector<8x128xf32>
    %c1_i32_101 = arith.constant 1 : i32
    %389 = tpu.dynamic_rotate %337 by %c1_i32_101 dim 1 : vector<8x128xf32>, i32 -> vector<8x128xf32>
    %c0_i32_102 = arith.constant 0 : i32
    %390 = vector.broadcast %c0_i32_102 : i32 to vector<8x128xi32>
    %391 = arith.cmpi eq, %2, %390 : vector<8x128xi32>
    %cst_103 = arith.constant 5.000000e+00 : f32
    %cst_104 = arith.constant 1.000000e+00 : f32
    %392 = arith.subf %cst_103, %cst_104 : f32
    %393 = arith.mulf %392, %0 : f32
    %394 = vector.broadcast %393 : f32 to vector<8x128xf32>
    %395 = arith.select %391, %394, %389 : vector<8x128xi1>, vector<8x128xf32>
    %396 = arith.addf %395, %388 : vector<8x128xf32>
    %397 = vector.broadcast %0 : f32 to vector<8x128xf32>
    %398 = arith.addf %337, %397 : vector<8x128xf32>
    %399 = arith.minimumf %396, %398 : vector<8x128xf32>
    %400 = arith.subf %399, %5 : vector<8x128xf32>
    %cst_105 = arith.constant 1.000000e+09 : f32
    %401 = vector.broadcast %cst_105 : f32 to vector<8x128xf32>
    %402 = arith.select %9, %400, %401 : vector<8x128xi1>, vector<8x128xf32>
    %c1_i32_106 = arith.constant 1 : i32
    %403 = tpu.dynamic_rotate %402 by %c1_i32_106 dim 1 : vector<8x128xf32>, i32 -> vector<8x128xf32>
    %404 = arith.minimumf %402, %403 : vector<8x128xf32>
    %c2_i32_107 = arith.constant 2 : i32
    %405 = tpu.dynamic_rotate %404 by %c2_i32_107 dim 1 : vector<8x128xf32>, i32 -> vector<8x128xf32>
    %406 = arith.minimumf %404, %405 : vector<8x128xf32>
    %c4_i32_108 = arith.constant 4 : i32
    %407 = tpu.dynamic_rotate %406 by %c4_i32_108 dim 1 : vector<8x128xf32>, i32 -> vector<8x128xf32>
    %408 = arith.minimumf %406, %407 : vector<8x128xf32>
    %409 = arith.addf %408, %5 : vector<8x128xf32>
    %cst_109 = arith.constant 5.000000e+00 : f32
    %410 = arith.mulf %cst_109, %0 : f32
    %411 = vector.broadcast %410 : f32 to vector<8x128xf32>
    %412 = arith.addf %411, %7 : vector<8x128xf32>
    %413 = arith.minimumf %409, %412 : vector<8x128xf32>
    %c5_i32_110 = arith.constant 5 : i32
    %414 = vector.broadcast %c5_i32_110 : i32 to vector<8x1xi32>
    %415 = arith.cmpi eq, %11, %414 : vector<8x1xi32>
    %416 = vector.shape_cast %415 : vector<8x1xi1> to vector<8x1xi1>
    %417 = vector.broadcast %416 : vector<8x1xi1> to vector<8x128xi1>
    %418 = arith.select %417, %413, %342 : vector<8x128xi1>, vector<8x128xf32>
    %419 = vector.extract_strided_slice %10 {offsets = [0, 7], sizes = [8, 1], strides = [1, 1]} : vector<8x128xi32> to vector<8x1xi32>
    %c1_i32_111 = arith.constant 1 : i32
    %420 = vector.broadcast %c1_i32_111 : i32 to vector<8x1xi32>
    %421 = arith.cmpi eq, %419, %420 : vector<8x1xi32>
    %422 = vector.shape_cast %421 : vector<8x1xi1> to vector<8x1xi1>
    %423 = vector.broadcast %422 : vector<8x1xi1> to vector<8x128xi1>
    %424 = arith.select %423, %16, %14 : vector<8x128xi1>, vector<8x128xf32>
    %c2_i32_112 = arith.constant 2 : i32
    %425 = vector.broadcast %c2_i32_112 : i32 to vector<8x1xi32>
    %426 = arith.cmpi eq, %419, %425 : vector<8x1xi32>
    %427 = vector.shape_cast %426 : vector<8x1xi1> to vector<8x1xi1>
    %428 = vector.broadcast %427 : vector<8x1xi1> to vector<8x128xi1>
    %429 = arith.select %428, %18, %424 : vector<8x128xi1>, vector<8x128xf32>
    %c3_i32_113 = arith.constant 3 : i32
    %430 = vector.broadcast %c3_i32_113 : i32 to vector<8x1xi32>
    %431 = arith.cmpi eq, %419, %430 : vector<8x1xi32>
    %432 = vector.shape_cast %431 : vector<8x1xi1> to vector<8x1xi1>
    %433 = vector.broadcast %432 : vector<8x1xi1> to vector<8x128xi1>
    %434 = arith.select %433, %20, %429 : vector<8x128xi1>, vector<8x128xf32>
    %c4_i32_114 = arith.constant 4 : i32
    %435 = vector.broadcast %c4_i32_114 : i32 to vector<8x1xi32>
    %436 = arith.cmpi eq, %419, %435 : vector<8x1xi32>
    %437 = vector.shape_cast %436 : vector<8x1xi1> to vector<8x1xi1>
    %438 = vector.broadcast %437 : vector<8x1xi1> to vector<8x128xi1>
    %439 = arith.select %438, %22, %434 : vector<8x128xi1>, vector<8x128xf32>
    %c5_i32_115 = arith.constant 5 : i32
    %440 = vector.broadcast %c5_i32_115 : i32 to vector<8x1xi32>
    %441 = arith.cmpi eq, %419, %440 : vector<8x1xi32>
    %442 = vector.shape_cast %441 : vector<8x1xi1> to vector<8x1xi1>
    %443 = vector.broadcast %442 : vector<8x1xi1> to vector<8x128xi1>
    %444 = arith.select %443, %24, %439 : vector<8x128xi1>, vector<8x128xf32>
    %c6_i32_116 = arith.constant 6 : i32
    %445 = vector.broadcast %c6_i32_116 : i32 to vector<8x1xi32>
    %446 = arith.cmpi eq, %419, %445 : vector<8x1xi32>
    %447 = vector.shape_cast %446 : vector<8x1xi1> to vector<8x1xi1>
    %448 = vector.broadcast %447 : vector<8x1xi1> to vector<8x128xi1>
    %449 = arith.select %448, %26, %444 : vector<8x128xi1>, vector<8x128xf32>
    %c7_i32_117 = arith.constant 7 : i32
    %450 = vector.broadcast %c7_i32_117 : i32 to vector<8x1xi32>
    %451 = arith.cmpi eq, %419, %450 : vector<8x1xi32>
    %452 = vector.shape_cast %451 : vector<8x1xi1> to vector<8x1xi1>
    %453 = vector.broadcast %452 : vector<8x1xi1> to vector<8x128xi1>
    %454 = arith.select %453, %28, %449 : vector<8x128xi1>, vector<8x128xf32>
    %c8_i32_118 = arith.constant 8 : i32
    %455 = vector.broadcast %c8_i32_118 : i32 to vector<8x1xi32>
    %456 = arith.cmpi eq, %419, %455 : vector<8x1xi32>
    %457 = vector.shape_cast %456 : vector<8x1xi1> to vector<8x1xi1>
    %458 = vector.broadcast %457 : vector<8x1xi1> to vector<8x128xi1>
    %459 = arith.select %458, %30, %454 : vector<8x128xi1>, vector<8x128xf32>
    %c9_i32_119 = arith.constant 9 : i32
    %460 = vector.broadcast %c9_i32_119 : i32 to vector<8x1xi32>
    %461 = arith.cmpi eq, %419, %460 : vector<8x1xi32>
    %462 = vector.shape_cast %461 : vector<8x1xi1> to vector<8x1xi1>
    %463 = vector.broadcast %462 : vector<8x1xi1> to vector<8x128xi1>
    %464 = arith.select %463, %32, %459 : vector<8x128xi1>, vector<8x128xf32>
    %c1_i32_120 = arith.constant 1 : i32
    %465 = tpu.dynamic_rotate %413 by %c1_i32_120 dim 1 : vector<8x128xf32>, i32 -> vector<8x128xf32>
    %c0_i32_121 = arith.constant 0 : i32
    %466 = vector.broadcast %c0_i32_121 : i32 to vector<8x128xi32>
    %467 = arith.cmpi eq, %2, %466 : vector<8x128xi32>
    %cst_122 = arith.constant 6.000000e+00 : f32
    %cst_123 = arith.constant 1.000000e+00 : f32
    %468 = arith.subf %cst_122, %cst_123 : f32
    %469 = arith.mulf %468, %0 : f32
    %470 = vector.broadcast %469 : f32 to vector<8x128xf32>
    %471 = arith.select %467, %470, %465 : vector<8x128xi1>, vector<8x128xf32>
    %472 = arith.addf %471, %464 : vector<8x128xf32>
    %473 = vector.broadcast %0 : f32 to vector<8x128xf32>
    %474 = arith.addf %413, %473 : vector<8x128xf32>
    %475 = arith.minimumf %472, %474 : vector<8x128xf32>
    %476 = arith.subf %475, %5 : vector<8x128xf32>
    %cst_124 = arith.constant 1.000000e+09 : f32
    %477 = vector.broadcast %cst_124 : f32 to vector<8x128xf32>
    %478 = arith.select %9, %476, %477 : vector<8x128xi1>, vector<8x128xf32>
    %c1_i32_125 = arith.constant 1 : i32
    %479 = tpu.dynamic_rotate %478 by %c1_i32_125 dim 1 : vector<8x128xf32>, i32 -> vector<8x128xf32>
    %480 = arith.minimumf %478, %479 : vector<8x128xf32>
    %c2_i32_126 = arith.constant 2 : i32
    %481 = tpu.dynamic_rotate %480 by %c2_i32_126 dim 1 : vector<8x128xf32>, i32 -> vector<8x128xf32>
    %482 = arith.minimumf %480, %481 : vector<8x128xf32>
    %c4_i32_127 = arith.constant 4 : i32
    %483 = tpu.dynamic_rotate %482 by %c4_i32_127 dim 1 : vector<8x128xf32>, i32 -> vector<8x128xf32>
    %484 = arith.minimumf %482, %483 : vector<8x128xf32>
    %485 = arith.addf %484, %5 : vector<8x128xf32>
    %cst_128 = arith.constant 6.000000e+00 : f32
    %486 = arith.mulf %cst_128, %0 : f32
    %487 = vector.broadcast %486 : f32 to vector<8x128xf32>
    %488 = arith.addf %487, %7 : vector<8x128xf32>
    %489 = arith.minimumf %485, %488 : vector<8x128xf32>
    %c6_i32_129 = arith.constant 6 : i32
    %490 = vector.broadcast %c6_i32_129 : i32 to vector<8x1xi32>
    %491 = arith.cmpi eq, %11, %490 : vector<8x1xi32>
    %492 = vector.shape_cast %491 : vector<8x1xi1> to vector<8x1xi1>
    %493 = vector.broadcast %492 : vector<8x1xi1> to vector<8x128xi1>
    %494 = arith.select %493, %489, %418 : vector<8x128xi1>, vector<8x128xf32>
    %495 = vector.extract_strided_slice %10 {offsets = [0, 8], sizes = [8, 1], strides = [1, 1]} : vector<8x128xi32> to vector<8x1xi32>
    %c1_i32_130 = arith.constant 1 : i32
    %496 = vector.broadcast %c1_i32_130 : i32 to vector<8x1xi32>
    %497 = arith.cmpi eq, %495, %496 : vector<8x1xi32>
    %498 = vector.shape_cast %497 : vector<8x1xi1> to vector<8x1xi1>
    %499 = vector.broadcast %498 : vector<8x1xi1> to vector<8x128xi1>
    %500 = arith.select %499, %16, %14 : vector<8x128xi1>, vector<8x128xf32>
    %c2_i32_131 = arith.constant 2 : i32
    %501 = vector.broadcast %c2_i32_131 : i32 to vector<8x1xi32>
    %502 = arith.cmpi eq, %495, %501 : vector<8x1xi32>
    %503 = vector.shape_cast %502 : vector<8x1xi1> to vector<8x1xi1>
    %504 = vector.broadcast %503 : vector<8x1xi1> to vector<8x128xi1>
    %505 = arith.select %504, %18, %500 : vector<8x128xi1>, vector<8x128xf32>
    %c3_i32_132 = arith.constant 3 : i32
    %506 = vector.broadcast %c3_i32_132 : i32 to vector<8x1xi32>
    %507 = arith.cmpi eq, %495, %506 : vector<8x1xi32>
    %508 = vector.shape_cast %507 : vector<8x1xi1> to vector<8x1xi1>
    %509 = vector.broadcast %508 : vector<8x1xi1> to vector<8x128xi1>
    %510 = arith.select %509, %20, %505 : vector<8x128xi1>, vector<8x128xf32>
    %c4_i32_133 = arith.constant 4 : i32
    %511 = vector.broadcast %c4_i32_133 : i32 to vector<8x1xi32>
    %512 = arith.cmpi eq, %495, %511 : vector<8x1xi32>
    %513 = vector.shape_cast %512 : vector<8x1xi1> to vector<8x1xi1>
    %514 = vector.broadcast %513 : vector<8x1xi1> to vector<8x128xi1>
    %515 = arith.select %514, %22, %510 : vector<8x128xi1>, vector<8x128xf32>
    %c5_i32_134 = arith.constant 5 : i32
    %516 = vector.broadcast %c5_i32_134 : i32 to vector<8x1xi32>
    %517 = arith.cmpi eq, %495, %516 : vector<8x1xi32>
    %518 = vector.shape_cast %517 : vector<8x1xi1> to vector<8x1xi1>
    %519 = vector.broadcast %518 : vector<8x1xi1> to vector<8x128xi1>
    %520 = arith.select %519, %24, %515 : vector<8x128xi1>, vector<8x128xf32>
    %c6_i32_135 = arith.constant 6 : i32
    %521 = vector.broadcast %c6_i32_135 : i32 to vector<8x1xi32>
    %522 = arith.cmpi eq, %495, %521 : vector<8x1xi32>
    %523 = vector.shape_cast %522 : vector<8x1xi1> to vector<8x1xi1>
    %524 = vector.broadcast %523 : vector<8x1xi1> to vector<8x128xi1>
    %525 = arith.select %524, %26, %520 : vector<8x128xi1>, vector<8x128xf32>
    %c7_i32_136 = arith.constant 7 : i32
    %526 = vector.broadcast %c7_i32_136 : i32 to vector<8x1xi32>
    %527 = arith.cmpi eq, %495, %526 : vector<8x1xi32>
    %528 = vector.shape_cast %527 : vector<8x1xi1> to vector<8x1xi1>
    %529 = vector.broadcast %528 : vector<8x1xi1> to vector<8x128xi1>
    %530 = arith.select %529, %28, %525 : vector<8x128xi1>, vector<8x128xf32>
    %c8_i32_137 = arith.constant 8 : i32
    %531 = vector.broadcast %c8_i32_137 : i32 to vector<8x1xi32>
    %532 = arith.cmpi eq, %495, %531 : vector<8x1xi32>
    %533 = vector.shape_cast %532 : vector<8x1xi1> to vector<8x1xi1>
    %534 = vector.broadcast %533 : vector<8x1xi1> to vector<8x128xi1>
    %535 = arith.select %534, %30, %530 : vector<8x128xi1>, vector<8x128xf32>
    %c9_i32_138 = arith.constant 9 : i32
    %536 = vector.broadcast %c9_i32_138 : i32 to vector<8x1xi32>
    %537 = arith.cmpi eq, %495, %536 : vector<8x1xi32>
    %538 = vector.shape_cast %537 : vector<8x1xi1> to vector<8x1xi1>
    %539 = vector.broadcast %538 : vector<8x1xi1> to vector<8x128xi1>
    %540 = arith.select %539, %32, %535 : vector<8x128xi1>, vector<8x128xf32>
    %c1_i32_139 = arith.constant 1 : i32
    %541 = tpu.dynamic_rotate %489 by %c1_i32_139 dim 1 : vector<8x128xf32>, i32 -> vector<8x128xf32>
    %c0_i32_140 = arith.constant 0 : i32
    %542 = vector.broadcast %c0_i32_140 : i32 to vector<8x128xi32>
    %543 = arith.cmpi eq, %2, %542 : vector<8x128xi32>
    %cst_141 = arith.constant 7.000000e+00 : f32
    %cst_142 = arith.constant 1.000000e+00 : f32
    %544 = arith.subf %cst_141, %cst_142 : f32
    %545 = arith.mulf %544, %0 : f32
    %546 = vector.broadcast %545 : f32 to vector<8x128xf32>
    %547 = arith.select %543, %546, %541 : vector<8x128xi1>, vector<8x128xf32>
    %548 = arith.addf %547, %540 : vector<8x128xf32>
    %549 = vector.broadcast %0 : f32 to vector<8x128xf32>
    %550 = arith.addf %489, %549 : vector<8x128xf32>
    %551 = arith.minimumf %548, %550 : vector<8x128xf32>
    %552 = arith.subf %551, %5 : vector<8x128xf32>
    %cst_143 = arith.constant 1.000000e+09 : f32
    %553 = vector.broadcast %cst_143 : f32 to vector<8x128xf32>
    %554 = arith.select %9, %552, %553 : vector<8x128xi1>, vector<8x128xf32>
    %c1_i32_144 = arith.constant 1 : i32
    %555 = tpu.dynamic_rotate %554 by %c1_i32_144 dim 1 : vector<8x128xf32>, i32 -> vector<8x128xf32>
    %556 = arith.minimumf %554, %555 : vector<8x128xf32>
    %c2_i32_145 = arith.constant 2 : i32
    %557 = tpu.dynamic_rotate %556 by %c2_i32_145 dim 1 : vector<8x128xf32>, i32 -> vector<8x128xf32>
    %558 = arith.minimumf %556, %557 : vector<8x128xf32>
    %c4_i32_146 = arith.constant 4 : i32
    %559 = tpu.dynamic_rotate %558 by %c4_i32_146 dim 1 : vector<8x128xf32>, i32 -> vector<8x128xf32>
    %560 = arith.minimumf %558, %559 : vector<8x128xf32>
    %561 = arith.addf %560, %5 : vector<8x128xf32>
    %cst_147 = arith.constant 7.000000e+00 : f32
    %562 = arith.mulf %cst_147, %0 : f32
    %563 = vector.broadcast %562 : f32 to vector<8x128xf32>
    %564 = arith.addf %563, %7 : vector<8x128xf32>
    %565 = arith.minimumf %561, %564 : vector<8x128xf32>
    %c7_i32_148 = arith.constant 7 : i32
    %566 = vector.broadcast %c7_i32_148 : i32 to vector<8x1xi32>
    %567 = arith.cmpi eq, %11, %566 : vector<8x1xi32>
    %568 = vector.shape_cast %567 : vector<8x1xi1> to vector<8x1xi1>
    %569 = vector.broadcast %568 : vector<8x1xi1> to vector<8x128xi1>
    %570 = arith.select %569, %565, %494 : vector<8x128xi1>, vector<8x128xf32>
    %571 = vector.extract_strided_slice %10 {offsets = [0, 9], sizes = [8, 1], strides = [1, 1]} : vector<8x128xi32> to vector<8x1xi32>
    %c1_i32_149 = arith.constant 1 : i32
    %572 = vector.broadcast %c1_i32_149 : i32 to vector<8x1xi32>
    %573 = arith.cmpi eq, %571, %572 : vector<8x1xi32>
    %574 = vector.shape_cast %573 : vector<8x1xi1> to vector<8x1xi1>
    %575 = vector.broadcast %574 : vector<8x1xi1> to vector<8x128xi1>
    %576 = arith.select %575, %16, %14 : vector<8x128xi1>, vector<8x128xf32>
    %c2_i32_150 = arith.constant 2 : i32
    %577 = vector.broadcast %c2_i32_150 : i32 to vector<8x1xi32>
    %578 = arith.cmpi eq, %571, %577 : vector<8x1xi32>
    %579 = vector.shape_cast %578 : vector<8x1xi1> to vector<8x1xi1>
    %580 = vector.broadcast %579 : vector<8x1xi1> to vector<8x128xi1>
    %581 = arith.select %580, %18, %576 : vector<8x128xi1>, vector<8x128xf32>
    %c3_i32_151 = arith.constant 3 : i32
    %582 = vector.broadcast %c3_i32_151 : i32 to vector<8x1xi32>
    %583 = arith.cmpi eq, %571, %582 : vector<8x1xi32>
    %584 = vector.shape_cast %583 : vector<8x1xi1> to vector<8x1xi1>
    %585 = vector.broadcast %584 : vector<8x1xi1> to vector<8x128xi1>
    %586 = arith.select %585, %20, %581 : vector<8x128xi1>, vector<8x128xf32>
    %c4_i32_152 = arith.constant 4 : i32
    %587 = vector.broadcast %c4_i32_152 : i32 to vector<8x1xi32>
    %588 = arith.cmpi eq, %571, %587 : vector<8x1xi32>
    %589 = vector.shape_cast %588 : vector<8x1xi1> to vector<8x1xi1>
    %590 = vector.broadcast %589 : vector<8x1xi1> to vector<8x128xi1>
    %591 = arith.select %590, %22, %586 : vector<8x128xi1>, vector<8x128xf32>
    %c5_i32_153 = arith.constant 5 : i32
    %592 = vector.broadcast %c5_i32_153 : i32 to vector<8x1xi32>
    %593 = arith.cmpi eq, %571, %592 : vector<8x1xi32>
    %594 = vector.shape_cast %593 : vector<8x1xi1> to vector<8x1xi1>
    %595 = vector.broadcast %594 : vector<8x1xi1> to vector<8x128xi1>
    %596 = arith.select %595, %24, %591 : vector<8x128xi1>, vector<8x128xf32>
    %c6_i32_154 = arith.constant 6 : i32
    %597 = vector.broadcast %c6_i32_154 : i32 to vector<8x1xi32>
    %598 = arith.cmpi eq, %571, %597 : vector<8x1xi32>
    %599 = vector.shape_cast %598 : vector<8x1xi1> to vector<8x1xi1>
    %600 = vector.broadcast %599 : vector<8x1xi1> to vector<8x128xi1>
    %601 = arith.select %600, %26, %596 : vector<8x128xi1>, vector<8x128xf32>
    %c7_i32_155 = arith.constant 7 : i32
    %602 = vector.broadcast %c7_i32_155 : i32 to vector<8x1xi32>
    %603 = arith.cmpi eq, %571, %602 : vector<8x1xi32>
    %604 = vector.shape_cast %603 : vector<8x1xi1> to vector<8x1xi1>
    %605 = vector.broadcast %604 : vector<8x1xi1> to vector<8x128xi1>
    %606 = arith.select %605, %28, %601 : vector<8x128xi1>, vector<8x128xf32>
    %c8_i32_156 = arith.constant 8 : i32
    %607 = vector.broadcast %c8_i32_156 : i32 to vector<8x1xi32>
    %608 = arith.cmpi eq, %571, %607 : vector<8x1xi32>
    %609 = vector.shape_cast %608 : vector<8x1xi1> to vector<8x1xi1>
    %610 = vector.broadcast %609 : vector<8x1xi1> to vector<8x128xi1>
    %611 = arith.select %610, %30, %606 : vector<8x128xi1>, vector<8x128xf32>
    %c9_i32_157 = arith.constant 9 : i32
    %612 = vector.broadcast %c9_i32_157 : i32 to vector<8x1xi32>
    %613 = arith.cmpi eq, %571, %612 : vector<8x1xi32>
    %614 = vector.shape_cast %613 : vector<8x1xi1> to vector<8x1xi1>
    %615 = vector.broadcast %614 : vector<8x1xi1> to vector<8x128xi1>
    %616 = arith.select %615, %32, %611 : vector<8x128xi1>, vector<8x128xf32>
    %c1_i32_158 = arith.constant 1 : i32
    %617 = tpu.dynamic_rotate %565 by %c1_i32_158 dim 1 : vector<8x128xf32>, i32 -> vector<8x128xf32>
    %c0_i32_159 = arith.constant 0 : i32
    %618 = vector.broadcast %c0_i32_159 : i32 to vector<8x128xi32>
    %619 = arith.cmpi eq, %2, %618 : vector<8x128xi32>
    %cst_160 = arith.constant 8.000000e+00 : f32
    %cst_161 = arith.constant 1.000000e+00 : f32
    %620 = arith.subf %cst_160, %cst_161 : f32
    %621 = arith.mulf %620, %0 : f32
    %622 = vector.broadcast %621 : f32 to vector<8x128xf32>
    %623 = arith.select %619, %622, %617 : vector<8x128xi1>, vector<8x128xf32>
    %624 = arith.addf %623, %616 : vector<8x128xf32>
    %625 = vector.broadcast %0 : f32 to vector<8x128xf32>
    %626 = arith.addf %565, %625 : vector<8x128xf32>
    %627 = arith.minimumf %624, %626 : vector<8x128xf32>
    %628 = arith.subf %627, %5 : vector<8x128xf32>
    %cst_162 = arith.constant 1.000000e+09 : f32
    %629 = vector.broadcast %cst_162 : f32 to vector<8x128xf32>
    %630 = arith.select %9, %628, %629 : vector<8x128xi1>, vector<8x128xf32>
    %c1_i32_163 = arith.constant 1 : i32
    %631 = tpu.dynamic_rotate %630 by %c1_i32_163 dim 1 : vector<8x128xf32>, i32 -> vector<8x128xf32>
    %632 = arith.minimumf %630, %631 : vector<8x128xf32>
    %c2_i32_164 = arith.constant 2 : i32
    %633 = tpu.dynamic_rotate %632 by %c2_i32_164 dim 1 : vector<8x128xf32>, i32 -> vector<8x128xf32>
    %634 = arith.minimumf %632, %633 : vector<8x128xf32>
    %c4_i32_165 = arith.constant 4 : i32
    %635 = tpu.dynamic_rotate %634 by %c4_i32_165 dim 1 : vector<8x128xf32>, i32 -> vector<8x128xf32>
    %636 = arith.minimumf %634, %635 : vector<8x128xf32>
    %637 = arith.addf %636, %5 : vector<8x128xf32>
    %cst_166 = arith.constant 8.000000e+00 : f32
    %638 = arith.mulf %cst_166, %0 : f32
    %639 = vector.broadcast %638 : f32 to vector<8x128xf32>
    %640 = arith.addf %639, %7 : vector<8x128xf32>
    %641 = arith.minimumf %637, %640 : vector<8x128xf32>
    %c8_i32_167 = arith.constant 8 : i32
    %642 = vector.broadcast %c8_i32_167 : i32 to vector<8x1xi32>
    %643 = arith.cmpi eq, %11, %642 : vector<8x1xi32>
    %644 = vector.shape_cast %643 : vector<8x1xi1> to vector<8x1xi1>
    %645 = vector.broadcast %644 : vector<8x1xi1> to vector<8x128xi1>
    %646 = arith.select %645, %641, %570 : vector<8x128xi1>, vector<8x128xf32>
    %c1_i32_168 = arith.constant 1 : i32
    %647 = vector.broadcast %c1_i32_168 : i32 to vector<8x1xi32>
    %648 = arith.subi %12, %647 : vector<8x1xi32>
    %c0_i32_169 = arith.constant 0 : i32
    %649 = vector.broadcast %c0_i32_169 : i32 to vector<8x1xi32>
    %650 = arith.maxsi %648, %649 : vector<8x1xi32>
    %651 = vector.broadcast %650 : vector<8x1xi32> to vector<8x128xi32>
    %652 = arith.cmpi eq, %2, %651 : vector<8x128xi32>
    %cst_170 = arith.constant 0.000000e+00 : f32
    %653 = vector.broadcast %cst_170 : f32 to vector<8x128xf32>
    %654 = arith.select %652, %646, %653 : vector<8x128xi1>, vector<8x128xf32>
    %cst_171 = arith.constant dense<0.000000e+00> : vector<8xf32>
    %655 = vector.multi_reduction <add>, %654, %cst_171 [1] : vector<8x128xf32> to vector<8xf32>
    %656 = vector.shape_cast %655 : vector<8xf32> to vector<8x1xf32>
    %c0_i32_172 = arith.constant 0 : i32
    %657 = vector.broadcast %c0_i32_172 : i32 to vector<8x1xi32>
    %658 = arith.cmpi eq, %12, %657 : vector<8x1xi32>
    %659 = arith.sitofp %11 : vector<8x1xi32> to vector<8x1xf32>
    %660 = vector.broadcast %0 : f32 to vector<8x1xf32>
    %661 = arith.mulf %659, %660 : vector<8x1xf32>
    %662 = arith.select %658, %661, %656 : vector<8x1xi1>, vector<8x1xf32>
    %c0_173 = arith.constant 0 : index
    %c0_174 = arith.constant 0 : index
    %663 = vector.load %arg4[%c0_173, %c0_174] : memref<24x1xf32, #tpu.memory_space<vmem>>, vector<8x1xf32>
    tpu.vector_store %arg4[%c0_173, %c0_174], %662 {strides = array<i32>} : memref<24x1xf32, #tpu.memory_space<vmem>>, vector<8x1xf32>,
    %c8_175 = arith.constant 8 : index
    %c0_176 = arith.constant 0 : index
    %664 = vector.load %arg2[%c8_175, %c0_176] : memref<24x128xi32, #tpu.memory_space<vmem>>, vector<8x128xi32>
    %665 = vector.extract_strided_slice %664 {offsets = [0, 0], sizes = [8, 1], strides = [1, 1]} : vector<8x128xi32> to vector<8x1xi32>
    %666 = vector.extract_strided_slice %664 {offsets = [0, 1], sizes = [8, 1], strides = [1, 1]} : vector<8x128xi32> to vector<8x1xi32>
    %c0_177 = arith.constant 0 : index
    %c8_178 = arith.constant 8 : index
    %c0_179 = arith.constant 0 : index
    %667 = vector.load %arg3[%c0_177, %c8_178, %c0_179] : memref<10x24x128xf32, #tpu.memory_space<vmem>>, vector<1x8x128xf32>
    %668 = vector.shape_cast %667 : vector<1x8x128xf32> to vector<8x128xf32>
    %c1_180 = arith.constant 1 : index
    %c8_181 = arith.constant 8 : index
    %c0_182 = arith.constant 0 : index
    %669 = vector.load %arg3[%c1_180, %c8_181, %c0_182] : memref<10x24x128xf32, #tpu.memory_space<vmem>>, vector<1x8x128xf32>
    %670 = vector.shape_cast %669 : vector<1x8x128xf32> to vector<8x128xf32>
    %c2_183 = arith.constant 2 : index
    %c8_184 = arith.constant 8 : index
    %c0_185 = arith.constant 0 : index
    %671 = vector.load %arg3[%c2_183, %c8_184, %c0_185] : memref<10x24x128xf32, #tpu.memory_space<vmem>>, vector<1x8x128xf32>
    %672 = vector.shape_cast %671 : vector<1x8x128xf32> to vector<8x128xf32>
    %c3_186 = arith.constant 3 : index
    %c8_187 = arith.constant 8 : index
    %c0_188 = arith.constant 0 : index
    %673 = vector.load %arg3[%c3_186, %c8_187, %c0_188] : memref<10x24x128xf32, #tpu.memory_space<vmem>>, vector<1x8x128xf32>
    %674 = vector.shape_cast %673 : vector<1x8x128xf32> to vector<8x128xf32>
    %c4_189 = arith.constant 4 : index
    %c8_190 = arith.constant 8 : index
    %c0_191 = arith.constant 0 : index
    %675 = vector.load %arg3[%c4_189, %c8_190, %c0_191] : memref<10x24x128xf32, #tpu.memory_space<vmem>>, vector<1x8x128xf32>
    %676 = vector.shape_cast %675 : vector<1x8x128xf32> to vector<8x128xf32>
    %c5_192 = arith.constant 5 : index
    %c8_193 = arith.constant 8 : index
    %c0_194 = arith.constant 0 : index
    %677 = vector.load %arg3[%c5_192, %c8_193, %c0_194] : memref<10x24x128xf32, #tpu.memory_space<vmem>>, vector<1x8x128xf32>
    %678 = vector.shape_cast %677 : vector<1x8x128xf32> to vector<8x128xf32>
    %c6_195 = arith.constant 6 : index
    %c8_196 = arith.constant 8 : index
    %c0_197 = arith.constant 0 : index
    %679 = vector.load %arg3[%c6_195, %c8_196, %c0_197] : memref<10x24x128xf32, #tpu.memory_space<vmem>>, vector<1x8x128xf32>
    %680 = vector.shape_cast %679 : vector<1x8x128xf32> to vector<8x128xf32>
    %c7_198 = arith.constant 7 : index
    %c8_199 = arith.constant 8 : index
    %c0_200 = arith.constant 0 : index
    %681 = vector.load %arg3[%c7_198, %c8_199, %c0_200] : memref<10x24x128xf32, #tpu.memory_space<vmem>>, vector<1x8x128xf32>
    %682 = vector.shape_cast %681 : vector<1x8x128xf32> to vector<8x128xf32>
    %c8_201 = arith.constant 8 : index
    %c8_202 = arith.constant 8 : index
    %c0_203 = arith.constant 0 : index
    %683 = vector.load %arg3[%c8_201, %c8_202, %c0_203] : memref<10x24x128xf32, #tpu.memory_space<vmem>>, vector<1x8x128xf32>
    %684 = vector.shape_cast %683 : vector<1x8x128xf32> to vector<8x128xf32>
    %c9_204 = arith.constant 9 : index
    %c8_205 = arith.constant 8 : index
    %c0_206 = arith.constant 0 : index
    %685 = vector.load %arg3[%c9_204, %c8_205, %c0_206] : memref<10x24x128xf32, #tpu.memory_space<vmem>>, vector<1x8x128xf32>
    %686 = vector.shape_cast %685 : vector<1x8x128xf32> to vector<8x128xf32>
    %c0_i32_207 = arith.constant 0 : i32
    %687 = vector.broadcast %c0_i32_207 : i32 to vector<8x1xi32>
    %688 = arith.cmpi eq, %665, %687 : vector<8x1xi32>
    %cst_208 = arith.constant 0.000000e+00 : f32
    %689 = vector.shape_cast %688 : vector<8x1xi1> to vector<8x1xi1>
    %690 = vector.broadcast %689 : vector<8x1xi1> to vector<8x128xi1>
    %691 = vector.broadcast %cst_208 : f32 to vector<8x128xf32>
    %692 = arith.select %690, %7, %691 : vector<8x128xi1>, vector<8x128xf32>
    %693 = vector.extract_strided_slice %664 {offsets = [0, 2], sizes = [8, 1], strides = [1, 1]} : vector<8x128xi32> to vector<8x1xi32>
    %c1_i32_209 = arith.constant 1 : i32
    %694 = vector.broadcast %c1_i32_209 : i32 to vector<8x1xi32>
    %695 = arith.cmpi eq, %693, %694 : vector<8x1xi32>
    %696 = vector.shape_cast %695 : vector<8x1xi1> to vector<8x1xi1>
    %697 = vector.broadcast %696 : vector<8x1xi1> to vector<8x128xi1>
    %698 = arith.select %697, %670, %668 : vector<8x128xi1>, vector<8x128xf32>
    %c2_i32_210 = arith.constant 2 : i32
    %699 = vector.broadcast %c2_i32_210 : i32 to vector<8x1xi32>
    %700 = arith.cmpi eq, %693, %699 : vector<8x1xi32>
    %701 = vector.shape_cast %700 : vector<8x1xi1> to vector<8x1xi1>
    %702 = vector.broadcast %701 : vector<8x1xi1> to vector<8x128xi1>
    %703 = arith.select %702, %672, %698 : vector<8x128xi1>, vector<8x128xf32>
    %c3_i32_211 = arith.constant 3 : i32
    %704 = vector.broadcast %c3_i32_211 : i32 to vector<8x1xi32>
    %705 = arith.cmpi eq, %693, %704 : vector<8x1xi32>
    %706 = vector.shape_cast %705 : vector<8x1xi1> to vector<8x1xi1>
    %707 = vector.broadcast %706 : vector<8x1xi1> to vector<8x128xi1>
    %708 = arith.select %707, %674, %703 : vector<8x128xi1>, vector<8x128xf32>
    %c4_i32_212 = arith.constant 4 : i32
    %709 = vector.broadcast %c4_i32_212 : i32 to vector<8x1xi32>
    %710 = arith.cmpi eq, %693, %709 : vector<8x1xi32>
    %711 = vector.shape_cast %710 : vector<8x1xi1> to vector<8x1xi1>
    %712 = vector.broadcast %711 : vector<8x1xi1> to vector<8x128xi1>
    %713 = arith.select %712, %676, %708 : vector<8x128xi1>, vector<8x128xf32>
    %c5_i32_213 = arith.constant 5 : i32
    %714 = vector.broadcast %c5_i32_213 : i32 to vector<8x1xi32>
    %715 = arith.cmpi eq, %693, %714 : vector<8x1xi32>
    %716 = vector.shape_cast %715 : vector<8x1xi1> to vector<8x1xi1>
    %717 = vector.broadcast %716 : vector<8x1xi1> to vector<8x128xi1>
    %718 = arith.select %717, %678, %713 : vector<8x128xi1>, vector<8x128xf32>
    %c6_i32_214 = arith.constant 6 : i32
    %719 = vector.broadcast %c6_i32_214 : i32 to vector<8x1xi32>
    %720 = arith.cmpi eq, %693, %719 : vector<8x1xi32>
    %721 = vector.shape_cast %720 : vector<8x1xi1> to vector<8x1xi1>
    %722 = vector.broadcast %721 : vector<8x1xi1> to vector<8x128xi1>
    %723 = arith.select %722, %680, %718 : vector<8x128xi1>, vector<8x128xf32>
    %c7_i32_215 = arith.constant 7 : i32
    %724 = vector.broadcast %c7_i32_215 : i32 to vector<8x1xi32>
    %725 = arith.cmpi eq, %693, %724 : vector<8x1xi32>
    %726 = vector.shape_cast %725 : vector<8x1xi1> to vector<8x1xi1>
    %727 = vector.broadcast %726 : vector<8x1xi1> to vector<8x128xi1>
    %728 = arith.select %727, %682, %723 : vector<8x128xi1>, vector<8x128xf32>
    %c8_i32_216 = arith.constant 8 : i32
    %729 = vector.broadcast %c8_i32_216 : i32 to vector<8x1xi32>
    %730 = arith.cmpi eq, %693, %729 : vector<8x1xi32>
    %731 = vector.shape_cast %730 : vector<8x1xi1> to vector<8x1xi1>
    %732 = vector.broadcast %731 : vector<8x1xi1> to vector<8x128xi1>
    %733 = arith.select %732, %684, %728 : vector<8x128xi1>, vector<8x128xf32>
    %c9_i32_217 = arith.constant 9 : i32
    %734 = vector.broadcast %c9_i32_217 : i32 to vector<8x1xi32>
    %735 = arith.cmpi eq, %693, %734 : vector<8x1xi32>
    %736 = vector.shape_cast %735 : vector<8x1xi1> to vector<8x1xi1>
    %737 = vector.broadcast %736 : vector<8x1xi1> to vector<8x128xi1>
    %738 = arith.select %737, %686, %733 : vector<8x128xi1>, vector<8x128xf32>
    %c1_i32_218 = arith.constant 1 : i32
    %739 = tpu.dynamic_rotate %7 by %c1_i32_218 dim 1 : vector<8x128xf32>, i32 -> vector<8x128xf32>
    %c0_i32_219 = arith.constant 0 : i32
    %740 = vector.broadcast %c0_i32_219 : i32 to vector<8x128xi32>
    %741 = arith.cmpi eq, %2, %740 : vector<8x128xi32>
    %cst_220 = arith.constant 1.000000e+00 : f32
    %cst_221 = arith.constant 1.000000e+00 : f32
    %742 = arith.subf %cst_220, %cst_221 : f32
    %743 = arith.mulf %742, %0 : f32
    %744 = vector.broadcast %743 : f32 to vector<8x128xf32>
    %745 = arith.select %741, %744, %739 : vector<8x128xi1>, vector<8x128xf32>
    %746 = arith.addf %745, %738 : vector<8x128xf32>
    %747 = vector.broadcast %0 : f32 to vector<8x128xf32>
    %748 = arith.addf %7, %747 : vector<8x128xf32>
    %749 = arith.minimumf %746, %748 : vector<8x128xf32>
    %750 = arith.subf %749, %5 : vector<8x128xf32>
    %cst_222 = arith.constant 1.000000e+09 : f32
    %751 = vector.broadcast %cst_222 : f32 to vector<8x128xf32>
    %752 = arith.select %9, %750, %751 : vector<8x128xi1>, vector<8x128xf32>
    %c1_i32_223 = arith.constant 1 : i32
    %753 = tpu.dynamic_rotate %752 by %c1_i32_223 dim 1 : vector<8x128xf32>, i32 -> vector<8x128xf32>
    %754 = arith.minimumf %752, %753 : vector<8x128xf32>
    %c2_i32_224 = arith.constant 2 : i32
    %755 = tpu.dynamic_rotate %754 by %c2_i32_224 dim 1 : vector<8x128xf32>, i32 -> vector<8x128xf32>
    %756 = arith.minimumf %754, %755 : vector<8x128xf32>
    %c4_i32_225 = arith.constant 4 : i32
    %757 = tpu.dynamic_rotate %756 by %c4_i32_225 dim 1 : vector<8x128xf32>, i32 -> vector<8x128xf32>
    %758 = arith.minimumf %756, %757 : vector<8x128xf32>
    %759 = arith.addf %758, %5 : vector<8x128xf32>
    %cst_226 = arith.constant 1.000000e+00 : f32
    %760 = arith.mulf %cst_226, %0 : f32
    %761 = vector.broadcast %760 : f32 to vector<8x128xf32>
    %762 = arith.addf %761, %7 : vector<8x128xf32>
    %763 = arith.minimumf %759, %762 : vector<8x128xf32>
    %c1_i32_227 = arith.constant 1 : i32
    %764 = vector.broadcast %c1_i32_227 : i32 to vector<8x1xi32>
    %765 = arith.cmpi eq, %665, %764 : vector<8x1xi32>
    %766 = vector.shape_cast %765 : vector<8x1xi1> to vector<8x1xi1>
    %767 = vector.broadcast %766 : vector<8x1xi1> to vector<8x128xi1>
    %768 = arith.select %767, %763, %692 : vector<8x128xi1>, vector<8x128xf32>
    %769 = vector.extract_strided_slice %664 {offsets = [0, 3], sizes = [8, 1], strides = [1, 1]} : vector<8x128xi32> to vector<8x1xi32>
    %c1_i32_228 = arith.constant 1 : i32
    %770 = vector.broadcast %c1_i32_228 : i32 to vector<8x1xi32>
    %771 = arith.cmpi eq, %769, %770 : vector<8x1xi32>
    %772 = vector.shape_cast %771 : vector<8x1xi1> to vector<8x1xi1>
    %773 = vector.broadcast %772 : vector<8x1xi1> to vector<8x128xi1>
    %774 = arith.select %773, %670, %668 : vector<8x128xi1>, vector<8x128xf32>
    %c2_i32_229 = arith.constant 2 : i32
    %775 = vector.broadcast %c2_i32_229 : i32 to vector<8x1xi32>
    %776 = arith.cmpi eq, %769, %775 : vector<8x1xi32>
    %777 = vector.shape_cast %776 : vector<8x1xi1> to vector<8x1xi1>
    %778 = vector.broadcast %777 : vector<8x1xi1> to vector<8x128xi1>
    %779 = arith.select %778, %672, %774 : vector<8x128xi1>, vector<8x128xf32>
    %c3_i32_230 = arith.constant 3 : i32
    %780 = vector.broadcast %c3_i32_230 : i32 to vector<8x1xi32>
    %781 = arith.cmpi eq, %769, %780 : vector<8x1xi32>
    %782 = vector.shape_cast %781 : vector<8x1xi1> to vector<8x1xi1>
    %783 = vector.broadcast %782 : vector<8x1xi1> to vector<8x128xi1>
    %784 = arith.select %783, %674, %779 : vector<8x128xi1>, vector<8x128xf32>
    %c4_i32_231 = arith.constant 4 : i32
    %785 = vector.broadcast %c4_i32_231 : i32 to vector<8x1xi32>
    %786 = arith.cmpi eq, %769, %785 : vector<8x1xi32>
    %787 = vector.shape_cast %786 : vector<8x1xi1> to vector<8x1xi1>
    %788 = vector.broadcast %787 : vector<8x1xi1> to vector<8x128xi1>
    %789 = arith.select %788, %676, %784 : vector<8x128xi1>, vector<8x128xf32>
    %c5_i32_232 = arith.constant 5 : i32
    %790 = vector.broadcast %c5_i32_232 : i32 to vector<8x1xi32>
    %791 = arith.cmpi eq, %769, %790 : vector<8x1xi32>
    %792 = vector.shape_cast %791 : vector<8x1xi1> to vector<8x1xi1>
    %793 = vector.broadcast %792 : vector<8x1xi1> to vector<8x128xi1>
    %794 = arith.select %793, %678, %789 : vector<8x128xi1>, vector<8x128xf32>
    %c6_i32_233 = arith.constant 6 : i32
    %795 = vector.broadcast %c6_i32_233 : i32 to vector<8x1xi32>
    %796 = arith.cmpi eq, %769, %795 : vector<8x1xi32>
    %797 = vector.shape_cast %796 : vector<8x1xi1> to vector<8x1xi1>
    %798 = vector.broadcast %797 : vector<8x1xi1> to vector<8x128xi1>
    %799 = arith.select %798, %680, %794 : vector<8x128xi1>, vector<8x128xf32>
    %c7_i32_234 = arith.constant 7 : i32
    %800 = vector.broadcast %c7_i32_234 : i32 to vector<8x1xi32>
    %801 = arith.cmpi eq, %769, %800 : vector<8x1xi32>
    %802 = vector.shape_cast %801 : vector<8x1xi1> to vector<8x1xi1>
    %803 = vector.broadcast %802 : vector<8x1xi1> to vector<8x128xi1>
    %804 = arith.select %803, %682, %799 : vector<8x128xi1>, vector<8x128xf32>
    %c8_i32_235 = arith.constant 8 : i32
    %805 = vector.broadcast %c8_i32_235 : i32 to vector<8x1xi32>
    %806 = arith.cmpi eq, %769, %805 : vector<8x1xi32>
    %807 = vector.shape_cast %806 : vector<8x1xi1> to vector<8x1xi1>
    %808 = vector.broadcast %807 : vector<8x1xi1> to vector<8x128xi1>
    %809 = arith.select %808, %684, %804 : vector<8x128xi1>, vector<8x128xf32>
    %c9_i32_236 = arith.constant 9 : i32
    %810 = vector.broadcast %c9_i32_236 : i32 to vector<8x1xi32>
    %811 = arith.cmpi eq, %769, %810 : vector<8x1xi32>
    %812 = vector.shape_cast %811 : vector<8x1xi1> to vector<8x1xi1>
    %813 = vector.broadcast %812 : vector<8x1xi1> to vector<8x128xi1>
    %814 = arith.select %813, %686, %809 : vector<8x128xi1>, vector<8x128xf32>
    %c1_i32_237 = arith.constant 1 : i32
    %815 = tpu.dynamic_rotate %763 by %c1_i32_237 dim 1 : vector<8x128xf32>, i32 -> vector<8x128xf32>
    %c0_i32_238 = arith.constant 0 : i32
    %816 = vector.broadcast %c0_i32_238 : i32 to vector<8x128xi32>
    %817 = arith.cmpi eq, %2, %816 : vector<8x128xi32>
    %cst_239 = arith.constant 2.000000e+00 : f32
    %cst_240 = arith.constant 1.000000e+00 : f32
    %818 = arith.subf %cst_239, %cst_240 : f32
    %819 = arith.mulf %818, %0 : f32
    %820 = vector.broadcast %819 : f32 to vector<8x128xf32>
    %821 = arith.select %817, %820, %815 : vector<8x128xi1>, vector<8x128xf32>
    %822 = arith.addf %821, %814 : vector<8x128xf32>
    %823 = vector.broadcast %0 : f32 to vector<8x128xf32>
    %824 = arith.addf %763, %823 : vector<8x128xf32>
    %825 = arith.minimumf %822, %824 : vector<8x128xf32>
    %826 = arith.subf %825, %5 : vector<8x128xf32>
    %cst_241 = arith.constant 1.000000e+09 : f32
    %827 = vector.broadcast %cst_241 : f32 to vector<8x128xf32>
    %828 = arith.select %9, %826, %827 : vector<8x128xi1>, vector<8x128xf32>
    %c1_i32_242 = arith.constant 1 : i32
    %829 = tpu.dynamic_rotate %828 by %c1_i32_242 dim 1 : vector<8x128xf32>, i32 -> vector<8x128xf32>
    %830 = arith.minimumf %828, %829 : vector<8x128xf32>
    %c2_i32_243 = arith.constant 2 : i32
    %831 = tpu.dynamic_rotate %830 by %c2_i32_243 dim 1 : vector<8x128xf32>, i32 -> vector<8x128xf32>
    %832 = arith.minimumf %830, %831 : vector<8x128xf32>
    %c4_i32_244 = arith.constant 4 : i32
    %833 = tpu.dynamic_rotate %832 by %c4_i32_244 dim 1 : vector<8x128xf32>, i32 -> vector<8x128xf32>
    %834 = arith.minimumf %832, %833 : vector<8x128xf32>
    %835 = arith.addf %834, %5 : vector<8x128xf32>
    %cst_245 = arith.constant 2.000000e+00 : f32
    %836 = arith.mulf %cst_245, %0 : f32
    %837 = vector.broadcast %836 : f32 to vector<8x128xf32>
    %838 = arith.addf %837, %7 : vector<8x128xf32>
    %839 = arith.minimumf %835, %838 : vector<8x128xf32>
    %c2_i32_246 = arith.constant 2 : i32
    %840 = vector.broadcast %c2_i32_246 : i32 to vector<8x1xi32>
    %841 = arith.cmpi eq, %665, %840 : vector<8x1xi32>
    %842 = vector.shape_cast %841 : vector<8x1xi1> to vector<8x1xi1>
    %843 = vector.broadcast %842 : vector<8x1xi1> to vector<8x128xi1>
    %844 = arith.select %843, %839, %768 : vector<8x128xi1>, vector<8x128xf32>
    %845 = vector.extract_strided_slice %664 {offsets = [0, 4], sizes = [8, 1], strides = [1, 1]} : vector<8x128xi32> to vector<8x1xi32>
    %c1_i32_247 = arith.constant 1 : i32
    %846 = vector.broadcast %c1_i32_247 : i32 to vector<8x1xi32>
    %847 = arith.cmpi eq, %845, %846 : vector<8x1xi32>
    %848 = vector.shape_cast %847 : vector<8x1xi1> to vector<8x1xi1>
    %849 = vector.broadcast %848 : vector<8x1xi1> to vector<8x128xi1>
    %850 = arith.select %849, %670, %668 : vector<8x128xi1>, vector<8x128xf32>
    %c2_i32_248 = arith.constant 2 : i32
    %851 = vector.broadcast %c2_i32_248 : i32 to vector<8x1xi32>
    %852 = arith.cmpi eq, %845, %851 : vector<8x1xi32>
    %853 = vector.shape_cast %852 : vector<8x1xi1> to vector<8x1xi1>
    %854 = vector.broadcast %853 : vector<8x1xi1> to vector<8x128xi1>
    %855 = arith.select %854, %672, %850 : vector<8x128xi1>, vector<8x128xf32>
    %c3_i32_249 = arith.constant 3 : i32
    %856 = vector.broadcast %c3_i32_249 : i32 to vector<8x1xi32>
    %857 = arith.cmpi eq, %845, %856 : vector<8x1xi32>
    %858 = vector.shape_cast %857 : vector<8x1xi1> to vector<8x1xi1>
    %859 = vector.broadcast %858 : vector<8x1xi1> to vector<8x128xi1>
    %860 = arith.select %859, %674, %855 : vector<8x128xi1>, vector<8x128xf32>
    %c4_i32_250 = arith.constant 4 : i32
    %861 = vector.broadcast %c4_i32_250 : i32 to vector<8x1xi32>
    %862 = arith.cmpi eq, %845, %861 : vector<8x1xi32>
    %863 = vector.shape_cast %862 : vector<8x1xi1> to vector<8x1xi1>
    %864 = vector.broadcast %863 : vector<8x1xi1> to vector<8x128xi1>
    %865 = arith.select %864, %676, %860 : vector<8x128xi1>, vector<8x128xf32>
    %c5_i32_251 = arith.constant 5 : i32
    %866 = vector.broadcast %c5_i32_251 : i32 to vector<8x1xi32>
    %867 = arith.cmpi eq, %845, %866 : vector<8x1xi32>
    %868 = vector.shape_cast %867 : vector<8x1xi1> to vector<8x1xi1>
    %869 = vector.broadcast %868 : vector<8x1xi1> to vector<8x128xi1>
    %870 = arith.select %869, %678, %865 : vector<8x128xi1>, vector<8x128xf32>
    %c6_i32_252 = arith.constant 6 : i32
    %871 = vector.broadcast %c6_i32_252 : i32 to vector<8x1xi32>
    %872 = arith.cmpi eq, %845, %871 : vector<8x1xi32>
    %873 = vector.shape_cast %872 : vector<8x1xi1> to vector<8x1xi1>
    %874 = vector.broadcast %873 : vector<8x1xi1> to vector<8x128xi1>
    %875 = arith.select %874, %680, %870 : vector<8x128xi1>, vector<8x128xf32>
    %c7_i32_253 = arith.constant 7 : i32
    %876 = vector.broadcast %c7_i32_253 : i32 to vector<8x1xi32>
    %877 = arith.cmpi eq, %845, %876 : vector<8x1xi32>
    %878 = vector.shape_cast %877 : vector<8x1xi1> to vector<8x1xi1>
    %879 = vector.broadcast %878 : vector<8x1xi1> to vector<8x128xi1>
    %880 = arith.select %879, %682, %875 : vector<8x128xi1>, vector<8x128xf32>
    %c8_i32_254 = arith.constant 8 : i32
    %881 = vector.broadcast %c8_i32_254 : i32 to vector<8x1xi32>
    %882 = arith.cmpi eq, %845, %881 : vector<8x1xi32>
    %883 = vector.shape_cast %882 : vector<8x1xi1> to vector<8x1xi1>
    %884 = vector.broadcast %883 : vector<8x1xi1> to vector<8x128xi1>
    %885 = arith.select %884, %684, %880 : vector<8x128xi1>, vector<8x128xf32>
    %c9_i32_255 = arith.constant 9 : i32
    %886 = vector.broadcast %c9_i32_255 : i32 to vector<8x1xi32>
    %887 = arith.cmpi eq, %845, %886 : vector<8x1xi32>
    %888 = vector.shape_cast %887 : vector<8x1xi1> to vector<8x1xi1>
    %889 = vector.broadcast %888 : vector<8x1xi1> to vector<8x128xi1>
    %890 = arith.select %889, %686, %885 : vector<8x128xi1>, vector<8x128xf32>
    %c1_i32_256 = arith.constant 1 : i32
    %891 = tpu.dynamic_rotate %839 by %c1_i32_256 dim 1 : vector<8x128xf32>, i32 -> vector<8x128xf32>
    %c0_i32_257 = arith.constant 0 : i32
    %892 = vector.broadcast %c0_i32_257 : i32 to vector<8x128xi32>
    %893 = arith.cmpi eq, %2, %892 : vector<8x128xi32>
    %cst_258 = arith.constant 3.000000e+00 : f32
    %cst_259 = arith.constant 1.000000e+00 : f32
    %894 = arith.subf %cst_258, %cst_259 : f32
    %895 = arith.mulf %894, %0 : f32
    %896 = vector.broadcast %895 : f32 to vector<8x128xf32>
    %897 = arith.select %893, %896, %891 : vector<8x128xi1>, vector<8x128xf32>
    %898 = arith.addf %897, %890 : vector<8x128xf32>
    %899 = vector.broadcast %0 : f32 to vector<8x128xf32>
    %900 = arith.addf %839, %899 : vector<8x128xf32>
    %901 = arith.minimumf %898, %900 : vector<8x128xf32>
    %902 = arith.subf %901, %5 : vector<8x128xf32>
    %cst_260 = arith.constant 1.000000e+09 : f32
    %903 = vector.broadcast %cst_260 : f32 to vector<8x128xf32>
    %904 = arith.select %9, %902, %903 : vector<8x128xi1>, vector<8x128xf32>
    %c1_i32_261 = arith.constant 1 : i32
    %905 = tpu.dynamic_rotate %904 by %c1_i32_261 dim 1 : vector<8x128xf32>, i32 -> vector<8x128xf32>
    %906 = arith.minimumf %904, %905 : vector<8x128xf32>
    %c2_i32_262 = arith.constant 2 : i32
    %907 = tpu.dynamic_rotate %906 by %c2_i32_262 dim 1 : vector<8x128xf32>, i32 -> vector<8x128xf32>
    %908 = arith.minimumf %906, %907 : vector<8x128xf32>
    %c4_i32_263 = arith.constant 4 : i32
    %909 = tpu.dynamic_rotate %908 by %c4_i32_263 dim 1 : vector<8x128xf32>, i32 -> vector<8x128xf32>
    %910 = arith.minimumf %908, %909 : vector<8x128xf32>
    %911 = arith.addf %910, %5 : vector<8x128xf32>
    %cst_264 = arith.constant 3.000000e+00 : f32
    %912 = arith.mulf %cst_264, %0 : f32
    %913 = vector.broadcast %912 : f32 to vector<8x128xf32>
    %914 = arith.addf %913, %7 : vector<8x128xf32>
    %915 = arith.minimumf %911, %914 : vector<8x128xf32>
    %c3_i32_265 = arith.constant 3 : i32
    %916 = vector.broadcast %c3_i32_265 : i32 to vector<8x1xi32>
    %917 = arith.cmpi eq, %665, %916 : vector<8x1xi32>
    %918 = vector.shape_cast %917 : vector<8x1xi1> to vector<8x1xi1>
    %919 = vector.broadcast %918 : vector<8x1xi1> to vector<8x128xi1>
    %920 = arith.select %919, %915, %844 : vector<8x128xi1>, vector<8x128xf32>
    %921 = vector.extract_strided_slice %664 {offsets = [0, 5], sizes = [8, 1], strides = [1, 1]} : vector<8x128xi32> to vector<8x1xi32>
    %c1_i32_266 = arith.constant 1 : i32
    %922 = vector.broadcast %c1_i32_266 : i32 to vector<8x1xi32>
    %923 = arith.cmpi eq, %921, %922 : vector<8x1xi32>
    %924 = vector.shape_cast %923 : vector<8x1xi1> to vector<8x1xi1>
    %925 = vector.broadcast %924 : vector<8x1xi1> to vector<8x128xi1>
    %926 = arith.select %925, %670, %668 : vector<8x128xi1>, vector<8x128xf32>
    %c2_i32_267 = arith.constant 2 : i32
    %927 = vector.broadcast %c2_i32_267 : i32 to vector<8x1xi32>
    %928 = arith.cmpi eq, %921, %927 : vector<8x1xi32>
    %929 = vector.shape_cast %928 : vector<8x1xi1> to vector<8x1xi1>
    %930 = vector.broadcast %929 : vector<8x1xi1> to vector<8x128xi1>
    %931 = arith.select %930, %672, %926 : vector<8x128xi1>, vector<8x128xf32>
    %c3_i32_268 = arith.constant 3 : i32
    %932 = vector.broadcast %c3_i32_268 : i32 to vector<8x1xi32>
    %933 = arith.cmpi eq, %921, %932 : vector<8x1xi32>
    %934 = vector.shape_cast %933 : vector<8x1xi1> to vector<8x1xi1>
    %935 = vector.broadcast %934 : vector<8x1xi1> to vector<8x128xi1>
    %936 = arith.select %935, %674, %931 : vector<8x128xi1>, vector<8x128xf32>
    %c4_i32_269 = arith.constant 4 : i32
    %937 = vector.broadcast %c4_i32_269 : i32 to vector<8x1xi32>
    %938 = arith.cmpi eq, %921, %937 : vector<8x1xi32>
    %939 = vector.shape_cast %938 : vector<8x1xi1> to vector<8x1xi1>
    %940 = vector.broadcast %939 : vector<8x1xi1> to vector<8x128xi1>
    %941 = arith.select %940, %676, %936 : vector<8x128xi1>, vector<8x128xf32>
    %c5_i32_270 = arith.constant 5 : i32
    %942 = vector.broadcast %c5_i32_270 : i32 to vector<8x1xi32>
    %943 = arith.cmpi eq, %921, %942 : vector<8x1xi32>
    %944 = vector.shape_cast %943 : vector<8x1xi1> to vector<8x1xi1>
    %945 = vector.broadcast %944 : vector<8x1xi1> to vector<8x128xi1>
    %946 = arith.select %945, %678, %941 : vector<8x128xi1>, vector<8x128xf32>
    %c6_i32_271 = arith.constant 6 : i32
    %947 = vector.broadcast %c6_i32_271 : i32 to vector<8x1xi32>
    %948 = arith.cmpi eq, %921, %947 : vector<8x1xi32>
    %949 = vector.shape_cast %948 : vector<8x1xi1> to vector<8x1xi1>
    %950 = vector.broadcast %949 : vector<8x1xi1> to vector<8x128xi1>
    %951 = arith.select %950, %680, %946 : vector<8x128xi1>, vector<8x128xf32>
    %c7_i32_272 = arith.constant 7 : i32
    %952 = vector.broadcast %c7_i32_272 : i32 to vector<8x1xi32>
    %953 = arith.cmpi eq, %921, %952 : vector<8x1xi32>
    %954 = vector.shape_cast %953 : vector<8x1xi1> to vector<8x1xi1>
    %955 = vector.broadcast %954 : vector<8x1xi1> to vector<8x128xi1>
    %956 = arith.select %955, %682, %951 : vector<8x128xi1>, vector<8x128xf32>
    %c8_i32_273 = arith.constant 8 : i32
    %957 = vector.broadcast %c8_i32_273 : i32 to vector<8x1xi32>
    %958 = arith.cmpi eq, %921, %957 : vector<8x1xi32>
    %959 = vector.shape_cast %958 : vector<8x1xi1> to vector<8x1xi1>
    %960 = vector.broadcast %959 : vector<8x1xi1> to vector<8x128xi1>
    %961 = arith.select %960, %684, %956 : vector<8x128xi1>, vector<8x128xf32>
    %c9_i32_274 = arith.constant 9 : i32
    %962 = vector.broadcast %c9_i32_274 : i32 to vector<8x1xi32>
    %963 = arith.cmpi eq, %921, %962 : vector<8x1xi32>
    %964 = vector.shape_cast %963 : vector<8x1xi1> to vector<8x1xi1>
    %965 = vector.broadcast %964 : vector<8x1xi1> to vector<8x128xi1>
    %966 = arith.select %965, %686, %961 : vector<8x128xi1>, vector<8x128xf32>
    %c1_i32_275 = arith.constant 1 : i32
    %967 = tpu.dynamic_rotate %915 by %c1_i32_275 dim 1 : vector<8x128xf32>, i32 -> vector<8x128xf32>
    %c0_i32_276 = arith.constant 0 : i32
    %968 = vector.broadcast %c0_i32_276 : i32 to vector<8x128xi32>
    %969 = arith.cmpi eq, %2, %968 : vector<8x128xi32>
    %cst_277 = arith.constant 4.000000e+00 : f32
    %cst_278 = arith.constant 1.000000e+00 : f32
    %970 = arith.subf %cst_277, %cst_278 : f32
    %971 = arith.mulf %970, %0 : f32
    %972 = vector.broadcast %971 : f32 to vector<8x128xf32>
    %973 = arith.select %969, %972, %967 : vector<8x128xi1>, vector<8x128xf32>
    %974 = arith.addf %973, %966 : vector<8x128xf32>
    %975 = vector.broadcast %0 : f32 to vector<8x128xf32>
    %976 = arith.addf %915, %975 : vector<8x128xf32>
    %977 = arith.minimumf %974, %976 : vector<8x128xf32>
    %978 = arith.subf %977, %5 : vector<8x128xf32>
    %cst_279 = arith.constant 1.000000e+09 : f32
    %979 = vector.broadcast %cst_279 : f32 to vector<8x128xf32>
    %980 = arith.select %9, %978, %979 : vector<8x128xi1>, vector<8x128xf32>
    %c1_i32_280 = arith.constant 1 : i32
    %981 = tpu.dynamic_rotate %980 by %c1_i32_280 dim 1 : vector<8x128xf32>, i32 -> vector<8x128xf32>
    %982 = arith.minimumf %980, %981 : vector<8x128xf32>
    %c2_i32_281 = arith.constant 2 : i32
    %983 = tpu.dynamic_rotate %982 by %c2_i32_281 dim 1 : vector<8x128xf32>, i32 -> vector<8x128xf32>
    %984 = arith.minimumf %982, %983 : vector<8x128xf32>
    %c4_i32_282 = arith.constant 4 : i32
    %985 = tpu.dynamic_rotate %984 by %c4_i32_282 dim 1 : vector<8x128xf32>, i32 -> vector<8x128xf32>
    %986 = arith.minimumf %984, %985 : vector<8x128xf32>
    %987 = arith.addf %986, %5 : vector<8x128xf32>
    %cst_283 = arith.constant 4.000000e+00 : f32
    %988 = arith.mulf %cst_283, %0 : f32
    %989 = vector.broadcast %988 : f32 to vector<8x128xf32>
    %990 = arith.addf %989, %7 : vector<8x128xf32>
    %991 = arith.minimumf %987, %990 : vector<8x128xf32>
    %c4_i32_284 = arith.constant 4 : i32
    %992 = vector.broadcast %c4_i32_284 : i32 to vector<8x1xi32>
    %993 = arith.cmpi eq, %665, %992 : vector<8x1xi32>
    %994 = vector.shape_cast %993 : vector<8x1xi1> to vector<8x1xi1>
    %995 = vector.broadcast %994 : vector<8x1xi1> to vector<8x128xi1>
    %996 = arith.select %995, %991, %920 : vector<8x128xi1>, vector<8x128xf32>
    %997 = vector.extract_strided_slice %664 {offsets = [0, 6], sizes = [8, 1], strides = [1, 1]} : vector<8x128xi32> to vector<8x1xi32>
    %c1_i32_285 = arith.constant 1 : i32
    %998 = vector.broadcast %c1_i32_285 : i32 to vector<8x1xi32>
    %999 = arith.cmpi eq, %997, %998 : vector<8x1xi32>
    %1000 = vector.shape_cast %999 : vector<8x1xi1> to vector<8x1xi1>
    %1001 = vector.broadcast %1000 : vector<8x1xi1> to vector<8x128xi1>
    %1002 = arith.select %1001, %670, %668 : vector<8x128xi1>, vector<8x128xf32>
    %c2_i32_286 = arith.constant 2 : i32
    %1003 = vector.broadcast %c2_i32_286 : i32 to vector<8x1xi32>
    %1004 = arith.cmpi eq, %997, %1003 : vector<8x1xi32>
    %1005 = vector.shape_cast %1004 : vector<8x1xi1> to vector<8x1xi1>
    %1006 = vector.broadcast %1005 : vector<8x1xi1> to vector<8x128xi1>
    %1007 = arith.select %1006, %672, %1002 : vector<8x128xi1>, vector<8x128xf32>
    %c3_i32_287 = arith.constant 3 : i32
    %1008 = vector.broadcast %c3_i32_287 : i32 to vector<8x1xi32>
    %1009 = arith.cmpi eq, %997, %1008 : vector<8x1xi32>
    %1010 = vector.shape_cast %1009 : vector<8x1xi1> to vector<8x1xi1>
    %1011 = vector.broadcast %1010 : vector<8x1xi1> to vector<8x128xi1>
    %1012 = arith.select %1011, %674, %1007 : vector<8x128xi1>, vector<8x128xf32>
    %c4_i32_288 = arith.constant 4 : i32
    %1013 = vector.broadcast %c4_i32_288 : i32 to vector<8x1xi32>
    %1014 = arith.cmpi eq, %997, %1013 : vector<8x1xi32>
    %1015 = vector.shape_cast %1014 : vector<8x1xi1> to vector<8x1xi1>
    %1016 = vector.broadcast %1015 : vector<8x1xi1> to vector<8x128xi1>
    %1017 = arith.select %1016, %676, %1012 : vector<8x128xi1>, vector<8x128xf32>
    %c5_i32_289 = arith.constant 5 : i32
    %1018 = vector.broadcast %c5_i32_289 : i32 to vector<8x1xi32>
    %1019 = arith.cmpi eq, %997, %1018 : vector<8x1xi32>
    %1020 = vector.shape_cast %1019 : vector<8x1xi1> to vector<8x1xi1>
    %1021 = vector.broadcast %1020 : vector<8x1xi1> to vector<8x128xi1>
    %1022 = arith.select %1021, %678, %1017 : vector<8x128xi1>, vector<8x128xf32>
    %c6_i32_290 = arith.constant 6 : i32
    %1023 = vector.broadcast %c6_i32_290 : i32 to vector<8x1xi32>
    %1024 = arith.cmpi eq, %997, %1023 : vector<8x1xi32>
    %1025 = vector.shape_cast %1024 : vector<8x1xi1> to vector<8x1xi1>
    %1026 = vector.broadcast %1025 : vector<8x1xi1> to vector<8x128xi1>
    %1027 = arith.select %1026, %680, %1022 : vector<8x128xi1>, vector<8x128xf32>
    %c7_i32_291 = arith.constant 7 : i32
    %1028 = vector.broadcast %c7_i32_291 : i32 to vector<8x1xi32>
    %1029 = arith.cmpi eq, %997, %1028 : vector<8x1xi32>
    %1030 = vector.shape_cast %1029 : vector<8x1xi1> to vector<8x1xi1>
    %1031 = vector.broadcast %1030 : vector<8x1xi1> to vector<8x128xi1>
    %1032 = arith.select %1031, %682, %1027 : vector<8x128xi1>, vector<8x128xf32>
    %c8_i32_292 = arith.constant 8 : i32
    %1033 = vector.broadcast %c8_i32_292 : i32 to vector<8x1xi32>
    %1034 = arith.cmpi eq, %997, %1033 : vector<8x1xi32>
    %1035 = vector.shape_cast %1034 : vector<8x1xi1> to vector<8x1xi1>
    %1036 = vector.broadcast %1035 : vector<8x1xi1> to vector<8x128xi1>
    %1037 = arith.select %1036, %684, %1032 : vector<8x128xi1>, vector<8x128xf32>
    %c9_i32_293 = arith.constant 9 : i32
    %1038 = vector.broadcast %c9_i32_293 : i32 to vector<8x1xi32>
    %1039 = arith.cmpi eq, %997, %1038 : vector<8x1xi32>
    %1040 = vector.shape_cast %1039 : vector<8x1xi1> to vector<8x1xi1>
    %1041 = vector.broadcast %1040 : vector<8x1xi1> to vector<8x128xi1>
    %1042 = arith.select %1041, %686, %1037 : vector<8x128xi1>, vector<8x128xf32>
    %c1_i32_294 = arith.constant 1 : i32
    %1043 = tpu.dynamic_rotate %991 by %c1_i32_294 dim 1 : vector<8x128xf32>, i32 -> vector<8x128xf32>
    %c0_i32_295 = arith.constant 0 : i32
    %1044 = vector.broadcast %c0_i32_295 : i32 to vector<8x128xi32>
    %1045 = arith.cmpi eq, %2, %1044 : vector<8x128xi32>
    %cst_296 = arith.constant 5.000000e+00 : f32
    %cst_297 = arith.constant 1.000000e+00 : f32
    %1046 = arith.subf %cst_296, %cst_297 : f32
    %1047 = arith.mulf %1046, %0 : f32
    %1048 = vector.broadcast %1047 : f32 to vector<8x128xf32>
    %1049 = arith.select %1045, %1048, %1043 : vector<8x128xi1>, vector<8x128xf32>
    %1050 = arith.addf %1049, %1042 : vector<8x128xf32>
    %1051 = vector.broadcast %0 : f32 to vector<8x128xf32>
    %1052 = arith.addf %991, %1051 : vector<8x128xf32>
    %1053 = arith.minimumf %1050, %1052 : vector<8x128xf32>
    %1054 = arith.subf %1053, %5 : vector<8x128xf32>
    %cst_298 = arith.constant 1.000000e+09 : f32
    %1055 = vector.broadcast %cst_298 : f32 to vector<8x128xf32>
    %1056 = arith.select %9, %1054, %1055 : vector<8x128xi1>, vector<8x128xf32>
    %c1_i32_299 = arith.constant 1 : i32
    %1057 = tpu.dynamic_rotate %1056 by %c1_i32_299 dim 1 : vector<8x128xf32>, i32 -> vector<8x128xf32>
    %1058 = arith.minimumf %1056, %1057 : vector<8x128xf32>
    %c2_i32_300 = arith.constant 2 : i32
    %1059 = tpu.dynamic_rotate %1058 by %c2_i32_300 dim 1 : vector<8x128xf32>, i32 -> vector<8x128xf32>
    %1060 = arith.minimumf %1058, %1059 : vector<8x128xf32>
    %c4_i32_301 = arith.constant 4 : i32
    %1061 = tpu.dynamic_rotate %1060 by %c4_i32_301 dim 1 : vector<8x128xf32>, i32 -> vector<8x128xf32>
    %1062 = arith.minimumf %1060, %1061 : vector<8x128xf32>
    %1063 = arith.addf %1062, %5 : vector<8x128xf32>
    %cst_302 = arith.constant 5.000000e+00 : f32
    %1064 = arith.mulf %cst_302, %0 : f32
    %1065 = vector.broadcast %1064 : f32 to vector<8x128xf32>
    %1066 = arith.addf %1065, %7 : vector<8x128xf32>
    %1067 = arith.minimumf %1063, %1066 : vector<8x128xf32>
    %c5_i32_303 = arith.constant 5 : i32
    %1068 = vector.broadcast %c5_i32_303 : i32 to vector<8x1xi32>
    %1069 = arith.cmpi eq, %665, %1068 : vector<8x1xi32>
    %1070 = vector.shape_cast %1069 : vector<8x1xi1> to vector<8x1xi1>
    %1071 = vector.broadcast %1070 : vector<8x1xi1> to vector<8x128xi1>
    %1072 = arith.select %1071, %1067, %996 : vector<8x128xi1>, vector<8x128xf32>
    %1073 = vector.extract_strided_slice %664 {offsets = [0, 7], sizes = [8, 1], strides = [1, 1]} : vector<8x128xi32> to vector<8x1xi32>
    %c1_i32_304 = arith.constant 1 : i32
    %1074 = vector.broadcast %c1_i32_304 : i32 to vector<8x1xi32>
    %1075 = arith.cmpi eq, %1073, %1074 : vector<8x1xi32>
    %1076 = vector.shape_cast %1075 : vector<8x1xi1> to vector<8x1xi1>
    %1077 = vector.broadcast %1076 : vector<8x1xi1> to vector<8x128xi1>
    %1078 = arith.select %1077, %670, %668 : vector<8x128xi1>, vector<8x128xf32>
    %c2_i32_305 = arith.constant 2 : i32
    %1079 = vector.broadcast %c2_i32_305 : i32 to vector<8x1xi32>
    %1080 = arith.cmpi eq, %1073, %1079 : vector<8x1xi32>
    %1081 = vector.shape_cast %1080 : vector<8x1xi1> to vector<8x1xi1>
    %1082 = vector.broadcast %1081 : vector<8x1xi1> to vector<8x128xi1>
    %1083 = arith.select %1082, %672, %1078 : vector<8x128xi1>, vector<8x128xf32>
    %c3_i32_306 = arith.constant 3 : i32
    %1084 = vector.broadcast %c3_i32_306 : i32 to vector<8x1xi32>
    %1085 = arith.cmpi eq, %1073, %1084 : vector<8x1xi32>
    %1086 = vector.shape_cast %1085 : vector<8x1xi1> to vector<8x1xi1>
    %1087 = vector.broadcast %1086 : vector<8x1xi1> to vector<8x128xi1>
    %1088 = arith.select %1087, %674, %1083 : vector<8x128xi1>, vector<8x128xf32>
    %c4_i32_307 = arith.constant 4 : i32
    %1089 = vector.broadcast %c4_i32_307 : i32 to vector<8x1xi32>
    %1090 = arith.cmpi eq, %1073, %1089 : vector<8x1xi32>
    %1091 = vector.shape_cast %1090 : vector<8x1xi1> to vector<8x1xi1>
    %1092 = vector.broadcast %1091 : vector<8x1xi1> to vector<8x128xi1>
    %1093 = arith.select %1092, %676, %1088 : vector<8x128xi1>, vector<8x128xf32>
    %c5_i32_308 = arith.constant 5 : i32
    %1094 = vector.broadcast %c5_i32_308 : i32 to vector<8x1xi32>
    %1095 = arith.cmpi eq, %1073, %1094 : vector<8x1xi32>
    %1096 = vector.shape_cast %1095 : vector<8x1xi1> to vector<8x1xi1>
    %1097 = vector.broadcast %1096 : vector<8x1xi1> to vector<8x128xi1>
    %1098 = arith.select %1097, %678, %1093 : vector<8x128xi1>, vector<8x128xf32>
    %c6_i32_309 = arith.constant 6 : i32
    %1099 = vector.broadcast %c6_i32_309 : i32 to vector<8x1xi32>
    %1100 = arith.cmpi eq, %1073, %1099 : vector<8x1xi32>
    %1101 = vector.shape_cast %1100 : vector<8x1xi1> to vector<8x1xi1>
    %1102 = vector.broadcast %1101 : vector<8x1xi1> to vector<8x128xi1>
    %1103 = arith.select %1102, %680, %1098 : vector<8x128xi1>, vector<8x128xf32>
    %c7_i32_310 = arith.constant 7 : i32
    %1104 = vector.broadcast %c7_i32_310 : i32 to vector<8x1xi32>
    %1105 = arith.cmpi eq, %1073, %1104 : vector<8x1xi32>
    %1106 = vector.shape_cast %1105 : vector<8x1xi1> to vector<8x1xi1>
    %1107 = vector.broadcast %1106 : vector<8x1xi1> to vector<8x128xi1>
    %1108 = arith.select %1107, %682, %1103 : vector<8x128xi1>, vector<8x128xf32>
    %c8_i32_311 = arith.constant 8 : i32
    %1109 = vector.broadcast %c8_i32_311 : i32 to vector<8x1xi32>
    %1110 = arith.cmpi eq, %1073, %1109 : vector<8x1xi32>
    %1111 = vector.shape_cast %1110 : vector<8x1xi1> to vector<8x1xi1>
    %1112 = vector.broadcast %1111 : vector<8x1xi1> to vector<8x128xi1>
    %1113 = arith.select %1112, %684, %1108 : vector<8x128xi1>, vector<8x128xf32>
    %c9_i32_312 = arith.constant 9 : i32
    %1114 = vector.broadcast %c9_i32_312 : i32 to vector<8x1xi32>
    %1115 = arith.cmpi eq, %1073, %1114 : vector<8x1xi32>
    %1116 = vector.shape_cast %1115 : vector<8x1xi1> to vector<8x1xi1>
    %1117 = vector.broadcast %1116 : vector<8x1xi1> to vector<8x128xi1>
    %1118 = arith.select %1117, %686, %1113 : vector<8x128xi1>, vector<8x128xf32>
    %c1_i32_313 = arith.constant 1 : i32
    %1119 = tpu.dynamic_rotate %1067 by %c1_i32_313 dim 1 : vector<8x128xf32>, i32 -> vector<8x128xf32>
    %c0_i32_314 = arith.constant 0 : i32
    %1120 = vector.broadcast %c0_i32_314 : i32 to vector<8x128xi32>
    %1121 = arith.cmpi eq, %2, %1120 : vector<8x128xi32>
    %cst_315 = arith.constant 6.000000e+00 : f32
    %cst_316 = arith.constant 1.000000e+00 : f32
    %1122 = arith.subf %cst_315, %cst_316 : f32
    %1123 = arith.mulf %1122, %0 : f32
    %1124 = vector.broadcast %1123 : f32 to vector<8x128xf32>
    %1125 = arith.select %1121, %1124, %1119 : vector<8x128xi1>, vector<8x128xf32>
    %1126 = arith.addf %1125, %1118 : vector<8x128xf32>
    %1127 = vector.broadcast %0 : f32 to vector<8x128xf32>
    %1128 = arith.addf %1067, %1127 : vector<8x128xf32>
    %1129 = arith.minimumf %1126, %1128 : vector<8x128xf32>
    %1130 = arith.subf %1129, %5 : vector<8x128xf32>
    %cst_317 = arith.constant 1.000000e+09 : f32
    %1131 = vector.broadcast %cst_317 : f32 to vector<8x128xf32>
    %1132 = arith.select %9, %1130, %1131 : vector<8x128xi1>, vector<8x128xf32>
    %c1_i32_318 = arith.constant 1 : i32
    %1133 = tpu.dynamic_rotate %1132 by %c1_i32_318 dim 1 : vector<8x128xf32>, i32 -> vector<8x128xf32>
    %1134 = arith.minimumf %1132, %1133 : vector<8x128xf32>
    %c2_i32_319 = arith.constant 2 : i32
    %1135 = tpu.dynamic_rotate %1134 by %c2_i32_319 dim 1 : vector<8x128xf32>, i32 -> vector<8x128xf32>
    %1136 = arith.minimumf %1134, %1135 : vector<8x128xf32>
    %c4_i32_320 = arith.constant 4 : i32
    %1137 = tpu.dynamic_rotate %1136 by %c4_i32_320 dim 1 : vector<8x128xf32>, i32 -> vector<8x128xf32>
    %1138 = arith.minimumf %1136, %1137 : vector<8x128xf32>
    %1139 = arith.addf %1138, %5 : vector<8x128xf32>
    %cst_321 = arith.constant 6.000000e+00 : f32
    %1140 = arith.mulf %cst_321, %0 : f32
    %1141 = vector.broadcast %1140 : f32 to vector<8x128xf32>
    %1142 = arith.addf %1141, %7 : vector<8x128xf32>
    %1143 = arith.minimumf %1139, %1142 : vector<8x128xf32>
    %c6_i32_322 = arith.constant 6 : i32
    %1144 = vector.broadcast %c6_i32_322 : i32 to vector<8x1xi32>
    %1145 = arith.cmpi eq, %665, %1144 : vector<8x1xi32>
    %1146 = vector.shape_cast %1145 : vector<8x1xi1> to vector<8x1xi1>
    %1147 = vector.broadcast %1146 : vector<8x1xi1> to vector<8x128xi1>
    %1148 = arith.select %1147, %1143, %1072 : vector<8x128xi1>, vector<8x128xf32>
    %1149 = vector.extract_strided_slice %664 {offsets = [0, 8], sizes = [8, 1], strides = [1, 1]} : vector<8x128xi32> to vector<8x1xi32>
    %c1_i32_323 = arith.constant 1 : i32
    %1150 = vector.broadcast %c1_i32_323 : i32 to vector<8x1xi32>
    %1151 = arith.cmpi eq, %1149, %1150 : vector<8x1xi32>
    %1152 = vector.shape_cast %1151 : vector<8x1xi1> to vector<8x1xi1>
    %1153 = vector.broadcast %1152 : vector<8x1xi1> to vector<8x128xi1>
    %1154 = arith.select %1153, %670, %668 : vector<8x128xi1>, vector<8x128xf32>
    %c2_i32_324 = arith.constant 2 : i32
    %1155 = vector.broadcast %c2_i32_324 : i32 to vector<8x1xi32>
    %1156 = arith.cmpi eq, %1149, %1155 : vector<8x1xi32>
    %1157 = vector.shape_cast %1156 : vector<8x1xi1> to vector<8x1xi1>
    %1158 = vector.broadcast %1157 : vector<8x1xi1> to vector<8x128xi1>
    %1159 = arith.select %1158, %672, %1154 : vector<8x128xi1>, vector<8x128xf32>
    %c3_i32_325 = arith.constant 3 : i32
    %1160 = vector.broadcast %c3_i32_325 : i32 to vector<8x1xi32>
    %1161 = arith.cmpi eq, %1149, %1160 : vector<8x1xi32>
    %1162 = vector.shape_cast %1161 : vector<8x1xi1> to vector<8x1xi1>
    %1163 = vector.broadcast %1162 : vector<8x1xi1> to vector<8x128xi1>
    %1164 = arith.select %1163, %674, %1159 : vector<8x128xi1>, vector<8x128xf32>
    %c4_i32_326 = arith.constant 4 : i32
    %1165 = vector.broadcast %c4_i32_326 : i32 to vector<8x1xi32>
    %1166 = arith.cmpi eq, %1149, %1165 : vector<8x1xi32>
    %1167 = vector.shape_cast %1166 : vector<8x1xi1> to vector<8x1xi1>
    %1168 = vector.broadcast %1167 : vector<8x1xi1> to vector<8x128xi1>
    %1169 = arith.select %1168, %676, %1164 : vector<8x128xi1>, vector<8x128xf32>
    %c5_i32_327 = arith.constant 5 : i32
    %1170 = vector.broadcast %c5_i32_327 : i32 to vector<8x1xi32>
    %1171 = arith.cmpi eq, %1149, %1170 : vector<8x1xi32>
    %1172 = vector.shape_cast %1171 : vector<8x1xi1> to vector<8x1xi1>
    %1173 = vector.broadcast %1172 : vector<8x1xi1> to vector<8x128xi1>
    %1174 = arith.select %1173, %678, %1169 : vector<8x128xi1>, vector<8x128xf32>
    %c6_i32_328 = arith.constant 6 : i32
    %1175 = vector.broadcast %c6_i32_328 : i32 to vector<8x1xi32>
    %1176 = arith.cmpi eq, %1149, %1175 : vector<8x1xi32>
    %1177 = vector.shape_cast %1176 : vector<8x1xi1> to vector<8x1xi1>
    %1178 = vector.broadcast %1177 : vector<8x1xi1> to vector<8x128xi1>
    %1179 = arith.select %1178, %680, %1174 : vector<8x128xi1>, vector<8x128xf32>
    %c7_i32_329 = arith.constant 7 : i32
    %1180 = vector.broadcast %c7_i32_329 : i32 to vector<8x1xi32>
    %1181 = arith.cmpi eq, %1149, %1180 : vector<8x1xi32>
    %1182 = vector.shape_cast %1181 : vector<8x1xi1> to vector<8x1xi1>
    %1183 = vector.broadcast %1182 : vector<8x1xi1> to vector<8x128xi1>
    %1184 = arith.select %1183, %682, %1179 : vector<8x128xi1>, vector<8x128xf32>
    %c8_i32_330 = arith.constant 8 : i32
    %1185 = vector.broadcast %c8_i32_330 : i32 to vector<8x1xi32>
    %1186 = arith.cmpi eq, %1149, %1185 : vector<8x1xi32>
    %1187 = vector.shape_cast %1186 : vector<8x1xi1> to vector<8x1xi1>
    %1188 = vector.broadcast %1187 : vector<8x1xi1> to vector<8x128xi1>
    %1189 = arith.select %1188, %684, %1184 : vector<8x128xi1>, vector<8x128xf32>
    %c9_i32_331 = arith.constant 9 : i32
    %1190 = vector.broadcast %c9_i32_331 : i32 to vector<8x1xi32>
    %1191 = arith.cmpi eq, %1149, %1190 : vector<8x1xi32>
    %1192 = vector.shape_cast %1191 : vector<8x1xi1> to vector<8x1xi1>
    %1193 = vector.broadcast %1192 : vector<8x1xi1> to vector<8x128xi1>
    %1194 = arith.select %1193, %686, %1189 : vector<8x128xi1>, vector<8x128xf32>
    %c1_i32_332 = arith.constant 1 : i32
    %1195 = tpu.dynamic_rotate %1143 by %c1_i32_332 dim 1 : vector<8x128xf32>, i32 -> vector<8x128xf32>
    %c0_i32_333 = arith.constant 0 : i32
    %1196 = vector.broadcast %c0_i32_333 : i32 to vector<8x128xi32>
    %1197 = arith.cmpi eq, %2, %1196 : vector<8x128xi32>
    %cst_334 = arith.constant 7.000000e+00 : f32
    %cst_335 = arith.constant 1.000000e+00 : f32
    %1198 = arith.subf %cst_334, %cst_335 : f32
    %1199 = arith.mulf %1198, %0 : f32
    %1200 = vector.broadcast %1199 : f32 to vector<8x128xf32>
    %1201 = arith.select %1197, %1200, %1195 : vector<8x128xi1>, vector<8x128xf32>
    %1202 = arith.addf %1201, %1194 : vector<8x128xf32>
    %1203 = vector.broadcast %0 : f32 to vector<8x128xf32>
    %1204 = arith.addf %1143, %1203 : vector<8x128xf32>
    %1205 = arith.minimumf %1202, %1204 : vector<8x128xf32>
    %1206 = arith.subf %1205, %5 : vector<8x128xf32>
    %cst_336 = arith.constant 1.000000e+09 : f32
    %1207 = vector.broadcast %cst_336 : f32 to vector<8x128xf32>
    %1208 = arith.select %9, %1206, %1207 : vector<8x128xi1>, vector<8x128xf32>
    %c1_i32_337 = arith.constant 1 : i32
    %1209 = tpu.dynamic_rotate %1208 by %c1_i32_337 dim 1 : vector<8x128xf32>, i32 -> vector<8x128xf32>
    %1210 = arith.minimumf %1208, %1209 : vector<8x128xf32>
    %c2_i32_338 = arith.constant 2 : i32
    %1211 = tpu.dynamic_rotate %1210 by %c2_i32_338 dim 1 : vector<8x128xf32>, i32 -> vector<8x128xf32>
    %1212 = arith.minimumf %1210, %1211 : vector<8x128xf32>
    %c4_i32_339 = arith.constant 4 : i32
    %1213 = tpu.dynamic_rotate %1212 by %c4_i32_339 dim 1 : vector<8x128xf32>, i32 -> vector<8x128xf32>
    %1214 = arith.minimumf %1212, %1213 : vector<8x128xf32>
    %1215 = arith.addf %1214, %5 : vector<8x128xf32>
    %cst_340 = arith.constant 7.000000e+00 : f32
    %1216 = arith.mulf %cst_340, %0 : f32
    %1217 = vector.broadcast %1216 : f32 to vector<8x128xf32>
    %1218 = arith.addf %1217, %7 : vector<8x128xf32>
    %1219 = arith.minimumf %1215, %1218 : vector<8x128xf32>
    %c7_i32_341 = arith.constant 7 : i32
    %1220 = vector.broadcast %c7_i32_341 : i32 to vector<8x1xi32>
    %1221 = arith.cmpi eq, %665, %1220 : vector<8x1xi32>
    %1222 = vector.shape_cast %1221 : vector<8x1xi1> to vector<8x1xi1>
    %1223 = vector.broadcast %1222 : vector<8x1xi1> to vector<8x128xi1>
    %1224 = arith.select %1223, %1219, %1148 : vector<8x128xi1>, vector<8x128xf32>
    %1225 = vector.extract_strided_slice %664 {offsets = [0, 9], sizes = [8, 1], strides = [1, 1]} : vector<8x128xi32> to vector<8x1xi32>
    %c1_i32_342 = arith.constant 1 : i32
    %1226 = vector.broadcast %c1_i32_342 : i32 to vector<8x1xi32>
    %1227 = arith.cmpi eq, %1225, %1226 : vector<8x1xi32>
    %1228 = vector.shape_cast %1227 : vector<8x1xi1> to vector<8x1xi1>
    %1229 = vector.broadcast %1228 : vector<8x1xi1> to vector<8x128xi1>
    %1230 = arith.select %1229, %670, %668 : vector<8x128xi1>, vector<8x128xf32>
    %c2_i32_343 = arith.constant 2 : i32
    %1231 = vector.broadcast %c2_i32_343 : i32 to vector<8x1xi32>
    %1232 = arith.cmpi eq, %1225, %1231 : vector<8x1xi32>
    %1233 = vector.shape_cast %1232 : vector<8x1xi1> to vector<8x1xi1>
    %1234 = vector.broadcast %1233 : vector<8x1xi1> to vector<8x128xi1>
    %1235 = arith.select %1234, %672, %1230 : vector<8x128xi1>, vector<8x128xf32>
    %c3_i32_344 = arith.constant 3 : i32
    %1236 = vector.broadcast %c3_i32_344 : i32 to vector<8x1xi32>
    %1237 = arith.cmpi eq, %1225, %1236 : vector<8x1xi32>
    %1238 = vector.shape_cast %1237 : vector<8x1xi1> to vector<8x1xi1>
    %1239 = vector.broadcast %1238 : vector<8x1xi1> to vector<8x128xi1>
    %1240 = arith.select %1239, %674, %1235 : vector<8x128xi1>, vector<8x128xf32>
    %c4_i32_345 = arith.constant 4 : i32
    %1241 = vector.broadcast %c4_i32_345 : i32 to vector<8x1xi32>
    %1242 = arith.cmpi eq, %1225, %1241 : vector<8x1xi32>
    %1243 = vector.shape_cast %1242 : vector<8x1xi1> to vector<8x1xi1>
    %1244 = vector.broadcast %1243 : vector<8x1xi1> to vector<8x128xi1>
    %1245 = arith.select %1244, %676, %1240 : vector<8x128xi1>, vector<8x128xf32>
    %c5_i32_346 = arith.constant 5 : i32
    %1246 = vector.broadcast %c5_i32_346 : i32 to vector<8x1xi32>
    %1247 = arith.cmpi eq, %1225, %1246 : vector<8x1xi32>
    %1248 = vector.shape_cast %1247 : vector<8x1xi1> to vector<8x1xi1>
    %1249 = vector.broadcast %1248 : vector<8x1xi1> to vector<8x128xi1>
    %1250 = arith.select %1249, %678, %1245 : vector<8x128xi1>, vector<8x128xf32>
    %c6_i32_347 = arith.constant 6 : i32
    %1251 = vector.broadcast %c6_i32_347 : i32 to vector<8x1xi32>
    %1252 = arith.cmpi eq, %1225, %1251 : vector<8x1xi32>
    %1253 = vector.shape_cast %1252 : vector<8x1xi1> to vector<8x1xi1>
    %1254 = vector.broadcast %1253 : vector<8x1xi1> to vector<8x128xi1>
    %1255 = arith.select %1254, %680, %1250 : vector<8x128xi1>, vector<8x128xf32>
    %c7_i32_348 = arith.constant 7 : i32
    %1256 = vector.broadcast %c7_i32_348 : i32 to vector<8x1xi32>
    %1257 = arith.cmpi eq, %1225, %1256 : vector<8x1xi32>
    %1258 = vector.shape_cast %1257 : vector<8x1xi1> to vector<8x1xi1>
    %1259 = vector.broadcast %1258 : vector<8x1xi1> to vector<8x128xi1>
    %1260 = arith.select %1259, %682, %1255 : vector<8x128xi1>, vector<8x128xf32>
    %c8_i32_349 = arith.constant 8 : i32
    %1261 = vector.broadcast %c8_i32_349 : i32 to vector<8x1xi32>
    %1262 = arith.cmpi eq, %1225, %1261 : vector<8x1xi32>
    %1263 = vector.shape_cast %1262 : vector<8x1xi1> to vector<8x1xi1>
    %1264 = vector.broadcast %1263 : vector<8x1xi1> to vector<8x128xi1>
    %1265 = arith.select %1264, %684, %1260 : vector<8x128xi1>, vector<8x128xf32>
    %c9_i32_350 = arith.constant 9 : i32
    %1266 = vector.broadcast %c9_i32_350 : i32 to vector<8x1xi32>
    %1267 = arith.cmpi eq, %1225, %1266 : vector<8x1xi32>
    %1268 = vector.shape_cast %1267 : vector<8x1xi1> to vector<8x1xi1>
    %1269 = vector.broadcast %1268 : vector<8x1xi1> to vector<8x128xi1>
    %1270 = arith.select %1269, %686, %1265 : vector<8x128xi1>, vector<8x128xf32>
    %c1_i32_351 = arith.constant 1 : i32
    %1271 = tpu.dynamic_rotate %1219 by %c1_i32_351 dim 1 : vector<8x128xf32>, i32 -> vector<8x128xf32>
    %c0_i32_352 = arith.constant 0 : i32
    %1272 = vector.broadcast %c0_i32_352 : i32 to vector<8x128xi32>
    %1273 = arith.cmpi eq, %2, %1272 : vector<8x128xi32>
    %cst_353 = arith.constant 8.000000e+00 : f32
    %cst_354 = arith.constant 1.000000e+00 : f32
    %1274 = arith.subf %cst_353, %cst_354 : f32
    %1275 = arith.mulf %1274, %0 : f32
    %1276 = vector.broadcast %1275 : f32 to vector<8x128xf32>
    %1277 = arith.select %1273, %1276, %1271 : vector<8x128xi1>, vector<8x128xf32>
    %1278 = arith.addf %1277, %1270 : vector<8x128xf32>
    %1279 = vector.broadcast %0 : f32 to vector<8x128xf32>
    %1280 = arith.addf %1219, %1279 : vector<8x128xf32>
    %1281 = arith.minimumf %1278, %1280 : vector<8x128xf32>
    %1282 = arith.subf %1281, %5 : vector<8x128xf32>
    %cst_355 = arith.constant 1.000000e+09 : f32
    %1283 = vector.broadcast %cst_355 : f32 to vector<8x128xf32>
    %1284 = arith.select %9, %1282, %1283 : vector<8x128xi1>, vector<8x128xf32>
    %c1_i32_356 = arith.constant 1 : i32
    %1285 = tpu.dynamic_rotate %1284 by %c1_i32_356 dim 1 : vector<8x128xf32>, i32 -> vector<8x128xf32>
    %1286 = arith.minimumf %1284, %1285 : vector<8x128xf32>
    %c2_i32_357 = arith.constant 2 : i32
    %1287 = tpu.dynamic_rotate %1286 by %c2_i32_357 dim 1 : vector<8x128xf32>, i32 -> vector<8x128xf32>
    %1288 = arith.minimumf %1286, %1287 : vector<8x128xf32>
    %c4_i32_358 = arith.constant 4 : i32
    %1289 = tpu.dynamic_rotate %1288 by %c4_i32_358 dim 1 : vector<8x128xf32>, i32 -> vector<8x128xf32>
    %1290 = arith.minimumf %1288, %1289 : vector<8x128xf32>
    %1291 = arith.addf %1290, %5 : vector<8x128xf32>
    %cst_359 = arith.constant 8.000000e+00 : f32
    %1292 = arith.mulf %cst_359, %0 : f32
    %1293 = vector.broadcast %1292 : f32 to vector<8x128xf32>
    %1294 = arith.addf %1293, %7 : vector<8x128xf32>
    %1295 = arith.minimumf %1291, %1294 : vector<8x128xf32>
    %c8_i32_360 = arith.constant 8 : i32
    %1296 = vector.broadcast %c8_i32_360 : i32 to vector<8x1xi32>
    %1297 = arith.cmpi eq, %665, %1296 : vector<8x1xi32>
    %1298 = vector.shape_cast %1297 : vector<8x1xi1> to vector<8x1xi1>
    %1299 = vector.broadcast %1298 : vector<8x1xi1> to vector<8x128xi1>
    %1300 = arith.select %1299, %1295, %1224 : vector<8x128xi1>, vector<8x128xf32>
    %c1_i32_361 = arith.constant 1 : i32
    %1301 = vector.broadcast %c1_i32_361 : i32 to vector<8x1xi32>
    %1302 = arith.subi %666, %1301 : vector<8x1xi32>
    %c0_i32_362 = arith.constant 0 : i32
    %1303 = vector.broadcast %c0_i32_362 : i32 to vector<8x1xi32>
    %1304 = arith.maxsi %1302, %1303 : vector<8x1xi32>
    %1305 = vector.broadcast %1304 : vector<8x1xi32> to vector<8x128xi32>
    %1306 = arith.cmpi eq, %2, %1305 : vector<8x128xi32>
    %cst_363 = arith.constant 0.000000e+00 : f32
    %1307 = vector.broadcast %cst_363 : f32 to vector<8x128xf32>
    %1308 = arith.select %1306, %1300, %1307 : vector<8x128xi1>, vector<8x128xf32>
    %cst_364 = arith.constant dense<0.000000e+00> : vector<8xf32>
    %1309 = vector.multi_reduction <add>, %1308, %cst_364 [1] : vector<8x128xf32> to vector<8xf32>
    %1310 = vector.shape_cast %1309 : vector<8xf32> to vector<8x1xf32>
    %c0_i32_365 = arith.constant 0 : i32
    %1311 = vector.broadcast %c0_i32_365 : i32 to vector<8x1xi32>
    %1312 = arith.cmpi eq, %666, %1311 : vector<8x1xi32>
    %1313 = arith.sitofp %665 : vector<8x1xi32> to vector<8x1xf32>
    %1314 = vector.broadcast %0 : f32 to vector<8x1xf32>
    %1315 = arith.mulf %1313, %1314 : vector<8x1xf32>
    %1316 = arith.select %1312, %1315, %1310 : vector<8x1xi1>, vector<8x1xf32>
    %c8_366 = arith.constant 8 : index
    %c0_367 = arith.constant 0 : index
    %1317 = vector.load %arg4[%c8_366, %c0_367] : memref<24x1xf32, #tpu.memory_space<vmem>>, vector<8x1xf32>
    tpu.vector_store %arg4[%c8_366, %c0_367], %1316 {strides = array<i32>} : memref<24x1xf32, #tpu.memory_space<vmem>>, vector<8x1xf32>,
    %c16 = arith.constant 16 : index
    %c0_368 = arith.constant 0 : index
    %1318 = vector.load %arg2[%c16, %c0_368] : memref<24x128xi32, #tpu.memory_space<vmem>>, vector<8x128xi32>
    %1319 = vector.extract_strided_slice %1318 {offsets = [0, 0], sizes = [8, 1], strides = [1, 1]} : vector<8x128xi32> to vector<8x1xi32>
    %1320 = vector.extract_strided_slice %1318 {offsets = [0, 1], sizes = [8, 1], strides = [1, 1]} : vector<8x128xi32> to vector<8x1xi32>
    %c0_369 = arith.constant 0 : index
    %c16_370 = arith.constant 16 : index
    %c0_371 = arith.constant 0 : index
    %1321 = vector.load %arg3[%c0_369, %c16_370, %c0_371] : memref<10x24x128xf32, #tpu.memory_space<vmem>>, vector<1x8x128xf32>
    %1322 = vector.shape_cast %1321 : vector<1x8x128xf32> to vector<8x128xf32>
    %c1_372 = arith.constant 1 : index
    %c16_373 = arith.constant 16 : index
    %c0_374 = arith.constant 0 : index
    %1323 = vector.load %arg3[%c1_372, %c16_373, %c0_374] : memref<10x24x128xf32, #tpu.memory_space<vmem>>, vector<1x8x128xf32>
    %1324 = vector.shape_cast %1323 : vector<1x8x128xf32> to vector<8x128xf32>
    %c2_375 = arith.constant 2 : index
    %c16_376 = arith.constant 16 : index
    %c0_377 = arith.constant 0 : index
    %1325 = vector.load %arg3[%c2_375, %c16_376, %c0_377] : memref<10x24x128xf32, #tpu.memory_space<vmem>>, vector<1x8x128xf32>
    %1326 = vector.shape_cast %1325 : vector<1x8x128xf32> to vector<8x128xf32>
    %c3_378 = arith.constant 3 : index
    %c16_379 = arith.constant 16 : index
    %c0_380 = arith.constant 0 : index
    %1327 = vector.load %arg3[%c3_378, %c16_379, %c0_380] : memref<10x24x128xf32, #tpu.memory_space<vmem>>, vector<1x8x128xf32>
    %1328 = vector.shape_cast %1327 : vector<1x8x128xf32> to vector<8x128xf32>
    %c4_381 = arith.constant 4 : index
    %c16_382 = arith.constant 16 : index
    %c0_383 = arith.constant 0 : index
    %1329 = vector.load %arg3[%c4_381, %c16_382, %c0_383] : memref<10x24x128xf32, #tpu.memory_space<vmem>>, vector<1x8x128xf32>
    %1330 = vector.shape_cast %1329 : vector<1x8x128xf32> to vector<8x128xf32>
    %c5_384 = arith.constant 5 : index
    %c16_385 = arith.constant 16 : index
    %c0_386 = arith.constant 0 : index
    %1331 = vector.load %arg3[%c5_384, %c16_385, %c0_386] : memref<10x24x128xf32, #tpu.memory_space<vmem>>, vector<1x8x128xf32>
    %1332 = vector.shape_cast %1331 : vector<1x8x128xf32> to vector<8x128xf32>
    %c6_387 = arith.constant 6 : index
    %c16_388 = arith.constant 16 : index
    %c0_389 = arith.constant 0 : index
    %1333 = vector.load %arg3[%c6_387, %c16_388, %c0_389] : memref<10x24x128xf32, #tpu.memory_space<vmem>>, vector<1x8x128xf32>
    %1334 = vector.shape_cast %1333 : vector<1x8x128xf32> to vector<8x128xf32>
    %c7_390 = arith.constant 7 : index
    %c16_391 = arith.constant 16 : index
    %c0_392 = arith.constant 0 : index
    %1335 = vector.load %arg3[%c7_390, %c16_391, %c0_392] : memref<10x24x128xf32, #tpu.memory_space<vmem>>, vector<1x8x128xf32>
    %1336 = vector.shape_cast %1335 : vector<1x8x128xf32> to vector<8x128xf32>
    %c8_393 = arith.constant 8 : index
    %c16_394 = arith.constant 16 : index
    %c0_395 = arith.constant 0 : index
    %1337 = vector.load %arg3[%c8_393, %c16_394, %c0_395] : memref<10x24x128xf32, #tpu.memory_space<vmem>>, vector<1x8x128xf32>
    %1338 = vector.shape_cast %1337 : vector<1x8x128xf32> to vector<8x128xf32>
    %c9_396 = arith.constant 9 : index
    %c16_397 = arith.constant 16 : index
    %c0_398 = arith.constant 0 : index
    %1339 = vector.load %arg3[%c9_396, %c16_397, %c0_398] : memref<10x24x128xf32, #tpu.memory_space<vmem>>, vector<1x8x128xf32>
    %1340 = vector.shape_cast %1339 : vector<1x8x128xf32> to vector<8x128xf32>
    %c0_i32_399 = arith.constant 0 : i32
    %1341 = vector.broadcast %c0_i32_399 : i32 to vector<8x1xi32>
    %1342 = arith.cmpi eq, %1319, %1341 : vector<8x1xi32>
    %cst_400 = arith.constant 0.000000e+00 : f32
    %1343 = vector.shape_cast %1342 : vector<8x1xi1> to vector<8x1xi1>
    %1344 = vector.broadcast %1343 : vector<8x1xi1> to vector<8x128xi1>
    %1345 = vector.broadcast %cst_400 : f32 to vector<8x128xf32>
    %1346 = arith.select %1344, %7, %1345 : vector<8x128xi1>, vector<8x128xf32>
    %1347 = vector.extract_strided_slice %1318 {offsets = [0, 2], sizes = [8, 1], strides = [1, 1]} : vector<8x128xi32> to vector<8x1xi32>
    %c1_i32_401 = arith.constant 1 : i32
    %1348 = vector.broadcast %c1_i32_401 : i32 to vector<8x1xi32>
    %1349 = arith.cmpi eq, %1347, %1348 : vector<8x1xi32>
    %1350 = vector.shape_cast %1349 : vector<8x1xi1> to vector<8x1xi1>
    %1351 = vector.broadcast %1350 : vector<8x1xi1> to vector<8x128xi1>
    %1352 = arith.select %1351, %1324, %1322 : vector<8x128xi1>, vector<8x128xf32>
    %c2_i32_402 = arith.constant 2 : i32
    %1353 = vector.broadcast %c2_i32_402 : i32 to vector<8x1xi32>
    %1354 = arith.cmpi eq, %1347, %1353 : vector<8x1xi32>
    %1355 = vector.shape_cast %1354 : vector<8x1xi1> to vector<8x1xi1>
    %1356 = vector.broadcast %1355 : vector<8x1xi1> to vector<8x128xi1>
    %1357 = arith.select %1356, %1326, %1352 : vector<8x128xi1>, vector<8x128xf32>
    %c3_i32_403 = arith.constant 3 : i32
    %1358 = vector.broadcast %c3_i32_403 : i32 to vector<8x1xi32>
    %1359 = arith.cmpi eq, %1347, %1358 : vector<8x1xi32>
    %1360 = vector.shape_cast %1359 : vector<8x1xi1> to vector<8x1xi1>
    %1361 = vector.broadcast %1360 : vector<8x1xi1> to vector<8x128xi1>
    %1362 = arith.select %1361, %1328, %1357 : vector<8x128xi1>, vector<8x128xf32>
    %c4_i32_404 = arith.constant 4 : i32
    %1363 = vector.broadcast %c4_i32_404 : i32 to vector<8x1xi32>
    %1364 = arith.cmpi eq, %1347, %1363 : vector<8x1xi32>
    %1365 = vector.shape_cast %1364 : vector<8x1xi1> to vector<8x1xi1>
    %1366 = vector.broadcast %1365 : vector<8x1xi1> to vector<8x128xi1>
    %1367 = arith.select %1366, %1330, %1362 : vector<8x128xi1>, vector<8x128xf32>
    %c5_i32_405 = arith.constant 5 : i32
    %1368 = vector.broadcast %c5_i32_405 : i32 to vector<8x1xi32>
    %1369 = arith.cmpi eq, %1347, %1368 : vector<8x1xi32>
    %1370 = vector.shape_cast %1369 : vector<8x1xi1> to vector<8x1xi1>
    %1371 = vector.broadcast %1370 : vector<8x1xi1> to vector<8x128xi1>
    %1372 = arith.select %1371, %1332, %1367 : vector<8x128xi1>, vector<8x128xf32>
    %c6_i32_406 = arith.constant 6 : i32
    %1373 = vector.broadcast %c6_i32_406 : i32 to vector<8x1xi32>
    %1374 = arith.cmpi eq, %1347, %1373 : vector<8x1xi32>
    %1375 = vector.shape_cast %1374 : vector<8x1xi1> to vector<8x1xi1>
    %1376 = vector.broadcast %1375 : vector<8x1xi1> to vector<8x128xi1>
    %1377 = arith.select %1376, %1334, %1372 : vector<8x128xi1>, vector<8x128xf32>
    %c7_i32_407 = arith.constant 7 : i32
    %1378 = vector.broadcast %c7_i32_407 : i32 to vector<8x1xi32>
    %1379 = arith.cmpi eq, %1347, %1378 : vector<8x1xi32>
    %1380 = vector.shape_cast %1379 : vector<8x1xi1> to vector<8x1xi1>
    %1381 = vector.broadcast %1380 : vector<8x1xi1> to vector<8x128xi1>
    %1382 = arith.select %1381, %1336, %1377 : vector<8x128xi1>, vector<8x128xf32>
    %c8_i32_408 = arith.constant 8 : i32
    %1383 = vector.broadcast %c8_i32_408 : i32 to vector<8x1xi32>
    %1384 = arith.cmpi eq, %1347, %1383 : vector<8x1xi32>
    %1385 = vector.shape_cast %1384 : vector<8x1xi1> to vector<8x1xi1>
    %1386 = vector.broadcast %1385 : vector<8x1xi1> to vector<8x128xi1>
    %1387 = arith.select %1386, %1338, %1382 : vector<8x128xi1>, vector<8x128xf32>
    %c9_i32_409 = arith.constant 9 : i32
    %1388 = vector.broadcast %c9_i32_409 : i32 to vector<8x1xi32>
    %1389 = arith.cmpi eq, %1347, %1388 : vector<8x1xi32>
    %1390 = vector.shape_cast %1389 : vector<8x1xi1> to vector<8x1xi1>
    %1391 = vector.broadcast %1390 : vector<8x1xi1> to vector<8x128xi1>
    %1392 = arith.select %1391, %1340, %1387 : vector<8x128xi1>, vector<8x128xf32>
    %c1_i32_410 = arith.constant 1 : i32
    %1393 = tpu.dynamic_rotate %7 by %c1_i32_410 dim 1 : vector<8x128xf32>, i32 -> vector<8x128xf32>
    %c0_i32_411 = arith.constant 0 : i32
    %1394 = vector.broadcast %c0_i32_411 : i32 to vector<8x128xi32>
    %1395 = arith.cmpi eq, %2, %1394 : vector<8x128xi32>
    %cst_412 = arith.constant 1.000000e+00 : f32
    %cst_413 = arith.constant 1.000000e+00 : f32
    %1396 = arith.subf %cst_412, %cst_413 : f32
    %1397 = arith.mulf %1396, %0 : f32
    %1398 = vector.broadcast %1397 : f32 to vector<8x128xf32>
    %1399 = arith.select %1395, %1398, %1393 : vector<8x128xi1>, vector<8x128xf32>
    %1400 = arith.addf %1399, %1392 : vector<8x128xf32>
    %1401 = vector.broadcast %0 : f32 to vector<8x128xf32>
    %1402 = arith.addf %7, %1401 : vector<8x128xf32>
    %1403 = arith.minimumf %1400, %1402 : vector<8x128xf32>
    %1404 = arith.subf %1403, %5 : vector<8x128xf32>
    %cst_414 = arith.constant 1.000000e+09 : f32
    %1405 = vector.broadcast %cst_414 : f32 to vector<8x128xf32>
    %1406 = arith.select %9, %1404, %1405 : vector<8x128xi1>, vector<8x128xf32>
    %c1_i32_415 = arith.constant 1 : i32
    %1407 = tpu.dynamic_rotate %1406 by %c1_i32_415 dim 1 : vector<8x128xf32>, i32 -> vector<8x128xf32>
    %1408 = arith.minimumf %1406, %1407 : vector<8x128xf32>
    %c2_i32_416 = arith.constant 2 : i32
    %1409 = tpu.dynamic_rotate %1408 by %c2_i32_416 dim 1 : vector<8x128xf32>, i32 -> vector<8x128xf32>
    %1410 = arith.minimumf %1408, %1409 : vector<8x128xf32>
    %c4_i32_417 = arith.constant 4 : i32
    %1411 = tpu.dynamic_rotate %1410 by %c4_i32_417 dim 1 : vector<8x128xf32>, i32 -> vector<8x128xf32>
    %1412 = arith.minimumf %1410, %1411 : vector<8x128xf32>
    %1413 = arith.addf %1412, %5 : vector<8x128xf32>
    %cst_418 = arith.constant 1.000000e+00 : f32
    %1414 = arith.mulf %cst_418, %0 : f32
    %1415 = vector.broadcast %1414 : f32 to vector<8x128xf32>
    %1416 = arith.addf %1415, %7 : vector<8x128xf32>
    %1417 = arith.minimumf %1413, %1416 : vector<8x128xf32>
    %c1_i32_419 = arith.constant 1 : i32
    %1418 = vector.broadcast %c1_i32_419 : i32 to vector<8x1xi32>
    %1419 = arith.cmpi eq, %1319, %1418 : vector<8x1xi32>
    %1420 = vector.shape_cast %1419 : vector<8x1xi1> to vector<8x1xi1>
    %1421 = vector.broadcast %1420 : vector<8x1xi1> to vector<8x128xi1>
    %1422 = arith.select %1421, %1417, %1346 : vector<8x128xi1>, vector<8x128xf32>
    %1423 = vector.extract_strided_slice %1318 {offsets = [0, 3], sizes = [8, 1], strides = [1, 1]} : vector<8x128xi32> to vector<8x1xi32>
    %c1_i32_420 = arith.constant 1 : i32
    %1424 = vector.broadcast %c1_i32_420 : i32 to vector<8x1xi32>
    %1425 = arith.cmpi eq, %1423, %1424 : vector<8x1xi32>
    %1426 = vector.shape_cast %1425 : vector<8x1xi1> to vector<8x1xi1>
    %1427 = vector.broadcast %1426 : vector<8x1xi1> to vector<8x128xi1>
    %1428 = arith.select %1427, %1324, %1322 : vector<8x128xi1>, vector<8x128xf32>
    %c2_i32_421 = arith.constant 2 : i32
    %1429 = vector.broadcast %c2_i32_421 : i32 to vector<8x1xi32>
    %1430 = arith.cmpi eq, %1423, %1429 : vector<8x1xi32>
    %1431 = vector.shape_cast %1430 : vector<8x1xi1> to vector<8x1xi1>
    %1432 = vector.broadcast %1431 : vector<8x1xi1> to vector<8x128xi1>
    %1433 = arith.select %1432, %1326, %1428 : vector<8x128xi1>, vector<8x128xf32>
    %c3_i32_422 = arith.constant 3 : i32
    %1434 = vector.broadcast %c3_i32_422 : i32 to vector<8x1xi32>
    %1435 = arith.cmpi eq, %1423, %1434 : vector<8x1xi32>
    %1436 = vector.shape_cast %1435 : vector<8x1xi1> to vector<8x1xi1>
    %1437 = vector.broadcast %1436 : vector<8x1xi1> to vector<8x128xi1>
    %1438 = arith.select %1437, %1328, %1433 : vector<8x128xi1>, vector<8x128xf32>
    %c4_i32_423 = arith.constant 4 : i32
    %1439 = vector.broadcast %c4_i32_423 : i32 to vector<8x1xi32>
    %1440 = arith.cmpi eq, %1423, %1439 : vector<8x1xi32>
    %1441 = vector.shape_cast %1440 : vector<8x1xi1> to vector<8x1xi1>
    %1442 = vector.broadcast %1441 : vector<8x1xi1> to vector<8x128xi1>
    %1443 = arith.select %1442, %1330, %1438 : vector<8x128xi1>, vector<8x128xf32>
    %c5_i32_424 = arith.constant 5 : i32
    %1444 = vector.broadcast %c5_i32_424 : i32 to vector<8x1xi32>
    %1445 = arith.cmpi eq, %1423, %1444 : vector<8x1xi32>
    %1446 = vector.shape_cast %1445 : vector<8x1xi1> to vector<8x1xi1>
    %1447 = vector.broadcast %1446 : vector<8x1xi1> to vector<8x128xi1>
    %1448 = arith.select %1447, %1332, %1443 : vector<8x128xi1>, vector<8x128xf32>
    %c6_i32_425 = arith.constant 6 : i32
    %1449 = vector.broadcast %c6_i32_425 : i32 to vector<8x1xi32>
    %1450 = arith.cmpi eq, %1423, %1449 : vector<8x1xi32>
    %1451 = vector.shape_cast %1450 : vector<8x1xi1> to vector<8x1xi1>
    %1452 = vector.broadcast %1451 : vector<8x1xi1> to vector<8x128xi1>
    %1453 = arith.select %1452, %1334, %1448 : vector<8x128xi1>, vector<8x128xf32>
    %c7_i32_426 = arith.constant 7 : i32
    %1454 = vector.broadcast %c7_i32_426 : i32 to vector<8x1xi32>
    %1455 = arith.cmpi eq, %1423, %1454 : vector<8x1xi32>
    %1456 = vector.shape_cast %1455 : vector<8x1xi1> to vector<8x1xi1>
    %1457 = vector.broadcast %1456 : vector<8x1xi1> to vector<8x128xi1>
    %1458 = arith.select %1457, %1336, %1453 : vector<8x128xi1>, vector<8x128xf32>
    %c8_i32_427 = arith.constant 8 : i32
    %1459 = vector.broadcast %c8_i32_427 : i32 to vector<8x1xi32>
    %1460 = arith.cmpi eq, %1423, %1459 : vector<8x1xi32>
    %1461 = vector.shape_cast %1460 : vector<8x1xi1> to vector<8x1xi1>
    %1462 = vector.broadcast %1461 : vector<8x1xi1> to vector<8x128xi1>
    %1463 = arith.select %1462, %1338, %1458 : vector<8x128xi1>, vector<8x128xf32>
    %c9_i32_428 = arith.constant 9 : i32
    %1464 = vector.broadcast %c9_i32_428 : i32 to vector<8x1xi32>
    %1465 = arith.cmpi eq, %1423, %1464 : vector<8x1xi32>
    %1466 = vector.shape_cast %1465 : vector<8x1xi1> to vector<8x1xi1>
    %1467 = vector.broadcast %1466 : vector<8x1xi1> to vector<8x128xi1>
    %1468 = arith.select %1467, %1340, %1463 : vector<8x128xi1>, vector<8x128xf32>
    %c1_i32_429 = arith.constant 1 : i32
    %1469 = tpu.dynamic_rotate %1417 by %c1_i32_429 dim 1 : vector<8x128xf32>, i32 -> vector<8x128xf32>
    %c0_i32_430 = arith.constant 0 : i32
    %1470 = vector.broadcast %c0_i32_430 : i32 to vector<8x128xi32>
    %1471 = arith.cmpi eq, %2, %1470 : vector<8x128xi32>
    %cst_431 = arith.constant 2.000000e+00 : f32
    %cst_432 = arith.constant 1.000000e+00 : f32
    %1472 = arith.subf %cst_431, %cst_432 : f32
    %1473 = arith.mulf %1472, %0 : f32
    %1474 = vector.broadcast %1473 : f32 to vector<8x128xf32>
    %1475 = arith.select %1471, %1474, %1469 : vector<8x128xi1>, vector<8x128xf32>
    %1476 = arith.addf %1475, %1468 : vector<8x128xf32>
    %1477 = vector.broadcast %0 : f32 to vector<8x128xf32>
    %1478 = arith.addf %1417, %1477 : vector<8x128xf32>
    %1479 = arith.minimumf %1476, %1478 : vector<8x128xf32>
    %1480 = arith.subf %1479, %5 : vector<8x128xf32>
    %cst_433 = arith.constant 1.000000e+09 : f32
    %1481 = vector.broadcast %cst_433 : f32 to vector<8x128xf32>
    %1482 = arith.select %9, %1480, %1481 : vector<8x128xi1>, vector<8x128xf32>
    %c1_i32_434 = arith.constant 1 : i32
    %1483 = tpu.dynamic_rotate %1482 by %c1_i32_434 dim 1 : vector<8x128xf32>, i32 -> vector<8x128xf32>
    %1484 = arith.minimumf %1482, %1483 : vector<8x128xf32>
    %c2_i32_435 = arith.constant 2 : i32
    %1485 = tpu.dynamic_rotate %1484 by %c2_i32_435 dim 1 : vector<8x128xf32>, i32 -> vector<8x128xf32>
    %1486 = arith.minimumf %1484, %1485 : vector<8x128xf32>
    %c4_i32_436 = arith.constant 4 : i32
    %1487 = tpu.dynamic_rotate %1486 by %c4_i32_436 dim 1 : vector<8x128xf32>, i32 -> vector<8x128xf32>
    %1488 = arith.minimumf %1486, %1487 : vector<8x128xf32>
    %1489 = arith.addf %1488, %5 : vector<8x128xf32>
    %cst_437 = arith.constant 2.000000e+00 : f32
    %1490 = arith.mulf %cst_437, %0 : f32
    %1491 = vector.broadcast %1490 : f32 to vector<8x128xf32>
    %1492 = arith.addf %1491, %7 : vector<8x128xf32>
    %1493 = arith.minimumf %1489, %1492 : vector<8x128xf32>
    %c2_i32_438 = arith.constant 2 : i32
    %1494 = vector.broadcast %c2_i32_438 : i32 to vector<8x1xi32>
    %1495 = arith.cmpi eq, %1319, %1494 : vector<8x1xi32>
    %1496 = vector.shape_cast %1495 : vector<8x1xi1> to vector<8x1xi1>
    %1497 = vector.broadcast %1496 : vector<8x1xi1> to vector<8x128xi1>
    %1498 = arith.select %1497, %1493, %1422 : vector<8x128xi1>, vector<8x128xf32>
    %1499 = vector.extract_strided_slice %1318 {offsets = [0, 4], sizes = [8, 1], strides = [1, 1]} : vector<8x128xi32> to vector<8x1xi32>
    %c1_i32_439 = arith.constant 1 : i32
    %1500 = vector.broadcast %c1_i32_439 : i32 to vector<8x1xi32>
    %1501 = arith.cmpi eq, %1499, %1500 : vector<8x1xi32>
    %1502 = vector.shape_cast %1501 : vector<8x1xi1> to vector<8x1xi1>
    %1503 = vector.broadcast %1502 : vector<8x1xi1> to vector<8x128xi1>
    %1504 = arith.select %1503, %1324, %1322 : vector<8x128xi1>, vector<8x128xf32>
    %c2_i32_440 = arith.constant 2 : i32
    %1505 = vector.broadcast %c2_i32_440 : i32 to vector<8x1xi32>
    %1506 = arith.cmpi eq, %1499, %1505 : vector<8x1xi32>
    %1507 = vector.shape_cast %1506 : vector<8x1xi1> to vector<8x1xi1>
    %1508 = vector.broadcast %1507 : vector<8x1xi1> to vector<8x128xi1>
    %1509 = arith.select %1508, %1326, %1504 : vector<8x128xi1>, vector<8x128xf32>
    %c3_i32_441 = arith.constant 3 : i32
    %1510 = vector.broadcast %c3_i32_441 : i32 to vector<8x1xi32>
    %1511 = arith.cmpi eq, %1499, %1510 : vector<8x1xi32>
    %1512 = vector.shape_cast %1511 : vector<8x1xi1> to vector<8x1xi1>
    %1513 = vector.broadcast %1512 : vector<8x1xi1> to vector<8x128xi1>
    %1514 = arith.select %1513, %1328, %1509 : vector<8x128xi1>, vector<8x128xf32>
    %c4_i32_442 = arith.constant 4 : i32
    %1515 = vector.broadcast %c4_i32_442 : i32 to vector<8x1xi32>
    %1516 = arith.cmpi eq, %1499, %1515 : vector<8x1xi32>
    %1517 = vector.shape_cast %1516 : vector<8x1xi1> to vector<8x1xi1>
    %1518 = vector.broadcast %1517 : vector<8x1xi1> to vector<8x128xi1>
    %1519 = arith.select %1518, %1330, %1514 : vector<8x128xi1>, vector<8x128xf32>
    %c5_i32_443 = arith.constant 5 : i32
    %1520 = vector.broadcast %c5_i32_443 : i32 to vector<8x1xi32>
    %1521 = arith.cmpi eq, %1499, %1520 : vector<8x1xi32>
    %1522 = vector.shape_cast %1521 : vector<8x1xi1> to vector<8x1xi1>
    %1523 = vector.broadcast %1522 : vector<8x1xi1> to vector<8x128xi1>
    %1524 = arith.select %1523, %1332, %1519 : vector<8x128xi1>, vector<8x128xf32>
    %c6_i32_444 = arith.constant 6 : i32
    %1525 = vector.broadcast %c6_i32_444 : i32 to vector<8x1xi32>
    %1526 = arith.cmpi eq, %1499, %1525 : vector<8x1xi32>
    %1527 = vector.shape_cast %1526 : vector<8x1xi1> to vector<8x1xi1>
    %1528 = vector.broadcast %1527 : vector<8x1xi1> to vector<8x128xi1>
    %1529 = arith.select %1528, %1334, %1524 : vector<8x128xi1>, vector<8x128xf32>
    %c7_i32_445 = arith.constant 7 : i32
    %1530 = vector.broadcast %c7_i32_445 : i32 to vector<8x1xi32>
    %1531 = arith.cmpi eq, %1499, %1530 : vector<8x1xi32>
    %1532 = vector.shape_cast %1531 : vector<8x1xi1> to vector<8x1xi1>
    %1533 = vector.broadcast %1532 : vector<8x1xi1> to vector<8x128xi1>
    %1534 = arith.select %1533, %1336, %1529 : vector<8x128xi1>, vector<8x128xf32>
    %c8_i32_446 = arith.constant 8 : i32
    %1535 = vector.broadcast %c8_i32_446 : i32 to vector<8x1xi32>
    %1536 = arith.cmpi eq, %1499, %1535 : vector<8x1xi32>
    %1537 = vector.shape_cast %1536 : vector<8x1xi1> to vector<8x1xi1>
    %1538 = vector.broadcast %1537 : vector<8x1xi1> to vector<8x128xi1>
    %1539 = arith.select %1538, %1338, %1534 : vector<8x128xi1>, vector<8x128xf32>
    %c9_i32_447 = arith.constant 9 : i32
    %1540 = vector.broadcast %c9_i32_447 : i32 to vector<8x1xi32>
    %1541 = arith.cmpi eq, %1499, %1540 : vector<8x1xi32>
    %1542 = vector.shape_cast %1541 : vector<8x1xi1> to vector<8x1xi1>
    %1543 = vector.broadcast %1542 : vector<8x1xi1> to vector<8x128xi1>
    %1544 = arith.select %1543, %1340, %1539 : vector<8x128xi1>, vector<8x128xf32>
    %c1_i32_448 = arith.constant 1 : i32
    %1545 = tpu.dynamic_rotate %1493 by %c1_i32_448 dim 1 : vector<8x128xf32>, i32 -> vector<8x128xf32>
    %c0_i32_449 = arith.constant 0 : i32
    %1546 = vector.broadcast %c0_i32_449 : i32 to vector<8x128xi32>
    %1547 = arith.cmpi eq, %2, %1546 : vector<8x128xi32>
    %cst_450 = arith.constant 3.000000e+00 : f32
    %cst_451 = arith.constant 1.000000e+00 : f32
    %1548 = arith.subf %cst_450, %cst_451 : f32
    %1549 = arith.mulf %1548, %0 : f32
    %1550 = vector.broadcast %1549 : f32 to vector<8x128xf32>
    %1551 = arith.select %1547, %1550, %1545 : vector<8x128xi1>, vector<8x128xf32>
    %1552 = arith.addf %1551, %1544 : vector<8x128xf32>
    %1553 = vector.broadcast %0 : f32 to vector<8x128xf32>
    %1554 = arith.addf %1493, %1553 : vector<8x128xf32>
    %1555 = arith.minimumf %1552, %1554 : vector<8x128xf32>
    %1556 = arith.subf %1555, %5 : vector<8x128xf32>
    %cst_452 = arith.constant 1.000000e+09 : f32
    %1557 = vector.broadcast %cst_452 : f32 to vector<8x128xf32>
    %1558 = arith.select %9, %1556, %1557 : vector<8x128xi1>, vector<8x128xf32>
    %c1_i32_453 = arith.constant 1 : i32
    %1559 = tpu.dynamic_rotate %1558 by %c1_i32_453 dim 1 : vector<8x128xf32>, i32 -> vector<8x128xf32>
    %1560 = arith.minimumf %1558, %1559 : vector<8x128xf32>
    %c2_i32_454 = arith.constant 2 : i32
    %1561 = tpu.dynamic_rotate %1560 by %c2_i32_454 dim 1 : vector<8x128xf32>, i32 -> vector<8x128xf32>
    %1562 = arith.minimumf %1560, %1561 : vector<8x128xf32>
    %c4_i32_455 = arith.constant 4 : i32
    %1563 = tpu.dynamic_rotate %1562 by %c4_i32_455 dim 1 : vector<8x128xf32>, i32 -> vector<8x128xf32>
    %1564 = arith.minimumf %1562, %1563 : vector<8x128xf32>
    %1565 = arith.addf %1564, %5 : vector<8x128xf32>
    %cst_456 = arith.constant 3.000000e+00 : f32
    %1566 = arith.mulf %cst_456, %0 : f32
    %1567 = vector.broadcast %1566 : f32 to vector<8x128xf32>
    %1568 = arith.addf %1567, %7 : vector<8x128xf32>
    %1569 = arith.minimumf %1565, %1568 : vector<8x128xf32>
    %c3_i32_457 = arith.constant 3 : i32
    %1570 = vector.broadcast %c3_i32_457 : i32 to vector<8x1xi32>
    %1571 = arith.cmpi eq, %1319, %1570 : vector<8x1xi32>
    %1572 = vector.shape_cast %1571 : vector<8x1xi1> to vector<8x1xi1>
    %1573 = vector.broadcast %1572 : vector<8x1xi1> to vector<8x128xi1>
    %1574 = arith.select %1573, %1569, %1498 : vector<8x128xi1>, vector<8x128xf32>
    %1575 = vector.extract_strided_slice %1318 {offsets = [0, 5], sizes = [8, 1], strides = [1, 1]} : vector<8x128xi32> to vector<8x1xi32>
    %c1_i32_458 = arith.constant 1 : i32
    %1576 = vector.broadcast %c1_i32_458 : i32 to vector<8x1xi32>
    %1577 = arith.cmpi eq, %1575, %1576 : vector<8x1xi32>
    %1578 = vector.shape_cast %1577 : vector<8x1xi1> to vector<8x1xi1>
    %1579 = vector.broadcast %1578 : vector<8x1xi1> to vector<8x128xi1>
    %1580 = arith.select %1579, %1324, %1322 : vector<8x128xi1>, vector<8x128xf32>
    %c2_i32_459 = arith.constant 2 : i32
    %1581 = vector.broadcast %c2_i32_459 : i32 to vector<8x1xi32>
    %1582 = arith.cmpi eq, %1575, %1581 : vector<8x1xi32>
    %1583 = vector.shape_cast %1582 : vector<8x1xi1> to vector<8x1xi1>
    %1584 = vector.broadcast %1583 : vector<8x1xi1> to vector<8x128xi1>
    %1585 = arith.select %1584, %1326, %1580 : vector<8x128xi1>, vector<8x128xf32>
    %c3_i32_460 = arith.constant 3 : i32
    %1586 = vector.broadcast %c3_i32_460 : i32 to vector<8x1xi32>
    %1587 = arith.cmpi eq, %1575, %1586 : vector<8x1xi32>
    %1588 = vector.shape_cast %1587 : vector<8x1xi1> to vector<8x1xi1>
    %1589 = vector.broadcast %1588 : vector<8x1xi1> to vector<8x128xi1>
    %1590 = arith.select %1589, %1328, %1585 : vector<8x128xi1>, vector<8x128xf32>
    %c4_i32_461 = arith.constant 4 : i32
    %1591 = vector.broadcast %c4_i32_461 : i32 to vector<8x1xi32>
    %1592 = arith.cmpi eq, %1575, %1591 : vector<8x1xi32>
    %1593 = vector.shape_cast %1592 : vector<8x1xi1> to vector<8x1xi1>
    %1594 = vector.broadcast %1593 : vector<8x1xi1> to vector<8x128xi1>
    %1595 = arith.select %1594, %1330, %1590 : vector<8x128xi1>, vector<8x128xf32>
    %c5_i32_462 = arith.constant 5 : i32
    %1596 = vector.broadcast %c5_i32_462 : i32 to vector<8x1xi32>
    %1597 = arith.cmpi eq, %1575, %1596 : vector<8x1xi32>
    %1598 = vector.shape_cast %1597 : vector<8x1xi1> to vector<8x1xi1>
    %1599 = vector.broadcast %1598 : vector<8x1xi1> to vector<8x128xi1>
    %1600 = arith.select %1599, %1332, %1595 : vector<8x128xi1>, vector<8x128xf32>
    %c6_i32_463 = arith.constant 6 : i32
    %1601 = vector.broadcast %c6_i32_463 : i32 to vector<8x1xi32>
    %1602 = arith.cmpi eq, %1575, %1601 : vector<8x1xi32>
    %1603 = vector.shape_cast %1602 : vector<8x1xi1> to vector<8x1xi1>
    %1604 = vector.broadcast %1603 : vector<8x1xi1> to vector<8x128xi1>
    %1605 = arith.select %1604, %1334, %1600 : vector<8x128xi1>, vector<8x128xf32>
    %c7_i32_464 = arith.constant 7 : i32
    %1606 = vector.broadcast %c7_i32_464 : i32 to vector<8x1xi32>
    %1607 = arith.cmpi eq, %1575, %1606 : vector<8x1xi32>
    %1608 = vector.shape_cast %1607 : vector<8x1xi1> to vector<8x1xi1>
    %1609 = vector.broadcast %1608 : vector<8x1xi1> to vector<8x128xi1>
    %1610 = arith.select %1609, %1336, %1605 : vector<8x128xi1>, vector<8x128xf32>
    %c8_i32_465 = arith.constant 8 : i32
    %1611 = vector.broadcast %c8_i32_465 : i32 to vector<8x1xi32>
    %1612 = arith.cmpi eq, %1575, %1611 : vector<8x1xi32>
    %1613 = vector.shape_cast %1612 : vector<8x1xi1> to vector<8x1xi1>
    %1614 = vector.broadcast %1613 : vector<8x1xi1> to vector<8x128xi1>
    %1615 = arith.select %1614, %1338, %1610 : vector<8x128xi1>, vector<8x128xf32>
    %c9_i32_466 = arith.constant 9 : i32
    %1616 = vector.broadcast %c9_i32_466 : i32 to vector<8x1xi32>
    %1617 = arith.cmpi eq, %1575, %1616 : vector<8x1xi32>
    %1618 = vector.shape_cast %1617 : vector<8x1xi1> to vector<8x1xi1>
    %1619 = vector.broadcast %1618 : vector<8x1xi1> to vector<8x128xi1>
    %1620 = arith.select %1619, %1340, %1615 : vector<8x128xi1>, vector<8x128xf32>
    %c1_i32_467 = arith.constant 1 : i32
    %1621 = tpu.dynamic_rotate %1569 by %c1_i32_467 dim 1 : vector<8x128xf32>, i32 -> vector<8x128xf32>
    %c0_i32_468 = arith.constant 0 : i32
    %1622 = vector.broadcast %c0_i32_468 : i32 to vector<8x128xi32>
    %1623 = arith.cmpi eq, %2, %1622 : vector<8x128xi32>
    %cst_469 = arith.constant 4.000000e+00 : f32
    %cst_470 = arith.constant 1.000000e+00 : f32
    %1624 = arith.subf %cst_469, %cst_470 : f32
    %1625 = arith.mulf %1624, %0 : f32
    %1626 = vector.broadcast %1625 : f32 to vector<8x128xf32>
    %1627 = arith.select %1623, %1626, %1621 : vector<8x128xi1>, vector<8x128xf32>
    %1628 = arith.addf %1627, %1620 : vector<8x128xf32>
    %1629 = vector.broadcast %0 : f32 to vector<8x128xf32>
    %1630 = arith.addf %1569, %1629 : vector<8x128xf32>
    %1631 = arith.minimumf %1628, %1630 : vector<8x128xf32>
    %1632 = arith.subf %1631, %5 : vector<8x128xf32>
    %cst_471 = arith.constant 1.000000e+09 : f32
    %1633 = vector.broadcast %cst_471 : f32 to vector<8x128xf32>
    %1634 = arith.select %9, %1632, %1633 : vector<8x128xi1>, vector<8x128xf32>
    %c1_i32_472 = arith.constant 1 : i32
    %1635 = tpu.dynamic_rotate %1634 by %c1_i32_472 dim 1 : vector<8x128xf32>, i32 -> vector<8x128xf32>
    %1636 = arith.minimumf %1634, %1635 : vector<8x128xf32>
    %c2_i32_473 = arith.constant 2 : i32
    %1637 = tpu.dynamic_rotate %1636 by %c2_i32_473 dim 1 : vector<8x128xf32>, i32 -> vector<8x128xf32>
    %1638 = arith.minimumf %1636, %1637 : vector<8x128xf32>
    %c4_i32_474 = arith.constant 4 : i32
    %1639 = tpu.dynamic_rotate %1638 by %c4_i32_474 dim 1 : vector<8x128xf32>, i32 -> vector<8x128xf32>
    %1640 = arith.minimumf %1638, %1639 : vector<8x128xf32>
    %1641 = arith.addf %1640, %5 : vector<8x128xf32>
    %cst_475 = arith.constant 4.000000e+00 : f32
    %1642 = arith.mulf %cst_475, %0 : f32
    %1643 = vector.broadcast %1642 : f32 to vector<8x128xf32>
    %1644 = arith.addf %1643, %7 : vector<8x128xf32>
    %1645 = arith.minimumf %1641, %1644 : vector<8x128xf32>
    %c4_i32_476 = arith.constant 4 : i32
    %1646 = vector.broadcast %c4_i32_476 : i32 to vector<8x1xi32>
    %1647 = arith.cmpi eq, %1319, %1646 : vector<8x1xi32>
    %1648 = vector.shape_cast %1647 : vector<8x1xi1> to vector<8x1xi1>
    %1649 = vector.broadcast %1648 : vector<8x1xi1> to vector<8x128xi1>
    %1650 = arith.select %1649, %1645, %1574 : vector<8x128xi1>, vector<8x128xf32>
    %1651 = vector.extract_strided_slice %1318 {offsets = [0, 6], sizes = [8, 1], strides = [1, 1]} : vector<8x128xi32> to vector<8x1xi32>
    %c1_i32_477 = arith.constant 1 : i32
    %1652 = vector.broadcast %c1_i32_477 : i32 to vector<8x1xi32>
    %1653 = arith.cmpi eq, %1651, %1652 : vector<8x1xi32>
    %1654 = vector.shape_cast %1653 : vector<8x1xi1> to vector<8x1xi1>
    %1655 = vector.broadcast %1654 : vector<8x1xi1> to vector<8x128xi1>
    %1656 = arith.select %1655, %1324, %1322 : vector<8x128xi1>, vector<8x128xf32>
    %c2_i32_478 = arith.constant 2 : i32
    %1657 = vector.broadcast %c2_i32_478 : i32 to vector<8x1xi32>
    %1658 = arith.cmpi eq, %1651, %1657 : vector<8x1xi32>
    %1659 = vector.shape_cast %1658 : vector<8x1xi1> to vector<8x1xi1>
    %1660 = vector.broadcast %1659 : vector<8x1xi1> to vector<8x128xi1>
    %1661 = arith.select %1660, %1326, %1656 : vector<8x128xi1>, vector<8x128xf32>
    %c3_i32_479 = arith.constant 3 : i32
    %1662 = vector.broadcast %c3_i32_479 : i32 to vector<8x1xi32>
    %1663 = arith.cmpi eq, %1651, %1662 : vector<8x1xi32>
    %1664 = vector.shape_cast %1663 : vector<8x1xi1> to vector<8x1xi1>
    %1665 = vector.broadcast %1664 : vector<8x1xi1> to vector<8x128xi1>
    %1666 = arith.select %1665, %1328, %1661 : vector<8x128xi1>, vector<8x128xf32>
    %c4_i32_480 = arith.constant 4 : i32
    %1667 = vector.broadcast %c4_i32_480 : i32 to vector<8x1xi32>
    %1668 = arith.cmpi eq, %1651, %1667 : vector<8x1xi32>
    %1669 = vector.shape_cast %1668 : vector<8x1xi1> to vector<8x1xi1>
    %1670 = vector.broadcast %1669 : vector<8x1xi1> to vector<8x128xi1>
    %1671 = arith.select %1670, %1330, %1666 : vector<8x128xi1>, vector<8x128xf32>
    %c5_i32_481 = arith.constant 5 : i32
    %1672 = vector.broadcast %c5_i32_481 : i32 to vector<8x1xi32>
    %1673 = arith.cmpi eq, %1651, %1672 : vector<8x1xi32>
    %1674 = vector.shape_cast %1673 : vector<8x1xi1> to vector<8x1xi1>
    %1675 = vector.broadcast %1674 : vector<8x1xi1> to vector<8x128xi1>
    %1676 = arith.select %1675, %1332, %1671 : vector<8x128xi1>, vector<8x128xf32>
    %c6_i32_482 = arith.constant 6 : i32
    %1677 = vector.broadcast %c6_i32_482 : i32 to vector<8x1xi32>
    %1678 = arith.cmpi eq, %1651, %1677 : vector<8x1xi32>
    %1679 = vector.shape_cast %1678 : vector<8x1xi1> to vector<8x1xi1>
    %1680 = vector.broadcast %1679 : vector<8x1xi1> to vector<8x128xi1>
    %1681 = arith.select %1680, %1334, %1676 : vector<8x128xi1>, vector<8x128xf32>
    %c7_i32_483 = arith.constant 7 : i32
    %1682 = vector.broadcast %c7_i32_483 : i32 to vector<8x1xi32>
    %1683 = arith.cmpi eq, %1651, %1682 : vector<8x1xi32>
    %1684 = vector.shape_cast %1683 : vector<8x1xi1> to vector<8x1xi1>
    %1685 = vector.broadcast %1684 : vector<8x1xi1> to vector<8x128xi1>
    %1686 = arith.select %1685, %1336, %1681 : vector<8x128xi1>, vector<8x128xf32>
    %c8_i32_484 = arith.constant 8 : i32
    %1687 = vector.broadcast %c8_i32_484 : i32 to vector<8x1xi32>
    %1688 = arith.cmpi eq, %1651, %1687 : vector<8x1xi32>
    %1689 = vector.shape_cast %1688 : vector<8x1xi1> to vector<8x1xi1>
    %1690 = vector.broadcast %1689 : vector<8x1xi1> to vector<8x128xi1>
    %1691 = arith.select %1690, %1338, %1686 : vector<8x128xi1>, vector<8x128xf32>
    %c9_i32_485 = arith.constant 9 : i32
    %1692 = vector.broadcast %c9_i32_485 : i32 to vector<8x1xi32>
    %1693 = arith.cmpi eq, %1651, %1692 : vector<8x1xi32>
    %1694 = vector.shape_cast %1693 : vector<8x1xi1> to vector<8x1xi1>
    %1695 = vector.broadcast %1694 : vector<8x1xi1> to vector<8x128xi1>
    %1696 = arith.select %1695, %1340, %1691 : vector<8x128xi1>, vector<8x128xf32>
    %c1_i32_486 = arith.constant 1 : i32
    %1697 = tpu.dynamic_rotate %1645 by %c1_i32_486 dim 1 : vector<8x128xf32>, i32 -> vector<8x128xf32>
    %c0_i32_487 = arith.constant 0 : i32
    %1698 = vector.broadcast %c0_i32_487 : i32 to vector<8x128xi32>
    %1699 = arith.cmpi eq, %2, %1698 : vector<8x128xi32>
    %cst_488 = arith.constant 5.000000e+00 : f32
    %cst_489 = arith.constant 1.000000e+00 : f32
    %1700 = arith.subf %cst_488, %cst_489 : f32
    %1701 = arith.mulf %1700, %0 : f32
    %1702 = vector.broadcast %1701 : f32 to vector<8x128xf32>
    %1703 = arith.select %1699, %1702, %1697 : vector<8x128xi1>, vector<8x128xf32>
    %1704 = arith.addf %1703, %1696 : vector<8x128xf32>
    %1705 = vector.broadcast %0 : f32 to vector<8x128xf32>
    %1706 = arith.addf %1645, %1705 : vector<8x128xf32>
    %1707 = arith.minimumf %1704, %1706 : vector<8x128xf32>
    %1708 = arith.subf %1707, %5 : vector<8x128xf32>
    %cst_490 = arith.constant 1.000000e+09 : f32
    %1709 = vector.broadcast %cst_490 : f32 to vector<8x128xf32>
    %1710 = arith.select %9, %1708, %1709 : vector<8x128xi1>, vector<8x128xf32>
    %c1_i32_491 = arith.constant 1 : i32
    %1711 = tpu.dynamic_rotate %1710 by %c1_i32_491 dim 1 : vector<8x128xf32>, i32 -> vector<8x128xf32>
    %1712 = arith.minimumf %1710, %1711 : vector<8x128xf32>
    %c2_i32_492 = arith.constant 2 : i32
    %1713 = tpu.dynamic_rotate %1712 by %c2_i32_492 dim 1 : vector<8x128xf32>, i32 -> vector<8x128xf32>
    %1714 = arith.minimumf %1712, %1713 : vector<8x128xf32>
    %c4_i32_493 = arith.constant 4 : i32
    %1715 = tpu.dynamic_rotate %1714 by %c4_i32_493 dim 1 : vector<8x128xf32>, i32 -> vector<8x128xf32>
    %1716 = arith.minimumf %1714, %1715 : vector<8x128xf32>
    %1717 = arith.addf %1716, %5 : vector<8x128xf32>
    %cst_494 = arith.constant 5.000000e+00 : f32
    %1718 = arith.mulf %cst_494, %0 : f32
    %1719 = vector.broadcast %1718 : f32 to vector<8x128xf32>
    %1720 = arith.addf %1719, %7 : vector<8x128xf32>
    %1721 = arith.minimumf %1717, %1720 : vector<8x128xf32>
    %c5_i32_495 = arith.constant 5 : i32
    %1722 = vector.broadcast %c5_i32_495 : i32 to vector<8x1xi32>
    %1723 = arith.cmpi eq, %1319, %1722 : vector<8x1xi32>
    %1724 = vector.shape_cast %1723 : vector<8x1xi1> to vector<8x1xi1>
    %1725 = vector.broadcast %1724 : vector<8x1xi1> to vector<8x128xi1>
    %1726 = arith.select %1725, %1721, %1650 : vector<8x128xi1>, vector<8x128xf32>
    %1727 = vector.extract_strided_slice %1318 {offsets = [0, 7], sizes = [8, 1], strides = [1, 1]} : vector<8x128xi32> to vector<8x1xi32>
    %c1_i32_496 = arith.constant 1 : i32
    %1728 = vector.broadcast %c1_i32_496 : i32 to vector<8x1xi32>
    %1729 = arith.cmpi eq, %1727, %1728 : vector<8x1xi32>
    %1730 = vector.shape_cast %1729 : vector<8x1xi1> to vector<8x1xi1>
    %1731 = vector.broadcast %1730 : vector<8x1xi1> to vector<8x128xi1>
    %1732 = arith.select %1731, %1324, %1322 : vector<8x128xi1>, vector<8x128xf32>
    %c2_i32_497 = arith.constant 2 : i32
    %1733 = vector.broadcast %c2_i32_497 : i32 to vector<8x1xi32>
    %1734 = arith.cmpi eq, %1727, %1733 : vector<8x1xi32>
    %1735 = vector.shape_cast %1734 : vector<8x1xi1> to vector<8x1xi1>
    %1736 = vector.broadcast %1735 : vector<8x1xi1> to vector<8x128xi1>
    %1737 = arith.select %1736, %1326, %1732 : vector<8x128xi1>, vector<8x128xf32>
    %c3_i32_498 = arith.constant 3 : i32
    %1738 = vector.broadcast %c3_i32_498 : i32 to vector<8x1xi32>
    %1739 = arith.cmpi eq, %1727, %1738 : vector<8x1xi32>
    %1740 = vector.shape_cast %1739 : vector<8x1xi1> to vector<8x1xi1>
    %1741 = vector.broadcast %1740 : vector<8x1xi1> to vector<8x128xi1>
    %1742 = arith.select %1741, %1328, %1737 : vector<8x128xi1>, vector<8x128xf32>
    %c4_i32_499 = arith.constant 4 : i32
    %1743 = vector.broadcast %c4_i32_499 : i32 to vector<8x1xi32>
    %1744 = arith.cmpi eq, %1727, %1743 : vector<8x1xi32>
    %1745 = vector.shape_cast %1744 : vector<8x1xi1> to vector<8x1xi1>
    %1746 = vector.broadcast %1745 : vector<8x1xi1> to vector<8x128xi1>
    %1747 = arith.select %1746, %1330, %1742 : vector<8x128xi1>, vector<8x128xf32>
    %c5_i32_500 = arith.constant 5 : i32
    %1748 = vector.broadcast %c5_i32_500 : i32 to vector<8x1xi32>
    %1749 = arith.cmpi eq, %1727, %1748 : vector<8x1xi32>
    %1750 = vector.shape_cast %1749 : vector<8x1xi1> to vector<8x1xi1>
    %1751 = vector.broadcast %1750 : vector<8x1xi1> to vector<8x128xi1>
    %1752 = arith.select %1751, %1332, %1747 : vector<8x128xi1>, vector<8x128xf32>
    %c6_i32_501 = arith.constant 6 : i32
    %1753 = vector.broadcast %c6_i32_501 : i32 to vector<8x1xi32>
    %1754 = arith.cmpi eq, %1727, %1753 : vector<8x1xi32>
    %1755 = vector.shape_cast %1754 : vector<8x1xi1> to vector<8x1xi1>
    %1756 = vector.broadcast %1755 : vector<8x1xi1> to vector<8x128xi1>
    %1757 = arith.select %1756, %1334, %1752 : vector<8x128xi1>, vector<8x128xf32>
    %c7_i32_502 = arith.constant 7 : i32
    %1758 = vector.broadcast %c7_i32_502 : i32 to vector<8x1xi32>
    %1759 = arith.cmpi eq, %1727, %1758 : vector<8x1xi32>
    %1760 = vector.shape_cast %1759 : vector<8x1xi1> to vector<8x1xi1>
    %1761 = vector.broadcast %1760 : vector<8x1xi1> to vector<8x128xi1>
    %1762 = arith.select %1761, %1336, %1757 : vector<8x128xi1>, vector<8x128xf32>
    %c8_i32_503 = arith.constant 8 : i32
    %1763 = vector.broadcast %c8_i32_503 : i32 to vector<8x1xi32>
    %1764 = arith.cmpi eq, %1727, %1763 : vector<8x1xi32>
    %1765 = vector.shape_cast %1764 : vector<8x1xi1> to vector<8x1xi1>
    %1766 = vector.broadcast %1765 : vector<8x1xi1> to vector<8x128xi1>
    %1767 = arith.select %1766, %1338, %1762 : vector<8x128xi1>, vector<8x128xf32>
    %c9_i32_504 = arith.constant 9 : i32
    %1768 = vector.broadcast %c9_i32_504 : i32 to vector<8x1xi32>
    %1769 = arith.cmpi eq, %1727, %1768 : vector<8x1xi32>
    %1770 = vector.shape_cast %1769 : vector<8x1xi1> to vector<8x1xi1>
    %1771 = vector.broadcast %1770 : vector<8x1xi1> to vector<8x128xi1>
    %1772 = arith.select %1771, %1340, %1767 : vector<8x128xi1>, vector<8x128xf32>
    %c1_i32_505 = arith.constant 1 : i32
    %1773 = tpu.dynamic_rotate %1721 by %c1_i32_505 dim 1 : vector<8x128xf32>, i32 -> vector<8x128xf32>
    %c0_i32_506 = arith.constant 0 : i32
    %1774 = vector.broadcast %c0_i32_506 : i32 to vector<8x128xi32>
    %1775 = arith.cmpi eq, %2, %1774 : vector<8x128xi32>
    %cst_507 = arith.constant 6.000000e+00 : f32
    %cst_508 = arith.constant 1.000000e+00 : f32
    %1776 = arith.subf %cst_507, %cst_508 : f32
    %1777 = arith.mulf %1776, %0 : f32
    %1778 = vector.broadcast %1777 : f32 to vector<8x128xf32>
    %1779 = arith.select %1775, %1778, %1773 : vector<8x128xi1>, vector<8x128xf32>
    %1780 = arith.addf %1779, %1772 : vector<8x128xf32>
    %1781 = vector.broadcast %0 : f32 to vector<8x128xf32>
    %1782 = arith.addf %1721, %1781 : vector<8x128xf32>
    %1783 = arith.minimumf %1780, %1782 : vector<8x128xf32>
    %1784 = arith.subf %1783, %5 : vector<8x128xf32>
    %cst_509 = arith.constant 1.000000e+09 : f32
    %1785 = vector.broadcast %cst_509 : f32 to vector<8x128xf32>
    %1786 = arith.select %9, %1784, %1785 : vector<8x128xi1>, vector<8x128xf32>
    %c1_i32_510 = arith.constant 1 : i32
    %1787 = tpu.dynamic_rotate %1786 by %c1_i32_510 dim 1 : vector<8x128xf32>, i32 -> vector<8x128xf32>
    %1788 = arith.minimumf %1786, %1787 : vector<8x128xf32>
    %c2_i32_511 = arith.constant 2 : i32
    %1789 = tpu.dynamic_rotate %1788 by %c2_i32_511 dim 1 : vector<8x128xf32>, i32 -> vector<8x128xf32>
    %1790 = arith.minimumf %1788, %1789 : vector<8x128xf32>
    %c4_i32_512 = arith.constant 4 : i32
    %1791 = tpu.dynamic_rotate %1790 by %c4_i32_512 dim 1 : vector<8x128xf32>, i32 -> vector<8x128xf32>
    %1792 = arith.minimumf %1790, %1791 : vector<8x128xf32>
    %1793 = arith.addf %1792, %5 : vector<8x128xf32>
    %cst_513 = arith.constant 6.000000e+00 : f32
    %1794 = arith.mulf %cst_513, %0 : f32
    %1795 = vector.broadcast %1794 : f32 to vector<8x128xf32>
    %1796 = arith.addf %1795, %7 : vector<8x128xf32>
    %1797 = arith.minimumf %1793, %1796 : vector<8x128xf32>
    %c6_i32_514 = arith.constant 6 : i32
    %1798 = vector.broadcast %c6_i32_514 : i32 to vector<8x1xi32>
    %1799 = arith.cmpi eq, %1319, %1798 : vector<8x1xi32>
    %1800 = vector.shape_cast %1799 : vector<8x1xi1> to vector<8x1xi1>
    %1801 = vector.broadcast %1800 : vector<8x1xi1> to vector<8x128xi1>
    %1802 = arith.select %1801, %1797, %1726 : vector<8x128xi1>, vector<8x128xf32>
    %1803 = vector.extract_strided_slice %1318 {offsets = [0, 8], sizes = [8, 1], strides = [1, 1]} : vector<8x128xi32> to vector<8x1xi32>
    %c1_i32_515 = arith.constant 1 : i32
    %1804 = vector.broadcast %c1_i32_515 : i32 to vector<8x1xi32>
    %1805 = arith.cmpi eq, %1803, %1804 : vector<8x1xi32>
    %1806 = vector.shape_cast %1805 : vector<8x1xi1> to vector<8x1xi1>
    %1807 = vector.broadcast %1806 : vector<8x1xi1> to vector<8x128xi1>
    %1808 = arith.select %1807, %1324, %1322 : vector<8x128xi1>, vector<8x128xf32>
    %c2_i32_516 = arith.constant 2 : i32
    %1809 = vector.broadcast %c2_i32_516 : i32 to vector<8x1xi32>
    %1810 = arith.cmpi eq, %1803, %1809 : vector<8x1xi32>
    %1811 = vector.shape_cast %1810 : vector<8x1xi1> to vector<8x1xi1>
    %1812 = vector.broadcast %1811 : vector<8x1xi1> to vector<8x128xi1>
    %1813 = arith.select %1812, %1326, %1808 : vector<8x128xi1>, vector<8x128xf32>
    %c3_i32_517 = arith.constant 3 : i32
    %1814 = vector.broadcast %c3_i32_517 : i32 to vector<8x1xi32>
    %1815 = arith.cmpi eq, %1803, %1814 : vector<8x1xi32>
    %1816 = vector.shape_cast %1815 : vector<8x1xi1> to vector<8x1xi1>
    %1817 = vector.broadcast %1816 : vector<8x1xi1> to vector<8x128xi1>
    %1818 = arith.select %1817, %1328, %1813 : vector<8x128xi1>, vector<8x128xf32>
    %c4_i32_518 = arith.constant 4 : i32
    %1819 = vector.broadcast %c4_i32_518 : i32 to vector<8x1xi32>
    %1820 = arith.cmpi eq, %1803, %1819 : vector<8x1xi32>
    %1821 = vector.shape_cast %1820 : vector<8x1xi1> to vector<8x1xi1>
    %1822 = vector.broadcast %1821 : vector<8x1xi1> to vector<8x128xi1>
    %1823 = arith.select %1822, %1330, %1818 : vector<8x128xi1>, vector<8x128xf32>
    %c5_i32_519 = arith.constant 5 : i32
    %1824 = vector.broadcast %c5_i32_519 : i32 to vector<8x1xi32>
    %1825 = arith.cmpi eq, %1803, %1824 : vector<8x1xi32>
    %1826 = vector.shape_cast %1825 : vector<8x1xi1> to vector<8x1xi1>
    %1827 = vector.broadcast %1826 : vector<8x1xi1> to vector<8x128xi1>
    %1828 = arith.select %1827, %1332, %1823 : vector<8x128xi1>, vector<8x128xf32>
    %c6_i32_520 = arith.constant 6 : i32
    %1829 = vector.broadcast %c6_i32_520 : i32 to vector<8x1xi32>
    %1830 = arith.cmpi eq, %1803, %1829 : vector<8x1xi32>
    %1831 = vector.shape_cast %1830 : vector<8x1xi1> to vector<8x1xi1>
    %1832 = vector.broadcast %1831 : vector<8x1xi1> to vector<8x128xi1>
    %1833 = arith.select %1832, %1334, %1828 : vector<8x128xi1>, vector<8x128xf32>
    %c7_i32_521 = arith.constant 7 : i32
    %1834 = vector.broadcast %c7_i32_521 : i32 to vector<8x1xi32>
    %1835 = arith.cmpi eq, %1803, %1834 : vector<8x1xi32>
    %1836 = vector.shape_cast %1835 : vector<8x1xi1> to vector<8x1xi1>
    %1837 = vector.broadcast %1836 : vector<8x1xi1> to vector<8x128xi1>
    %1838 = arith.select %1837, %1336, %1833 : vector<8x128xi1>, vector<8x128xf32>
    %c8_i32_522 = arith.constant 8 : i32
    %1839 = vector.broadcast %c8_i32_522 : i32 to vector<8x1xi32>
    %1840 = arith.cmpi eq, %1803, %1839 : vector<8x1xi32>
    %1841 = vector.shape_cast %1840 : vector<8x1xi1> to vector<8x1xi1>
    %1842 = vector.broadcast %1841 : vector<8x1xi1> to vector<8x128xi1>
    %1843 = arith.select %1842, %1338, %1838 : vector<8x128xi1>, vector<8x128xf32>
    %c9_i32_523 = arith.constant 9 : i32
    %1844 = vector.broadcast %c9_i32_523 : i32 to vector<8x1xi32>
    %1845 = arith.cmpi eq, %1803, %1844 : vector<8x1xi32>
    %1846 = vector.shape_cast %1845 : vector<8x1xi1> to vector<8x1xi1>
    %1847 = vector.broadcast %1846 : vector<8x1xi1> to vector<8x128xi1>
    %1848 = arith.select %1847, %1340, %1843 : vector<8x128xi1>, vector<8x128xf32>
    %c1_i32_524 = arith.constant 1 : i32
    %1849 = tpu.dynamic_rotate %1797 by %c1_i32_524 dim 1 : vector<8x128xf32>, i32 -> vector<8x128xf32>
    %c0_i32_525 = arith.constant 0 : i32
    %1850 = vector.broadcast %c0_i32_525 : i32 to vector<8x128xi32>
    %1851 = arith.cmpi eq, %2, %1850 : vector<8x128xi32>
    %cst_526 = arith.constant 7.000000e+00 : f32
    %cst_527 = arith.constant 1.000000e+00 : f32
    %1852 = arith.subf %cst_526, %cst_527 : f32
    %1853 = arith.mulf %1852, %0 : f32
    %1854 = vector.broadcast %1853 : f32 to vector<8x128xf32>
    %1855 = arith.select %1851, %1854, %1849 : vector<8x128xi1>, vector<8x128xf32>
    %1856 = arith.addf %1855, %1848 : vector<8x128xf32>
    %1857 = vector.broadcast %0 : f32 to vector<8x128xf32>
    %1858 = arith.addf %1797, %1857 : vector<8x128xf32>
    %1859 = arith.minimumf %1856, %1858 : vector<8x128xf32>
    %1860 = arith.subf %1859, %5 : vector<8x128xf32>
    %cst_528 = arith.constant 1.000000e+09 : f32
    %1861 = vector.broadcast %cst_528 : f32 to vector<8x128xf32>
    %1862 = arith.select %9, %1860, %1861 : vector<8x128xi1>, vector<8x128xf32>
    %c1_i32_529 = arith.constant 1 : i32
    %1863 = tpu.dynamic_rotate %1862 by %c1_i32_529 dim 1 : vector<8x128xf32>, i32 -> vector<8x128xf32>
    %1864 = arith.minimumf %1862, %1863 : vector<8x128xf32>
    %c2_i32_530 = arith.constant 2 : i32
    %1865 = tpu.dynamic_rotate %1864 by %c2_i32_530 dim 1 : vector<8x128xf32>, i32 -> vector<8x128xf32>
    %1866 = arith.minimumf %1864, %1865 : vector<8x128xf32>
    %c4_i32_531 = arith.constant 4 : i32
    %1867 = tpu.dynamic_rotate %1866 by %c4_i32_531 dim 1 : vector<8x128xf32>, i32 -> vector<8x128xf32>
    %1868 = arith.minimumf %1866, %1867 : vector<8x128xf32>
    %1869 = arith.addf %1868, %5 : vector<8x128xf32>
    %cst_532 = arith.constant 7.000000e+00 : f32
    %1870 = arith.mulf %cst_532, %0 : f32
    %1871 = vector.broadcast %1870 : f32 to vector<8x128xf32>
    %1872 = arith.addf %1871, %7 : vector<8x128xf32>
    %1873 = arith.minimumf %1869, %1872 : vector<8x128xf32>
    %c7_i32_533 = arith.constant 7 : i32
    %1874 = vector.broadcast %c7_i32_533 : i32 to vector<8x1xi32>
    %1875 = arith.cmpi eq, %1319, %1874 : vector<8x1xi32>
    %1876 = vector.shape_cast %1875 : vector<8x1xi1> to vector<8x1xi1>
    %1877 = vector.broadcast %1876 : vector<8x1xi1> to vector<8x128xi1>
    %1878 = arith.select %1877, %1873, %1802 : vector<8x128xi1>, vector<8x128xf32>
    %1879 = vector.extract_strided_slice %1318 {offsets = [0, 9], sizes = [8, 1], strides = [1, 1]} : vector<8x128xi32> to vector<8x1xi32>
    %c1_i32_534 = arith.constant 1 : i32
    %1880 = vector.broadcast %c1_i32_534 : i32 to vector<8x1xi32>
    %1881 = arith.cmpi eq, %1879, %1880 : vector<8x1xi32>
    %1882 = vector.shape_cast %1881 : vector<8x1xi1> to vector<8x1xi1>
    %1883 = vector.broadcast %1882 : vector<8x1xi1> to vector<8x128xi1>
    %1884 = arith.select %1883, %1324, %1322 : vector<8x128xi1>, vector<8x128xf32>
    %c2_i32_535 = arith.constant 2 : i32
    %1885 = vector.broadcast %c2_i32_535 : i32 to vector<8x1xi32>
    %1886 = arith.cmpi eq, %1879, %1885 : vector<8x1xi32>
    %1887 = vector.shape_cast %1886 : vector<8x1xi1> to vector<8x1xi1>
    %1888 = vector.broadcast %1887 : vector<8x1xi1> to vector<8x128xi1>
    %1889 = arith.select %1888, %1326, %1884 : vector<8x128xi1>, vector<8x128xf32>
    %c3_i32_536 = arith.constant 3 : i32
    %1890 = vector.broadcast %c3_i32_536 : i32 to vector<8x1xi32>
    %1891 = arith.cmpi eq, %1879, %1890 : vector<8x1xi32>
    %1892 = vector.shape_cast %1891 : vector<8x1xi1> to vector<8x1xi1>
    %1893 = vector.broadcast %1892 : vector<8x1xi1> to vector<8x128xi1>
    %1894 = arith.select %1893, %1328, %1889 : vector<8x128xi1>, vector<8x128xf32>
    %c4_i32_537 = arith.constant 4 : i32
    %1895 = vector.broadcast %c4_i32_537 : i32 to vector<8x1xi32>
    %1896 = arith.cmpi eq, %1879, %1895 : vector<8x1xi32>
    %1897 = vector.shape_cast %1896 : vector<8x1xi1> to vector<8x1xi1>
    %1898 = vector.broadcast %1897 : vector<8x1xi1> to vector<8x128xi1>
    %1899 = arith.select %1898, %1330, %1894 : vector<8x128xi1>, vector<8x128xf32>
    %c5_i32_538 = arith.constant 5 : i32
    %1900 = vector.broadcast %c5_i32_538 : i32 to vector<8x1xi32>
    %1901 = arith.cmpi eq, %1879, %1900 : vector<8x1xi32>
    %1902 = vector.shape_cast %1901 : vector<8x1xi1> to vector<8x1xi1>
    %1903 = vector.broadcast %1902 : vector<8x1xi1> to vector<8x128xi1>
    %1904 = arith.select %1903, %1332, %1899 : vector<8x128xi1>, vector<8x128xf32>
    %c6_i32_539 = arith.constant 6 : i32
    %1905 = vector.broadcast %c6_i32_539 : i32 to vector<8x1xi32>
    %1906 = arith.cmpi eq, %1879, %1905 : vector<8x1xi32>
    %1907 = vector.shape_cast %1906 : vector<8x1xi1> to vector<8x1xi1>
    %1908 = vector.broadcast %1907 : vector<8x1xi1> to vector<8x128xi1>
    %1909 = arith.select %1908, %1334, %1904 : vector<8x128xi1>, vector<8x128xf32>
    %c7_i32_540 = arith.constant 7 : i32
    %1910 = vector.broadcast %c7_i32_540 : i32 to vector<8x1xi32>
    %1911 = arith.cmpi eq, %1879, %1910 : vector<8x1xi32>
    %1912 = vector.shape_cast %1911 : vector<8x1xi1> to vector<8x1xi1>
    %1913 = vector.broadcast %1912 : vector<8x1xi1> to vector<8x128xi1>
    %1914 = arith.select %1913, %1336, %1909 : vector<8x128xi1>, vector<8x128xf32>
    %c8_i32_541 = arith.constant 8 : i32
    %1915 = vector.broadcast %c8_i32_541 : i32 to vector<8x1xi32>
    %1916 = arith.cmpi eq, %1879, %1915 : vector<8x1xi32>
    %1917 = vector.shape_cast %1916 : vector<8x1xi1> to vector<8x1xi1>
    %1918 = vector.broadcast %1917 : vector<8x1xi1> to vector<8x128xi1>
    %1919 = arith.select %1918, %1338, %1914 : vector<8x128xi1>, vector<8x128xf32>
    %c9_i32_542 = arith.constant 9 : i32
    %1920 = vector.broadcast %c9_i32_542 : i32 to vector<8x1xi32>
    %1921 = arith.cmpi eq, %1879, %1920 : vector<8x1xi32>
    %1922 = vector.shape_cast %1921 : vector<8x1xi1> to vector<8x1xi1>
    %1923 = vector.broadcast %1922 : vector<8x1xi1> to vector<8x128xi1>
    %1924 = arith.select %1923, %1340, %1919 : vector<8x128xi1>, vector<8x128xf32>
    %c1_i32_543 = arith.constant 1 : i32
    %1925 = tpu.dynamic_rotate %1873 by %c1_i32_543 dim 1 : vector<8x128xf32>, i32 -> vector<8x128xf32>
    %c0_i32_544 = arith.constant 0 : i32
    %1926 = vector.broadcast %c0_i32_544 : i32 to vector<8x128xi32>
    %1927 = arith.cmpi eq, %2, %1926 : vector<8x128xi32>
    %cst_545 = arith.constant 8.000000e+00 : f32
    %cst_546 = arith.constant 1.000000e+00 : f32
    %1928 = arith.subf %cst_545, %cst_546 : f32
    %1929 = arith.mulf %1928, %0 : f32
    %1930 = vector.broadcast %1929 : f32 to vector<8x128xf32>
    %1931 = arith.select %1927, %1930, %1925 : vector<8x128xi1>, vector<8x128xf32>
    %1932 = arith.addf %1931, %1924 : vector<8x128xf32>
    %1933 = vector.broadcast %0 : f32 to vector<8x128xf32>
    %1934 = arith.addf %1873, %1933 : vector<8x128xf32>
    %1935 = arith.minimumf %1932, %1934 : vector<8x128xf32>
    %1936 = arith.subf %1935, %5 : vector<8x128xf32>
    %cst_547 = arith.constant 1.000000e+09 : f32
    %1937 = vector.broadcast %cst_547 : f32 to vector<8x128xf32>
    %1938 = arith.select %9, %1936, %1937 : vector<8x128xi1>, vector<8x128xf32>
    %c1_i32_548 = arith.constant 1 : i32
    %1939 = tpu.dynamic_rotate %1938 by %c1_i32_548 dim 1 : vector<8x128xf32>, i32 -> vector<8x128xf32>
    %1940 = arith.minimumf %1938, %1939 : vector<8x128xf32>
    %c2_i32_549 = arith.constant 2 : i32
    %1941 = tpu.dynamic_rotate %1940 by %c2_i32_549 dim 1 : vector<8x128xf32>, i32 -> vector<8x128xf32>
    %1942 = arith.minimumf %1940, %1941 : vector<8x128xf32>
    %c4_i32_550 = arith.constant 4 : i32
    %1943 = tpu.dynamic_rotate %1942 by %c4_i32_550 dim 1 : vector<8x128xf32>, i32 -> vector<8x128xf32>
    %1944 = arith.minimumf %1942, %1943 : vector<8x128xf32>
    %1945 = arith.addf %1944, %5 : vector<8x128xf32>
    %cst_551 = arith.constant 8.000000e+00 : f32
    %1946 = arith.mulf %cst_551, %0 : f32
    %1947 = vector.broadcast %1946 : f32 to vector<8x128xf32>
    %1948 = arith.addf %1947, %7 : vector<8x128xf32>
    %1949 = arith.minimumf %1945, %1948 : vector<8x128xf32>
    %c8_i32_552 = arith.constant 8 : i32
    %1950 = vector.broadcast %c8_i32_552 : i32 to vector<8x1xi32>
    %1951 = arith.cmpi eq, %1319, %1950 : vector<8x1xi32>
    %1952 = vector.shape_cast %1951 : vector<8x1xi1> to vector<8x1xi1>
    %1953 = vector.broadcast %1952 : vector<8x1xi1> to vector<8x128xi1>
    %1954 = arith.select %1953, %1949, %1878 : vector<8x128xi1>, vector<8x128xf32>
    %c1_i32_553 = arith.constant 1 : i32
    %1955 = vector.broadcast %c1_i32_553 : i32 to vector<8x1xi32>
    %1956 = arith.subi %1320, %1955 : vector<8x1xi32>
    %c0_i32_554 = arith.constant 0 : i32
    %1957 = vector.broadcast %c0_i32_554 : i32 to vector<8x1xi32>
    %1958 = arith.maxsi %1956, %1957 : vector<8x1xi32>
    %1959 = vector.broadcast %1958 : vector<8x1xi32> to vector<8x128xi32>
    %1960 = arith.cmpi eq, %2, %1959 : vector<8x128xi32>
    %cst_555 = arith.constant 0.000000e+00 : f32
    %1961 = vector.broadcast %cst_555 : f32 to vector<8x128xf32>
    %1962 = arith.select %1960, %1954, %1961 : vector<8x128xi1>, vector<8x128xf32>
    %cst_556 = arith.constant dense<0.000000e+00> : vector<8xf32>
    %1963 = vector.multi_reduction <add>, %1962, %cst_556 [1] : vector<8x128xf32> to vector<8xf32>
    %1964 = vector.shape_cast %1963 : vector<8xf32> to vector<8x1xf32>
    %c0_i32_557 = arith.constant 0 : i32
    %1965 = vector.broadcast %c0_i32_557 : i32 to vector<8x1xi32>
    %1966 = arith.cmpi eq, %1320, %1965 : vector<8x1xi32>
    %1967 = arith.sitofp %1319 : vector<8x1xi32> to vector<8x1xf32>
    %1968 = vector.broadcast %0 : f32 to vector<8x1xf32>
    %1969 = arith.mulf %1967, %1968 : vector<8x1xf32>
    %1970 = arith.select %1966, %1969, %1964 : vector<8x1xi1>, vector<8x1xf32>
    %c16_558 = arith.constant 16 : index
    %c0_559 = arith.constant 0 : index
    %1971 = vector.load %arg4[%c16_558, %c0_559] : memref<24x1xf32, #tpu.memory_space<vmem>>, vector<8x1xf32>
    tpu.vector_store %arg4[%c16_558, %c0_559], %1970 {strides = array<i32>} : memref<24x1xf32, #tpu.memory_space<vmem>>, vector<8x1xf32>,
    return
  }
  func.func @transform_0(%arg0: i32) -> i32 {
    %c0_i32 = arith.constant 0 : i32
    %c0_i32_0 = arith.constant 0 : i32
    return %c0_i32 : i32
  }
  func.func @transform_1(%arg0: i32) -> (i32, i32) {
    %c0_i32 = arith.constant 0 : i32
    %c0_i32_0 = arith.constant 0 : i32
    return %arg0, %c0_i32 : i32, i32
  }
  func.func @transform_2(%arg0: i32) -> (i32, i32, i32) {
    %c0_i32 = arith.constant 0 : i32
    %c0_i32_0 = arith.constant 0 : i32
    %c0_i32_1 = arith.constant 0 : i32
    return %c0_i32, %arg0, %c0_i32_0 : i32, i32, i32
  }
  func.func @transform_3(%arg0: i32) -> (i32, i32) {
    %c0_i32 = arith.constant 0 : i32
    %c0_i32_0 = arith.constant 0 : i32
    return %arg0, %c0_i32 : i32, i32
  }
}

</mosaic_0001>

<bundles_post_ra>
// kernel: tpu_custom_call.1
= control target key start
LH: loop header
LB: loop body
LE: loop exit
PB: predicated region body
PF: predicated region fallthrough
CT: control target
= control target key end

     0   :  { %8 = vsyncpa [#allocation4], 0  ;;  %s4447_s0 = inlined_call_operand.hbm [shape: f32[2], index: 0, kind: input, shape index: {}]   ;;  %s4448_s1 = inlined_call_operand.hbm [shape: s32[48,128], index: 1, kind: input, shape index: {}]   ;;  %s4449_s2 = inlined_call_operand.hbm [shape: f32[10,48,128], index: 2, kind: input, shape index: {}]   ;;  %s4450_s3 = inlined_call_operand.vmem [shape: f32[48,1], index: 3, kind: output, shape index: {}]  }
   0x1   :  { %9 = vsyncpa [#allocation3], 0 }
   0x2   :  { %11 = vsyncpa [#allocation3 + $0x1], 0 }
   0x3   :  { %12 = vsyncpa [#allocation7], 0 }
   0x4   :  { %14 = vsyncpa [#allocation7 + $0x1], 0  ;;  %s2621_s12 = smov 0   ;;  %s2623_s13 = smov 0  }
   0x5   :  { %s2625_s14 = smov 0   ;;  %s2627_s15 = smov 0  }
   0x6 LB: > { %s2245_s16 = sadd.s32 4294967295, %s2576_s15   ;;  %s2641_s17 = sadd.s32 1, %s2576_s15   ;;  %s2576_s15 = sphi %s2627_s15, %s4869_s15   ;;  %s2572_s14 = sphi %s2625_s14, %s4868_s14   ;;  %s2568_s13 = sphi %s2623_s13, %s4867_s13   ;;  %s2564_s12 = sphi %s2621_s12, %s4866_s12  }
   0x7   : > { %s45_s18 = ssub.s32 %s2576_s15, %s2641_s17  ;;  %s48_s19 = sadd.s32 1, %s2572_s14 }
   0x8   : > { %p46_p0 = scmp.eq.s32.totalorder %s45_s18, 0  ;;  %p55_p1 = scmp.ne.s32.totalorder %s2572_s14, %s2568_s13 }
   0x9   : > { %p56_p2 = scmp.eq.s32.totalorder %s2576_s15, 0  ;;  %p61_p3 = scmp.ne.s32.totalorder %s2568_s13, %s2564_s12 }
   0xa   : > { %s2651_s20 = scalar_select %p46_p0, %s2572_s14, %s48_s19  }
   0xb   : > { %p2653_p4 = por %p56_p2, %p55_p1  ;;  %p2659_p5 = scmp.eq.s32.totalorder %s2245_s16, 0 }
   0xc   : > { %p2247_p6 = scmp.ge.s32.totalorder %s2576_s15, 1  ;;  %p124_p7 = scmp.lt.s32.totalorder %s2576_s15, 3 }
   0xd   : > { %p2667_p8 = por %p2659_p5, %p61_p3  ;;  %s136_s27 = sshll.u32 %s4447_s0, 4  ;;  %s137_s27 = int_to_ptr.hbm [resolvable:$true] %s136_s27 }
   0xe   : > { %p2671_p9 = pnand %p2247_p6, %p124_p7  ;;  %s2578_s28 = smov [#allocation2]  }
   0xf   : > { %p2249_p12 = scmp.ge.s32.totalorder %s2576_s15, 2 }
  0x10   : > { %p2311_p10 = pneg %p2671_p9  ;;  %s2684_s29 = sand.u32 (!%p2249_p12), 1, %s2572_s14  }
  0x11   : > { %143 = sbr.rel (%p2249_p12) target bundleno = 49 (0x31), region = 20  ;;  %s148_s11 = scalar_lea.sflag (!%p2249_p12), [#allocation3], %s2684_s29 }
  0x12   : > { %p2312_p11 = pnand %p2311_p10, %p2659_p5  ;;  %s2290_s30 = smul.u32 (!%p2249_p12), 24, %s2576_s15 }
  0x13   : > { %s2292_s4 = smul.u32 (!%p2249_p12), 24, %s2684_s29  ;;  %s2512_s26 = scalar_lea.hbm (!%p2249_p12), %s4448_s1, 48 }
  0x14   : > { %2314 = dma.hbm_to_smem (!%p2312_p11), %s137_s27, 16, %s2578_s28, [#allocation4]  }
  0x15   : > { %s156_s7 = scalar_lea.hbm (!%p2249_p12), %s4448_s1, %s2290_s30  ;;  %s151_s9 = scalar_lea.vmem (!%p2249_p12), [#allocation5], %s2292_s4 }
  0x16   : > { %s157_s8 = sshll.u32 %s156_s7, 4  ;;  %s159_s10 = sshll.u32 %s151_s9, 4  ;;  %s158_s8 = int_to_ptr.hbm [resolvable:$true] %s157_s8  ;;  %s160_s10 = int_to_ptr.vmem [resolvable:$true] %s159_s10 }
  0x17   : > { %s2506_s12 = sshra.s32 %s158_s8, 4  ;;  %s2507_s12 = int_to_ptr.hbm [resolvable:$true] %s2506_s12 }
  0x18   : > { %s2508_s18 = scalar_lea.hbm %s2507_s12, 24  ;;  %p2513_p2 = scmp.lt.s32.totalorder %s2507_s12, %s4448_s1 }
  0x19   : > { %p2509_p13 = scmp.ne.s32.totalorder %s2507_s12, %s2508_s18  ;;  %p2514_p3 = scmp.lt.s32.totalorder %s2512_s26, %s2508_s18 }
  0x1b   : > { %p2510_p0 = pnand %p2509_p13, %p2653_p4  ;;  %p2515_p6 = por %p2514_p3, %p2513_p2 }
  0x1d   : > { %p2511_p1 = pneg %p2510_p0 }
  0x1f   : > { %p2516_p7 = pnand %p2515_p6, %p2511_p1 }
  0x21   : > { %2519 = shalt.err (!%p2516_p7)
}
  0x22   : > { %s2579_s4 = smov 128   ;;  %s2580_s5 = smov 8  }
  0x23   : > { %2298 = dma.hbm_to_vmem [thread:$0]  (%p2653_p4), %s158_s8, 384, %s160_s10, %s148_s11, %s2579_s4, %s2579_s4, %s2580_s5  }
  0x24   : > { %s2293_s6 = smul.u32 240, %s2684_s29  ;;  %s178_s12 = scalar_lea.hbm %s4449_s2, %s2290_s30 }
  0x25   : > { %s191_s18 = sshll.u32 %s178_s12, 4  ;;  %s2581_s10 = smov 768   ;;  %s192_s18 = int_to_ptr.hbm [resolvable:$true] %s191_s18 }
  0x26   : > { %s2299_s19 = scalar_select %p2653_p4, [#allocation0], [#allocation10] }
  0x27   : > { %s173_s25 = scalar_lea.vmem [#allocation6], %s2293_s6  ;;  %2300 = sst [smem:[#allocation9]] (%p2653_p4), %s2581_s10 }
  0x28   : > { %s193_s26 = sshll.u32 %s173_s25, 4  ;;  %s183_s8 = sld [smem:[%s2299_s19]]   ;;  %s194_s26 = int_to_ptr.vmem [resolvable:$true] %s193_s26 }
  0x29   : > { %s2582_s11 = smov 384   ;;  %s2583_s27 = smov 3  }
  0x2a   : > { %2301 = sst [smem:[#allocation9 + $0x1]] (%p2653_p4), %s2582_s11  ;;  %s2584_s30 = smov 128  }
  0x2b   : > { %2302 = sst [smem:[#allocation9 + $0x2]] (%p2653_p4), %s2583_s27  ;;  %s2585_s4 = smov 8  }
  0x2c   : > { %2303 = sst [smem:[#allocation9 + $0x3]] (%p2653_p4), %s2584_s30  ;;  %s170_s6 = scalar_lea.sflag [#allocation7], %s2684_s29 }
  0x2d   : > { %2304 = sst [smem:[#allocation9 + $0x4]] (%p2653_p4), %s2584_s30  ;;  %s2586_s7 = smov [#allocation8]  }
  0x2e   : > { %s2252_s28 = sshll.u32 %s183_s8, 26  ;;  %2305 = sst [smem:[#allocation9 + $0x5]] (%p2653_p4), %s2585_s4 }
  0x2f   : > { %s2253_s5 = sadd.s32 134217728, %s2252_s28 }
  0x30   : > { %2306 = dma.general (%p2653_p4), %s192_s18, 3840, %s194_s26, %s170_s6, %s2586_s7, [#allocation9], %s2253_s5, 0  }
  0x31 PF: > { %218 = sbr.rel (%p2671_p9) target bundleno = 4263 (0x10a7), region = 32 }
  0x36   : > { %2551 = dma.done.wait (%p2659_p5), [#allocation4], 16  }
  0x37   : > { %2553 = vsyncadd (%p2659_p5), [#allocation4], 4294967280  ;;  %s225_s9 = sand.u32 1, %s2568_s13  }
  0x38   : > { %s2294_s12 = smul.u32 24, %s225_s9  ;;  %s226_s19 = scalar_lea.sflag [#allocation3], %s225_s9 }
  0x3a   : > { %s2730_s25 = scalar_lea.vmem [#allocation5], %s2294_s12 }
  0x3b   : > { %2555 = dma.done.wait (%p2667_p8), %s226_s19, 384  }
  0x3c   : > { %2557 = vsyncadd (%p2667_p8), %s226_s19, 4294966912  ;;  %s2295_s21 = smul.u32 240, %s225_s9  ;;  %s236_s24 = scalar_lea.sflag [#allocation7], %s225_s9 }
  0x3e   : > { %s2736_s29 = scalar_lea.vmem [#allocation6], %s2295_s21 }
  0x3f   : > { %2559 = dma.done.wait (%p2667_p8), %s236_s24, 3840  }
  0x40   : > { %2561 = vsyncadd (%p2667_p8), %s236_s24, 4294963456 }
  0x41   : > { %245 = sfence }
  0x42   : > { %v286_v0 = vld [vmem:[%s2730_s25] sm:$0xff]  ;;  %v2587_v1 = vmov 2   ;;  %v4461_v2 = vmov 0   ;;  %v279_v6 = vlaneseq  ;;  %s2257_s22 = sld [smem:[#allocation2 + $0x1]]  ;;  %s2589_s23 = smov 1   ;;  %v4457_v18 = vmov 3  }
  0x43   : > { %2374 = vset.pattern.permute.xlu2 %v2587_v1  ;;  %2373 = vset.pattern.permute.xlu1 %v2587_v1  ;;  %vm334_vm0 = vcmp.eq.s32.totalorder %v286_v0, 4  ;;  %vm320_vm1 = vcmp.eq.s32.totalorder %v286_v0, 2  ;;  %vm313_vm2 = vcmp.eq.s32.totalorder %v286_v0, 1  ;;  %vm341_vm3 = vcmp.eq.s32.totalorder %v286_v0, 5  ;;  %v2801_v19 = vld [vmem:[%s2730_s25 + $0x8] sm:$0xff]  ;;  %v2811_v21 = vld [vmem:[%s2730_s25 + $0x10] sm:$0xff] }
  0x44   : > { %2372 = vset.pattern.permute.xlu0 %v2587_v1  ;;  %v2747_v3 = vsel %vm334_vm0, 1, %v4461_v2  ;;  %v2750_v4 = vsel %vm320_vm1, 1, %v4461_v2  ;;  %v2753_v5 = vsel %vm313_vm2, 1, %v4461_v2  ;;  %vm327_vm4 = vcmp.eq.s32.totalorder %v286_v0, 3  ;;  %v2854_v34 = vld [vmem:[%s2736_s29] sm:$0xff]  ;;  %v2857_v35 = vld [vmem:[%s2736_s29 + $0x18] sm:$0xff] }
  0x45   : > { %4594 = vst [vmem:[#allocation14_spill] sm:$0xff] %v2747_v3  ;;  %337 = vperm.xlu2 %2374, %v2747_v3   ;;  %323 = vperm.xlu1 %2373, %v2750_v4   ;;  %vm362_vm5 = vcmp.eq.s32.totalorder %v286_v0, 8  ;;  %v2759_v7 = vsel %vm341_vm3, 1, %v4461_v2  ;;  %v2762_v8 = vsel %vm327_vm4, 1, %v4461_v2  ;;  %v2769_v10 = vand.u32 127, %v279_v6  ;;  %v2862_v37 = vld [vmem:[%s2736_s29 + $0x30] sm:$0xff] }
  0x46   : > { %4595 = vst [vmem:[#allocation15_spill] sm:$0xff] %v2753_v5  ;;  %316 = vperm.xlu0 %2372, %v2753_v5   ;;  %v2765_v9 = vsel %vm362_vm5, 1, %v4461_v2  ;;  %vm355_vm6 = vcmp.eq.s32.totalorder %v286_v0, 7  ;;  %vm348_vm7 = vcmp.eq.s32.totalorder %v286_v0, 6  ;;  %vm369_vm8 = vcmp.eq.s32.totalorder %v286_v0, 9  ;;  %v2868_v40 = vld [vmem:[%s2736_s29 + $0x48] sm:$0xff] }
  0x47   : > { %4596 = vst [vmem:[#allocation16_spill] sm:$0xff] %v2759_v7  ;;  %v281_v11 = vcvt.s32.f32 %v2769_v10  ;;  %v2774_v12 = vsel %vm355_vm6, 1, %v4461_v2  ;;  %v2777_v13 = vsel %vm348_vm7, 1, %v4461_v2  ;;  %v2787_v17 = vsel %vm369_vm8, 1, %v4461_v2  ;;  %s2870_s18 = sld [smem:[#allocation2]]  ;;  %v2875_v42 = vld [vmem:[%s2736_s29 + $0x60] sm:$0xff] }
  0x48   : > { %4597 = vst [vmem:[#allocation17_spill] sm:$0xff] %v2762_v8  ;;  %v282_v14 = vstv %s2257_s22  ;;  %vm949_vm9 = vcmp.eq.s32.totalorder %v2801_v19, 1  ;;  %vm1569_vm10 = vcmp.eq.s32.totalorder %v2811_v21, 3  ;;  %v4455_v23 = vmov 4   ;;  %v2880_v45 = vld [vmem:[%s2736_s29 + $0x78] sm:$0xff]  ;;  %v2883_v46 = vld [vmem:[%s2736_s29 + $0x90] sm:$0xff] }
  0x49   : > { %4598 = vst [vmem:[#allocation18_spill] sm:$0xff] %v2765_v9  ;;  %v2781_v15 = vmul.f32 %v282_v14, %v281_v11  ;;  %v2805_v20 = vsel %vm949_vm9, 1, %v4461_v2  ;;  %v2815_v22 = vsel %vm1569_vm10, 1, %v4461_v2  ;;  %vm977_vm11 = vcmp.eq.s32.totalorder %v2801_v19, 5  ;;  %v2893_v52 = vld [vmem:[%s2736_s29 + $0xa8] sm:$0xff]  ;;  %v2898_v54 = vld [vmem:[%s2736_s29 + $0xc0] sm:$0xff] }
  0x4a   : > { %4599 = vst [vmem:[#allocation19_spill] sm:$0xff] %v2777_v13  ;;  %v2824_v24 = vsel %vm977_vm11, 1, %v4461_v2  ;;  %vm1590_vm12 = vcmp.eq.s32.totalorder %v2811_v21, 6  ;;  %vm998_vm13 = vcmp.eq.s32.totalorder %v2801_v19, 8  ;;  %v4453_v28 = vmov 5   ;;  %v2906_v58 = vld [vmem:[%s2736_s29 + $0xd8] sm:$0xff] }
  0x4b   : > { %v2784_v16 = vadd.f32 %v2781_v15, %v282_v14  ;;  %4601 = vst [vmem:[#allocation21_spill] sm:$0xff] %v2787_v17  ;;  %v2832_v25 = vsel %vm1590_vm12, 1, %v4461_v2  ;;  %v2839_v26 = vsel %vm998_vm13, 1, %v4461_v2  ;;  %v4451_v48 = vmov 6   ;;  %s2594_s8 = smov 2   ;;  %s2596_s10 = smov 4  }
  0x4c   : > { %4602 = vst [vmem:[#allocation22_spill] sm:$0xff] %v2815_v22  ;;  %vm378_vm6 = vcmp.eq.s32.totalorder %v2769_v10, 0  ;;  %vm285_vm8 = vcmp.lt.s32.totalorder %v2769_v10, 7  ;;  %vm1611_vm9 = vcmp.eq.s32.totalorder %v2811_v21, 9  ;;  %vm956_vm10 = vcmp.eq.s32.totalorder %v2801_v19, 2  ;;  %s2600_s7 = smov 127  }
  0x4d   : > { %344 = vperm.xlu2 %2374, %v2759_v7   ;;  %330 = vperm.xlu1 %2373, %v2762_v8   ;;  %4600 = vst [vmem:[#allocation20_spill] sm:$0xff] %v2784_v16  ;;  %s379_s26 = smul.f32 0.0, %s2870_s18  ;;  %v2902_v56 = vstv %s2870_s18  ;;  %vm1555_vm11 = vcmp.eq.s32.totalorder %v2811_v21, 1  ;;  %vm963_vm12 = vcmp.eq.s32.totalorder %v2801_v19, 3  ;;  %vm1562_vm13 = vcmp.eq.s32.totalorder %v2811_v21, 2 }
  0x4e   : > { %365 = vperm.xlu0 %2372, %v2765_v9   ;;  %4603 = vst [vmem:[#allocation23_spill] sm:$0xff] %v2824_v24  ;;  %v2914_v62 = vadd.f32 %v2902_v56, %v2784_v16  ;;  %s467_s11 = smul.f32 2.0, %s2870_s18 }
  0x4f   : > { %4604 = vst [vmem:[#allocation24_spill] sm:$0xff] %v2832_v25  ;;  %v380_v57 = vstv %s379_s26  ;;  %s539_s27 = smul.f32 3.0, %s2870_s18 }
  0x50   : > { %4605 = vst [vmem:[#allocation25_spill] sm:$0xff] %v2839_v26  ;;  %s611_s30 = smul.f32 4.0, %s2870_s18 }
  0x51   : > { %4606 = vst [vmem:[#allocation26_spill] sm:$0xff] %v2854_v34  ;;  %s683_s28 = smul.f32 5.0, %s2870_s18 }
  0x52   : > { %4607 = vst [vmem:[#allocation27_spill] sm:$0xff] %v2857_v35  ;;  %s755_s4 = smul.f32 6.0, %s2870_s18 }
  0x53   : > { %4608 = vst [vmem:[#allocation28_spill] sm:$0xff] %v2862_v37  ;;  %s827_s5 = smul.f32 7.0, %s2870_s18 }
  0x54   : > { %4609 = vst [vmem:[#allocation29_spill] sm:$0xff] %v2868_v40  ;;  %s899_s6 = smul.f32 8.0, %s2870_s18 }
  0x55   : > { %358 = vperm.xlu2 %2374, %v2774_v12   ;;  %351 = vperm.xlu1 %2373, %v2777_v13   ;;  %4610 = vst [vmem:[#allocation30_spill] sm:$0xff] %v2875_v42  ;;  %s271_s9 = smul.u32 3, %s2245_s16 }
  0x56   : > { %952 = vperm.xlu0 %2372, %v2805_v20   ;;  %4611 = vst [vmem:[#allocation31_spill] sm:$0xff] %v2880_v45 }
  0x57   : > { %4612 = vst [vmem:[#allocation32_spill] sm:$0xff] %v2883_v46  ;;  %p272_p4 = scmp.lt.s32.totalorder %s271_s9, 5 }
  0x58   : > { %4613 = vst [vmem:[#allocation33_spill] sm:$0xff] %v2893_v52 }
  0x59   : > { %4614 = vst [vmem:[#allocation34_spill] sm:$0xff] %v2898_v54  ;;  %s4871_s9 = smov (!%p272_p4, %s271_s9), 5 }
  0x5a   : > { %4615 = vst [vmem:[#allocation35_spill] sm:$0xff] %v2902_v56  ;;  %s2256_s12 = sshll.u32 %s4871_s9, 3 }
  0x5b   : > { %4616 = vst [vmem:[#allocation36_spill] sm:$0xff] %v2906_v58  ;;  %s275_s21 = scalar_lea.vmem %s4450_s3, %s2256_s12 }
  0x5d   : > { %372 = vperm.xlu1 %2373, %v2787_v17   ;;  %376 = vrot.lane.b32.xlu2 %v2784_v16, %s2589_s23  ;;  %v3065_v16 = vld [vmem:[%s2736_s29 + $0x8] sm:$0xff] }
  0x5e   : > { %2376 = vset.pattern.permute.xlu2 %v4457_v18  ;;  %1572 = vperm.xlu0 %2372, %v2815_v22   ;;  %4649 = vst [vmem:[#allocation69_spill] sm:$0xff] %v3065_v16 }
  0x65   : > { %2375 = vset.pattern.permute.xlu1 %v4457_v18  ;;  %410 = vperm.xlu2 %2376, %v2750_v4  }
  0x66   : > { %405 = vperm.xlu1 %2375, %v2753_v5   ;;  %980 = vperm.xlu0 %2372, %v2824_v24  }
  0x6d   : > { %420 = vperm.xlu2 %2376, %v2747_v3  }
  0x6e   : > { %415 = vperm.xlu1 %2375, %v2762_v8   ;;  %1593 = vperm.xlu0 %2372, %v2832_v25  }
  0x75   : > { %435 = vperm.xlu2 %2376, %v2774_v12  }
  0x76   : > { %430 = vperm.xlu1 %2375, %v2777_v13   ;;  %1001 = vperm.xlu0 %2372, %v2839_v26  }
  0x7d   : > { %445 = vperm.xlu2 %2376, %v2787_v17  }
  0x7e   : > { %440 = vperm.xlu1 %2375, %v2765_v9  }
  0x85   : > { %2378 = vset.pattern.permute.xlu2 %v4455_v23 }
  0x86   : > { %2377 = vset.pattern.permute.xlu1 %v4461_v2  ;;  %477 = vperm.xlu2 %2378, %v2753_v5  }
  0x87   : > { %472 = vperm.xlu1 %2377, %v2750_v4  }
  0x8e   : > { %492 = vperm.xlu2 %2378, %v2747_v3  }
  0x8f   : > { %2379 = vset.pattern.permute.xlu1 %v4455_v23 }
  0x90   : > { %487 = vperm.xlu1 %2379, %v2762_v8  }
  0x96   : > { %502 = vperm.xlu2 %2378, %v2777_v13  }
  0x98   : > { %497 = vperm.xlu1 %2379, %v2759_v7  }
  0x9e   : > { %517 = vperm.xlu2 %2378, %v2787_v17  }
  0x9f   : > { %v338_v27 = vpop.permute.xlu2 %337 }
  0xa0   : > { %512 = vperm.xlu1 %2379, %v2765_v9   ;;  %vm339_vm1 = vcmp.eq.s32.totalorder %v338_v27, 1 }
  0xa6   : > { %2381 = vset.pattern.permute.xlu2 %v4453_v28 }
  0xa7   : > { %v345_v29 = vpop.permute.xlu2 %344  ;;  %549 = vperm.xlu2 %2381, %v2753_v5  }
  0xa8   : > { %2380 = vset.pattern.permute.xlu1 %v4461_v2  ;;  %vm346_vm2 = vcmp.eq.s32.totalorder %v345_v29, 1 }
  0xa9   : > { %544 = vperm.xlu1 %2380, %v2762_v8  }
  0xaf   : > { %v359_v30 = vpop.permute.xlu2 %358  ;;  %564 = vperm.xlu2 %2381, %v2747_v3  }
  0xb0   : > { %vm360_vm4 = vcmp.eq.s32.totalorder %v359_v30, 1 }
  0xb1   : > { %2382 = vset.pattern.permute.xlu1 %v4453_v28 }
  0xb2   : > { %559 = vperm.xlu1 %2382, %v2762_v8  }
  0xb7   : > { %v324_v31 = vpop.permute.xlu1 %323  ;;  %574 = vperm.xlu2 %2381, %v2777_v13   ;;  %v377_v32 = vpop.permute.xlu2 %376 }
  0xb8   : > { %v317_v33 = vpop.permute.xlu0 %316  ;;  %vm325_vm15 = vcmp.eq.s32.totalorder %v324_v31, 1  ;;  %v2918_v63 = vsel %vm378_vm6, %v380_v57, %v377_v32  ;;  %v2941_v31 = vsel %vm1611_vm9, 1, %v4461_v2 }
  0xb9   : > { %vm318_vm14 = vcmp.eq.s32.totalorder %v317_v33, 1  ;;  %4618 = vst [vmem:[#allocation38_spill] sm:$0xff] %v2941_v31 }
  0xba   : > { %569 = vperm.xlu1 %2382, %v2759_v7   ;;  %v319_v36 = vsel %vm318_vm14, %v2857_v35, %v2854_v34  ;;  %vm1576_vm14 = vcmp.eq.s32.totalorder %v2811_v21, 4 }
  0xbb   : > { %v326_v41 = vsel %vm325_vm15, %v2862_v37, %v319_v36  ;;  %v2952_v36 = vsel %vm956_vm10, 1, %v4461_v2  ;;  %vm970_vm15 = vcmp.eq.s32.totalorder %v2801_v19, 4 }
  0xbc   : > { %v2993_v57 = vsel %vm970_vm15, 1, %v4461_v2 }
  0xbf   : > { %v331_v38 = vpop.permute.xlu1 %330  ;;  %589 = vperm.xlu2 %2381, %v2787_v17   ;;  %v2865_v39 = vpop.permute.xlu2 %410 }
  0xc0   : > { %vm332_vm0 = vcmp.eq.s32.totalorder %v331_v38, 1  ;;  %v366_v53 = vpop.permute.xlu0 %365 }
  0xc1   : > { %v333_v43 = vsel %vm332_vm0, %v2868_v40, %v326_v41  ;;  %vm367_vm5 = vcmp.eq.s32.totalorder %v366_v53, 1  ;;  %vm984_vm0 = vcmp.eq.s32.totalorder %v2801_v19, 6 }
  0xc2   : > { %584 = vperm.xlu1 %2382, %v2765_v9   ;;  %v340_v44 = vsel %vm339_vm1, %v2875_v42, %v333_v43  ;;  %v2964_v43 = vsel %vm1555_vm11, 1, %v4461_v2  ;;  %vm1583_vm1 = vcmp.eq.s32.totalorder %v2811_v21, 5 }
  0xc3   : > { %v347_v50 = vsel %vm346_vm2, %v2880_v45, %v340_v44  ;;  %v2970_v44 = vsel %vm963_vm12, 1, %v4461_v2  ;;  %vm1597_vm2 = vcmp.eq.s32.totalorder %v2811_v21, 7 }
  0xc7   : > { %v352_v47 = vpop.permute.xlu1 %351  ;;  %2384 = vset.pattern.permute.xlu2 %v4451_v48  ;;  %v2886_v49 = vpop.permute.xlu2 %420 }
  0xc8   : > { %vm353_vm3 = vcmp.eq.s32.totalorder %v352_v47, 1  ;;  %621 = vperm.xlu2 %2384, %v2753_v5  }
  0xc9   : > { %v354_v51 = vsel %vm353_vm3, %v2883_v46, %v347_v50  ;;  %vm991_vm3 = vcmp.eq.s32.totalorder %v2801_v19, 7 }
  0xca   : > { %2383 = vset.pattern.permute.xlu1 %v4461_v2  ;;  %v361_v55 = vsel %vm360_vm4, %v2893_v52, %v354_v51  ;;  %v2979_v51 = vsel %vm1562_vm13, 1, %v4461_v2  ;;  %v3021_v28 = vsel %vm991_vm3, 1, %v4461_v2  ;;  %vm1005_vm4 = vcmp.eq.s32.totalorder %v2801_v19, 9 }
  0xcb   : > { %616 = vperm.xlu1 %2383, %v2747_v3   ;;  %v368_v61 = vsel %vm367_vm5, %v2898_v54, %v361_v55  ;;  %4623 = vst [vmem:[#allocation43_spill] sm:$0xff] %v2979_v51  ;;  %v3026_v23 = vsel %vm1005_vm4, 1, %v4461_v2  ;;  %vm1604_vm5 = vcmp.eq.s32.totalorder %v2811_v21, 8  ;;  %v3085_v54 = vld [vmem:[%s2736_s29 + $0x68] sm:$0xff] }
  0xcc   : > { %4632 = vst [vmem:[#allocation52_spill] sm:$0xff] %v3021_v28 }
  0xcd   : > { %4654 = vst [vmem:[#allocation74_spill] sm:$0xff] %v3085_v54 }
  0xcf   : > { %v373_v59 = vpop.permute.xlu1 %372  ;;  %v2908_v60 = vpop.permute.xlu2 %435 }
  0xd0   : > { %vm374_vm7 = vcmp.eq.s32.totalorder %v373_v59, 1  ;;  %636 = vperm.xlu2 %2384, %v2747_v3   ;;  %v2998_v59 = vsel %vm984_vm0, 1, %v4461_v2 }
  0xd1   : > { %v375_v0 = vsel %vm374_vm7, %v2906_v58, %v368_v61  ;;  %v3079_v58 = vld [vmem:[%s2736_s29 + $0x10] sm:$0xff] }
  0xd2   : > { %v382_v6 = vadd.f32 %v2918_v63, %v375_v0  ;;  %4652 = vst [vmem:[#allocation72_spill] sm:$0xff] %v3079_v58 }
  0xd3   : > { %2385 = vset.pattern.permute.xlu1 %v4451_v48 }
  0xd4   : > { %631 = vperm.xlu1 %2385, %v2762_v8   ;;  %v385_v11 = vmin.f32 %v382_v6, %v2914_v62  ;;  %v3007_v6 = vsel %vm1583_vm1, 1, %v4461_v2 }
  0xd5   : > { %4629 = vst [vmem:[#allocation49_spill] sm:$0xff] %v3007_v6 }
  0xd6   : > { %v386_v14 = vsub.f32 %v385_v11, %v2781_v15  ;;  %v3012_v11 = vsel %vm1597_vm2, 1, %v4461_v2 }
  0xd7   : > { %v2927_v27 = vpop.permute.xlu2 %445 }
  0xd8   : > { %4617 = vst [vmem:[#allocation37_spill] sm:$0xff] %v2927_v27  ;;  %v2929_v29 = vpop.permute.xlu1 %405  ;;  %646 = vperm.xlu2 %2384, %v2777_v13   ;;  %v2934_v30 = vsel %vm285_vm8, %v386_v14, 1e+09  ;;  %v3074_v13 = vld [vmem:[%s2736_s29 + $0x50] sm:$0xff]  ;;  %v3082_v27 = vld [vmem:[%s2736_s29 + $0x28] sm:$0xff] }
  0xd9   : > { %388 = vrot.lane.b32.xlu0 %v2934_v30, %s2589_s23  ;;  %4651 = vst [vmem:[#allocation71_spill] sm:$0xff] %v3074_v13 }
  0xda   : > { %4653 = vst [vmem:[#allocation73_spill] sm:$0xff] %v3082_v27 }
  0xdc   : > { %641 = vperm.xlu1 %2385, %v2759_v7  }
  0xe0   : > { %v2943_v32 = vpop.permute.xlu1 %415  ;;  %661 = vperm.xlu2 %2384, %v2787_v17   ;;  %v2946_v33 = vpop.permute.xlu2 %477 }
  0xe1   : > { %4619 = vst [vmem:[#allocation39_spill] sm:$0xff] %v2946_v33  ;;  %1614 = vperm.xlu0 %2372, %v2941_v31  }
  0xe4   : > { %656 = vperm.xlu1 %2385, %v2765_v9   ;;  %v3068_v9 = vld [vmem:[%s2736_s29 + $0x20] sm:$0xff] }
  0xe5   : > { %4650 = vst [vmem:[#allocation70_spill] sm:$0xff] %v3068_v9 }
  0xe8   : > { %v2955_v38 = vpop.permute.xlu1 %430  ;;  %2387 = vset.pattern.permute.xlu2 %v2587_v1  ;;  %v2958_v41 = vpop.permute.xlu2 %492 }
  0xe9   : > { %4620 = vst [vmem:[#allocation40_spill] sm:$0xff] %v2958_v41  ;;  %959 = vperm.xlu2 %2387, %v2952_v36   ;;  %2388 = vset.pattern.permute.xlu0 %v4457_v18 }
  0xea   : > { %425 = vperm.xlu0 %2388, %v2759_v7  }
  0xec   : > { %2386 = vset.pattern.permute.xlu1 %v2587_v1  ;;  %v2984_v1 = vsel %vm1576_vm14, 1, %v4461_v2 }
  0xed   : > { %1558 = vperm.xlu1 %2386, %v2964_v43   ;;  %4624 = vst [vmem:[#allocation44_spill] sm:$0xff] %v2984_v1 }
  0xf0   : > { %v2973_v47 = vpop.permute.xlu1 %440  ;;  %v2975_v50 = vpop.permute.xlu2 %502 }
  0xf1   : > { %4621 = vst [vmem:[#allocation41_spill] sm:$0xff] %v2973_v47  ;;  %966 = vperm.xlu2 %2387, %v2970_v44   ;;  %v3089_v47 = vld [vmem:[%s2736_s29 + $0x40] sm:$0xff] }
  0xf2   : > { %4622 = vst [vmem:[#allocation42_spill] sm:$0xff] %v2975_v50 }
  0xf3   : > { %4655 = vst [vmem:[#allocation75_spill] sm:$0xff] %v3089_v47 }
  0xf5   : > { %1565 = vperm.xlu1 %2386, %v2979_v51  }
  0xf8   : > { %v2987_v53 = vpop.permute.xlu2 %517 }
  0xf9   : > { %4625 = vst [vmem:[#allocation45_spill] sm:$0xff] %v2987_v53  ;;  %v2989_v55 = vpop.permute.xlu1 %472  ;;  %1579 = vperm.xlu2 %2387, %v2984_v1  }
  0xfa   : > { %4626 = vst [vmem:[#allocation46_spill] sm:$0xff] %v2989_v55 }
  0xfd   : > { %973 = vperm.xlu1 %2386, %v2993_v57  }
 0x101   : > { %987 = vperm.xlu2 %2387, %v2998_v59   ;;  %v3002_v61 = vpop.permute.xlu2 %549 }
 0x102   : > { %4627 = vst [vmem:[#allocation47_spill] sm:$0xff] %v3002_v61  ;;  %v3004_v0 = vpop.permute.xlu1 %487 }
 0x103   : > { %4628 = vst [vmem:[#allocation48_spill] sm:$0xff] %v3004_v0 }
 0x105   : > { %1586 = vperm.xlu1 %2386, %v3007_v6  }
 0x109   : > { %1600 = vperm.xlu2 %2387, %v3012_v11   ;;  %v3016_v14 = vpop.permute.xlu2 %564 }
 0x10a   : > { %4630 = vst [vmem:[#allocation50_spill] sm:$0xff] %v3016_v14  ;;  %v3018_v48 = vpop.permute.xlu1 %497  ;;  %v3035_v14 = vsel %vm1604_vm5, 1, %v4461_v2 }
 0x10b   : > { %4631 = vst [vmem:[#allocation51_spill] sm:$0xff] %v3018_v48 }
 0x10c   : > { %4635 = vst [vmem:[#allocation55_spill] sm:$0xff] %v3035_v14 }
 0x10d   : > { %994 = vperm.xlu1 %2386, %v3021_v28  }
 0x111   : > { %1008 = vperm.xlu2 %2387, %v3026_v23   ;;  %v3030_v18 = vpop.permute.xlu2 %574 }
 0x112   : > { %4633 = vst [vmem:[#allocation53_spill] sm:$0xff] %v3030_v18  ;;  %v3032_v55 = vpop.permute.xlu1 %512 }
 0x113   : > { %4634 = vst [vmem:[#allocation54_spill] sm:$0xff] %v3032_v55 }
 0x115   : > { %1607 = vperm.xlu1 %2386, %v3035_v14  }
 0x119   : > { %v3038_v61 = vpop.permute.xlu2 %589 }
 0x11a   : > { %4636 = vst [vmem:[#allocation56_spill] sm:$0xff] %v3038_v61 }
 0x11b   : > { %v3040_v19 = vpop.permute.xlu1 %544 }
 0x11c   : > { %4637 = vst [vmem:[#allocation57_spill] sm:$0xff] %v3040_v19  ;;  %v953_v19 = vpop.permute.xlu0 %952 }
 0x11d   : > { %vm954_vm7 = vcmp.eq.s32.totalorder %v953_v19, 1 }
 0x11e   : > { %v955_v56 = vsel %vm954_vm7, %v3068_v9, %v3065_v16  ;;  %v3095_v16 = vld [vmem:[%s2736_s29 + $0x80] sm:$0xff] }
 0x11f   : > { %4656 = vst [vmem:[#allocation76_spill] sm:$0xff] %v3095_v16 }
 0x122   : > { %v3044_v53 = vpop.permute.xlu2 %621 }
 0x123   : > { %4639 = vst [vmem:[#allocation59_spill] sm:$0xff] %v3044_v53 }
 0x124   : > { %v3042_v8 = vpop.permute.xlu1 %559 }
 0x125   : > { %4638 = vst [vmem:[#allocation58_spill] sm:$0xff] %v3042_v8 }
 0x12a   : > { %v3048_v50 = vpop.permute.xlu2 %636 }
 0x12b   : > { %4641 = vst [vmem:[#allocation61_spill] sm:$0xff] %v3048_v50 }
 0x12c   : > { %v3046_v21 = vpop.permute.xlu1 %569 }
 0x12d   : > { %4640 = vst [vmem:[#allocation60_spill] sm:$0xff] %v3046_v21  ;;  %v1573_v21 = vpop.permute.xlu0 %1572 }
 0x12e   : > { %vm1574_vm15 = vcmp.eq.s32.totalorder %v1573_v21, 1  ;;  %v3120_v21 = vld [vmem:[%s2736_s29 + $0xe0] sm:$0xff] }
 0x132   : > { %v3052_v55 = vpop.permute.xlu2 %646 }
 0x133   : > { %4643 = vst [vmem:[#allocation63_spill] sm:$0xff] %v3052_v55 }
 0x134   : > { %v3050_v18 = vpop.permute.xlu1 %584 }
 0x135   : > { %4642 = vst [vmem:[#allocation62_spill] sm:$0xff] %v3050_v18  ;;  %v981_v55 = vpop.permute.xlu0 %980 }
 0x136   : > { %vm982_vm14 = vcmp.eq.s32.totalorder %v981_v55, 1 }
 0x13a   : > { %v3056_v48 = vpop.permute.xlu2 %661 }
 0x13b   : > { %4645 = vst [vmem:[#allocation65_spill] sm:$0xff] %v3056_v48 }
 0x13d   : > { %v3054_v2 = vpop.permute.xlu1 %616  ;;  %v1594_v48 = vpop.permute.xlu0 %1593 }
 0x13e   : > { %4644 = vst [vmem:[#allocation64_spill] sm:$0xff] %v3054_v2  ;;  %vm1595_vm7 = vcmp.eq.s32.totalorder %v1594_v48, 1 }
 0x143   : > { %v960_v8 = vpop.permute.xlu2 %959 }
 0x144   : > { %vm961_vm9 = vcmp.eq.s32.totalorder %v960_v8, 1 }
 0x146   : > { %v3058_v61 = vpop.permute.xlu1 %631 }
 0x147   : > { %4646 = vst [vmem:[#allocation66_spill] sm:$0xff] %v3058_v61 }
 0x14b   : > { %v967_v50 = vpop.permute.xlu2 %966 }
 0x14c   : > { %vm968_vm10 = vcmp.eq.s32.totalorder %v967_v50, 1 }
 0x14e   : > { %v3060_v53 = vpop.permute.xlu1 %641 }
 0x14f   : > { %4647 = vst [vmem:[#allocation67_spill] sm:$0xff] %v3060_v53  ;;  %v1002_v53 = vpop.permute.xlu0 %1001 }
 0x150   : > { %vm1003_vm4 = vcmp.eq.s32.totalorder %v1002_v53, 1  ;;  %v3134_v53 = vld [vmem:[%s2736_s29 + $0xb8] sm:$0xff] }
 0x153   : > { %v1580_v2 = vpop.permute.xlu2 %1579 }
 0x154   : > { %vm1581_vm2 = vcmp.eq.s32.totalorder %v1580_v2, 1 }
 0x156   : > { %v3062_v41 = vpop.permute.xlu1 %656 }
 0x157   : > { %4648 = vst [vmem:[#allocation68_spill] sm:$0xff] %v3062_v41  ;;  %v3071_v41 = vld [vmem:[%s2736_s29 + $0x38] sm:$0xff] }
 0x158   : > { %v962_v8 = vsel %vm961_vm9, %v3071_v41, %v955_v56  ;;  %v389_v56 = vpop.permute.xlu0 %388 }
 0x159   : > { %v969_v50 = vsel %vm968_vm10, %v3074_v13, %v962_v8  ;;  %v3104_v8 = vld [vmem:[%s2736_s29 + $0x98] sm:$0xff] }
 0x15b   : > { %v988_v33 = vpop.permute.xlu2 %987 }
 0x15c   : > { %vm989_vm0 = vcmp.eq.s32.totalorder %v988_v33, 1 }
 0x15f   : > { %v1559_v18 = vpop.permute.xlu1 %1558 }
 0x160   : > { %vm1560_vm11 = vcmp.eq.s32.totalorder %v1559_v18, 1 }
 0x161   : > { %v1561_v9 = vsel %vm1560_vm11, %v3082_v27, %v3079_v58  ;;  %v3108_v27 = vld [vmem:[%s2736_s29 + $0x70] sm:$0xff] }
 0x162   : > { %v3111_v58 = vld [vmem:[%s2736_s29 + $0xb0] sm:$0xff] }
 0x163   : > { %v1601_v17 = vpop.permute.xlu2 %1600 }
 0x164   : > { %vm1602_vm9 = vcmp.eq.s32.totalorder %v1601_v17, 1 }
 0x167   : > { %v1566_v0 = vpop.permute.xlu1 %1565 }
 0x168   : > { %vm1567_vm13 = vcmp.eq.s32.totalorder %v1566_v0, 1 }
 0x169   : > { %v1568_v52 = vsel %vm1567_vm13, %v3089_v47, %v1561_v9  ;;  %v3117_v9 = vld [vmem:[%s2736_s29 + $0xc8] sm:$0xff]  ;;  %vm417_vm13 = vcmp.eq.s32.totalorder %v2943_v32, 1 }
 0x16f   : > { %v974_v61 = vpop.permute.xlu1 %973 }
 0x170   : > { %vm975_vm12 = vcmp.eq.s32.totalorder %v974_v61, 1  ;;  %v3099_v61 = vld [vmem:[%s2736_s29 + $0x58] sm:$0xff] }
 0x171   : > { %v976_v18 = vsel %vm975_vm12, %v3085_v54, %v969_v50  ;;  %4657 = vst [vmem:[#allocation77_spill] sm:$0xff] %v3099_v61  ;;  %v1575_v13 = vsel %vm1574_vm15, %v3099_v61, %v1568_v52  ;;  %v1009_v50 = vpop.permute.xlu2 %1008  ;;  %v3114_v54 = vld [vmem:[%s2736_s29 + $0x88] sm:$0xff]  ;;  %v3126_v61 = vld [vmem:[%s2736_s29 + $0xa0] sm:$0xff]  ;;  %vm407_vm12 = vcmp.eq.s32.totalorder %v2929_v29, 1 }
 0x172   : > { %v983_v0 = vsel %vm982_vm14, %v3095_v16, %v976_v18  ;;  %v1582_v18 = vsel %vm1581_vm2, %v3108_v27, %v1575_v13  ;;  %vm1010_vm5 = vcmp.eq.s32.totalorder %v1009_v50, 1  ;;  %4658 = vst [vmem:[#allocation78_spill] sm:$0xff] %v3126_v61  ;;  %v3137_v13 = vld [vmem:[%s2736_s29 + $0xd0] sm:$0xff]  ;;  %vm412_vm14 = vcmp.eq.s32.totalorder %v2865_v39, 1  ;;  %v4669_v39 = vld [vmem:[#allocation33_spill] sm:$0xff] }
 0x173   : > { %v990_v52 = vsel %vm989_vm0, %v3104_v8, %v983_v0  ;;  %vm422_vm0 = vcmp.eq.s32.totalorder %v2886_v49, 1  ;;  %vm437_vm2 = vcmp.eq.s32.totalorder %v2908_v60, 1 }
 0x177   : > { %v1587_v19 = vpop.permute.xlu1 %1586 }
 0x178   : > { %vm1588_vm1 = vcmp.eq.s32.totalorder %v1587_v19, 1 }
 0x179   : > { %v1589_v19 = vsel %vm1588_vm1, %v3114_v54, %v1582_v18  ;;  %vm432_vm1 = vcmp.eq.s32.totalorder %v2955_v38, 1  ;;  %v4674_v38 = vld [vmem:[#allocation35_spill] sm:$0xff] }
 0x17a   : > { %v1596_v0 = vsel %vm1595_vm7, %v3126_v61, %v1589_v19 }
 0x17f   : > { %v995_v55 = vpop.permute.xlu1 %994 }
 0x180   : > { %vm996_vm3 = vcmp.eq.s32.totalorder %v995_v55, 1  ;;  %v1615_v55 = vpop.permute.xlu0 %1614 }
 0x181   : > { %v997_v33 = vsel %vm996_vm3, %v3111_v58, %v990_v52  ;;  %v3141_v52 = vld [vmem:[%s2736_s29 + $0xe8] sm:$0xff]  ;;  %vm1616_vm11 = vcmp.eq.s32.totalorder %v1615_v55, 1 }
 0x182   : > { %v1004_v47 = vsel %vm1003_vm4, %v3117_v9, %v997_v33  ;;  %v1603_v33 = vsel %vm1602_vm9, %v3134_v53, %v1596_v0  ;;  %v390_v0 = vmin.f32 %v2934_v30, %v389_v56 }
 0x183   : > { %v1011_v2 = vsel %vm1010_vm5, %v3120_v21, %v1004_v47 }
 0x184   : > { %v1012_v16 = vadd.f32 %v1011_v2, %v2918_v63 }
 0x186   : > { %v1013_v50 = vmin.f32 %v1012_v16, %v2914_v62 }
 0x187   : > { %v1608_v18 = vpop.permute.xlu1 %1607 }
 0x188   : > { %vm1609_vm10 = vcmp.eq.s32.totalorder %v1608_v18, 1  ;;  %v1014_v48 = vsub.f32 %v1013_v50, %v2781_v15  ;;  %v4499_v50 = vmov 7  }
 0x189   : > { %v1610_v47 = vsel %vm1609_vm10, %v3137_v13, %v1603_v33  ;;  %2390 = vset.pattern.permute.xlu2 %v4499_v50  ;;  %2389 = vset.pattern.permute.xlu1 %v4499_v50 }
 0x18a   : > { %v1617_v19 = vsel %vm1616_vm11, %v3141_v52, %v1610_v47  ;;  %v1015_v2 = vsel %vm285_vm8, %v1014_v48, 1e+09  ;;  %v4660_v47 = vmov 4  }
 0x18b   : > { %v1618_v61 = vadd.f32 %v1617_v19, %v2918_v63  ;;  %1016 = vrot.lane.b32.xlu1 %v1015_v2, %s2589_s23  ;;  %v4659_v63 = vmov 3  }
 0x18d   : > { %v1619_v16 = vmin.f32 %v1618_v61, %v2914_v62 }
 0x18f   : > { %v1620_v17 = vsub.f32 %v1619_v16, %v2781_v15 }
 0x191   : > { %v1621_v55 = vsel %vm285_vm8, %v1620_v17, 1e+09 }
 0x192   : > { %1622 = vrot.lane.b32.xlu2 %v1621_v55, %s2589_s23 }
 0x193   : > { %391 = vrot.lane.b32.xlu1 %v390_v0, %s2594_s8 }
 0x19a   : > { %698 = vperm.xlu2 %2390, %v2750_v4  }
 0x1a2   : > { %713 = vperm.xlu2 %2390, %v2759_v7  }
 0x1aa   : > { %2392 = vset.pattern.permute.xlu2 %v4659_v63 }
 0x1ab   : > { %1639 = vperm.xlu2 %2392, %v2964_v43  }
 0x1ec   : > { %v1623_v30 = vpop.permute.xlu2 %1622 }
 0x1ed   : > { %v1624_v61 = vmin.f32 %v1621_v55, %v1623_v30 }
 0x1ef   : > { %1625 = vrot.lane.b32.xlu1 %v1624_v61, %s2594_s8 }
 0x1f4   : > { %v3179_v19 = vpop.permute.xlu2 %698 }
 0x1f5   : > { %4661 = vst [vmem:[#allocation79_spill] sm:$0xff] %v3179_v19 }
 0x1f7   : > { %693 = vperm.xlu1 %2389, %v2753_v5  }
 0x1fd   : > { %v1017_v56 = vpop.permute.xlu1 %1016 }
 0x1fe   : > { %v1018_v18 = vmin.f32 %v1015_v2, %v1017_v56  ;;  %v3181_v2 = vpop.permute.xlu2 %713 }
 0x1ff   : > { %708 = vperm.xlu1 %2389, %v2747_v3   ;;  %4662 = vst [vmem:[#allocation80_spill] sm:$0xff] %v3181_v2  ;;  %v408_v3 = vsel %vm407_vm12, %v2857_v35, %v2854_v34 }
 0x200   : > { %1019 = vrot.lane.b32.xlu0 %v1018_v18, %s2594_s8 }
 0x205   : > { %v392_v33 = vpop.permute.xlu1 %391 }
 0x206   : > { %v393_v48 = vmin.f32 %v390_v0, %v392_v33  ;;  %v3183_v16 = vpop.permute.xlu2 %1639  ;;  %v426_v33 = vpop.permute.xlu0 %425 }
 0x207   : > { %2391 = vset.pattern.permute.xlu1 %v4659_v63  ;;  %vm427_vm15 = vcmp.eq.s32.totalorder %v426_v33, 1  ;;  %v4671_v33 = vld [vmem:[#allocation34_spill] sm:$0xff]  ;;  %vm1641_vm12 = vcmp.eq.s32.totalorder %v3183_v16, 1 }
 0x208   : > { %1038 = vperm.xlu0 %2388, %v2952_v36   ;;  %394 = vrot.lane.b32.xlu2 %v393_v48, %s2596_s10 }
 0x209   : > { %1033 = vperm.xlu1 %2391, %v2805_v20  }
 0x210   : > { %1654 = vperm.xlu0 %2388, %v2984_v1  }
 0x218   : > { %1058 = vperm.xlu0 %2388, %v2998_v59  }
 0x220   : > { %1669 = vperm.xlu0 %2388, %v3012_v11  }
 0x228   : > { %1073 = vperm.xlu0 %2388, %v3026_v23  }
 0x230   : > { %2393 = vset.pattern.permute.xlu0 %v4660_v47 }
 0x231   : > { %482 = vperm.xlu0 %2393, %v2750_v4  }
 0x239   : > { %507 = vperm.xlu0 %2393, %v2774_v12  }
 0x261   : > { %v1626_v17 = vpop.permute.xlu1 %1625 }
 0x262   : > { %v1627_v0 = vmin.f32 %v1624_v61, %v1626_v17  ;;  %v395_v55 = vpop.permute.xlu2 %394  ;;  %v4664_v61 = vmov 7  }
 0x263   : > { %v396_v63 = vmin.f32 %v393_v48, %v395_v55 }
 0x264   : > { %1628 = vrot.lane.b32.xlu2 %v1627_v0, %s2596_s10 }
 0x265   : > { %v397_v30 = vadd.f32 %v396_v63, %v2781_v15 }
 0x267   : > { %v3188_v56 = vmin.f32 %v397_v30, %v2914_v62 }
 0x269   : > { %4663 = vst [vmem:[#allocation81_spill] sm:$0xff] %v3188_v56  ;;  %449 = vrot.lane.b32.xlu0 %v3188_v56, %s2589_s23  ;;  %v453_v60 = vadd.f32 %v3188_v56, %v4674_v38 }
 0x26c   : > { %1043 = vperm.xlu2 %2392, %v2970_v44  }
 0x272   : > { %v1020_v50 = vpop.permute.xlu0 %1019 }
 0x273   : > { %v1021_v2 = vmin.f32 %v1018_v18, %v1020_v50 }
 0x274   : > { %1048 = vperm.xlu2 %2392, %v2993_v57  }
 0x275   : > { %1022 = vrot.lane.b32.xlu1 %v1021_v2, %s2596_s10 }
 0x27a   : > { %v3203_v50 = vpop.permute.xlu0 %1038 }
 0x27b   : > { %vm1040_vm7 = vcmp.eq.s32.totalorder %v3203_v50, 1 }
 0x27c   : > { %1659 = vperm.xlu2 %2392, %v3007_v6  }
 0x27d   : > { %1644 = vperm.xlu1 %2391, %v2979_v51  }
 0x282   : > { %v3206_v18 = vpop.permute.xlu0 %1654 }
 0x284   : > { %1063 = vperm.xlu2 %2392, %v3021_v28  }
 0x285   : > { %1649 = vperm.xlu1 %2391, %v2815_v22  }
 0x28a   : > { %v3209_v48 = vpop.permute.xlu0 %1058 }
 0x28c   : > { %1674 = vperm.xlu2 %2392, %v3035_v14  }
 0x28d   : > { %1053 = vperm.xlu1 %2391, %v2824_v24  }
 0x292   : > { %v3212_v17 = vpop.permute.xlu0 %1669 }
 0x294   : > { %2394 = vset.pattern.permute.xlu2 %v4664_v61 }
 0x295   : > { %1664 = vperm.xlu1 %2391, %v2832_v25  }
 0x29a   : > { %v3214_v63 = vpop.permute.xlu0 %1073 }
 0x29d   : > { %1068 = vperm.xlu1 %2391, %v2839_v26  }
 0x2a5   : > { %1679 = vperm.xlu1 %2391, %v2941_v31  }
 0x2ad   : > { %2395 = vset.pattern.permute.xlu1 %v4664_v61  ;;  %v3226_v61 = vpop.permute.xlu0 %482 }
 0x2b5   : > { %v3238_v7 = vpop.permute.xlu0 %507 }
 0x2b6   : > { %4667 = vst [vmem:[#allocation84_spill] sm:$0xff] %v3238_v7 }
 0x2be   : > { %v1629_v55 = vpop.permute.xlu2 %1628 }
 0x2bf   : > { %v1630_v30 = vmin.f32 %v1627_v0, %v1629_v55  ;;  %v413_v0 = vsel %vm412_vm14, %v2862_v37, %v408_v3  ;;  %v3230_v55 = vpop.permute.xlu1 %693  ;;  %v4680_v37 = vld [vmem:[#allocation76_spill] sm:$0xff] }
 0x2c0   : > { %4666 = vst [vmem:[#allocation83_spill] sm:$0xff] %v3230_v55 }
 0x2c1   : > { %v1631_v19 = vadd.f32 %v1630_v30, %v2781_v15 }
 0x2c3   : > { %v3218_v5 = vmin.f32 %v1631_v19, %v2914_v62  ;;  %v418_v19 = vsel %vm417_vm13, %v2868_v40, %v413_v0  ;;  %v4670_v0 = vld [vmem:[#allocation41_spill] sm:$0xff]  ;;  %vm1060_vm13 = vcmp.eq.s32.totalorder %v3209_v48, 1 }
 0x2c4   : > { %v423_v29 = vsel %vm422_vm0, %v2875_v42, %v418_v19  ;;  %vm442_vm3 = vcmp.eq.s32.totalorder %v4670_v0, 1  ;;  %v4672_v40 = vld [vmem:[#allocation37_spill] sm:$0xff] }
 0x2c5   : > { %4665 = vst [vmem:[#allocation82_spill] sm:$0xff] %v3218_v5  ;;  %1683 = vrot.lane.b32.xlu0 %v3218_v5, %s2589_s23  ;;  %v428_v30 = vsel %vm427_vm15, %v2880_v45, %v423_v29  ;;  %vm447_vm4 = vcmp.eq.s32.totalorder %v4672_v40, 1  ;;  %v4673_v29 = vld [vmem:[#allocation36_spill] sm:$0xff] }
 0x2c6   : > { %v433_v32 = vsel %vm432_vm1, %v2883_v46, %v428_v30 }
 0x2c7   : > { %v3241_v3 = vpop.permute.xlu1 %708  ;;  %v438_v55 = vsel %vm437_vm2, %v4669_v39, %v433_v32  ;;  %v4677_v39 = vld [vmem:[#allocation70_spill] sm:$0xff]  ;;  %vm1656_vm2 = vcmp.eq.s32.totalorder %v3206_v18, 1 }
 0x2c8   : > { %4668 = vst [vmem:[#allocation85_spill] sm:$0xff] %v3241_v3  ;;  %v443_v49 = vsel %vm442_vm3, %v4671_v33, %v438_v55  ;;  %v4676_v33 = vld [vmem:[#allocation69_spill] sm:$0xff]  ;;  %vm1075_vm3 = vcmp.eq.s32.totalorder %v3214_v63, 1  ;;  %v4685_v18 = vld [vmem:[#allocation78_spill] sm:$0xff] }
 0x2c9   : > { %v448_v45 = vsel %vm447_vm4, %v4673_v29, %v443_v49 }
 0x2cf   : > { %v1034_v3 = vpop.permute.xlu1 %1033 }
 0x2d0   : > { %vm1035_vm5 = vcmp.eq.s32.totalorder %v1034_v3, 1 }
 0x2db   : > { %v450_v19 = vpop.permute.xlu0 %449 }
 0x2dc   : > { %v451_v30 = vsel %vm378_vm6, %v4674_v38, %v450_v19 }
 0x2dd   : > { %v452_v46 = vadd.f32 %v451_v30, %v448_v45  ;;  %v1044_v45 = vpop.permute.xlu2 %1043 }
 0x2de   : > { %vm1045_vm9 = vcmp.eq.s32.totalorder %v1044_v45, 1  ;;  %v4681_v45 = vld [vmem:[#allocation72_spill] sm:$0xff] }
 0x2df   : > { %v454_v7 = vmin.f32 %v452_v46, %v453_v60 }
 0x2e1   : > { %v455_v32 = vsub.f32 %v454_v7, %v2781_v15 }
 0x2e3   : > { %v3256_v55 = vsel %vm285_vm8, %v455_v32, 1e+09 }
 0x2e4   : > { %457 = vrot.lane.b32.xlu1 %v3256_v55, %s2589_s23 }
 0x2e5   : > { %v1049_v7 = vpop.permute.xlu2 %1048 }
 0x2e6   : > { %vm1050_vm10 = vcmp.eq.s32.totalorder %v1049_v7, 1  ;;  %v4682_v7 = vld [vmem:[#allocation73_spill] sm:$0xff] }
 0x2e7   : > { %v1023_v40 = vpop.permute.xlu1 %1022 }
 0x2e8   : > { %v1024_v0 = vmin.f32 %v1021_v2, %v1023_v40  ;;  %v1036_v2 = vsel %vm1035_vm5, %v4677_v39, %v4676_v33  ;;  %v4678_v40 = vld [vmem:[#allocation71_spill] sm:$0xff] }
 0x2ea   : > { %v1025_v49 = vadd.f32 %v1024_v0, %v2781_v15 }
 0x2ec   : > { %v3262_v19 = vmin.f32 %v1025_v49, %v2914_v62  ;;  %v1041_v62 = vsel %vm1040_vm7, %v3071_v41, %v1036_v2  ;;  %v4679_v49 = vld [vmem:[#allocation74_spill] sm:$0xff]  ;;  %v1642_v2 = vsel %vm1641_vm12, %v4682_v7, %v4681_v45  ;;  %vm1671_vm7 = vcmp.eq.s32.totalorder %v3212_v17, 1 }
 0x2ed   : > { %v1660_v60 = vpop.permute.xlu2 %1659  ;;  %v1046_v0 = vsel %vm1045_vm9, %v4678_v40, %v1041_v62  ;;  %vm484_vm12 = vcmp.eq.s32.totalorder %v3226_v61, 1  ;;  %v4705_v61 = vld [vmem:[#allocation40_spill] sm:$0xff] }
 0x2ee   : > { %4675 = vst [vmem:[#allocation41_spill] sm:$0xff] %v3262_v19  ;;  %1077 = vrot.lane.b32.xlu2 %v3262_v19, %s2589_s23  ;;  %v1051_v42 = vsel %vm1050_vm10, %v4679_v49, %v1046_v0  ;;  %v4684_v0 = vld [vmem:[#allocation77_spill] sm:$0xff]  ;;  %vm1661_vm5 = vcmp.eq.s32.totalorder %v1660_v60, 1 }
 0x2ef   : > { %v1645_v46 = vpop.permute.xlu1 %1644 }
 0x2f0   : > { %vm1646_vm14 = vcmp.eq.s32.totalorder %v1645_v46, 1 }
 0x2f5   : > { %v1064_v56 = vpop.permute.xlu2 %1063 }
 0x2f6   : > { %vm1065_vm1 = vcmp.eq.s32.totalorder %v1064_v56, 1 }
 0x2f7   : > { %v1650_v30 = vpop.permute.xlu1 %1649 }
 0x2f8   : > { %vm1651_vm15 = vcmp.eq.s32.totalorder %v1650_v30, 1  ;;  %v1081_v30 = vadd.f32 %v3262_v19, %v4674_v38  ;;  %v4696_v19 = vld [vmem:[#allocation39_spill] sm:$0xff] }
 0x2fd   : > { %v1675_v3 = vpop.permute.xlu2 %1674 }
 0x2fe   : > { %vm1676_vm10 = vcmp.eq.s32.totalorder %v1675_v3, 1 }
 0x2ff   : > { %v1054_v32 = vpop.permute.xlu1 %1053 }
 0x300   : > { %vm1055_vm11 = vcmp.eq.s32.totalorder %v1054_v32, 1  ;;  %v4683_v32 = vld [vmem:[#allocation75_spill] sm:$0xff] }
 0x301   : > { %v1056_v35 = vsel %vm1055_vm11, %v4680_v37, %v1051_v42  ;;  %v1647_v62 = vsel %vm1646_vm14, %v4683_v32, %v1642_v2  ;;  %vm479_vm11 = vcmp.eq.s32.totalorder %v4696_v19, 1  ;;  %vm494_vm14 = vcmp.eq.s32.totalorder %v4705_v61, 1 }
 0x302   : > { %v1061_v50 = vsel %vm1060_vm13, %v3104_v8, %v1056_v35  ;;  %v1652_v49 = vsel %vm1651_vm15, %v4684_v0, %v1647_v62 }
 0x303   : > { %v1066_v42 = vsel %vm1065_vm1, %v3111_v58, %v1061_v50  ;;  %v1657_v48 = vsel %vm1656_vm2, %v3108_v27, %v1652_v49 }
 0x304   : > { %v1662_v50 = vsel %vm1661_vm5, %v3114_v54, %v1657_v48 }
 0x307   : > { %v1665_v29 = vpop.permute.xlu1 %1664 }
 0x308   : > { %vm1666_vm4 = vcmp.eq.s32.totalorder %v1665_v29, 1 }
 0x309   : > { %v1667_v2 = vsel %vm1666_vm4, %v4685_v18, %v1662_v50 }
 0x30f   : > { %v1069_v34 = vpop.permute.xlu1 %1068 }
 0x310   : > { %vm1070_vm0 = vcmp.eq.s32.totalorder %v1069_v34, 1 }
 0x311   : > { %v1071_v16 = vsel %vm1070_vm0, %v3117_v9, %v1066_v42  ;;  %v1672_v42 = vsel %vm1671_vm7, %v3134_v53, %v1667_v2  ;;  %v4686_v2 = vld [vmem:[#allocation19_spill] sm:$0xff] }
 0x312   : > { %v1076_v46 = vsel %vm1075_vm3, %v3120_v21, %v1071_v16  ;;  %v1677_v48 = vsel %vm1676_vm10, %v3137_v13, %v1672_v42 }
 0x317   : > { %v1680_v62 = vpop.permute.xlu1 %1679 }
 0x318   : > { %vm1681_vm9 = vcmp.eq.s32.totalorder %v1680_v62, 1 }
 0x319   : > { %v1682_v17 = vsel %vm1681_vm9, %v3141_v52, %v1677_v48  ;;  %v4689_v48 = vmov 0  }
 0x337   : > { %v1684_v29 = vpop.permute.xlu0 %1683 }
 0x338   : > { %v1685_v16 = vsel %vm378_vm6, %v4674_v38, %v1684_v29 }
 0x348   : > { %v1078_v35 = vpop.permute.xlu2 %1077 }
 0x349   : > { %v1079_v34 = vsel %vm378_vm6, %v4674_v38, %v1078_v35  ;;  %v1686_v35 = vadd.f32 %v1685_v16, %v1682_v17  ;;  %v4688_v16 = vld [vmem:[#allocation18_spill] sm:$0xff] }
 0x34a   : > { %v1080_v56 = vadd.f32 %v1079_v34, %v1076_v46  ;;  %v1687_v46 = vadd.f32 %v3218_v5, %v4674_v38 }
 0x34c   : > { %v1082_v63 = vmin.f32 %v1080_v56, %v1081_v30  ;;  %v1688_v30 = vmin.f32 %v1686_v35, %v1687_v46 }
 0x34e   : > { %v1083_v49 = vsub.f32 %v1082_v63, %v2781_v15  ;;  %v1689_v3 = vsub.f32 %v1688_v30, %v2781_v15  ;;  %v4687_v63 = vld [vmem:[#allocation21_spill] sm:$0xff]  ;;  %v3343_v30 = vstv %s467_s11 }
 0x350   : > { %v1084_v60 = vsel %vm285_vm8, %v1083_v49, 1e+09  ;;  %v1690_v50 = vsel %vm285_vm8, %v1689_v3, 1e+09 }
 0x351   : > { %1085 = vrot.lane.b32.xlu1 %v1084_v60, %s2589_s23 }
 0x356   : > { %v458_v34 = vpop.permute.xlu1 %457 }
 0x357   : > { %v459_v56 = vmin.f32 %v3256_v55, %v458_v34 }
 0x359   : > { %460 = vrot.lane.b32.xlu2 %v459_v56, %s2594_s8 }
 0x361   : > { %1691 = vrot.lane.b32.xlu2 %v1690_v50, %s2589_s23 }
 0x369   : > { %718 = vperm.xlu2 %2394, %v4686_v2  }
 0x371   : > { %733 = vperm.xlu2 %2394, %v4687_v63  }
 0x379   : > { %2397 = vset.pattern.permute.xlu2 %v4660_v47 }
 0x37a   : > { %1102 = vperm.xlu2 %2397, %v2805_v20  }
 0x3b3   : > { %v461_v62 = vpop.permute.xlu2 %460 }
 0x3b4   : > { %v462_v17 = vmin.f32 %v459_v56, %v461_v62  ;;  %v4691_v62 = vld [vmem:[#allocation20_spill] sm:$0xff] }
 0x3bb   : > { %v1692_v55 = vpop.permute.xlu2 %1691 }
 0x3bc   : > { %v1693_v29 = vmin.f32 %v1690_v50, %v1692_v55  ;;  %v469_v55 = vadd.f32 %v3343_v30, %v4691_v62 }
 0x3be   : > { %1694 = vrot.lane.b32.xlu1 %v1693_v29, %s2594_s8 }
 0x3c3   : > { %v1086_v49 = vpop.permute.xlu1 %1085  ;;  %v3372_v5 = vpop.permute.xlu2 %718 }
 0x3c4   : > { %v1087_v42 = vmin.f32 %v1084_v60, %v1086_v49  ;;  %v4690_v60 = vmov 5   ;;  %4695 = vst [vmem:[#allocation70_spill] sm:$0xff] %v3372_v5  ;;  %v4703_v5 = vld [vmem:[#allocation29_spill] sm:$0xff] }
 0x3c6   : > { %1088 = vrot.lane.b32.xlu0 %v1087_v42, %s2594_s8  ;;  %728 = vperm.xlu1 %2395, %v4688_v16   ;;  %v4698_v16 = vld [vmem:[#allocation27_spill] sm:$0xff] }
 0x3ce   : > { %1708 = vperm.xlu0 %2393, %v2964_v43   ;;  %2396 = vset.pattern.permute.xlu1 %v4689_v48  ;;  %v4697_v48 = vld [vmem:[#allocation26_spill] sm:$0xff] }
 0x3cf   : > { %760 = vperm.xlu1 %2396, %v4686_v2  }
 0x3d6   : > { %463 = vrot.lane.b32.xlu0 %v462_v17, %s2596_s10 }
 0x3d7   : > { %2398 = vset.pattern.permute.xlu1 %v4660_v47 }
 0x3d8   : > { %1107 = vperm.xlu1 %2398, %v2952_v36  }
 0x3de   : > { %1117 = vperm.xlu0 %2393, %v2993_v57  }
 0x3e6   : > { %1728 = vperm.xlu0 %2393, %v3007_v6  }
 0x3ee   : > { %1132 = vperm.xlu0 %2393, %v3021_v28   ;;  %v4714_v28 = vld [vmem:[#allocation34_spill] sm:$0xff] }
 0x3f6   : > { %1743 = vperm.xlu0 %2393, %v3035_v14   ;;  %v3383_v14 = vpop.permute.xlu2 %733 }
 0x3f7   : > { %4702 = vst [vmem:[#allocation76_spill] sm:$0xff] %v3383_v14  ;;  %v4712_v14 = vld [vmem:[#allocation33_spill] sm:$0xff] }
 0x3fe   : > { %2399 = vset.pattern.permute.xlu0 %v4690_v60 }
 0x3ff   : > { %554 = vperm.xlu0 %2399, %v2750_v4  }
 0x407   : > { %579 = vperm.xlu0 %2399, %v2774_v12  }
 0x430   : > { %v1695_v35 = vpop.permute.xlu1 %1694 }
 0x431   : > { %v3332_v46 = vmin.f32 %v1693_v29, %v1695_v35 }
 0x433   : > { %1697 = vrot.lane.b32.xlu2 %v3332_v46, %s2596_s10 }
 0x438   : > { %v1089_v47 = vpop.permute.xlu0 %1088 }
 0x439   : > { %v1090_v34 = vmin.f32 %v1087_v42, %v1089_v47 }
 0x43b   : > { %1713 = vperm.xlu2 %2397, %v2979_v51   ;;  %1091 = vrot.lane.b32.xlu1 %v1090_v34, %s2596_s10 }
 0x440   : > { %v3338_v56 = vpop.permute.xlu0 %1708 }
 0x443   : > { %1718 = vperm.xlu2 %2397, %v2815_v22   ;;  %1112 = vperm.xlu1 %2398, %v2970_v44   ;;  %v4701_v22 = vld [vmem:[#allocation48_spill] sm:$0xff] }
 0x444   : > { %vm489_vm13 = vcmp.eq.s32.totalorder %v4701_v22, 1 }
 0x448   : > { %v464_v3 = vpop.permute.xlu0 %463 }
 0x449   : > { %v465_v50 = vmin.f32 %v462_v17, %v464_v3  ;;  %v3362_v17 = vpop.permute.xlu1 %728 }
 0x44a   : > { %4693 = vst [vmem:[#allocation35_spill] sm:$0xff] %v3362_v17 }
 0x44b   : > { %v466_v29 = vadd.f32 %v465_v50, %v2781_v15  ;;  %1723 = vperm.xlu1 %2398, %v2984_v1   ;;  %1122 = vperm.xlu2 %2397, %v2824_v24  }
 0x44d   : > { %v3350_v49 = vmin.f32 %v466_v29, %v469_v55 }
 0x44f   : > { %4692 = vst [vmem:[#allocation37_spill] sm:$0xff] %v3350_v49  ;;  %521 = vrot.lane.b32.xlu0 %v3350_v49, %s2589_s23 }
 0x450   : > { %v3360_v42 = vpop.permute.xlu0 %1117 }
 0x451   : > { %v3366_v47 = vpop.permute.xlu1 %760  ;;  %vm1119_vm9 = vcmp.eq.s32.totalorder %v3360_v42, 1 }
 0x452   : > { %4694 = vst [vmem:[#allocation69_spill] sm:$0xff] %v3366_v47 }
 0x453   : > { %1127 = vperm.xlu1 %2398, %v2998_v59   ;;  %1733 = vperm.xlu2 %2397, %v2832_v25  }
 0x458   : > { %v3364_v35 = vpop.permute.xlu0 %1728 }
 0x459   : > { %v1108_v50 = vpop.permute.xlu1 %1107 }
 0x45a   : > { %vm1109_vm5 = vcmp.eq.s32.totalorder %v1108_v50, 1 }
 0x45b   : > { %1738 = vperm.xlu1 %2398, %v3012_v11   ;;  %1137 = vperm.xlu2 %2397, %v2839_v26   ;;  %v4699_v26 = vld [vmem:[#allocation28_spill] sm:$0xff] }
 0x460   : > { %v3368_v3 = vpop.permute.xlu0 %1132 }
 0x463   : > { %1142 = vperm.xlu1 %2398, %v3026_v23   ;;  %1748 = vperm.xlu2 %2397, %v2941_v31   ;;  %v480_v31 = vsel %vm479_vm11, %v4698_v16, %v4697_v48 }
 0x464   : > { %v485_v25 = vsel %vm484_vm12, %v4699_v26, %v480_v31  ;;  %v4707_v26 = vld [vmem:[#allocation51_spill] sm:$0xff]  ;;  %vm1134_vm12 = vcmp.eq.s32.totalorder %v3368_v3, 1 }
 0x465   : > { %v490_v51 = vsel %vm489_vm13, %v4703_v5, %v485_v25  ;;  %vm499_vm15 = vcmp.eq.s32.totalorder %v4707_v26, 1  ;;  %v4708_v31 = vld [vmem:[#allocation31_spill] sm:$0xff]  ;;  %v4711_v5 = vld [vmem:[#allocation32_spill] sm:$0xff] }
 0x466   : > { %v4716_v26 = vld [vmem:[#allocation36_spill] sm:$0xff] }
 0x468   : > { %v3370_v29 = vpop.permute.xlu0 %1743 }
 0x471   : > { %v3379_v24 = vpop.permute.xlu0 %554 }
 0x472   : > { %4700 = vst [vmem:[#allocation71_spill] sm:$0xff] %v3379_v24  ;;  %v4713_v24 = vld [vmem:[#allocation54_spill] sm:$0xff] }
 0x473   : > { %vm514_vm2 = vcmp.eq.s32.totalorder %v4713_v24, 1 }
 0x479   : > { %v3395_v22 = vpop.permute.xlu0 %579 }
 0x4ad   : > { %v1092_v63 = vpop.permute.xlu1 %1091 }
 0x4ae   : > { %v1093_v17 = vmin.f32 %v1090_v34, %v1092_v63  ;;  %v4706_v63 = vld [vmem:[#allocation30_spill] sm:$0xff]  ;;  %v4709_v34 = vld [vmem:[#allocation84_spill] sm:$0xff] }
 0x4af   : > { %v495_v16 = vsel %vm494_vm14, %v4706_v63, %v490_v51  ;;  %vm509_vm0 = vcmp.eq.s32.totalorder %v4709_v34, 1  ;;  %v4715_v51 = vld [vmem:[#allocation45_spill] sm:$0xff]  ;;  %v525_v34 = vadd.f32 %v3350_v49, %v4674_v38 }
 0x4b0   : > { %v1094_v47 = vadd.f32 %v1093_v17, %v2781_v15  ;;  %v500_v48 = vsel %vm499_vm15, %v4708_v31, %v495_v16  ;;  %v4710_v17 = vld [vmem:[#allocation42_spill] sm:$0xff]  ;;  %vm519_vm3 = vcmp.eq.s32.totalorder %v4715_v51, 1  ;;  %vm1710_vm15 = vcmp.eq.s32.totalorder %v3338_v56, 1 }
 0x4b1   : > { %vm504_vm1 = vcmp.eq.s32.totalorder %v4710_v17, 1 }
 0x4b2   : > { %v3386_v19 = vmin.f32 %v1094_v47, %v469_v55  ;;  %v505_v25 = vsel %vm504_vm1, %v4711_v5, %v500_v48  ;;  %v1103_v47 = vpop.permute.xlu2 %1102 }
 0x4b3   : > { %v510_v61 = vsel %vm509_vm0, %v4712_v14, %v505_v25  ;;  %vm1104_vm4 = vcmp.eq.s32.totalorder %v1103_v47, 1 }
 0x4b4   : > { %4704 = vst [vmem:[#allocation72_spill] sm:$0xff] %v3386_v19  ;;  %1146 = vrot.lane.b32.xlu0 %v3386_v19, %s2589_s23  ;;  %v515_v6 = vsel %vm514_vm2, %v4714_v28, %v510_v61 }
 0x4b5   : > { %v520_v16 = vsel %vm519_vm3, %v4716_v26, %v515_v6  ;;  %v1113_v61 = vpop.permute.xlu1 %1112  ;;  %vm1730_vm3 = vcmp.eq.s32.totalorder %v3364_v35, 1 }
 0x4b6   : > { %vm1114_vm7 = vcmp.eq.s32.totalorder %v1113_v61, 1 }
 0x4ba   : > { %v1698_v17 = vpop.permute.xlu2 %1697 }
 0x4bb   : > { %v1699_v24 = vmin.f32 %v3332_v46, %v1698_v17  ;;  %v1105_v46 = vsel %vm1104_vm4, %v4677_v39, %v4676_v33 }
 0x4bd   : > { %v1700_v6 = vadd.f32 %v1699_v24, %v2781_v15 }
 0x4bf   : > { %v3415_v25 = vmin.f32 %v1700_v6, %v469_v55 }
 0x4c1   : > { %v522_v63 = vpop.permute.xlu0 %521  ;;  %4717 = vst [vmem:[#allocation73_spill] sm:$0xff] %v3415_v25 }
 0x4c2   : > { %v523_v31 = vsel %vm378_vm6, %v3343_v30, %v522_v63  ;;  %v1714_v51 = vpop.permute.xlu2 %1713  ;;  %v1724_v63 = vpop.permute.xlu1 %1723 }
 0x4c3   : > { %v524_v48 = vadd.f32 %v523_v31, %v520_v16  ;;  %vm1715_vm0 = vcmp.eq.s32.totalorder %v1714_v51, 1  ;;  %vm1725_vm2 = vcmp.eq.s32.totalorder %v1724_v63, 1 }
 0x4c5   : > { %v526_v5 = vmin.f32 %v524_v48, %v525_v34  ;;  %v1110_v34 = vsel %vm1109_vm5, %v3071_v41, %v1105_v46  ;;  %v1711_v46 = vsel %vm1710_vm15, %v4682_v7, %v4681_v45  ;;  %vm581_vm15 = vcmp.eq.s32.totalorder %v3395_v22, 1 }
 0x4c6   : > { %v1115_v55 = vsel %vm1114_vm7, %v4678_v40, %v1110_v34  ;;  %v1716_v34 = vsel %vm1715_vm0, %v4683_v32, %v1711_v46  ;;  %vm1745_vm7 = vcmp.eq.s32.totalorder %v3370_v29, 1  ;;  %v4723_v46 = vld [vmem:[#allocation49_spill] sm:$0xff] }
 0x4c7   : > { %v527_v14 = vsub.f32 %v526_v5, %v2781_v15  ;;  %v4718_v5 = vld [vmem:[#allocation74_spill] sm:$0xff] }
 0x4c9   : > { %v528_v28 = vsel %vm285_vm8, %v527_v14, 1e+09  ;;  %v1120_v14 = vsel %vm1119_vm9, %v4718_v5, %v1115_v55 }
 0x4ca   : > { %529 = vrot.lane.b32.xlu1 %v528_v28, %s2589_s23  ;;  %v1719_v26 = vpop.permute.xlu2 %1718  ;;  %v1128_v16 = vpop.permute.xlu1 %1127 }
 0x4cb   : > { %vm1129_vm11 = vcmp.eq.s32.totalorder %v1128_v16, 1  ;;  %vm1720_vm1 = vcmp.eq.s32.totalorder %v1719_v26, 1 }
 0x4cc   : > { %v1721_v55 = vsel %vm1720_vm1, %v4684_v0, %v1716_v34  ;;  %v1756_v0 = vadd.f32 %v3415_v25, %v4674_v38 }
 0x4cd   : > { %v1726_v5 = vsel %vm1725_vm2, %v3108_v27, %v1721_v55 }
 0x4d2   : > { %1752 = vrot.lane.b32.xlu1 %v3415_v25, %s2589_s23  ;;  %v1123_v31 = vpop.permute.xlu2 %1122  ;;  %v1739_v48 = vpop.permute.xlu1 %1738  ;;  %v3566_v25 = vld [vmem:[%s2736_s29 + $0x78] sm:$0xff] }
 0x4d3   : > { %vm1124_vm10 = vcmp.eq.s32.totalorder %v1123_v31, 1  ;;  %vm1740_vm5 = vcmp.eq.s32.totalorder %v1739_v48, 1  ;;  %4746 = vst [vmem:[#allocation30_spill] sm:$0xff] %v3566_v25 }
 0x4d4   : > { %v1125_v47 = vsel %vm1124_vm10, %v4680_v37, %v1120_v14  ;;  %v1150_v37 = vadd.f32 %v3386_v19, %v4674_v38  ;;  %v1731_v14 = vsel %vm1730_vm3, %v3114_v54, %v1726_v5  ;;  %v4724_v5 = vld [vmem:[#allocation52_spill] sm:$0xff] }
 0x4d5   : > { %v1130_v24 = vsel %vm1129_vm11, %v3104_v8, %v1125_v47 }
 0x4d6   : > { %v1135_v41 = vsel %vm1134_vm12, %v3111_v58, %v1130_v24  ;;  %v4719_v24 = vld [vmem:[#allocation16_spill] sm:$0xff] }
 0x4da   : > { %v1734_v17 = vpop.permute.xlu2 %1733  ;;  %v1143_v6 = vpop.permute.xlu1 %1142 }
 0x4db   : > { %vm1144_vm13 = vcmp.eq.s32.totalorder %v1143_v6, 1  ;;  %vm1735_vm4 = vcmp.eq.s32.totalorder %v1734_v17, 1 }
 0x4dc   : > { %v1736_v51 = vsel %vm1735_vm4, %v4685_v18, %v1731_v14  ;;  %v4725_v14 = vld [vmem:[#allocation43_spill] sm:$0xff] }
 0x4dd   : > { %v1741_v26 = vsel %vm1740_vm5, %v3134_v53, %v1736_v51  ;;  %v4728_v51 = vld [vmem:[#allocation23_spill] sm:$0xff] }
 0x4de   : > { %v1746_v7 = vsel %vm1745_vm7, %v3137_v13, %v1741_v26  ;;  %v4536_v13 = vmov 8  }
 0x4df   : > { %2400 = vset.pattern.permute.xlu1 %v4536_v13  ;;  %2401 = vset.pattern.permute.xlu2 %v4536_v13 }
 0x4e2   : > { %v1138_v39 = vpop.permute.xlu2 %1137 }
 0x4e3   : > { %vm1139_vm14 = vcmp.eq.s32.totalorder %v1138_v39, 1  ;;  %v4720_v39 = vmov 6  }
 0x4e4   : > { %v1140_v33 = vsel %vm1139_vm14, %v3117_v9, %v1135_v41 }
 0x4e5   : > { %v1145_v42 = vsel %vm1144_vm13, %v3120_v21, %v1140_v33  ;;  %v4721_v33 = vld [vmem:[#allocation17_spill] sm:$0xff] }
 0x4ea   : > { %v1749_v45 = vpop.permute.xlu2 %1748 }
 0x4eb   : > { %vm1750_vm9 = vcmp.eq.s32.totalorder %v1749_v45, 1  ;;  %v4730_v45 = vld [vmem:[#allocation24_spill] sm:$0xff] }
 0x4ec   : > { %v1751_v32 = vsel %vm1750_vm9, %v3141_v52, %v1746_v7  ;;  %v4731_v7 = vld [vmem:[#allocation25_spill] sm:$0xff] }
 0x526   : > { %v1147_v40 = vpop.permute.xlu0 %1146 }
 0x527   : > { %v1148_v50 = vsel %vm378_vm6, %v3343_v30, %v1147_v40 }
 0x528   : > { %v1149_v61 = vadd.f32 %v1148_v50, %v1145_v42 }
 0x52a   : > { %v1151_v16 = vmin.f32 %v1149_v61, %v1150_v37  ;;  %v3489_v37 = vstv %s539_s27 }
 0x52c   : > { %v1152_v3 = vsub.f32 %v1151_v16, %v2781_v15 }
 0x52e   : > { %v1153_v31 = vsel %vm285_vm8, %v1152_v3, 1e+09  ;;  %v3493_v3 = vadd.f32 %v3489_v37, %v4691_v62 }
 0x52f   : > { %1154 = vrot.lane.b32.xlu2 %v1153_v31, %s2589_s23 }
 0x53c   : > { %v530_v47 = vpop.permute.xlu1 %529 }
 0x53d   : > { %v531_v56 = vmin.f32 %v528_v28, %v530_v47  ;;  %v4726_v47 = vld [vmem:[#allocation55_spill] sm:$0xff] }
 0x53f   : > { %532 = vrot.lane.b32.xlu2 %v531_v56, %s2594_s8 }
 0x544   : > { %v1753_v27 = vpop.permute.xlu1 %1752 }
 0x545   : > { %v1754_v54 = vsel %vm378_vm6, %v3343_v30, %v1753_v27 }
 0x546   : > { %v1755_v18 = vadd.f32 %v1754_v54, %v1751_v32  ;;  %v4733_v54 = vld [vmem:[#allocation38_spill] sm:$0xff] }
 0x548   : > { %v1757_v35 = vmin.f32 %v1755_v18, %v1756_v0 }
 0x54a   : > { %v1758_v28 = vsub.f32 %v1757_v35, %v2781_v15 }
 0x54c   : > { %v1759_v29 = vsel %vm285_vm8, %v1758_v28, 1e+09 }
 0x54d   : > { %1760 = vrot.lane.b32.xlu0 %v1759_v29, %s2589_s23 }
 0x555   : > { %1176 = vperm.xlu0 %2399, %v2952_v36  }
 0x589   : > { %v1155_v30 = vpop.permute.xlu2 %1154 }
 0x58a   : > { %v1156_v63 = vmin.f32 %v1153_v31, %v1155_v30 }
 0x58c   : > { %1157 = vrot.lane.b32.xlu1 %v1156_v63, %s2594_s8 }
 0x594   : > { %770 = vperm.xlu1 %2400, %v2750_v4  }
 0x599   : > { %v533_v48 = vpop.permute.xlu2 %532 }
 0x59a   : > { %v534_v17 = vmin.f32 %v531_v56, %v533_v48  ;;  %v4727_v56 = vld [vmem:[#allocation22_spill] sm:$0xff] }
 0x59c   : > { %785 = vperm.xlu1 %2400, %v4719_v24   ;;  %535 = vrot.lane.b32.xlu0 %v534_v17, %s2596_s10 }
 0x5a4   : > { %2402 = vset.pattern.permute.xlu1 %v4690_v60  ;;  %1792 = vperm.xlu0 %2399, %v2984_v1  }
 0x5a5   : > { %1171 = vperm.xlu1 %2402, %v2805_v20  }
 0x5ac   : > { %1196 = vperm.xlu0 %2399, %v2998_v59  }
 0x5b4   : > { %1807 = vperm.xlu0 %2399, %v3012_v11  }
 0x5bc   : > { %1211 = vperm.xlu0 %2399, %v3026_v23  }
 0x5bf   : > { %v1761_v6 = vpop.permute.xlu0 %1760 }
 0x5c0   : > { %v1762_v41 = vmin.f32 %v1759_v29, %v1761_v6  ;;  %v4736_v6 = vld [vmem:[#allocation71_spill] sm:$0xff] }
 0x5c1   : > { %vm556_vm11 = vcmp.eq.s32.totalorder %v4736_v6, 1  ;;  %v3561_v6 = vld [vmem:[%s2736_s29 + $0x60] sm:$0xff] }
 0x5c2   : > { %1763 = vrot.lane.b32.xlu2 %v1762_v41, %s2594_s8  ;;  %4744 = vst [vmem:[#allocation40_spill] sm:$0xff] %v3561_v6 }
 0x5c4   : > { %2404 = vset.pattern.permute.xlu0 %v4720_v39 }
 0x5c5   : > { %626 = vperm.xlu0 %2404, %v2750_v4  }
 0x5c7   : > { %v3485_v50 = vpop.permute.xlu0 %1176 }
 0x5c8   : > { %vm1178_vm5 = vcmp.eq.s32.totalorder %v3485_v50, 1 }
 0x5ca   : > { %775 = vperm.xlu2 %2401, %v4721_v33  }
 0x5cd   : > { %651 = vperm.xlu0 %2404, %v2774_v12  }
 0x5d2   : > { %790 = vperm.xlu2 %2401, %v4686_v2  }
 0x5da   : > { %2403 = vset.pattern.permute.xlu2 %v4690_v60 }
 0x5db   : > { %1777 = vperm.xlu2 %2403, %v2964_v43  }
 0x5fe   : > { %v1158_v40 = vpop.permute.xlu1 %1157 }
 0x5ff   : > { %v1159_v42 = vmin.f32 %v1156_v63, %v1158_v40  ;;  %v3542_v40 = vld [vmem:[%s2736_s29 + $0x18] sm:$0xff] }
 0x600   : > { %4738 = vst [vmem:[#allocation27_spill] sm:$0xff] %v3542_v40 }
 0x601   : > { %1160 = vrot.lane.b32.xlu2 %v1159_v42, %s2596_s10 }
 0x609   : > { %1181 = vperm.xlu2 %2403, %v2970_v44  }
 0x60e   : > { %v536_v61 = vpop.permute.xlu0 %535 }
 0x60f   : > { %v537_v16 = vmin.f32 %v534_v17, %v536_v61  ;;  %v4735_v17 = vld [vmem:[#allocation47_spill] sm:$0xff]  ;;  %v3547_v61 = vld [vmem:[%s2736_s29 + $0x30] sm:$0xff] }
 0x610   : > { %vm551_vm10 = vcmp.eq.s32.totalorder %v4735_v17, 1  ;;  %4739 = vst [vmem:[#allocation28_spill] sm:$0xff] %v3547_v61  ;;  %v4743_v17 = vld [vmem:[#allocation50_spill] sm:$0xff] }
 0x611   : > { %v538_v60 = vadd.f32 %v537_v16, %v2781_v15  ;;  %1186 = vperm.xlu2 %2403, %v2993_v57   ;;  %vm566_vm13 = vcmp.eq.s32.totalorder %v4743_v17, 1  ;;  %v3576_v17 = vld [vmem:[%s2736_s29 + $0x90] sm:$0xff] }
 0x612   : > { %4750 = vst [vmem:[#allocation84_spill] sm:$0xff] %v3576_v17 }
 0x613   : > { %v3498_v31 = vmin.f32 %v538_v60, %v3493_v3  ;;  %v3550_v60 = vpop.permute.xlu1 %770 }
 0x614   : > { %4740 = vst [vmem:[#allocation48_spill] sm:$0xff] %v3550_v60  ;;  %v3590_v60 = vld [vmem:[%s2736_s29 + $0xd8] sm:$0xff] }
 0x615   : > { %4722 = vst [vmem:[#allocation75_spill] sm:$0xff] %v3498_v31  ;;  %593 = vrot.lane.b32.xlu0 %v3498_v31, %s2589_s23 }
 0x616   : > { %v3519_v32 = vpop.permute.xlu0 %1792  ;;  %4755 = vst [vmem:[#allocation33_spill] sm:$0xff] %v3590_v60 }
 0x619   : > { %1797 = vperm.xlu2 %2403, %v4723_v46  }
 0x61c   : > { %v1764_v34 = vpop.permute.xlu2 %1763 }
 0x61d   : > { %v3503_v55 = vmin.f32 %v1762_v41, %v1764_v34  ;;  %v3539_v41 = vld [vmem:[%s2736_s29] sm:$0xff] }
 0x61e   : > { %v3524_v18 = vpop.permute.xlu0 %1196  ;;  %4737 = vst [vmem:[#allocation26_spill] sm:$0xff] %v3539_v41 }
 0x61f   : > { %1766 = vrot.lane.b32.xlu1 %v3503_v55, %s2596_s10 }
 0x621   : > { %1201 = vperm.xlu2 %2403, %v4724_v5  }
 0x624   : > { %v3513_v26 = vpop.permute.xlu2 %775 }
 0x625   : > { %4729 = vst [vmem:[#allocation77_spill] sm:$0xff] %v3513_v26  ;;  %v3585_v26 = vld [vmem:[%s2736_s29 + $0xc0] sm:$0xff] }
 0x626   : > { %v3530_v63 = vpop.permute.xlu0 %1807  ;;  %4753 = vst [vmem:[#allocation32_spill] sm:$0xff] %v3585_v26 }
 0x627   : > { %1782 = vperm.xlu1 %2402, %v4725_v14  }
 0x629   : > { %1812 = vperm.xlu2 %2403, %v4726_v47  }
 0x62c   : > { %v3517_v27 = vpop.permute.xlu2 %790 }
 0x62d   : > { %4732 = vst [vmem:[#allocation78_spill] sm:$0xff] %v3517_v27  ;;  %v4752_v27 = vld [vmem:[#allocation62_spill] sm:$0xff] }
 0x62e   : > { %v3534_v48 = vpop.permute.xlu0 %1211  ;;  %vm586_vm1 = vcmp.eq.s32.totalorder %v4752_v27, 1 }
 0x62f   : > { %1787 = vperm.xlu1 %2402, %v4727_v56  }
 0x631   : > { %2405 = vset.pattern.permute.xlu2 %v4536_v13 }
 0x635   : > { %v3522_v0 = vpop.permute.xlu2 %1777 }
 0x637   : > { %1191 = vperm.xlu1 %2402, %v4728_v51   ;;  %v3552_v34 = vpop.permute.xlu0 %626 }
 0x63f   : > { %1802 = vperm.xlu1 %2402, %v4730_v45   ;;  %v3572_v19 = vpop.permute.xlu0 %651 }
 0x640   : > { %4748 = vst [vmem:[#allocation31_spill] sm:$0xff] %v3572_v19  ;;  %v3626_v19 = vld [vmem:[%s2736_s29 + $0x50] sm:$0xff] }
 0x647   : > { %1206 = vperm.xlu1 %2402, %v4731_v7  }
 0x64f   : > { %1817 = vperm.xlu1 %2402, %v4733_v54  }
 0x65b   : > { %v1161_v35 = vpop.permute.xlu2 %1160 }
 0x65c   : > { %v1162_v28 = vmin.f32 %v1159_v42, %v1161_v35  ;;  %v552_v42 = vsel %vm551_vm10, %v3542_v40, %v3539_v41  ;;  %v4741_v35 = vld [vmem:[#allocation58_spill] sm:$0xff]  ;;  %vm1198_vm10 = vcmp.eq.s32.totalorder %v3524_v18, 1 }
 0x65d   : > { %v557_v16 = vsel %vm556_vm11, %v3547_v61, %v552_v42  ;;  %vm561_vm12 = vcmp.eq.s32.totalorder %v4741_v35, 1  ;;  %v4745_v42 = vld [vmem:[#allocation60_spill] sm:$0xff]  ;;  %v3570_v35 = vpop.permute.xlu1 %785 }
 0x65e   : > { %v1163_v29 = vadd.f32 %v1162_v28, %v2781_v15  ;;  %v3556_v28 = vld [vmem:[%s2736_s29 + $0x48] sm:$0xff]  ;;  %vm571_vm14 = vcmp.eq.s32.totalorder %v4745_v42, 1  ;;  %4747 = vst [vmem:[#allocation51_spill] sm:$0xff] %v3570_v35 }
 0x65f   : > { %4742 = vst [vmem:[#allocation29_spill] sm:$0xff] %v3556_v28 }
 0x660   : > { %v3528_v30 = vmin.f32 %v1163_v29, %v3493_v3  ;;  %v562_v29 = vsel %vm561_vm12, %v3556_v28, %v557_v16  ;;  %v4749_v16 = vld [vmem:[#allocation53_spill] sm:$0xff] }
 0x661   : > { %v567_v13 = vsel %vm566_vm13, %v3561_v6, %v562_v29  ;;  %vm576_vm0 = vcmp.eq.s32.totalorder %v4749_v16, 1  ;;  %v3580_v29 = vld [vmem:[%s2736_s29 + $0xa8] sm:$0xff]  ;;  %vm1213_vm13 = vcmp.eq.s32.totalorder %v3534_v48, 1 }
 0x662   : > { %4734 = vst [vmem:[#allocation39_spill] sm:$0xff] %v3528_v30  ;;  %1215 = vrot.lane.b32.xlu2 %v3528_v30, %s2589_s23  ;;  %v572_v49 = vsel %vm571_vm14, %v3566_v25, %v567_v13  ;;  %v4754_v13 = vld [vmem:[#allocation56_spill] sm:$0xff]  ;;  %v3630_v25 = vld [vmem:[%s2736_s29 + $0x68] sm:$0xff]  ;;  %vm1779_vm14 = vcmp.eq.s32.totalorder %v3522_v0, 1 }
 0x663   : > { %v577_v2 = vsel %vm576_vm0, %v3576_v17, %v572_v49  ;;  %4751 = vst [vmem:[#allocation42_spill] sm:$0xff] %v3580_v29  ;;  %vm591_vm2 = vcmp.eq.s32.totalorder %v4754_v13, 1  ;;  %v3657_v48 = vld [vmem:[%s2736_s29 + $0x28] sm:$0xff]  ;;  %v3671_v0 = vld [vmem:[%s2736_s29 + $0x70] sm:$0xff] }
 0x664   : > { %v582_v42 = vsel %vm581_vm15, %v3580_v29, %v577_v2  ;;  %v597_v2 = vadd.f32 %v3498_v31, %v4674_v38  ;;  %4759 = vst [vmem:[#allocation36_spill] sm:$0xff] %v3657_v48 }
 0x665   : > { %v587_v22 = vsel %vm586_vm1, %v3585_v26, %v582_v42  ;;  %v1172_v24 = vpop.permute.xlu1 %1171  ;;  %v1182_v42 = vpop.permute.xlu2 %1181  ;;  %vm1794_vm1 = vcmp.eq.s32.totalorder %v3519_v32, 1  ;;  %v3685_v32 = vld [vmem:[%s2736_s29 + $0xd0] sm:$0xff] }
 0x666   : > { %v592_v16 = vsel %vm591_vm2, %v3590_v60, %v587_v22  ;;  %vm1173_vm3 = vcmp.eq.s32.totalorder %v1172_v24, 1  ;;  %vm1183_vm4 = vcmp.eq.s32.totalorder %v1182_v42, 1 }
 0x687   : > { %v594_v35 = vpop.permute.xlu0 %593 }
 0x688   : > { %v595_v49 = vsel %vm378_vm6, %v3489_v37, %v594_v35 }
 0x689   : > { %v596_v27 = vadd.f32 %v595_v49, %v592_v16 }
 0x68b   : > { %v598_v29 = vmin.f32 %v596_v27, %v597_v2 }
 0x68d   : > { %v599_v17 = vsub.f32 %v598_v29, %v2781_v15  ;;  %v1187_v29 = vpop.permute.xlu2 %1186 }
 0x68e   : > { %vm1188_vm7 = vcmp.eq.s32.totalorder %v1187_v29, 1 }
 0x68f   : > { %v3601_v13 = vsel %vm285_vm8, %v599_v17, 1e+09 }
 0x690   : > { %601 = vrot.lane.b32.xlu1 %v3601_v13, %s2589_s23 }
 0x691   : > { %v1767_v22 = vpop.permute.xlu1 %1766 }
 0x692   : > { %v1768_v35 = vmin.f32 %v3503_v55, %v1767_v22  ;;  %v3613_v55 = vld [vmem:[%s2736_s29 + $0x8] sm:$0xff]  ;;  %v3616_v22 = vld [vmem:[%s2736_s29 + $0x20] sm:$0xff] }
 0x693   : > { %4757 = vst [vmem:[#allocation34_spill] sm:$0xff] %v3616_v22 }
 0x694   : > { %v1769_v60 = vadd.f32 %v1768_v35, %v2781_v15 }
 0x695   : > { %v1798_v17 = vpop.permute.xlu2 %1797 }
 0x696   : > { %v3608_v16 = vmin.f32 %v1769_v60, %v3493_v3  ;;  %v1174_v3 = vsel %vm1173_vm3, %v3616_v22, %v3613_v55  ;;  %v3622_v60 = vld [vmem:[%s2736_s29 + $0x38] sm:$0xff]  ;;  %v3634_v22 = vld [vmem:[%s2736_s29 + $0x80] sm:$0xff]  ;;  %vm1799_vm3 = vcmp.eq.s32.totalorder %v1798_v17, 1 }
 0x697   : > { %v1179_v35 = vsel %vm1178_vm5, %v3622_v60, %v1174_v3 }
 0x698   : > { %4756 = vst [vmem:[#allocation54_spill] sm:$0xff] %v3608_v16  ;;  %1821 = vrot.lane.b32.xlu0 %v3608_v16, %s2589_s23  ;;  %v1184_v24 = vsel %vm1183_vm4, %v3626_v19, %v1179_v35  ;;  %vm1809_vm4 = vcmp.eq.s32.totalorder %v3530_v63, 1 }
 0x699   : > { %v1783_v49 = vpop.permute.xlu1 %1782  ;;  %v1189_v6 = vsel %vm1188_vm7, %v3630_v25, %v1184_v24 }
 0x69a   : > { %vm1784_vm15 = vcmp.eq.s32.totalorder %v1783_v49, 1 }
 0x69d   : > { %v1202_v31 = vpop.permute.xlu2 %1201 }
 0x69e   : > { %vm1203_vm11 = vcmp.eq.s32.totalorder %v1202_v31, 1  ;;  %v1219_v31 = vadd.f32 %v3528_v30, %v4674_v38  ;;  %v4773_v30 = vld [vmem:[#allocation61_spill] sm:$0xff] }
 0x6a1   : > { %v1788_v2 = vpop.permute.xlu1 %1787 }
 0x6a2   : > { %vm1789_vm0 = vcmp.eq.s32.totalorder %v1788_v2, 1  ;;  %v3679_v2 = vld [vmem:[%s2736_s29 + $0xa0] sm:$0xff] }
 0x6a5   : > { %v1813_v28 = vpop.permute.xlu2 %1812 }
 0x6a6   : > { %vm1814_vm7 = vcmp.eq.s32.totalorder %v1813_v28, 1 }
 0x6a9   : > { %v1192_v27 = vpop.permute.xlu1 %1191 }
 0x6aa   : > { %vm1193_vm9 = vcmp.eq.s32.totalorder %v1192_v27, 1 }
 0x6ab   : > { %v1194_v50 = vsel %vm1193_vm9, %v3634_v22, %v1189_v6 }
 0x6ac   : > { %v1199_v42 = vsel %vm1198_vm10, %v3104_v8, %v1194_v50  ;;  %vm628_vm10 = vcmp.eq.s32.totalorder %v3552_v34, 1 }
 0x6ad   : > { %v1204_v27 = vsel %vm1203_vm11, %v3111_v58, %v1199_v42  ;;  %v3662_v42 = vld [vmem:[%s2736_s29 + $0x40] sm:$0xff] }
 0x6ae   : > { %4760 = vst [vmem:[#allocation74_spill] sm:$0xff] %v3662_v42 }
 0x6b1   : > { %v1803_v26 = vpop.permute.xlu1 %1802 }
 0x6b2   : > { %vm1804_vm2 = vcmp.eq.s32.totalorder %v1803_v26, 1 }
 0x6b9   : > { %v1207_v29 = vpop.permute.xlu1 %1206 }
 0x6ba   : > { %vm1208_vm12 = vcmp.eq.s32.totalorder %v1207_v29, 1 }
 0x6bb   : > { %v1209_v3 = vsel %vm1208_vm12, %v3117_v9, %v1204_v27  ;;  %v3666_v27 = vld [vmem:[%s2736_s29 + $0x58] sm:$0xff]  ;;  %vm638_vm12 = vcmp.eq.s32.totalorder %v4773_v30, 1  ;;  %v4782_v30 = vld [vmem:[#allocation32_spill] sm:$0xff] }
 0x6bc   : > { %v1216_v35 = vpop.permute.xlu2 %1215  ;;  %v1214_v24 = vsel %vm1213_vm13, %v3120_v21, %v1209_v3  ;;  %v3654_v21 = vld [vmem:[%s2736_s29 + $0x10] sm:$0xff]  ;;  %4761 = vst [vmem:[#allocation17_spill] sm:$0xff] %v3666_v27 }
 0x6bd   : > { %v1217_v8 = vsel %vm378_vm6, %v3489_v37, %v1216_v35  ;;  %4758 = vst [vmem:[#allocation45_spill] sm:$0xff] %v3654_v21  ;;  %v1780_v50 = vsel %vm1779_vm14, %v3657_v48, %v3654_v21 }
 0x6be   : > { %v1218_v18 = vadd.f32 %v1217_v8, %v1214_v24  ;;  %v1785_v29 = vsel %vm1784_vm15, %v3662_v42, %v1780_v50  ;;  %v3675_v24 = vld [vmem:[%s2736_s29 + $0x88] sm:$0xff]  ;;  %v1825_v50 = vadd.f32 %v3608_v16, %v4674_v38 }
 0x6bf   : > { %v1790_v3 = vsel %vm1789_vm0, %v3666_v27, %v1785_v29 }
 0x6c0   : > { %v1220_v58 = vmin.f32 %v1218_v18, %v1219_v31  ;;  %v1795_v35 = vsel %vm1794_vm1, %v3671_v0, %v1790_v3 }
 0x6c1   : > { %v1800_v49 = vsel %vm1799_vm3, %v3675_v24, %v1795_v35  ;;  %v1818_v31 = vpop.permute.xlu1 %1817 }
 0x6c2   : > { %v1221_v6 = vsub.f32 %v1220_v58, %v2781_v15  ;;  %v1805_v8 = vsel %vm1804_vm2, %v3679_v2, %v1800_v49  ;;  %vm1819_vm5 = vcmp.eq.s32.totalorder %v1818_v31, 1  ;;  %v4559_v49 = vmov 9  }
 0x6c3   : > { %v1810_v18 = vsel %vm1809_vm4, %v3134_v53, %v1805_v8  ;;  %2407 = vset.pattern.permute.xlu1 %v4559_v49 }
 0x6c4   : > { %v1222_v9 = vsel %vm285_vm8, %v1221_v6, 1e+09  ;;  %v1815_v26 = vsel %vm1814_vm7, %v3685_v32, %v1810_v18 }
 0x6c5   : > { %1223 = vrot.lane.b32.xlu1 %v1222_v9, %s2589_s23  ;;  %v1820_v58 = vsel %vm1819_vm5, %v3141_v52, %v1815_v26  ;;  %v4762_v52 = vld [vmem:[#allocation18_spill] sm:$0xff] }
 0x702   : > { %v602_v3 = vpop.permute.xlu1 %601 }
 0x703   : > { %v603_v35 = vmin.f32 %v3601_v13, %v602_v3 }
 0x70a   : > { %v1822_v17 = vpop.permute.xlu0 %1821 }
 0x70b   : > { %v1823_v6 = vsel %vm378_vm6, %v3489_v37, %v1822_v17  ;;  %v4763_v37 = vmov 0  }
 0x70c   : > { %v1824_v29 = vadd.f32 %v1823_v6, %v1820_v58 }
 0x70e   : > { %v1826_v63 = vmin.f32 %v1824_v29, %v1825_v50 }
 0x710   : > { %v1827_v53 = vsub.f32 %v1826_v63, %v2781_v15  ;;  %v3729_v63 = vstv %s611_s30 }
 0x712   : > { %v1828_v28 = vsel %vm285_vm8, %v1827_v53, 1e+09  ;;  %v613_v53 = vadd.f32 %v3729_v63, %v4691_v62  ;;  %v4775_v62 = vld [vmem:[#allocation67_spill] sm:$0xff] }
 0x713   : > { %1829 = vrot.lane.b32.xlu2 %v1828_v28, %s2589_s23  ;;  %vm643_vm13 = vcmp.eq.s32.totalorder %v4775_v62, 1 }
 0x71b   : > { %604 = vrot.lane.b32.xlu2 %v603_v35, %s2594_s8 }
 0x723   : > { %800 = vperm.xlu2 %2405, %v4762_v52  }
 0x72b   : > { %2406 = vset.pattern.permute.xlu2 %v4763_v37  ;;  %v4774_v37 = vld [vmem:[#allocation40_spill] sm:$0xff] }
 0x72c   : > { %832 = vperm.xlu2 %2406, %v2774_v12  }
 0x734   : > { %2408 = vset.pattern.permute.xlu2 %v4720_v39 }
 0x735   : > { %1240 = vperm.xlu2 %2408, %v2805_v20  }
 0x737   : > { %v1224_v26 = vpop.permute.xlu1 %1223 }
 0x738   : > { %v1225_v17 = vmin.f32 %v1222_v9, %v1224_v26 }
 0x73d   : > { %1245 = vperm.xlu2 %2408, %v2952_v36  }
 0x745   : > { %1856 = vperm.xlu2 %2408, %v4727_v56  }
 0x76d   : > { %v1830_v13 = vpop.permute.xlu2 %1829 }
 0x76e   : > { %v1831_v8 = vmin.f32 %v1828_v28, %v1830_v13 }
 0x770   : > { %1832 = vrot.lane.b32.xlu1 %v1831_v8, %s2594_s8 }
 0x775   : > { %v605_v31 = vpop.permute.xlu2 %604 }
 0x776   : > { %v606_v18 = vmin.f32 %v603_v35, %v605_v31 }
 0x778   : > { %607 = vrot.lane.b32.xlu0 %v606_v18, %s2596_s10  ;;  %842 = vperm.xlu1 %2407, %v2750_v4   ;;  %v4764_v4 = vmov 7  }
 0x77d   : > { %v3742_v35 = vpop.permute.xlu2 %800 }
 0x77e   : > { %4766 = vst [vmem:[#allocation22_spill] sm:$0xff] %v3742_v35 }
 0x780   : > { %1226 = vrot.lane.b32.xlu0 %v1225_v17, %s2594_s8  ;;  %2409 = vset.pattern.permute.xlu1 %v4720_v39 }
 0x781   : > { %1846 = vperm.xlu1 %2409, %v2964_v43  }
 0x786   : > { %v3745_v13 = vpop.permute.xlu2 %832 }
 0x787   : > { %4767 = vst [vmem:[#allocation23_spill] sm:$0xff] %v3745_v13 }
 0x788   : > { %1851 = vperm.xlu0 %2404, %v4725_v14  }
 0x790   : > { %1260 = vperm.xlu0 %2404, %v4728_v51  }
 0x798   : > { %1871 = vperm.xlu0 %2404, %v4730_v45  }
 0x7a0   : > { %1275 = vperm.xlu0 %2404, %v4731_v7  }
 0x7a8   : > { %1886 = vperm.xlu0 %2404, %v4733_v54  }
 0x7b0   : > { %2410 = vset.pattern.permute.xlu0 %v4764_v4 }
 0x7b1   : > { %703 = vperm.xlu0 %2410, %v4721_v33  }
 0x7b9   : > { %723 = vperm.xlu0 %2410, %v2774_v12  }
 0x7e2   : > { %v1833_v39 = vpop.permute.xlu1 %1832 }
 0x7e3   : > { %v1834_v9 = vmin.f32 %v1831_v8, %v1833_v39  ;;  %v1241_v8 = vpop.permute.xlu2 %1240 }
 0x7e4   : > { %vm1242_vm4 = vcmp.eq.s32.totalorder %v1241_v8, 1 }
 0x7e5   : > { %1835 = vrot.lane.b32.xlu2 %v1834_v9, %s2596_s10 }
 0x7ea   : > { %v608_v58 = vpop.permute.xlu0 %607 }
 0x7eb   : > { %v609_v29 = vmin.f32 %v606_v18, %v608_v58  ;;  %v3749_v31 = vpop.permute.xlu2 %1245 }
 0x7ec   : > { %vm1247_vm7 = vcmp.eq.s32.totalorder %v3749_v31, 1 }
 0x7ed   : > { %1861 = vperm.xlu2 %2408, %v2984_v1   ;;  %v610_v28 = vadd.f32 %v609_v29, %v2781_v15 }
 0x7ef   : > { %v3736_v3 = vmin.f32 %v610_v28, %v613_v53  ;;  %v4769_v28 = vld [vmem:[#allocation59_spill] sm:$0xff] }
 0x7f0   : > { %vm623_vm9 = vcmp.eq.s32.totalorder %v4769_v28, 1  ;;  %v4776_v28 = vld [vmem:[#allocation30_spill] sm:$0xff] }
 0x7f1   : > { %4765 = vst [vmem:[#allocation43_spill] sm:$0xff] %v3736_v3 }
 0x7f2   : > { %v1227_v6 = vpop.permute.xlu0 %1226 }
 0x7f3   : > { %v1228_v50 = vmin.f32 %v1225_v17, %v1227_v6  ;;  %v1857_v18 = vpop.permute.xlu2 %1856 }
 0x7f4   : > { %vm1858_vm5 = vcmp.eq.s32.totalorder %v1857_v18, 1 }
 0x7f5   : > { %1265 = vperm.xlu2 %2408, %v2998_v59   ;;  %1229 = vrot.lane.b32.xlu1 %v1228_v50, %s2596_s10 }
 0x7fd   : > { %1876 = vperm.xlu2 %2408, %v3012_v11   ;;  %1250 = vperm.xlu1 %2409, %v2970_v44  }
 0x805   : > { %1280 = vperm.xlu2 %2408, %v3026_v23   ;;  %1255 = vperm.xlu1 %2409, %v2993_v57  }
 0x80d   : > { %665 = vrot.lane.b32.xlu2 %v3736_v3, %s2589_s23  ;;  %1866 = vperm.xlu1 %2409, %v4723_v46  }
 0x80e   : > { %2412 = vset.pattern.permute.xlu2 %v4559_v49 }
 0x815   : > { %1270 = vperm.xlu1 %2409, %v4724_v5  }
 0x81d   : > { %1881 = vperm.xlu1 %2409, %v4726_v47   ;;  %v4777_v47 = vld [vmem:[#allocation31_spill] sm:$0xff] }
 0x81e   : > { %vm653_vm14 = vcmp.eq.s32.totalorder %v4777_v47, 1  ;;  %v4784_v47 = vld [vmem:[#allocation33_spill] sm:$0xff] }
 0x825   : > { %2411 = vset.pattern.permute.xlu1 %v4559_v49  ;;  %v624_v49 = vsel %vm623_vm9, %v3542_v40, %v3539_v41 }
 0x826   : > { %v629_v13 = vsel %vm628_vm10, %v3547_v61, %v624_v49  ;;  %v4778_v49 = vld [vmem:[#allocation63_spill] sm:$0xff]  ;;  %v4780_v61 = vld [vmem:[#allocation42_spill] sm:$0xff] }
 0x827   : > { %vm648_vm15 = vcmp.eq.s32.totalorder %v4778_v49, 1 }
 0x83f   : > { %v1836_v26 = vpop.permute.xlu2 %1835 }
 0x840   : > { %v1837_v17 = vmin.f32 %v1834_v9, %v1836_v26  ;;  %v3763_v9 = vpop.permute.xlu1 %842  ;;  %v4771_v26 = vld [vmem:[#allocation66_spill] sm:$0xff] }
 0x841   : > { %4770 = vst [vmem:[#allocation47_spill] sm:$0xff] %v3763_v9  ;;  %vm633_vm11 = vcmp.eq.s32.totalorder %v4771_v26, 1  ;;  %v4779_v9 = vld [vmem:[#allocation84_spill] sm:$0xff] }
 0x842   : > { %v1838_v39 = vadd.f32 %v1837_v17, %v2781_v15 }
 0x844   : > { %v3752_v58 = vmin.f32 %v1838_v39, %v613_v53  ;;  %v4772_v39 = vld [vmem:[#allocation29_spill] sm:$0xff] }
 0x845   : > { %v634_v16 = vsel %vm633_vm11, %v4772_v39, %v629_v13  ;;  %v4781_v13 = vld [vmem:[#allocation68_spill] sm:$0xff] }
 0x846   : > { %4768 = vst [vmem:[#allocation24_spill] sm:$0xff] %v3752_v58  ;;  %1890 = vrot.lane.b32.xlu2 %v3752_v58, %s2589_s23  ;;  %v639_v35 = vsel %vm638_vm12, %v4774_v37, %v634_v16  ;;  %vm658_vm0 = vcmp.eq.s32.totalorder %v4781_v13, 1  ;;  %v4783_v16 = vld [vmem:[#allocation65_spill] sm:$0xff] }
 0x847   : > { %v1862_v6 = vpop.permute.xlu2 %1861  ;;  %v644_v34 = vsel %vm643_vm13, %v4776_v28, %v639_v35  ;;  %vm663_vm1 = vcmp.eq.s32.totalorder %v4783_v16, 1  ;;  %v1852_v35 = vpop.permute.xlu0 %1851 }
 0x848   : > { %v1847_v40 = vpop.permute.xlu1 %1846  ;;  %v649_v26 = vsel %vm648_vm15, %v4779_v9, %v644_v34  ;;  %v669_v34 = vadd.f32 %v3736_v3, %v4674_v38  ;;  %vm1853_vm3 = vcmp.eq.s32.totalorder %v1852_v35, 1  ;;  %vm1863_vm9 = vcmp.eq.s32.totalorder %v1862_v6, 1 }
 0x849   : > { %v654_v5 = vsel %vm653_vm14, %v4780_v61, %v649_v26  ;;  %vm1848_vm2 = vcmp.eq.s32.totalorder %v1847_v40, 1 }
 0x84a   : > { %v659_v39 = vsel %vm658_vm0, %v4782_v30, %v654_v5 }
 0x84b   : > { %v664_v46 = vsel %vm663_vm1, %v4784_v47, %v659_v39 }
 0x84f   : > { %v3756_v29 = vpop.permute.xlu2 %1265 }
 0x850   : > { %vm1267_vm0 = vcmp.eq.s32.totalorder %v3756_v29, 1 }
 0x857   : > { %v1877_v17 = vpop.permute.xlu2 %1876 }
 0x858   : > { %vm1878_vm14 = vcmp.eq.s32.totalorder %v1877_v17, 1 }
 0x85f   : > { %v3772_v41 = vpop.permute.xlu2 %1280 }
 0x867   : > { %v1230_v62 = vpop.permute.xlu1 %1229  ;;  %v666_v37 = vpop.permute.xlu2 %665 }
 0x868   : > { %v1231_v28 = vmin.f32 %v1228_v50, %v1230_v62  ;;  %v667_v49 = vsel %vm378_vm6, %v3729_v63, %v666_v37  ;;  %v1261_v37 = vpop.permute.xlu0 %1260  ;;  %v4786_v62 = vld [vmem:[#allocation34_spill] sm:$0xff] }
 0x869   : > { %v668_v26 = vadd.f32 %v667_v49, %v664_v46  ;;  %v1243_v49 = vsel %vm1242_vm4, %v4786_v62, %v3613_v55  ;;  %vm1262_vm15 = vcmp.eq.s32.totalorder %v1261_v37, 1  ;;  %v3827_v37 = vld [vmem:[%s2736_s29 + $0xc8] sm:$0xff] }
 0x86a   : > { %v1232_v13 = vadd.f32 %v1231_v28, %v2781_v15 }
 0x86b   : > { %v670_v61 = vmin.f32 %v668_v26, %v669_v34  ;;  %v1248_v26 = vsel %vm1247_vm7, %v3622_v60, %v1243_v49 }
 0x86c   : > { %v3787_v5 = vmin.f32 %v1232_v13, %v613_v53  ;;  %v1849_v53 = vsel %vm1848_vm2, %v3657_v48, %v3654_v21  ;;  %v3812_v13 = vld [vmem:[%s2736_s29 + $0xb8] sm:$0xff] }
 0x86d   : > { %v671_v16 = vsub.f32 %v670_v61, %v2781_v15  ;;  %v1854_v61 = vsel %vm1853_vm3, %v3662_v42, %v1849_v53  ;;  %vm1282_vm3 = vcmp.eq.s32.totalorder %v3772_v41, 1 }
 0x86e   : > { %4785 = vst [vmem:[#allocation71_spill] sm:$0xff] %v3787_v5  ;;  %1284 = vrot.lane.b32.xlu1 %v3787_v5, %s2589_s23  ;;  %v1859_v40 = vsel %vm1858_vm5, %v3666_v27, %v1854_v61  ;;  %v3818_v61 = vld [vmem:[%s2736_s29 + $0x98] sm:$0xff] }
 0x86f   : > { %v1251_v50 = vpop.permute.xlu1 %1250  ;;  %v3794_v39 = vsel %vm285_vm8, %v671_v16, 1e+09  ;;  %v1864_v8 = vsel %vm1863_vm9, %v3671_v0, %v1859_v40 }
 0x870   : > { %673 = vrot.lane.b32.xlu0 %v3794_v39, %s2589_s23  ;;  %v1872_v28 = vpop.permute.xlu0 %1871  ;;  %vm1252_vm10 = vcmp.eq.s32.totalorder %v1251_v50, 1 }
 0x871   : > { %vm1873_vm13 = vcmp.eq.s32.totalorder %v1872_v28, 1  ;;  %v1253_v18 = vsel %vm1252_vm10, %v3626_v19, %v1248_v26  ;;  %v3822_v28 = vld [vmem:[%s2736_s29 + $0xb0] sm:$0xff] }
 0x877   : > { %v1256_v46 = vpop.permute.xlu1 %1255 }
 0x878   : > { %vm1257_vm11 = vcmp.eq.s32.totalorder %v1256_v46, 1  ;;  %v1276_v46 = vpop.permute.xlu0 %1275 }
 0x879   : > { %v1258_v31 = vsel %vm1257_vm11, %v3630_v25, %v1253_v18  ;;  %vm1277_vm2 = vcmp.eq.s32.totalorder %v1276_v46, 1 }
 0x87a   : > { %v1263_v50 = vsel %vm1262_vm15, %v3634_v22, %v1258_v31  ;;  %v3836_v31 = vld [vmem:[%s2736_s29 + $0xe8] sm:$0xff] }
 0x87b   : > { %v1268_v17 = vsel %vm1267_vm0, %v3818_v61, %v1263_v50  ;;  %v1894_v50 = vadd.f32 %v3752_v58, %v4674_v38  ;;  %v4797_v58 = vld [vmem:[#allocation55_spill] sm:$0xff] }
 0x87f   : > { %v1867_v34 = vpop.permute.xlu1 %1866 }
 0x880   : > { %vm1868_vm12 = vcmp.eq.s32.totalorder %v1867_v34, 1  ;;  %v3831_v34 = vld [vmem:[%s2736_s29 + $0xe0] sm:$0xff] }
 0x881   : > { %v1869_v35 = vsel %vm1868_vm12, %v3675_v24, %v1864_v8  ;;  %v1887_v8 = vpop.permute.xlu0 %1886 }
 0x882   : > { %v1874_v6 = vsel %vm1873_vm13, %v3679_v2, %v1869_v35  ;;  %vm1888_vm5 = vcmp.eq.s32.totalorder %v1887_v8, 1 }
 0x883   : > { %v1879_v16 = vsel %vm1878_vm14, %v3812_v13, %v1874_v6 }
 0x887   : > { %v1271_v53 = vpop.permute.xlu1 %1270 }
 0x888   : > { %vm1272_vm1 = vcmp.eq.s32.totalorder %v1271_v53, 1 }
 0x889   : > { %v1273_v49 = vsel %vm1272_vm1, %v3822_v28, %v1268_v17 }
 0x88a   : > { %v1278_v40 = vsel %vm1277_vm2, %v3827_v37, %v1273_v49  ;;  %v3849_v49 = vpop.permute.xlu0 %703 }
 0x88b   : > { %v1283_v29 = vsel %vm1282_vm3, %v3831_v34, %v1278_v40 }
 0x88f   : > { %v1882_v26 = vpop.permute.xlu1 %1881 }
 0x890   : > { %vm1883_vm4 = vcmp.eq.s32.totalorder %v1882_v26, 1 }
 0x891   : > { %v1884_v18 = vsel %vm1883_vm4, %v3685_v32, %v1879_v16 }
 0x892   : > { %v1889_v6 = vsel %vm1888_vm5, %v3836_v31, %v1884_v18  ;;  %v3851_v40 = vpop.permute.xlu0 %723  ;;  %v1288_v18 = vadd.f32 %v3787_v5, %v4674_v38 }
 0x8a0   : > { %v1891_v35 = vpop.permute.xlu2 %1890 }
 0x8a1   : > { %v1892_v41 = vsel %vm378_vm6, %v3729_v63, %v1891_v35 }
 0x8a2   : > { %v1893_v46 = vadd.f32 %v1892_v41, %v1889_v6 }
 0x8a4   : > { %v1895_v53 = vmin.f32 %v1893_v46, %v1894_v50 }
 0x8a6   : > { %v1896_v17 = vsub.f32 %v1895_v53, %v2781_v15 }
 0x8a8   : > { %v1897_v16 = vsel %vm285_vm8, %v1896_v17, 1e+09 }
 0x8a9   : > { %1898 = vrot.lane.b32.xlu1 %v1897_v16, %s2589_s23 }
 0x8b1   : > { %847 = vperm.xlu1 %2411, %v4721_v33  }
 0x8e0   : > { %v1285_v26 = vpop.permute.xlu1 %1284 }
 0x8e1   : > { %v1286_v8 = vsel %vm378_vm6, %v3729_v63, %v1285_v26  ;;  %v4787_v63 = vld [vmem:[#allocation21_spill] sm:$0xff]  ;;  %v4788_v26 = vld [vmem:[#allocation14_spill] sm:$0xff] }
 0x8e2   : > { %v1287_v35 = vadd.f32 %v1286_v8, %v1283_v29  ;;  %v674_v6 = vpop.permute.xlu0 %673  ;;  %v4789_v8 = vld [vmem:[#allocation16_spill] sm:$0xff] }
 0x8e3   : > { %v675_v41 = vmin.f32 %v3794_v39, %v674_v6 }
 0x8e4   : > { %v1289_v50 = vmin.f32 %v1287_v35, %v1288_v18 }
 0x8e5   : > { %676 = vrot.lane.b32.xlu1 %v675_v41, %s2594_s8 }
 0x8e6   : > { %v1290_v33 = vsub.f32 %v1289_v50, %v2781_v15 }
 0x8e8   : > { %v1291_v46 = vsel %vm285_vm8, %v1290_v33, 1e+09 }
 0x8e9   : > { %1292 = vrot.lane.b32.xlu0 %v1291_v46, %s2589_s23 }
 0x8ed   : > { %867 = vperm.xlu1 %2411, %v2774_v12  }
 0x8f1   : > { %1915 = vperm.xlu0 %2410, %v2964_v43  }
 0x8f5   : > { %877 = vperm.xlu1 %2411, %v4787_v63  }
 0x8fd   : > { %2414 = vset.pattern.permute.xlu1 %v4764_v4 }
 0x8fe   : > { %1314 = vperm.xlu1 %2414, %v2952_v36  }
 0x906   : > { %1319 = vperm.xlu1 %2414, %v2970_v44  }
 0x91b   : > { %v1899_v39 = vpop.permute.xlu1 %1898 }
 0x91c   : > { %v1900_v29 = vmin.f32 %v1897_v16, %v1899_v39 }
 0x91e   : > { %1901 = vrot.lane.b32.xlu0 %v1900_v29, %s2594_s8 }
 0x923   : > { %v3876_v18 = vpop.permute.xlu1 %847 }
 0x924   : > { %4790 = vst [vmem:[#allocation58_spill] sm:$0xff] %v3876_v18 }
 0x926   : > { %1324 = vperm.xlu0 %2410, %v2993_v57  }
 0x957   : > { %v677_v16 = vpop.permute.xlu1 %676 }
 0x958   : > { %v678_v35 = vmin.f32 %v675_v41, %v677_v16  ;;  %v4795_v16 = vld [vmem:[#allocation52_spill] sm:$0xff] }
 0x95b   : > { %v1293_v53 = vpop.permute.xlu0 %1292 }
 0x95c   : > { %v1294_v17 = vmin.f32 %v1291_v46, %v1293_v53  ;;  %v4791_v46 = vmov 8  }
 0x95e   : > { %1295 = vrot.lane.b32.xlu2 %v1294_v17, %s2594_s8 }
 0x963   : > { %v1916_v6 = vpop.permute.xlu0 %1915 }
 0x964   : > { %vm1917_vm7 = vcmp.eq.s32.totalorder %v1916_v6, 1 }
 0x966   : > { %852 = vperm.xlu2 %2412, %v4788_v26  }
 0x96e   : > { %857 = vperm.xlu2 %2412, %v4789_v8  }
 0x976   : > { %872 = vperm.xlu2 %2412, %v4762_v52  }
 0x97e   : > { %2413 = vset.pattern.permute.xlu2 %v4764_v4 }
 0x97f   : > { %1309 = vperm.xlu2 %2413, %v2805_v20  }
 0x987   : > { %679 = vrot.lane.b32.xlu2 %v678_v35, %s2596_s10 }
 0x98f   : > { %1920 = vperm.xlu2 %2413, %v4725_v14  }
 0x990   : > { %v1902_v50 = vpop.permute.xlu0 %1901 }
 0x991   : > { %v3882_v33 = vmin.f32 %v1900_v29, %v1902_v50  ;;  %v4793_v29 = vld [vmem:[#allocation49_spill] sm:$0xff] }
 0x993   : > { %1904 = vrot.lane.b32.xlu1 %v3882_v33, %s2596_s10 }
 0x997   : > { %1925 = vperm.xlu2 %2413, %v4727_v56  }
 0x99b   : > { %1930 = vperm.xlu1 %2414, %v2984_v1  }
 0x99f   : > { %1329 = vperm.xlu2 %2413, %v4728_v51  }
 0x9a3   : > { %1334 = vperm.xlu1 %2414, %v2998_v59  }
 0x9a7   : > { %1940 = vperm.xlu2 %2413, %v4730_v45  }
 0x9ab   : > { %1945 = vperm.xlu1 %2414, %v3012_v11  }
 0x9af   : > { %1344 = vperm.xlu2 %2413, %v4731_v7  }
 0x9b3   : > { %1349 = vperm.xlu1 %2414, %v3026_v23  }
 0x9b7   : > { %1955 = vperm.xlu2 %2413, %v4733_v54   ;;  %v3918_v54 = vstv %s683_s28 }
 0x9b8   : > { %v1296_v4 = vpop.permute.xlu2 %1295 }
 0x9b9   : > { %v1297_v41 = vmin.f32 %v1294_v17, %v1296_v4  ;;  %v4798_v17 = vld [vmem:[#allocation15_spill] sm:$0xff]  ;;  %v3908_v4 = vpop.permute.xlu1 %867 }
 0x9ba   : > { %4799 = vst [vmem:[#allocation62_spill] sm:$0xff] %v3908_v4 }
 0x9bb   : > { %1298 = vrot.lane.b32.xlu0 %v1297_v41, %s2596_s10 }
 0x9bf   : > { %2418 = vset.pattern.permute.xlu2 %v4791_v46 }
 0x9c0   : > { %v3897_v39 = vpop.permute.xlu2 %852 }
 0x9c1   : > { %4792 = vst [vmem:[#allocation50_spill] sm:$0xff] %v3897_v39  ;;  %v3911_v8 = vpop.permute.xlu1 %877 }
 0x9c2   : > { %4800 = vst [vmem:[#allocation56_spill] sm:$0xff] %v3911_v8  ;;  %v4801_v8 = vld [vmem:[#allocation20_spill] sm:$0xff] }
 0x9c3   : > { %1935 = vperm.xlu0 %2410, %v4793_v29  }
 0x9c8   : > { %v3900_v53 = vpop.permute.xlu2 %857 }
 0x9c9   : > { %4794 = vst [vmem:[#allocation60_spill] sm:$0xff] %v3900_v53  ;;  %v1315_v4 = vpop.permute.xlu1 %1314 }
 0x9ca   : > { %vm1316_vm13 = vcmp.eq.s32.totalorder %v1315_v4, 1 }
 0x9cb   : > { %1339 = vperm.xlu0 %2410, %v4795_v16  }
 0x9d0   : > { %v3903_v50 = vpop.permute.xlu2 %872 }
 0x9d1   : > { %4796 = vst [vmem:[#allocation53_spill] sm:$0xff] %v3903_v50  ;;  %v1918_v50 = vsel %vm1917_vm7, %v3657_v48, %v3654_v21 }
 0x9d3   : > { %1950 = vperm.xlu0 %2410, %v4797_v58  }
 0x9d9   : > { %v1310_v5 = vpop.permute.xlu2 %1309 }
 0x9da   : > { %vm1311_vm12 = vcmp.eq.s32.totalorder %v1310_v5, 1 }
 0x9db   : > { %2415 = vset.pattern.permute.xlu0 %v4791_v46  ;;  %v1312_v21 = vsel %vm1311_vm12, %v4786_v62, %v3613_v55 }
 0x9dc   : > { %765 = vperm.xlu0 %2415, %v4798_v17  }
 0x9e1   : > { %v680_v3 = vpop.permute.xlu2 %679 }
 0x9e2   : > { %v681_v39 = vmin.f32 %v678_v35, %v680_v3  ;;  %v1320_v3 = vpop.permute.xlu1 %1319 }
 0x9e3   : > { %vm1321_vm14 = vcmp.eq.s32.totalorder %v1320_v3, 1  ;;  %v4804_v3 = vld [vmem:[#allocation26_spill] sm:$0xff] }
 0x9e4   : > { %780 = vperm.xlu0 %2415, %v4788_v26  }
 0x9e9   : > { %v1921_v52 = vpop.permute.xlu2 %1920 }
 0x9ea   : > { %vm1922_vm9 = vcmp.eq.s32.totalorder %v1921_v52, 1  ;;  %v682_v52 = vadd.f32 %v681_v39, %v2781_v15 }
 0x9eb   : > { %v1923_v18 = vsel %vm1922_vm9, %v3662_v42, %v1918_v50 }
 0x9ec   : > { %795 = vperm.xlu0 %2415, %v2774_v12   ;;  %v3924_v12 = vadd.f32 %v3918_v54, %v4801_v8 }
 0x9ee   : > { %v3928_v6 = vmin.f32 %v682_v52, %v3924_v12 }
 0x9f0   : > { %4802 = vst [vmem:[#allocation59_spill] sm:$0xff] %v3928_v6 }
 0x9f1   : > { %v1926_v53 = vpop.permute.xlu2 %1925 }
 0x9f2   : > { %vm1927_vm10 = vcmp.eq.s32.totalorder %v1926_v53, 1 }
 0x9f3   : > { %v1928_v26 = vsel %vm1927_vm10, %v3666_v27, %v1923_v18 }
 0x9f4   : > { %805 = vperm.xlu0 %2415, %v4787_v63   ;;  %v1325_v63 = vpop.permute.xlu0 %1324 }
 0x9f5   : > { %vm1326_vm3 = vcmp.eq.s32.totalorder %v1325_v63, 1  ;;  %v4806_v63 = vld [vmem:[#allocation48_spill] sm:$0xff] }
 0x9f6   : > { %vm772_vm10 = vcmp.eq.s32.totalorder %v4806_v63, 1 }
 0x9f9   : > { %v1330_v50 = vpop.permute.xlu2 %1329 }
 0x9fa   : > { %vm1331_vm2 = vcmp.eq.s32.totalorder %v1330_v50, 1  ;;  %v4808_v50 = vld [vmem:[#allocation77_spill] sm:$0xff] }
 0x9fc   : > { %737 = vrot.lane.b32.xlu0 %v3928_v6, %s2589_s23 }
 0xa01   : > { %v1941_v1 = vpop.permute.xlu2 %1940 }
 0xa02   : > { %vm1942_vm1 = vcmp.eq.s32.totalorder %v1941_v1, 1 }
 0xa05   : > { %v3932_v35 = vpop.permute.xlu1 %1904 }
 0xa0d   : > { %v1931_v53 = vpop.permute.xlu1 %1930 }
 0xa0e   : > { %vm1932_vm11 = vcmp.eq.s32.totalorder %v1931_v53, 1  ;;  %v1317_v53 = vsel %vm1316_vm13, %v3622_v60, %v1312_v21 }
 0xa0f   : > { %v1933_v18 = vsel %vm1932_vm11, %v3671_v0, %v1928_v26  ;;  %v1322_v5 = vsel %vm1321_vm14, %v3626_v19, %v1317_v53  ;;  %vm777_vm11 = vcmp.eq.s32.totalorder %v4808_v50, 1  ;;  %v4816_v50 = vld [vmem:[#allocation42_spill] sm:$0xff] }
 0xa10   : > { %v1327_v62 = vsel %vm1326_vm3, %v3630_v25, %v1322_v5  ;;  %v4807_v25 = vld [vmem:[#allocation28_spill] sm:$0xff] }
 0xa15   : > { %v1335_v27 = vpop.permute.xlu1 %1334 }
 0xa16   : > { %vm1336_vm4 = vcmp.eq.s32.totalorder %v1335_v27, 1 }
 0xa1d   : > { %v1946_v7 = vpop.permute.xlu1 %1945 }
 0xa1e   : > { %vm1947_vm0 = vcmp.eq.s32.totalorder %v1946_v7, 1 }
 0xa2d   : > { %v1299_v42 = vpop.permute.xlu0 %1298 }
 0xa2e   : > { %v1300_v48 = vmin.f32 %v1297_v41, %v1299_v42  ;;  %v1332_v41 = vsel %vm1331_vm2, %v3634_v22, %v1327_v62 }
 0xa2f   : > { %v1337_v21 = vsel %vm1336_vm4, %v3818_v61, %v1332_v41  ;;  %v4813_v41 = vld [vmem:[#allocation51_spill] sm:$0xff] }
 0xa30   : > { %v1301_v39 = vadd.f32 %v1300_v48, %v2781_v15 }
 0xa32   : > { %v3937_v52 = vmin.f32 %v1301_v39, %v3924_v12 }
 0xa34   : > { %4803 = vst [vmem:[#allocation66_spill] sm:$0xff] %v3937_v52  ;;  %1353 = vrot.lane.b32.xlu0 %v3937_v52, %s2589_s23 }
 0xa35   : > { %v1936_v26 = vpop.permute.xlu0 %1935 }
 0xa36   : > { %vm1937_vm15 = vcmp.eq.s32.totalorder %v1936_v26, 1  ;;  %v4809_v26 = vld [vmem:[#allocation29_spill] sm:$0xff] }
 0xa37   : > { %v1938_v48 = vsel %vm1937_vm15, %v3675_v24, %v1933_v18  ;;  %v4805_v18 = vld [vmem:[#allocation27_spill] sm:$0xff]  ;;  %vm787_vm15 = vcmp.eq.s32.totalorder %v4813_v41, 1 }
 0xa38   : > { %v1943_v42 = vsel %vm1942_vm1, %v3679_v2, %v1938_v48  ;;  %v4810_v48 = vld [vmem:[#allocation83_spill] sm:$0xff] }
 0xa39   : > { %v1948_v55 = vsel %vm1947_vm0, %v3812_v13, %v1943_v42  ;;  %vm695_vm13 = vcmp.eq.s32.totalorder %v4810_v48, 1  ;;  %v4811_v42 = vld [vmem:[#allocation40_spill] sm:$0xff]  ;;  %vm705_vm0 = vcmp.eq.s32.totalorder %v3849_v49, 1  ;;  %v4819_v48 = vld [vmem:[#allocation22_spill] sm:$0xff]  ;;  %v4821_v41 = vld [vmem:[#allocation35_spill] sm:$0xff] }
 0xa3a   : > { %v696_v62 = vsel %vm695_vm13, %v4805_v18, %v4804_v3 }
 0xa3d   : > { %v1340_v60 = vpop.permute.xlu0 %1339 }
 0xa3e   : > { %vm1341_vm5 = vcmp.eq.s32.totalorder %v1340_v60, 1  ;;  %v4814_v60 = vld [vmem:[#allocation30_spill] sm:$0xff] }
 0xa3f   : > { %v1342_v1 = vsel %vm1341_vm5, %v3822_v28, %v1337_v21  ;;  %vm802_vm5 = vcmp.eq.s32.totalorder %v4819_v48, 1 }
 0xa45   : > { %v1951_v7 = vpop.permute.xlu0 %1950 }
 0xa46   : > { %vm1952_vm7 = vcmp.eq.s32.totalorder %v1951_v7, 1  ;;  %v4815_v7 = vld [vmem:[#allocation78_spill] sm:$0xff] }
 0xa47   : > { %v3953_v4 = vsel %vm1952_vm7, %v3685_v32, %v1948_v55  ;;  %v4812_v55 = vld [vmem:[#allocation79_spill] sm:$0xff]  ;;  %vm792_vm1 = vcmp.eq.s32.totalorder %v4815_v7, 1  ;;  %vm725_vm7 = vcmp.eq.s32.totalorder %v3851_v40, 1 }
 0xa48   : > { %vm700_vm14 = vcmp.eq.s32.totalorder %v4812_v55, 1 }
 0xa4e   : > { %v766_v19 = vpop.permute.xlu0 %765 }
 0xa4f   : > { %vm767_vm9 = vcmp.eq.s32.totalorder %v766_v19, 1  ;;  %v701_v19 = vsel %vm700_vm14, %v4807_v25, %v696_v62 }
 0xa50   : > { %v768_v27 = vsel %vm767_vm9, %v4805_v18, %v4804_v3  ;;  %v706_v63 = vsel %vm705_vm0, %v4809_v26, %v701_v19  ;;  %v4818_v18 = vld [vmem:[#allocation80_spill] sm:$0xff] }
 0xa51   : > { %v773_v22 = vsel %vm772_vm10, %v4807_v25, %v768_v27  ;;  %vm715_vm4 = vcmp.eq.s32.totalorder %v4818_v18, 1 }
 0xa52   : > { %v778_v53 = vsel %vm777_vm11, %v4809_v26, %v773_v22  ;;  %vm730_vm11 = vcmp.eq.s32.totalorder %v4821_v41, 1 }
 0xa56   : > { %v781_v39 = vpop.permute.xlu0 %780 }
 0xa57   : > { %vm782_vm12 = vcmp.eq.s32.totalorder %v781_v39, 1 }
 0xa58   : > { %v783_v5 = vsel %vm782_vm12, %v4811_v42, %v778_v53  ;;  %v4817_v53 = vld [vmem:[#allocation85_spill] sm:$0xff] }
 0xa59   : > { %v788_v21 = vsel %vm787_vm15, %v4814_v60, %v783_v5  ;;  %vm710_vm3 = vcmp.eq.s32.totalorder %v4817_v53, 1  ;;  %v4820_v5 = vld [vmem:[#allocation70_spill] sm:$0xff]  ;;  %v1345_v53 = vpop.permute.xlu2 %1344 }
 0xa5a   : > { %v793_v22 = vsel %vm792_vm1, %v4779_v9, %v788_v21  ;;  %v711_v3 = vsel %vm710_vm3, %v4811_v42, %v706_v63  ;;  %vm720_vm9 = vcmp.eq.s32.totalorder %v4820_v5, 1  ;;  %v4822_v21 = vld [vmem:[#allocation76_spill] sm:$0xff]  ;;  %vm1346_vm13 = vcmp.eq.s32.totalorder %v1345_v53, 1 }
 0xa5b   : > { %v716_v49 = vsel %vm715_vm4, %v4814_v60, %v711_v3  ;;  %vm735_vm12 = vcmp.eq.s32.totalorder %v4822_v21, 1  ;;  %v1350_v3 = vpop.permute.xlu1 %1349  ;;  %v1347_v18 = vsel %vm1346_vm13, %v3827_v37, %v1342_v1 }
 0xa5c   : > { %v721_v55 = vsel %vm720_vm9, %v4779_v9, %v716_v49  ;;  %v741_v9 = vadd.f32 %v3928_v6, %v4674_v38  ;;  %vm1351_vm14 = vcmp.eq.s32.totalorder %v1350_v3, 1 }
 0xa5d   : > { %v726_v42 = vsel %vm725_vm7, %v4816_v50, %v721_v55 }
 0xa5e   : > { %v796_v27 = vpop.permute.xlu0 %795  ;;  %v731_v60 = vsel %vm730_vm11, %v4782_v30, %v726_v42 }
 0xa5f   : > { %vm797_vm2 = vcmp.eq.s32.totalorder %v796_v27, 1  ;;  %v736_v7 = vsel %vm735_vm12, %v4784_v47, %v731_v60 }
 0xa60   : > { %v798_v39 = vsel %vm797_vm2, %v4816_v50, %v793_v22  ;;  %v1906_v50 = vmin.f32 %v3882_v33, %v3932_v35  ;;  %v1352_v35 = vsel %vm1351_vm14, %v3831_v34, %v1347_v18  ;;  %v4042_v18 = vld [vmem:[%s2730_s25] sm:$0xff] }
 0xa61   : > { %v803_v26 = vsel %vm802_vm5, %v4782_v30, %v798_v39  ;;  %v1956_v42 = vpop.permute.xlu2 %1955 }
 0xa62   : > { %vm1957_vm15 = vcmp.eq.s32.totalorder %v1956_v42, 1 }
 0xa63   : > { %v1958_v60 = vsel %vm1957_vm15, %v3836_v31, %v3953_v4 }
 0xa66   : > { %v806_v25 = vpop.permute.xlu0 %805 }
 0xa67   : > { %vm807_vm10 = vcmp.eq.s32.totalorder %v806_v25, 1 }
 0xa68   : > { %v3984_v62 = vsel %vm807_vm10, %v4784_v47, %v803_v26  ;;  %v1907_v47 = vadd.f32 %v1906_v50, %v2781_v15 }
 0xa6a   : > { %v4004_v39 = vmin.f32 %v1907_v47, %v3924_v12  ;;  %v1357_v12 = vadd.f32 %v3937_v52, %v4674_v38 }
 0xa6c   : > { %4823 = vst [vmem:[#allocation61_spill] sm:$0xff] %v4004_v39 }
 0xa6e   : > { %v738_v40 = vpop.permute.xlu0 %737 }
 0xa6f   : > { %v739_v19 = vsel %vm378_vm6, %v3918_v54, %v738_v40  ;;  %v1963_v40 = vadd.f32 %v4004_v39, %v4674_v38 }
 0xa70   : > { %v740_v27 = vadd.f32 %v739_v19, %v736_v7 }
 0xa72   : > { %v742_v63 = vmin.f32 %v740_v27, %v741_v9 }
 0xa74   : > { %v743_v22 = vsub.f32 %v742_v63, %v2781_v15 }
 0xa76   : > { %v744_v30 = vsel %vm285_vm8, %v743_v22, 1e+09 }
 0xa77   : > { %745 = vrot.lane.b32.xlu1 %v744_v30, %s2589_s23 }
 0xa7f   : > { %1959 = vrot.lane.b32.xlu1 %v4004_v39, %s2589_s23  ;;  %v4834_v39 = vld [vmem:[#allocation60_spill] sm:$0xff] }
 0xa80   : > { %vm859_vm5 = vcmp.eq.s32.totalorder %v4834_v39, 1  ;;  %v2468_v39 = vld [vmem:[%s2736_s29 + $0xc0] sm:$0xff] }
 0xaa6   : > { %v1354_v33 = vpop.permute.xlu0 %1353 }
 0xaa7   : > { %v1355_v49 = vsel %vm378_vm6, %v3918_v54, %v1354_v33  ;;  %v2267_v33 = vadd.s32 4294967295, %v4042_v18 }
 0xaa8   : > { %v1356_v48 = vadd.f32 %v1355_v49, %v1352_v35  ;;  %v4824_v49 = vmov 9  }
 0xaa9   : > { %vm909_vm0 = vcmp.gt.s32.totalorder %v2267_v33, 0 }
 0xaaa   : > { %v1358_v25 = vmin.f32 %v1356_v48, %v1357_v12  ;;  %v910_v35 = vsel %vm909_vm0, %v2267_v33, 0  ;;  %v918_v12 = vcvt.s32.f32 %v4042_v18 }
 0xaac   : > { %v1359_v5 = vsub.f32 %v1358_v25, %v2781_v15  ;;  %v919_v48 = vmul.f32 %v918_v12, %v4674_v38  ;;  %v4825_v25 = vld [vmem:[#allocation19_spill] sm:$0xff] }
 0xaae   : > { %v1360_v26 = vsel %vm285_vm8, %v1359_v5, 1e+09 }
 0xaaf   : > { %1361 = vrot.lane.b32.xlu2 %v1360_v26, %s2589_s23 }
 0xae9   : > { %v746_v1 = vpop.permute.xlu1 %745 }
 0xaea   : > { %v747_v55 = vmin.f32 %v744_v30, %v746_v1 }
 0xaec   : > { %748 = vrot.lane.b32.xlu2 %v747_v55, %s2594_s8 }
 0xaf1   : > { %v1960_v41 = vpop.permute.xlu1 %1959 }
 0xaf2   : > { %v1961_v21 = vsel %vm378_vm6, %v3918_v54, %v1960_v41  ;;  %v4585_v54 = vmov 1   ;;  %v4070_v41 = vstv %s755_s4 }
 0xaf3   : > { %v1962_v7 = vadd.f32 %v1961_v21, %v1958_v60  ;;  %2416 = vset.pattern.permute.xlu1 %v4585_v54  ;;  %v4075_v60 = vadd.f32 %v4070_v41, %v4801_v8 }
 0xaf5   : > { %v1964_v19 = vmin.f32 %v1962_v7, %v1963_v40  ;;  %v4826_v7 = vld [vmem:[#allocation44_spill] sm:$0xff] }
 0xaf7   : > { %v1965_v27 = vsub.f32 %v1964_v19, %v2781_v15 }
 0xaf9   : > { %v1966_v9 = vsel %vm285_vm8, %v1965_v27, 1e+09  ;;  %v4827_v27 = vmov 0  }
 0xafa   : > { %1967 = vrot.lane.b32.xlu0 %v1966_v9, %s2589_s23 }
 0xb09   : > { %v1362_v63 = vpop.permute.xlu2 %1361 }
 0xb0a   : > { %v1363_v22 = vmin.f32 %v1360_v26, %v1362_v63  ;;  %v4828_v63 = vld [vmem:[#allocation25_spill] sm:$0xff] }
 0xb0c   : > { %1364 = vrot.lane.b32.xlu1 %v1363_v22, %s2594_s8 }
 0xb46   : > { %v749_v4 = vpop.permute.xlu2 %748 }
 0xb47   : > { %v750_v50 = vmin.f32 %v747_v55, %v749_v4  ;;  %v4829_v4 = vld [vmem:[#allocation38_spill] sm:$0xff] }
 0xb49   : > { %751 = vrot.lane.b32.xlu0 %v750_v50, %s2596_s10 }
 0xb51   : > { %1378 = vperm.xlu0 %2415, %v2805_v20  }
 0xb59   : > { %1989 = vperm.xlu0 %2415, %v4725_v14  }
 0xb61   : > { %1994 = vperm.xlu0 %2415, %v4727_v56  }
 0xb69   : > { %1398 = vperm.xlu0 %2415, %v4728_v51  }
 0xb6c   : > { %v1968_v30 = vpop.permute.xlu0 %1967 }
 0xb6d   : > { %v1969_v47 = vmin.f32 %v1966_v9, %v1968_v30 }
 0xb6f   : > { %1970 = vrot.lane.b32.xlu2 %v1969_v47, %s2594_s8 }
 0xb71   : > { %1403 = vperm.xlu0 %2415, %v2998_v59  }
 0xb79   : > { %1408 = vperm.xlu0 %2415, %v4795_v16  }
 0xb7e   : > { %v1365_v53 = vpop.permute.xlu1 %1364 }
 0xb7f   : > { %v1366_v3 = vmin.f32 %v1363_v22, %v1365_v53 }
 0xb81   : > { %1367 = vrot.lane.b32.xlu1 %v1366_v3, %s2596_s10  ;;  %2019 = vperm.xlu0 %2415, %v4797_v58  }
 0xb89   : > { %912 = vperm.xlu1 %2416, %v910_v35   ;;  %2419 = vset.pattern.permute.xlu0 %v4824_v49 }
 0xb8a   : > { %837 = vperm.xlu0 %2419, %v4798_v17  }
 0xb91   : > { %921 = vrot.lane.b32.xlu1 %v919_v48, %s2589_s23 }
 0xb92   : > { %862 = vperm.xlu0 %2419, %v4825_v25   ;;  %2417 = vset.pattern.permute.xlu1 %v4791_v46  ;;  %v4831_v25 = vld [vmem:[#allocation47_spill] sm:$0xff] }
 0xb93   : > { %vm844_vm2 = vcmp.eq.s32.totalorder %v4831_v25, 1  ;;  %v2465_v25 = vld [vmem:[%s2736_s29 + $0x78] sm:$0xff] }
 0xb99   : > { %1984 = vperm.xlu1 %2417, %v2964_v43  }
 0xba1   : > { %1383 = vperm.xlu1 %2417, %v2952_v36  }
 0xba9   : > { %1388 = vperm.xlu1 %2417, %v2970_v44  }
 0xbb1   : > { %1393 = vperm.xlu1 %2417, %v2993_v57  }
 0xbb9   : > { %2004 = vperm.xlu1 %2417, %v4793_v29  }
 0xbbb   : > { %v752_v5 = vpop.permute.xlu0 %751 }
 0xbbc   : > { %v753_v42 = vmin.f32 %v750_v50, %v752_v5  ;;  %v2460_v5 = vld [vmem:[%s2736_s29] sm:$0xff] }
 0xbbe   : > { %v754_v21 = vadd.f32 %v753_v42, %v2781_v15 }
 0xbc0   : > { %v4080_v19 = vmin.f32 %v754_v21, %v4075_v60  ;;  %v2462_v21 = vld [vmem:[%s2736_s29 + $0x30] sm:$0xff] }
 0xbc1   : > { %2009 = vperm.xlu1 %2417, %v4730_v45  }
 0xbc3   : > { %v4060_v26 = vpop.permute.xlu0 %1378 }
 0xbc4   : > { %vm1380_vm15 = vcmp.eq.s32.totalorder %v4060_v26, 1  ;;  %v4148_v26 = vld [vmem:[%s2736_s29 + $0x68] sm:$0xff] }
 0xbc9   : > { %2014 = vperm.xlu1 %2417, %v3012_v11   ;;  %v1971_v1 = vpop.permute.xlu2 %1970 }
 0xbca   : > { %v4063_v55 = vmin.f32 %v1969_v47, %v1971_v1  ;;  %v2461_v1 = vld [vmem:[%s2736_s29 + $0x18] sm:$0xff] }
 0xbcb   : > { %v4065_v46 = vpop.permute.xlu0 %1989 }
 0xbcc   : > { %1973 = vrot.lane.b32.xlu2 %v4063_v55, %s2596_s10  ;;  %vm1991_vm13 = vcmp.eq.s32.totalorder %v4065_v46, 1 }
 0xbd1   : > { %1418 = vperm.xlu1 %2417, %v3026_v23  }
 0xbd3   : > { %v1995_v40 = vpop.permute.xlu0 %1994 }
 0xbd4   : > { %1999 = vperm.xlu2 %2418, %v4826_v7   ;;  %vm1996_vm14 = vcmp.eq.s32.totalorder %v1995_v40, 1 }
 0xbd9   : > { %809 = vrot.lane.b32.xlu1 %v4080_v19, %s2589_s23 }
 0xbda   : > { %2420 = vset.pattern.permute.xlu1 %v4827_v27 }
 0xbdb   : > { %v4085_v9 = vpop.permute.xlu0 %1398 }
 0xbdc   : > { %1413 = vperm.xlu2 %2418, %v4828_v63  }
 0xbe3   : > { %v4088_v22 = vpop.permute.xlu0 %1403 }
 0xbe4   : > { %2024 = vperm.xlu2 %2418, %v4829_v4  }
 0xbeb   : > { %v4091_v50 = vpop.permute.xlu0 %1408 }
 0xbec   : > { %2421 = vset.pattern.permute.xlu2 %v4827_v27 }
 0xbf3   : > { %v1368_v30 = vpop.permute.xlu1 %1367  ;;  %v4094_v47 = vpop.permute.xlu0 %2019 }
 0xbf4   : > { %v1369_v53 = vmin.f32 %v1366_v3, %v1368_v30  ;;  %v4832_v3 = vld [vmem:[#allocation58_spill] sm:$0xff] }
 0xbf5   : > { %vm849_vm3 = vcmp.eq.s32.totalorder %v4832_v3, 1 }
 0xbf6   : > { %v1370_v33 = vadd.f32 %v1369_v53, %v2781_v15  ;;  %v4833_v53 = vld [vmem:[#allocation50_spill] sm:$0xff] }
 0xbf7   : > { %vm854_vm4 = vcmp.eq.s32.totalorder %v4833_v53, 1  ;;  %v2467_v53 = vld [vmem:[%s2736_s29 + $0xa8] sm:$0xff] }
 0xbf8   : > { %v4098_v35 = vmin.f32 %v1370_v33, %v4075_v60  ;;  %v2463_v33 = vld [vmem:[%s2736_s29 + $0x48] sm:$0xff] }
 0xbfa   : > { %1422 = vrot.lane.b32.xlu0 %v4098_v35, %s2589_s23 }
 0xbfb   : > { %v4102_v12 = vpop.permute.xlu1 %912 }
 0xbfc   : > { %4830 = vst [vmem:[#allocation67_spill] sm:$0xff] %v4102_v12  ;;  %v838_v48 = vpop.permute.xlu0 %837  ;;  %v2464_v12 = vld [vmem:[%s2736_s29 + $0x60] sm:$0xff] }
 0xbfd   : > { %vm839_vm1 = vcmp.eq.s32.totalorder %v838_v48, 1 }
 0xbfe   : > { %v840_v42 = vsel %vm839_vm1, %v2461_v1, %v2460_v5  ;;  %v4835_v1 = vld [vmem:[#allocation62_spill] sm:$0xff] }
 0xbff   : > { %v845_v30 = vsel %vm844_vm2, %v2462_v21, %v840_v42  ;;  %vm869_vm9 = vcmp.eq.s32.totalorder %v4835_v1, 1  ;;  %v2466_v42 = vld [vmem:[%s2736_s29 + $0x90] sm:$0xff]  ;;  %v4836_v21 = vld [vmem:[#allocation53_spill] sm:$0xff] }
 0xc00   : > { %v850_v54 = vsel %vm849_vm3, %v2463_v33, %v845_v30  ;;  %vm874_vm10 = vcmp.eq.s32.totalorder %v4836_v21, 1  ;;  %v4837_v33 = vld [vmem:[#allocation56_spill] sm:$0xff]  ;;  %v4841_v21 = vld [vmem:[#allocation17_spill] sm:$0xff] }
 0xc01   : > { %v855_v48 = vsel %vm854_vm4, %v2464_v12, %v850_v54  ;;  %vm879_vm11 = vcmp.eq.s32.totalorder %v4837_v33, 1  ;;  %v2469_v12 = vld [vmem:[%s2736_s29 + $0xd8] sm:$0xff] }
 0xc02   : > { %v860_v52 = vsel %vm859_vm5, %v2465_v25, %v855_v48 }
 0xc03   : > { %v4114_v6 = vpop.permute.xlu1 %921 }
 0xc04   : > { %v863_v5 = vpop.permute.xlu0 %862 }
 0xc05   : > { %vm864_vm7 = vcmp.eq.s32.totalorder %v863_v5, 1  ;;  %v4839_v5 = vld [vmem:[#allocation36_spill] sm:$0xff] }
 0xc06   : > { %v865_v3 = vsel %vm864_vm7, %v2466_v42, %v860_v52  ;;  %v4838_v52 = vld [vmem:[#allocation45_spill] sm:$0xff]  ;;  %v4840_v42 = vld [vmem:[#allocation74_spill] sm:$0xff] }
 0xc07   : > { %v870_v30 = vsel %vm869_vm9, %v2467_v53, %v865_v3  ;;  %vm2021_vm9 = vcmp.eq.s32.totalorder %v4094_v47, 1 }
 0xc08   : > { %v875_v54 = vsel %vm874_vm10, %v2468_v39, %v870_v30  ;;  %v4132_v30 = vld [vmem:[%s2736_s29 + $0x8] sm:$0xff]  ;;  %v4135_v39 = vld [vmem:[%s2736_s29 + $0x20] sm:$0xff]  ;;  %vm1400_vm10 = vcmp.eq.s32.totalorder %v4085_v9, 1 }
 0xc09   : > { %v4123_v48 = vsel %vm879_vm11, %v2469_v12, %v875_v54  ;;  %v1381_v46 = vsel %vm1380_vm15, %v4135_v39, %v4132_v30  ;;  %v4140_v12 = vld [vmem:[%s2736_s29 + $0x38] sm:$0xff]  ;;  %vm1405_vm11 = vcmp.eq.s32.totalorder %v4088_v22, 1  ;;  %v1426_v22 = vadd.f32 %v4098_v35, %v4674_v38 }
 0xc0b   : > { %v1985_v25 = vpop.permute.xlu1 %1984 }
 0xc0c   : > { %vm1986_vm12 = vcmp.eq.s32.totalorder %v1985_v25, 1  ;;  %v4144_v25 = vld [vmem:[%s2736_s29 + $0x50] sm:$0xff] }
 0xc0d   : > { %v1987_v1 = vsel %vm1986_vm12, %v4839_v5, %v4838_v52 }
 0xc0e   : > { %v1992_v3 = vsel %vm1991_vm13, %v4840_v42, %v1987_v1  ;;  %vm1410_vm13 = vcmp.eq.s32.totalorder %v4091_v50, 1 }
 0xc0f   : > { %v1997_v53 = vsel %vm1996_vm14, %v4841_v21, %v1992_v3 }
 0xc13   : > { %v1384_v33 = vpop.permute.xlu1 %1383 }
 0xc14   : > { %vm1385_vm0 = vcmp.eq.s32.totalorder %v1384_v33, 1 }
 0xc15   : > { %v1386_v40 = vsel %vm1385_vm0, %v4140_v12, %v1381_v46 }
 0xc1b   : > { %v1389_v54 = vpop.permute.xlu1 %1388 }
 0xc1c   : > { %vm1390_vm1 = vcmp.eq.s32.totalorder %v1389_v54, 1 }
 0xc1d   : > { %v1391_v52 = vsel %vm1390_vm1, %v4144_v25, %v1386_v40  ;;  %vm306_vm1 = vcmp.eq.s32.totalorder %v4042_v18, 0 }
 0xc23   : > { %v1394_v5 = vpop.permute.xlu1 %1393 }
 0xc24   : > { %vm1395_vm2 = vcmp.eq.s32.totalorder %v1394_v5, 1 }
 0xc25   : > { %v1396_v1 = vsel %vm1395_vm2, %v4148_v26, %v1391_v52 }
 0xc26   : > { %v1974_v42 = vpop.permute.xlu2 %1973 }
 0xc27   : > { %v1975_v3 = vmin.f32 %v4063_v55, %v1974_v42 }
 0xc29   : > { %v1976_v21 = vadd.f32 %v1975_v3, %v2781_v15 }
 0xc2b   : > { %v4154_v33 = vmin.f32 %v1976_v21, %v4075_v60  ;;  %v2005_v46 = vpop.permute.xlu1 %2004 }
 0xc2c   : > { %vm2006_vm3 = vcmp.eq.s32.totalorder %v2005_v46, 1 }
 0xc2d   : > { %2028 = vrot.lane.b32.xlu1 %v4154_v33, %s2589_s23 }
 0xc2e   : > { %v2000_v54 = vpop.permute.xlu2 %1999 }
 0xc2f   : > { %vm2001_vm4 = vcmp.eq.s32.totalorder %v2000_v54, 1 }
 0xc30   : > { %v2002_v40 = vsel %vm2001_vm4, %v3671_v0, %v1997_v53 }
 0xc31   : > { %v2007_v5 = vsel %vm2006_vm3, %v3675_v24, %v2002_v40 }
 0xc33   : > { %v2010_v52 = vpop.permute.xlu1 %2009 }
 0xc34   : > { %vm2011_vm5 = vcmp.eq.s32.totalorder %v2010_v52, 1 }
 0xc35   : > { %v2012_v55 = vsel %vm2011_vm5, %v3679_v2, %v2007_v5  ;;  %v813_v2 = vadd.f32 %v4080_v19, %v4674_v38 }
 0xc36   : > { %v1414_v40 = vpop.permute.xlu2 %1413 }
 0xc37   : > { %vm1415_vm12 = vcmp.eq.s32.totalorder %v1414_v40, 1 }
 0xc3b   : > { %v2015_v42 = vpop.permute.xlu1 %2014 }
 0xc3c   : > { %vm2016_vm7 = vcmp.eq.s32.totalorder %v2015_v42, 1 }
 0xc3d   : > { %v2017_v60 = vsel %vm2016_vm7, %v3812_v13, %v2012_v55 }
 0xc3e   : > { %v2022_v3 = vsel %vm2021_vm9, %v3685_v32, %v2017_v60  ;;  %v4176_v32 = vld [vmem:[%s2736_s29 + $0x80] sm:$0xff] }
 0xc3f   : > { %v1401_v13 = vsel %vm1400_vm10, %v4176_v32, %v1396_v1 }
 0xc43   : > { %v1419_v21 = vpop.permute.xlu1 %1418 }
 0xc44   : > { %vm1420_vm14 = vcmp.eq.s32.totalorder %v1419_v21, 1 }
 0xc4b   : > { %v810_v46 = vpop.permute.xlu1 %809 }
 0xc4c   : > { %v811_v0 = vsel %vm378_vm6, %v4070_v41, %v810_v46 }
 0xc4d   : > { %v812_v24 = vadd.f32 %v811_v0, %v3984_v62  ;;  %v1406_v62 = vsel %vm1405_vm11, %v3818_v61, %v1401_v13 }
 0xc4e   : > { %v1411_v5 = vsel %vm1410_vm13, %v3822_v28, %v1406_v62  ;;  %v2025_v28 = vpop.permute.xlu2 %2024 }
 0xc4f   : > { %v814_v53 = vmin.f32 %v812_v24, %v813_v2  ;;  %v1416_v52 = vsel %vm1415_vm12, %v3827_v37, %v1411_v5  ;;  %vm2026_vm15 = vcmp.eq.s32.totalorder %v2025_v28, 1  ;;  %v2032_v24 = vadd.f32 %v4154_v33, %v4674_v38 }
 0xc50   : > { %v1421_v9 = vsel %vm1420_vm14, %v3831_v34, %v1416_v52  ;;  %v2027_v34 = vsel %vm2026_vm15, %v3836_v31, %v2022_v3  ;;  %v4211_v3 = vld [vmem:[%s2730_s25 + $0x8] sm:$0xff] }
 0xc51   : > { %v815_v54 = vsub.f32 %v814_v53, %v2781_v15  ;;  %vm942_vm0 = vcmp.eq.s32.totalorder %v4211_v3, 0 }
 0xc53   : > { %v816_v47 = vsel %vm285_vm8, %v815_v54, 1e+09 }
 0xc54   : > { %817 = vrot.lane.b32.xlu2 %v816_v47, %s2589_s23 }
 0xc6c   : > { %v1423_v55 = vpop.permute.xlu0 %1422 }
 0xc6d   : > { %v1424_v1 = vsel %vm378_vm6, %v4070_v41, %v1423_v55 }
 0xc6e   : > { %v1425_v42 = vadd.f32 %v1424_v1, %v1421_v9  ;;  %v4842_v1 = vld [vmem:[#allocation41_spill] sm:$0xff] }
 0xc70   : > { %v1427_v60 = vmin.f32 %v1425_v42, %v1426_v22 }
 0xc72   : > { %v1428_v46 = vsub.f32 %v1427_v60, %v2781_v15 }
 0xc74   : > { %v1429_v50 = vsel %vm285_vm8, %v1428_v46, 1e+09 }
 0xc75   : > { %1430 = vrot.lane.b32.xlu2 %v1429_v50, %s2589_s23 }
 0xc9f   : > { %v2029_v37 = vpop.permute.xlu1 %2028 }
 0xca0   : > { %v2030_v21 = vsel %vm378_vm6, %v4070_v41, %v2029_v37 }
 0xca1   : > { %v2031_v0 = vadd.f32 %v2030_v21, %v2027_v34  ;;  %v4843_v34 = vld [vmem:[#allocation72_spill] sm:$0xff]  ;;  %v4845_v21 = vld [vmem:[#allocation18_spill] sm:$0xff] }
 0xca3   : > { %v2033_v2 = vmin.f32 %v2031_v0, %v2032_v24 }
 0xca5   : > { %v2034_v53 = vsub.f32 %v2033_v2, %v2781_v15  ;;  %v4267_v2 = vstv %s827_s5 }
 0xca7   : > { %v2035_v54 = vsel %vm285_vm8, %v2034_v53, 1e+09 }
 0xca8   : > { %2036 = vrot.lane.b32.xlu0 %v2035_v54, %s2589_s23 }
 0xcae   : > { %v818_v13 = vpop.permute.xlu2 %817 }
 0xcaf   : > { %v819_v40 = vmin.f32 %v816_v47, %v818_v13  ;;  %v943_v47 = vsel %vm942_vm0, 1, %v4827_v27  ;;  %v2477_v13 = vld [vmem:[%s2736_s29 + $0x10] sm:$0xff] }
 0xcb1   : > { %820 = vrot.lane.b32.xlu0 %v819_v40, %s2594_s8 }
 0xcb9   : > { %1452 = vperm.xlu0 %2419, %v2952_v36  }
 0xcc1   : > { %2068 = vperm.xlu0 %2419, %v4826_v7  }
 0xcc9   : > { %1472 = vperm.xlu0 %2419, %v2998_v59  }
 0xccf   : > { %v1431_v31 = vpop.permute.xlu2 %1430 }
 0xcd0   : > { %v1432_v41 = vmin.f32 %v1429_v50, %v1431_v31 }
 0xcd1   : > { %2083 = vperm.xlu0 %2419, %v3012_v11  }
 0xcd2   : > { %1433 = vrot.lane.b32.xlu1 %v1432_v41, %s2594_s8 }
 0xcd9   : > { %1487 = vperm.xlu0 %2419, %v3026_v23  }
 0xcda   : > { %945 = vperm.xlu1 %2420, %v943_v47  }
 0xce1   : > { %2424 = vset.pattern.permute.xlu0 %v4827_v27 }
 0xce2   : > { %1028 = vperm.xlu1 %2420, %v2805_v20  }
 0xcea   : > { %1235 = vperm.xlu1 %2420, %v2993_v57  }
 0xcf2   : > { %2422 = vset.pattern.permute.xlu1 %v4824_v49 }
 0xcf3   : > { %1447 = vperm.xlu1 %2422, %v2805_v20  }
 0xd1a   : > { %v2037_v62 = vpop.permute.xlu0 %2036 }
 0xd1b   : > { %v2038_v5 = vmin.f32 %v2035_v54, %v2037_v62  ;;  %v829_v54 = vadd.f32 %v4267_v2, %v4801_v8 }
 0xd1d   : > { %2039 = vrot.lane.b32.xlu2 %v2038_v5, %s2594_s8 }
 0xd23   : > { %v821_v52 = vpop.permute.xlu0 %820 }
 0xd24   : > { %v822_v55 = vmin.f32 %v819_v40, %v821_v52  ;;  %v2478_v40 = vld [vmem:[%s2736_s29 + $0x28] sm:$0xff] }
 0xd25   : > { %1097 = vperm.xlu2 %2421, %v2952_v36  }
 0xd26   : > { %823 = vrot.lane.b32.xlu1 %v822_v55, %s2596_s10 }
 0xd2b   : > { %v1453_v60 = vpop.permute.xlu0 %1452 }
 0xd2c   : > { %vm1454_vm5 = vcmp.eq.s32.totalorder %v1453_v60, 1 }
 0xd2d   : > { %1304 = vperm.xlu2 %2421, %v4728_v51  }
 0xd2e   : > { %2058 = vperm.xlu1 %2422, %v4725_v14  }
 0xd35   : > { %2423 = vset.pattern.permute.xlu2 %v4824_v49  ;;  %v307_v49 = vsel %vm306_vm1, 1, %v4827_v27 }
 0xd36   : > { %2063 = vperm.xlu1 %2422, %v4727_v56   ;;  %2053 = vperm.xlu2 %2423, %v2964_v43  }
 0xd37   : > { %309 = vperm.xlu0 %2424, %v307_v49  }
 0xd3e   : > { %1467 = vperm.xlu1 %2422, %v4728_v51  }
 0xd44   : > { %v1434_v20 = vpop.permute.xlu1 %1433 }
 0xd45   : > { %v1435_v23 = vmin.f32 %v1432_v41, %v1434_v20  ;;  %v2069_v20 = vpop.permute.xlu0 %2068 }
 0xd46   : > { %2078 = vperm.xlu1 %2422, %v4730_v45   ;;  %vm2070_vm12 = vcmp.eq.s32.totalorder %v2069_v20, 1 }
 0xd47   : > { %1436 = vrot.lane.b32.xlu2 %v1435_v23, %s2596_s10 }
 0xd4c   : > { %v946_v36 = vpop.permute.xlu1 %945 }
 0xd4d   : > { %vm947_vm2 = vcmp.eq.s32.totalorder %v946_v36, 1 }
 0xd4e   : > { %1482 = vperm.xlu1 %2422, %v4828_v63   ;;  %v948_v51 = vsel %vm947_vm2, %v4801_v8, 0.0 }
 0xd4f   : > { %1457 = vperm.xlu2 %2423, %v2970_v44  }
 0xd54   : > { %v1029_v9 = vpop.permute.xlu1 %1028 }
 0xd55   : > { %vm1030_vm3 = vcmp.eq.s32.totalorder %v1029_v9, 1  ;;  %v2480_v9 = vld [vmem:[%s2736_s29 + $0x58] sm:$0xff] }
 0xd56   : > { %v1031_v22 = vsel %vm1030_vm3, %v4842_v1, %v948_v51  ;;  %2093 = vperm.xlu1 %2422, %v4829_v4  }
 0xd57   : > { %1462 = vperm.xlu2 %2423, %v2993_v57  }
 0xd5c   : > { %v4244_v42 = vpop.permute.xlu1 %1235 }
 0xd5e   : > { %2426 = vset.pattern.permute.xlu1 %v4827_v27 }
 0xd5f   : > { %2073 = vperm.xlu2 %2423, %v4793_v29  }
 0xd65   : > { %v1448_v46 = vpop.permute.xlu1 %1447 }
 0xd66   : > { %vm1449_vm4 = vcmp.eq.s32.totalorder %v1448_v46, 1 }
 0xd67   : > { %v1450_v50 = vsel %vm1449_vm4, %v4135_v39, %v4132_v30  ;;  %1477 = vperm.xlu2 %2423, %v4795_v16   ;;  %v4844_v39 = vld [vmem:[#allocation16_spill] sm:$0xff] }
 0xd68   : > { %v1455_v4 = vsel %vm1454_vm5, %v4140_v12, %v1450_v50 }
 0xd6f   : > { %2088 = vperm.xlu2 %2423, %v4797_v58  }
 0xd77   : > { %v2040_v57 = vpop.permute.xlu2 %2039  ;;  %2425 = vset.pattern.permute.xlu2 %v4827_v27 }
 0xd78   : > { %v4254_v28 = vmin.f32 %v2038_v5, %v2040_v57  ;;  %v2479_v5 = vld [vmem:[%s2736_s29 + $0x40] sm:$0xff] }
 0xd7a   : > { %2042 = vrot.lane.b32.xlu0 %v4254_v28, %s2596_s10 }
 0xd7f   : > { %v1098_v37 = vpop.permute.xlu2 %1097 }
 0xd80   : > { %vm1099_vm7 = vcmp.eq.s32.totalorder %v1098_v37, 1 }
 0xd81   : > { %v4259_v30 = vsel %vm1099_vm7, %v4843_v34, %v1031_v22  ;;  %v2481_v22 = vld [vmem:[%s2736_s29 + $0x70] sm:$0xff] }
 0xd82   : > { %400 = vperm.xlu0 %2424, %v4798_v17  }
 0xd87   : > { %v4263_v12 = vpop.permute.xlu2 %1304 }
 0xd8a   : > { %688 = vperm.xlu0 %2424, %v4844_v39  }
 0xd90   : > { %v2054_v0 = vpop.permute.xlu2 %2053 }
 0xd91   : > { %vm2055_vm9 = vcmp.eq.s32.totalorder %v2054_v0, 1 }
 0xd92   : > { %904 = vperm.xlu0 %2424, %v4845_v21   ;;  %v2056_v31 = vsel %vm2055_vm9, %v2478_v40, %v2477_v13  ;;  %v2483_v13 = vld [vmem:[%s2736_s29 + $0xa0] sm:$0xff] }
 0xd98   : > { %v824_v24 = vpop.permute.xlu1 %823 }
 0xd99   : > { %v825_v53 = vmin.f32 %v822_v55, %v824_v24 }
 0xd9a   : > { %1166 = vperm.xlu0 %2424, %v2970_v44  }
 0xd9b   : > { %v826_v17 = vadd.f32 %v825_v53, %v2781_v15  ;;  %v2482_v53 = vld [vmem:[%s2736_s29 + $0x88] sm:$0xff] }
 0xd9d   : > { %v4275_v41 = vmin.f32 %v826_v17, %v829_v54 }
 0xda0   : > { %v2059_v47 = vpop.permute.xlu1 %2058 }
 0xda1   : > { %vm2060_vm10 = vcmp.eq.s32.totalorder %v2059_v47, 1  ;;  %v1437_v62 = vpop.permute.xlu2 %1436  ;;  %v2485_v47 = vld [vmem:[%s2736_s29 + $0xd0] sm:$0xff] }
 0xda2   : > { %v2061_v52 = vsel %vm2060_vm10, %v2479_v5, %v2056_v31  ;;  %v1438_v55 = vmin.f32 %v1435_v23, %v1437_v62  ;;  %881 = vrot.lane.b32.xlu0 %v4275_v41, %s2589_s23  ;;  %v1473_v23 = vpop.permute.xlu0 %1472 }
 0xda3   : > { %vm1474_vm2 = vcmp.eq.s32.totalorder %v1473_v23, 1  ;;  %v4849_v23 = vld [vmem:[#allocation57_spill] sm:$0xff] }
 0xda4   : > { %v1439_v44 = vadd.f32 %v1438_v55, %v2781_v15 }
 0xda6   : > { %v4281_v36 = vmin.f32 %v1439_v44, %v829_v54 }
 0xda8   : > { %v2064_v49 = vpop.permute.xlu1 %2063  ;;  %1491 = vrot.lane.b32.xlu2 %v4281_v36, %s2589_s23 }
 0xda9   : > { %vm2065_vm11 = vcmp.eq.s32.totalorder %v2064_v49, 1  ;;  %v1458_v51 = vpop.permute.xlu2 %1457 }
 0xdaa   : > { %v2066_v1 = vsel %vm2065_vm11, %v2480_v9, %v2061_v52  ;;  %vm1459_vm13 = vcmp.eq.s32.totalorder %v1458_v51, 1  ;;  %v2084_v0 = vpop.permute.xlu0 %2083  ;;  %v4846_v51 = vld [vmem:[#allocation46_spill] sm:$0xff]  ;;  %v4847_v9 = vld [vmem:[#allocation81_spill] sm:$0xff] }
 0xdab   : > { %v2071_v60 = vsel %vm2070_vm12, %v2481_v22, %v2066_v1  ;;  %v1460_v57 = vsel %vm1459_vm13, %v4144_v25, %v1455_v4  ;;  %vm2085_vm5 = vcmp.eq.s32.totalorder %v2084_v0, 1  ;;  %v2484_v4 = vld [vmem:[%s2736_s29 + $0xb8] sm:$0xff]  ;;  %vm474_vm11 = vcmp.eq.s32.totalorder %v4846_v51, 1 }
 0xdac   : > { %v4848_v22 = vld [vmem:[#allocation37_spill] sm:$0xff]  ;;  %vm546_vm12 = vcmp.eq.s32.totalorder %v4849_v23, 1 }
 0xdb0   : > { %v1468_v46 = vpop.permute.xlu1 %1467 }
 0xdb1   : > { %v1463_v50 = vpop.permute.xlu2 %1462  ;;  %vm1469_vm14 = vcmp.eq.s32.totalorder %v1468_v46, 1 }
 0xdb2   : > { %vm1464_vm15 = vcmp.eq.s32.totalorder %v1463_v50, 1  ;;  %v1488_v62 = vpop.permute.xlu0 %1487 }
 0xdb3   : > { %v1465_v37 = vsel %vm1464_vm15, %v4148_v26, %v1460_v57  ;;  %v4852_v57 = vld [vmem:[#allocation43_spill] sm:$0xff] }
 0xdb4   : > { %v1470_v34 = vsel %vm1469_vm14, %v4176_v32, %v1465_v37 }
 0xdb5   : > { %v1475_v39 = vsel %vm1474_vm2, %v3818_v61, %v1470_v34  ;;  %v4853_v34 = vld [vmem:[#allocation59_spill] sm:$0xff]  ;;  %vm1237_vm2 = vcmp.eq.s32.totalorder %v4244_v42, 1 }
 0xdb8   : > { %v2079_v21 = vpop.permute.xlu1 %2078 }
 0xdb9   : > { %v2074_v24 = vpop.permute.xlu2 %2073  ;;  %vm2080_vm3 = vcmp.eq.s32.totalorder %v2079_v21, 1 }
 0xdba   : > { %vm2075_vm4 = vcmp.eq.s32.totalorder %v2074_v24, 1  ;;  %v310_v61 = vpop.permute.xlu0 %309 }
 0xdbb   : > { %v2076_v17 = vsel %vm2075_vm4, %v2482_v53, %v2071_v60  ;;  %vm311_vm9 = vcmp.eq.s32.totalorder %v310_v61, 1  ;;  %vm1306_vm4 = vcmp.eq.s32.totalorder %v4263_v12, 1  ;;  %v885_v12 = vadd.f32 %v4275_v41, %v4674_v38 }
 0xdbc   : > { %v2081_v25 = vsel %vm2080_vm3, %v2483_v13, %v2076_v17  ;;  %v312_v49 = vsel %vm311_vm9, %v4801_v8, 0.0  ;;  %v4854_v17 = vld [vmem:[#allocation39_spill] sm:$0xff] }
 0xdbd   : > { %v2086_v40 = vsel %vm2085_vm5, %v2484_v4, %v2081_v25  ;;  %v4855_v25 = vld [vmem:[#allocation71_spill] sm:$0xff] }
 0xdc0   : > { %v1483_v53 = vpop.permute.xlu1 %1482 }
 0xdc1   : > { %v1478_v31 = vpop.permute.xlu2 %1477  ;;  %vm1484_vm5 = vcmp.eq.s32.totalorder %v1483_v53, 1 }
 0xdc2   : > { %vm1479_vm3 = vcmp.eq.s32.totalorder %v1478_v31, 1 }
 0xdc9   : > { %v2089_v26 = vpop.permute.xlu2 %2088 }
 0xdca   : > { %vm2090_vm7 = vcmp.eq.s32.totalorder %v2089_v26, 1 }
 0xdcb   : > { %v2091_v32 = vsel %vm2090_vm7, %v2485_v47, %v2086_v40  ;;  %v4856_v40 = vld [vmem:[#allocation66_spill] sm:$0xff]  ;;  %vm1489_vm7 = vcmp.eq.s32.totalorder %v1488_v62, 1 }
 0xdcc   : > { %v2486_v47 = vld [vmem:[%s2736_s29 + $0xb0] sm:$0xff] }
 0xdcd   : > { %v1480_v61 = vsel %vm1479_vm3, %v2486_v47, %v1475_v39  ;;  %v2488_v39 = vld [vmem:[%s2736_s29 + $0xe0] sm:$0xff] }
 0xdec   : > { %v2043_v5 = vpop.permute.xlu0 %2042 }
 0xded   : > { %v2044_v52 = vmin.f32 %v4254_v28, %v2043_v5  ;;  %v4850_v28 = vld [vmem:[#allocation75_spill] sm:$0xff] }
 0xdef   : > { %v2045_v55 = vadd.f32 %v2044_v52, %v2781_v15  ;;  %v2487_v52 = vld [vmem:[%s2736_s29 + $0xc8] sm:$0xff] }
 0xdf1   : > { %v4297_v44 = vmin.f32 %v2045_v55, %v829_v54  ;;  %v4851_v54 = vld [vmem:[#allocation64_spill] sm:$0xff]  ;;  %v1485_v55 = vsel %vm1484_vm5, %v2487_v52, %v1480_v61 }
 0xdf2   : > { %vm618_vm13 = vcmp.eq.s32.totalorder %v4851_v54, 1  ;;  %v2489_v54 = vld [vmem:[%s2736_s29 + $0xe8] sm:$0xff] }
 0xdf3   : > { %2097 = vrot.lane.b32.xlu0 %v4297_v44, %s2589_s23 }
 0xdf4   : > { %v401_v20 = vpop.permute.xlu0 %400 }
 0xdf5   : > { %vm402_vm10 = vcmp.eq.s32.totalorder %v401_v20, 1 }
 0xdf6   : > { %v403_v1 = vsel %vm402_vm10, %v4847_v9, %v312_v49  ;;  %v1490_v49 = vsel %vm1489_vm7, %v2488_v39, %v1485_v55 }
 0xdf7   : > { %v475_v60 = vsel %vm474_vm11, %v4848_v22, %v403_v1  ;;  %v1495_v1 = vadd.f32 %v4281_v36, %v4674_v38 }
 0xdf8   : > { %v547_v46 = vsel %vm546_vm12, %v4850_v28, %v475_v60  ;;  %v2094_v28 = vpop.permute.xlu1 %2093 }
 0xdf9   : > { %v619_v37 = vsel %vm618_vm13, %v4852_v57, %v547_v46  ;;  %vm2095_vm9 = vcmp.eq.s32.totalorder %v2094_v28, 1 }
 0xdfc   : > { %v689_v50 = vpop.permute.xlu0 %688 }
 0xdfd   : > { %vm690_vm14 = vcmp.eq.s32.totalorder %v689_v50, 1  ;;  %v2096_v50 = vsel %vm2095_vm9, %v2489_v54, %v2091_v32 }
 0xdfe   : > { %v4310_v21 = vsel %vm690_vm14, %v4853_v34, %v619_v37  ;;  %v2101_v37 = vadd.f32 %v4297_v44, %v4674_v38 }
 0xe02   : > { %v1492_v5 = vpop.permute.xlu2 %1491 }
 0xe03   : > { %v1493_v31 = vsel %vm378_vm6, %v4267_v2, %v1492_v5 }
 0xe04   : > { %v4312_v0 = vpop.permute.xlu0 %904  ;;  %v1494_v51 = vadd.f32 %v1493_v31, %v1490_v49  ;;  %v4858_v49 = vld [vmem:[#allocation82_spill] sm:$0xff] }
 0xe05   : > { %vm906_vm9 = vcmp.eq.s32.totalorder %v4312_v0, 1 }
 0xe06   : > { %v1496_v60 = vmin.f32 %v1494_v51, %v1495_v1 }
 0xe08   : > { %v1497_v62 = vsub.f32 %v1496_v60, %v2781_v15 }
 0xe0c   : > { %v1167_v24 = vpop.permute.xlu0 %1166 }
 0xe0d   : > { %vm1168_vm15 = vcmp.eq.s32.totalorder %v1167_v24, 1 }
 0xe0e   : > { %v1169_v13 = vsel %vm1168_vm15, %v4854_v17, %v4259_v30 }
 0xe0f   : > { %v1238_v4 = vsel %vm1237_vm2, %v4855_v25, %v1169_v13 }
 0xe10   : > { %v4320_v26 = vsel %vm1306_vm4, %v4856_v40, %v1238_v4 }
 0xe14   : > { %v882_v42 = vpop.permute.xlu0 %881 }
 0xe15   : > { %v883_v30 = vsel %vm378_vm6, %v4267_v2, %v882_v42 }
 0xe16   : > { %v884_v20 = vadd.f32 %v883_v30, %v4123_v48  ;;  %v1498_v48 = vsel %vm285_vm8, %v1497_v62, 1e+09 }
 0xe18   : > { %v886_v9 = vmin.f32 %v884_v20, %v885_v12 }
 0xe1a   : > { %v887_v22 = vsub.f32 %v886_v9, %v2781_v15  ;;  %v4859_v9 = vld [vmem:[#allocation73_spill] sm:$0xff] }
 0xe1c   : > { %v888_v23 = vsel %vm285_vm8, %v887_v22, 1e+09  ;;  %v4860_v22 = vld [vmem:[#allocation54_spill] sm:$0xff] }
 0xe1d   : > { %889 = vrot.lane.b32.xlu1 %v888_v23, %s2589_s23 }
 0xe25   : > { %1499 = vrot.lane.b32.xlu1 %v1498_v48, %s2589_s23 }
 0xe65   : > { %v2098_v46 = vpop.permute.xlu0 %2097 }
 0xe66   : > { %v2099_v57 = vsel %vm378_vm6, %v4267_v2, %v2098_v46  ;;  %v4857_v2 = vmov 1   ;;  %v1525_v46 = vcvt.s32.f32 %v4211_v3 }
 0xe67   : > { %v2100_v34 = vadd.f32 %v2099_v57, %v2096_v50 }
 0xe68   : > { %v1526_v54 = vmul.f32 %v1525_v46, %v4674_v38 }
 0xe69   : > { %v2102_v24 = vmin.f32 %v2100_v34, %v2101_v37 }
 0xe6b   : > { %v2103_v53 = vsub.f32 %v2102_v24, %v2781_v15  ;;  %v900_v24 = vstv %s899_s6 }
 0xe6d   : > { %v2104_v17 = vsel %vm285_vm8, %v2103_v53, 1e+09 }
 0xe6e   : > { %2105 = vrot.lane.b32.xlu2 %v2104_v17, %s2589_s23 }
 0xe8f   : > { %v890_v13 = vpop.permute.xlu1 %889 }
 0xe90   : > { %v891_v25 = vmin.f32 %v888_v23, %v890_v13  ;;  %v4861_v23 = vld [vmem:[#allocation24_spill] sm:$0xff] }
 0xe92   : > { %892 = vrot.lane.b32.xlu2 %v891_v25, %s2594_s8 }
 0xe97   : > { %v1500_v32 = vpop.permute.xlu1 %1499 }
 0xe98   : > { %v1501_v4 = vmin.f32 %v1498_v48, %v1500_v32 }
 0xe9a   : > { %1373 = vperm.xlu2 %2425, %v2998_v59   ;;  %1502 = vrot.lane.b32.xlu0 %v1501_v4, %s2594_s8 }
 0xea2   : > { %1442 = vperm.xlu0 %2424, %v4795_v16   ;;  %1634 = vperm.xlu2 %2425, %v2964_v43   ;;  %v4368_v16 = vld [vmem:[%s2730_s25 + $0x10] sm:$0xff] }
 0xea3   : > { %vm1548_vm6 = vcmp.eq.s32.totalorder %v4368_v16, 0 }
 0xea4   : > { %v1549_v43 = vsel %vm1548_vm6, 1, %v4827_v27  ;;  %v2287_v27 = vadd.s32 4294967295, %v4368_v16 }
 0xea6   : > { %vm2122_vm10 = vcmp.gt.s32.totalorder %v2287_v27, 0 }
 0xeaa   : > { %1772 = vperm.xlu0 %2424, %v4727_v56   ;;  %1841 = vperm.xlu2 %2425, %v4826_v7  }
 0xeb2   : > { %1910 = vperm.xlu0 %2424, %v4793_v29   ;;  %2048 = vperm.xlu2 %2425, %v3012_v11  }
 0xeba   : > { %1511 = vperm.xlu0 %2424, %v4828_v63   ;;  %2427 = vset.pattern.permute.xlu2 %v4857_v2  ;;  %v2277_v63 = vadd.s32 4294967295, %v4211_v3 }
 0xebc   : > { %vm1516_vm8 = vcmp.gt.s32.totalorder %v2277_v63, 0 }
 0xebd   : > { %v1517_v47 = vsel %vm1516_vm8, %v2277_v63, 0 }
 0xec2   : > { %2428 = vset.pattern.permute.xlu0 %v4857_v2  ;;  %v4864_v2 = vld [vmem:[#allocation23_spill] sm:$0xff] }
 0xec3   : > { %vm834_vm7 = vcmp.eq.s32.totalorder %v4864_v2, 1 }
 0xec8   : > { %v2106_v59 = vpop.permute.xlu2 %2105 }
 0xec9   : > { %v2107_v40 = vmin.f32 %v2104_v17, %v2106_v59  ;;  %v901_v17 = vadd.f32 %v900_v24, %v4801_v8 }
 0xecb   : > { %2108 = vrot.lane.b32.xlu1 %v2107_v40, %s2594_s8 }
 0xed3   : > { %1551 = vperm.xlu1 %2426, %v1549_v43  }
 0xedb   : > { %1703 = vperm.xlu1 %2426, %v4725_v14   ;;  %v2123_v14 = vsel %vm2122_vm10, %v2287_v27, 0 }
 0xee3   : > { %1979 = vperm.xlu1 %2426, %v4730_v45  }
 0xeec   : > { %v893_v11 = vpop.permute.xlu2 %892 }
 0xeed   : > { %v894_v56 = vmin.f32 %v891_v25, %v893_v11  ;;  %v4863_v25 = vld [vmem:[#allocation69_spill] sm:$0xff] }
 0xeee   : > { %vm762_vm5 = vcmp.eq.s32.totalorder %v4863_v25, 1 }
 0xeef   : > { %895 = vrot.lane.b32.xlu0 %v894_v56, %s2596_s10  ;;  %v763_v32 = vsel %vm762_vm5, %v4080_v19, %v4310_v21 }
 0xef4   : > { %v1374_v45 = vpop.permute.xlu2 %1373 }
 0xef5   : > { %vm1375_vm10 = vcmp.eq.s32.totalorder %v1374_v45, 1 }
 0xef7   : > { %2125 = vperm.xlu0 %2428, %v2123_v14  }
 0xefc   : > { %v1635_v55 = vpop.permute.xlu2 %1634 }
 0xefd   : > { %vm1636_vm12 = vcmp.eq.s32.totalorder %v1635_v55, 1 }
 0xeff   : > { %1528 = vrot.lane.b32.xlu0 %v1526_v54, %s2589_s23 }
 0xf04   : > { %v1842_v30 = vpop.permute.xlu2 %1841 }
 0xf05   : > { %vm1843_vm14 = vcmp.eq.s32.totalorder %v1842_v30, 1 }
 0xf0c   : > { %v1503_v29 = vpop.permute.xlu0 %1502  ;;  %v2049_v28 = vpop.permute.xlu2 %2048 }
 0xf0d   : > { %v4377_v7 = vmin.f32 %v1501_v4, %v1503_v29  ;;  %vm2050_vm3 = vcmp.eq.s32.totalorder %v2049_v28, 1 }
 0xf0f   : > { %1505 = vrot.lane.b32.xlu2 %v4377_v7, %s2596_s10 }
 0xf14   : > { %v1443_v61 = vpop.permute.xlu0 %1442 }
 0xf17   : > { %1519 = vperm.xlu2 %2427, %v1517_v47  }
 0xf1c   : > { %v1773_v42 = vpop.permute.xlu0 %1772 }
 0xf1d   : > { %vm1774_vm15 = vcmp.eq.s32.totalorder %v1773_v42, 1 }
 0xf24   : > { %v1911_v39 = vpop.permute.xlu0 %1910 }
 0xf25   : > { %vm1912_vm2 = vcmp.eq.s32.totalorder %v1911_v39, 1 }
 0xf2c   : > { %v1512_v34 = vpop.permute.xlu0 %1511 }
 0xf3d   : > { %v2109_v5 = vpop.permute.xlu1 %2108 }
 0xf3e   : > { %v4383_v52 = vmin.f32 %v2107_v40, %v2109_v5 }
 0xf40   : > { %2111 = vrot.lane.b32.xlu1 %v4383_v52, %s2596_s10 }
 0xf45   : > { %v1552_v31 = vpop.permute.xlu1 %1551 }
 0xf46   : > { %vm1553_vm11 = vcmp.eq.s32.totalorder %v1552_v31, 1 }
 0xf47   : > { %v1554_v12 = vsel %vm1553_vm11, %v4801_v8, 0.0  ;;  %vm1444_vm11 = vcmp.eq.s32.totalorder %v1443_v61, 1 }
 0xf48   : > { %2117 = vperm.xlu1 %2426, %v4797_v58   ;;  %v1637_v51 = vsel %vm1636_vm12, %v4858_v49, %v1554_v12  ;;  %v4862_v58 = vld [vmem:[#allocation61_spill] sm:$0xff]  ;;  %vm1513_vm12 = vcmp.eq.s32.totalorder %v1512_v34, 1 }
 0xf4d   : > { %v1704_v20 = vpop.permute.xlu1 %1703 }
 0xf4e   : > { %vm1705_vm13 = vcmp.eq.s32.totalorder %v1704_v20, 1 }
 0xf4f   : > { %v1706_v1 = vsel %vm1705_vm13, %v4859_v9, %v1637_v51 }
 0xf50   : > { %v1775_v60 = vsel %vm1774_vm15, %v4860_v22, %v1706_v1 }
 0xf51   : > { %v1844_v62 = vsel %vm1843_vm14, %v4861_v23, %v1775_v60 }
 0xf52   : > { %v1913_v48 = vsel %vm1912_vm2, %v4862_v58, %v1844_v62 }
 0xf55   : > { %v1980_v50 = vpop.permute.xlu1 %1979 }
 0xf56   : > { %vm1981_vm4 = vcmp.eq.s32.totalorder %v1980_v50, 1 }
 0xf57   : > { %v1982_v57 = vsel %vm1981_vm4, %v4154_v33, %v1913_v48  ;;  %v835_v33 = vsel %vm834_vm7, %v4275_v41, %v763_v32 }
 0xf58   : > { %v2051_v37 = vsel %vm2050_vm3, %v4297_v44, %v1982_v57  ;;  %v4865_v44 = vld [vmem:[#allocation67_spill] sm:$0xff] }
 0xf59   : > { %vm914_vm8 = vcmp.eq.s32.totalorder %v2769_v10, %v4865_v44 }
 0xf61   : > { %v896_v53 = vpop.permute.xlu0 %895 }
 0xf62   : > { %v897_v13 = vmin.f32 %v894_v56, %v896_v53  ;;  %v1376_v56 = vsel %vm1375_vm10, %v4098_v35, %v4320_v26 }
 0xf63   : > { %v1445_v0 = vsel %vm1444_vm11, %v4281_v36, %v1376_v56 }
 0xf64   : > { %v898_v4 = vadd.f32 %v897_v13, %v2781_v15 }
 0xf66   : > { %v902_v59 = vmin.f32 %v898_v4, %v901_v17 }
 0xf68   : > { %v907_v40 = vsel %vm906_vm9, %v902_v59, %v835_v33 }
 0xf69   : > { %v1506_v8 = vpop.permute.xlu2 %1505  ;;  %v915_v43 = vsel %vm914_vm8, %v907_v40, 0.0  ;;  %v2126_v26 = vpop.permute.xlu0 %2125 }
 0xf6a   : > { %v1507_v11 = vmin.f32 %v4377_v7, %v1506_v8  ;;  %916 = vadd.xlane.f32.xlu2 %v915_v43  ;;  %v2131_v7 = vcvt.s32.f32 %v4368_v16  ;;  %vm2127_vm14 = vcmp.eq.s32.totalorder %v2769_v10, %v2126_v26 }
 0xf6c   : > { %v1508_v19 = vadd.f32 %v1507_v11, %v2781_v15  ;;  %v2132_v47 = vmul.f32 %v2131_v7, %v4674_v38 }
 0xf6e   : > { %v1509_v21 = vmin.f32 %v1508_v19, %v901_v17  ;;  %2134 = vrot.lane.b32.xlu0 %v2132_v47, %s2589_s23 }
 0xf70   : > { %v1514_v29 = vsel %vm1513_vm12, %v1509_v21, %v1445_v0 }
 0xf71   : > { %v1520_v41 = vpop.permute.xlu2 %1519 }
 0xf72   : > { %vm1521_vm13 = vcmp.eq.s32.totalorder %v2769_v10, %v1520_v41 }
 0xf73   : > { %v1522_v63 = vsel %vm1521_vm13, %v1514_v29, 0.0 }
 0xf74   : > { %1523 = vadd.xlane.f32.xlu1 %v1522_v63 }
 0xfb2   : > { %v2112_v27 = vpop.permute.xlu1 %2111 }
 0xfb3   : > { %v2113_v14 = vmin.f32 %v4383_v52, %v2112_v27  ;;  %v1529_v52 = vpop.permute.xlu0 %1528 }
 0xfb5   : > { %v2114_v35 = vadd.f32 %v2113_v14, %v2781_v15 }
 0xfb7   : > { %v2115_v36 = vmin.f32 %v2114_v35, %v901_v17 }
 0xfba   : > { %v2118_v45 = vpop.permute.xlu1 %2117 }
 0xfbb   : > { %vm2119_vm15 = vcmp.eq.s32.totalorder %v2118_v45, 1 }
 0xfbc   : > { %v2120_v61 = vsel %vm2119_vm15, %v2115_v36, %v2051_v37 }
 0xfbd   : > { %v2128_v5 = vsel %vm2127_vm14, %v2120_v61, 0.0 }
 0xfbe   : > { %2129 = vadd.xlane.f32.xlu2 %v2128_v5 }
 0xfdd   : > { %v917_v55 = vpop.xlane.xlu2 %916 }
 0xfde   : > { %v924_v38 = vsel %vm306_vm1, %v4114_v6, %v917_v55  ;;  %vm929_vm1 = vcmask 7168  }
 0xfdf   : > { %926 = vrot.lane.b32.xlu0 %v924_v38, %s2600_s7 }
 0xfe0   : > { %v2135_v31 = vpop.permute.xlu0 %2134 }
 0xfe7   : > { %v1524_v42 = vpop.xlane.xlu1 %1523 }
 0xfe8   : > { %v1531_v15 = vsel %vm942_vm0, %v1529_v52, %v1524_v42 }
 0xfe9   : > { %1533 = vrot.lane.b32.xlu0 %v1531_v15, %s2600_s7 }
0x1031   : > { %v2130_v10 = vpop.xlane.xlu2 %2129 }
0x1032   : > { %v2137_v30 = vsel %vm1548_vm6, %v2135_v31, %v2130_v10 }
0x1033   : > { %2139 = vrot.lane.b32.xlu0 %v2137_v30, %s2600_s7 }
0x1051   : > { %v927_v6 = vpop.permute.xlu0 %926 }
0x1052   : > { %930 = vst.msk [vmem:[%s275_s21] sm:$0xff] %vm929_vm1, %v927_v6 }
0x105b   : > { %v1534_v18 = vpop.permute.xlu0 %1533 }
0x105c   : > { %1536 = vst.msk [vmem:[%s275_s21 + $0x8] sm:$0xff] %vm929_vm1, %v1534_v18 }
0x10a5   : > { %v2140_v3 = vpop.permute.xlu0 %2139 }
0x10a6   : > { %2142 = vst.msk [vmem:[%s275_s21 + $0x10] sm:$0xff] %vm929_vm1, %v2140_v3 }
0x10a7 PF: > { %p17_p5 = scmp.ge.s32.totalorder %s2641_s17, 4   ;;  %s4866_s12 = smov %s2568_s13 }
0x10a8   : > { %s4867_s13 = smov %s2572_s14  ;;  %s4868_s14 = smov %s2651_s20 }
0x10a9   : > { %s4869_s15 = smov %s2641_s17  ;;  %19 = sbr.rel (!%p17_p5) target bundleno = 6 (0x6), region = 104 }
0x10ae   :  { %2165 = vsyncpa [#allocation3], 1 }
0x10af   :  { %2167 = vsyncpa [#allocation3 + $0x1], 1 }
0x10b0   :  { %2168 = vsyncpa [#allocation7], 1 }
0x10b1   :  { %2170 = vsyncpa [#allocation7 + $0x1], 1 }
0x10b2   :  { %2171 = vsyncpa [#allocation4], 1 }
0x10b3   :  { %2173 = vsyncpa [#allocation4 + $0x1], 1 }

</bundles_post_ra>
